<compile_context>
chip_gen: v7x
topology: tpu7x:2x2x1
jax: 0.10.0
libtpu: 0.0.40
codegen_flags: <defaults>
</compile_context>

<pallas_src>
import functools

import jax
import jax.numpy as jnp
from jax.experimental import pallas as pl
from jax.experimental.pallas import tpu as pltpu

_LPAD = 8  # left zero-pad offset on the W (sublane) axis of padded scratch


# ------------------------------ fused kernel --------------------------------

def _encoder_kernel(bt, h, w, mid, cout,
                    x_ref, w1_ref, b1_ref, w2_ref, b2_ref, w3_ref, b3_ref,
                    w4_ref, b4_ref, o_ref, p1_ref, p2_ref, p3_ref):
    f32 = jnp.float32
    ho, wo = h // 2, w // 2
    L = _LPAD
    cin = x_ref.shape[-1]

    def zero_border(p_ref, hh, ww, cc):
        # Zero only the pad cells a 3x3 window can read; the interior is fully
        # overwritten every grid step before it is read.
        hp = hh + 2
        wp = ww + L + 2
        row = jnp.zeros((bt, 1, wp, cc), f32)
        p_ref[:, 0:1, :, :] = row                                   # top pad row
        p_ref[:, hh + 1:hh + 2, :, :] = row                         # bottom pad row
        p_ref[:, :, 0:L, :] = jnp.zeros((bt, hp, L, cc), f32)       # left pad cols
        p_ref[:, :, L + ww:L + ww + 2, :] = jnp.zeros((bt, hp, 2, cc), f32)  # right

    def conv3x3(p_ref, w_ref, b_ref, hh, ww, ci, co):
        # 3x3 conv (pad=1) as 9 tap matmuls accumulated in f32 -> no im2col
        # lane concatenation.  Window reshapes are free (ww % 8 == 0).
        m = bt * hh * ww
        acc = jnp.zeros((m, co), f32)
        for k in range(9):
            dh, dw = divmod(k, 3)
            win = p_ref[:, dh:dh + hh, L - 1 + dw:L - 1 + dw + ww, :]
            acc = acc + jnp.dot(win.reshape(m, ci), w_ref[k],
                                preferred_element_type=f32)
        return jnp.maximum(acc + b_ref[...], 0.0)

    # ---- layer1, conv #1: 1x1 conv (BN folded) + ReLU -----------------------
    # TODO(synk): K=cin is tiny (lane-padded x loads, wasted MXU K); kept as a
    # single matmul since it runs once per call and is negligible.
    a1 = jnp.dot(x_ref[...].reshape(bt * h * w, cin), w1_ref[...],
                 preferred_element_type=f32)
    a1 = jnp.maximum(a1 + b1_ref[...], 0.0)                     # (bt*h*w, mid)

    # ---- layer1, conv #2: 3x3 ------------------------------------------------
    zero_border(p1_ref, h, w, mid)
    p1_ref[:, 1:h + 1, L:L + w, :] = a1.reshape(bt, h, w, mid)  # aligned store
    a2 = conv3x3(p1_ref, w2_ref, b2_ref, h, w, mid, mid)        # (bt*h*w, mid)

    # TODO(synk): training=True Gaussian-noise branch (torch.normal) not
    # implemented; the module is constructed with training=False.

    # ---- layer2: 2x2 max-pool -------------------------------------------------
    a2r = a2.reshape(bt, ho, 2, w, mid)                         # free leading split
    hmax = jnp.maximum(a2r[:, :, 0], a2r[:, :, 1])              # H-pair reduce (free)
    p1_ref[:, 1:ho + 1, L:L + w, :] = hmax                      # p1 dead: reuse as staging
    pooled = jnp.maximum(p1_ref[:, 1:ho + 1, pl.ds(L, wo, 2), :],
                         p1_ref[:, 1:ho + 1, pl.ds(L + 1, wo, 2), :])  # W-pair reduce

    # ---- layer2, conv #1: 3x3 --------------------------------------------------
    zero_border(p2_ref, ho, wo, mid)
    p2_ref[:, 1:ho + 1, L:L + wo, :] = pooled
    a3 = conv3x3(p2_ref, w3_ref, b3_ref, ho, wo, mid, cout)     # (bt*ho*wo, cout)

    # ---- layer2, conv #2: 3x3 --------------------------------------------------
    zero_border(p3_ref, ho, wo, cout)
    p3_ref[:, 1:ho + 1, L:L + wo, :] = a3.reshape(bt, ho, wo, cout)
    a4 = conv3x3(p3_ref, w4_ref, b4_ref, ho, wo, cout, cout)

    o_ref[...] = a4.reshape(bt, ho * wo, cout)


# ------------------------------ JAX wrapper ----------------------------------

def encoder_forward(x_nchw, params, b_tile=None):
    # NCHW (PyTorch) -> NHWC for the kernel, back to NCHW on output.
    n, cin, h, w = x_nchw.shape
    assert h % 2 == 0 and w % 2 == 0, "MaxPool2d(2) requires even spatial dims"
    mid = params["w2"].shape[-1]
    cout = params["w4"].shape[-1]
    ho, wo = h // 2, w // 2

    if b_tile is None:
        b_tile = n          # whole batch in one grid step (best on v5e/v6e);
                            # pass b_tile = ceil(n/2) on v7x for 2 TC steps.
    assert n % b_tile == 0
    steps = n // b_tile

    x = jnp.transpose(x_nchw, (0, 2, 3, 1)).astype(jnp.float32).reshape(n, h * w, cin)

    kernel = functools.partial(_encoder_kernel, b_tile, h, w, mid, cout)
    f2 = lambda i: (0, 0)
    f3 = lambda i: (0, 0, 0)

    out = pl.pallas_call(
        kernel,
        out_shape=jax.ShapeDtypeStruct((n, ho * wo, cout), jnp.float32),
        grid=(steps,),
        in_specs=[
            pl.BlockSpec((b_tile, h * w, cin), lambda i: (i, 0, 0)),
            pl.BlockSpec((cin, mid), f2),
            pl.BlockSpec((1, mid), f2),
            pl.BlockSpec((9, mid, mid), f3),
            pl.BlockSpec((1, mid), f2),
            pl.BlockSpec((9, mid, cout), f3),
            pl.BlockSpec((1, cout), f2),
            pl.BlockSpec((9, cout, cout), f3),
            pl.BlockSpec((1, cout), f2),
        ],
        out_specs=pl.BlockSpec((b_tile, ho * wo, cout), lambda i: (i, 0, 0)),
        scratch_shapes=[
            pltpu.VMEM((b_tile, h + 2, w + _LPAD + 2, mid), jnp.float32),   # pad buf conv2
            pltpu.VMEM((b_tile, ho + 2, wo + _LPAD + 2, mid), jnp.float32), # pad buf conv3
            pltpu.VMEM((b_tile, ho + 2, wo + _LPAD + 2, cout), jnp.float32),# pad buf conv4
        ],
        compiler_params=pltpu.CompilerParams(
            dimension_semantics=("parallel",)),
    )(x, params["w1"], params["b1"], params["w2"], params["b2"],
      params["w3"], params["b3"], params["w4"], params["b4"])

    out = out.reshape(n, ho, wo, cout)
    return jnp.transpose(out, (0, 3, 1, 2))                     # back to NCHW


# ------------------------------ parameters -----------------------------------

def _fold_bn(w, gamma, beta, rmean, rvar, eps=1e-5):
    # Eval-mode BN folded into the conv: y = conv(x)*scale + (beta - mean*scale)
    scale = gamma / jnp.sqrt(rvar + eps)
    w_folded = (w * scale).astype(jnp.float32)                  # keep f32 (parity)
    bias = (beta - rmean * scale).reshape(1, -1).astype(jnp.float32)
    return w_folded, bias


def init_params(key, in_channels, mid_channels=32, out_channels=64):
    k1, k2, k3, k4 = jax.random.split(key, 4)
    # 1x1 conv weight: (Cin, Cout).  3x3 conv weights: (9, Cin, Cout) with tap
    # k = kh*3 + kw.  A real PyTorch Conv2d weight (Cout, Cin, kh, kw) maps via
    # w.transpose(2, 3, 1, 0).reshape(9, Cin, Cout).
    w1 = 0.1 * jax.random.normal(k1, (in_channels, mid_channels), jnp.float32)
    w2 = 0.1 * jax.random.normal(k2, (9, mid_channels, mid_channels), jnp.float32)
    w3 = 0.1 * jax.random.normal(k3, (9, mid_channels, out_channels), jnp.float32)
    w4 = 0.1 * jax.random.normal(k4, (9, out_channels, out_channels), jnp.float32)

    def bn(c):  # nn.BatchNorm2d default buffers (gamma=1, beta=0, mean=0, var=1)
        return (jnp.ones((c,), jnp.float32), jnp.zeros((c,), jnp.float32),
                jnp.zeros((c,), jnp.float32), jnp.ones((c,), jnp.float32))

    w1f, b1 = _fold_bn(w1, *bn(mid_channels))
    w2f, b2 = _fold_bn(w2, *bn(mid_channels))
    w3f, b3 = _fold_bn(w3, *bn(out_channels))
    w4f, b4 = _fold_bn(w4, *bn(out_channels))
    return dict(w1=w1f, b1=b1, w2=w2f, b2=b2, w3=w3f, b3=b3, w4=w4f, b4=b4)


# --------------------------- pure-JAX reference -------------------------------

def encoder_reference(x_nchw, params):
    hp = jax.lax.Precision.HIGHEST
    x = jnp.transpose(x_nchw, (0, 2, 3, 1)).astype(jnp.float32)  # NHWC

    def conv3x3(y, w9, b):
        w = w9.reshape(3, 3, w9.shape[1], w9.shape[2])           # HWIO
        y = jax.lax.conv_general_dilated(
            y, w, (1, 1), "SAME",
            dimension_numbers=("NHWC", "HWIO", "NHWC"), precision=hp)
        return jnp.maximum(y + b.reshape(1, 1, 1, -1), 0.0)

    y = jnp.einsum("nhwc,cm->nhwm", x, params["w1"], precision=hp)
    y = jnp.maximum(y + params["b1"].reshape(1, 1, 1, -1), 0.0)
    y = conv3x3(y, params["w2"], params["b2"])
    y = jax.lax.reduce_window(y, -jnp.inf, jax.lax.max,
                              (1, 2, 2, 1), (1, 2, 2, 1), "VALID")
    y = conv3x3(y, params["w3"], params["b3"])
    y = conv3x3(y, params["w4"], params["b4"])
    return jnp.transpose(y, (0, 3, 1, 2))                        # NCHW


# --------------------------------- demo ---------------------------------------

if __name__ == "__main__":
    key = jax.random.PRNGKey(0)
    kx, kp = jax.random.split(key)

    batch, in_channels, spatial = 2, 4, 16
    x = jax.random.normal(kx, (batch, in_channels, spatial, spatial), jnp.float32)
    params = init_params(kp, in_channels, mid_channels=32, out_channels=64)

    out = jax.block_until_ready(encoder_forward(x, params))
    assert out.shape == (batch, 64, spatial // 2, spatial // 2), out.shape

    ref = jax.block_until_ready(encoder_reference(x, params))
    err_ok = bool(jnp.all(jnp.abs(out - ref) <= 5e-2 + 5e-2 * jnp.abs(ref)))
    assert err_ok, float(jnp.max(jnp.abs(out - ref)))
    print("KERNEL_OK")
</pallas_src>

<mosaic_0001>
module attributes {stable_mosaic.version = 11 : i64} {
  func.func @_encoder_kernel(%arg0: i32, %arg1: memref<2x256x4xf32, #tpu.memory_space<vmem>>, %arg2: memref<4x32xf32, #tpu.memory_space<vmem>>, %arg3: memref<1x32xf32, #tpu.memory_space<vmem>>, %arg4: memref<9x32x32xf32, #tpu.memory_space<vmem>>, %arg5: memref<1x32xf32, #tpu.memory_space<vmem>>, %arg6: memref<9x32x64xf32, #tpu.memory_space<vmem>>, %arg7: memref<1x64xf32, #tpu.memory_space<vmem>>, %arg8: memref<9x64x64xf32, #tpu.memory_space<vmem>>, %arg9: memref<1x64xf32, #tpu.memory_space<vmem>>, %arg10: memref<2x64x64xf32, #tpu.memory_space<vmem>>, %arg11: memref<2x18x26x32xf32, #tpu.memory_space<vmem>>, %arg12: memref<2x10x18x32xf32, #tpu.memory_space<vmem>>, %arg13: memref<2x10x18x64xf32, #tpu.memory_space<vmem>>) attributes {dimension_semantics = [#tpu.dimension_semantics<parallel>], iteration_bounds = array<i64: 1>, scalar_prefetch = 0 : i64, scratch_operands = 3 : i64, tpu.core_type = #tpu.core_type<tc>, window_params = [{transform_indices = @transform_0, window_bounds = array<i64: 2, 256, 4>}, {pipeline_mode = #tpu.pipeline_mode<synchronous>, transform_indices = @transform_1, window_bounds = array<i64: 4, 32>}, {pipeline_mode = #tpu.pipeline_mode<synchronous>, transform_indices = @transform_2, window_bounds = array<i64: 1, 32>}, {pipeline_mode = #tpu.pipeline_mode<synchronous>, transform_indices = @transform_3, window_bounds = array<i64: 9, 32, 32>}, {pipeline_mode = #tpu.pipeline_mode<synchronous>, transform_indices = @transform_4, window_bounds = array<i64: 1, 32>}, {pipeline_mode = #tpu.pipeline_mode<synchronous>, transform_indices = @transform_5, window_bounds = array<i64: 9, 32, 64>}, {pipeline_mode = #tpu.pipeline_mode<synchronous>, transform_indices = @transform_6, window_bounds = array<i64: 1, 64>}, {pipeline_mode = #tpu.pipeline_mode<synchronous>, transform_indices = @transform_7, window_bounds = array<i64: 9, 64, 64>}, {pipeline_mode = #tpu.pipeline_mode<synchronous>, transform_indices = @transform_8, window_bounds = array<i64: 1, 64>}, {transform_indices = @transform_9, window_bounds = array<i64: 2, 64, 64>}]} {
    %c0 = arith.constant 0 : index
    %c0_0 = arith.constant 0 : index
    %c0_1 = arith.constant 0 : index
    %0 = vector.load %arg1[%c0, %c0_0, %c0_1] : memref<2x256x4xf32, #tpu.memory_space<vmem>>, vector<2x256x4xf32>
    %1 = vector.shape_cast %0 : vector<2x256x4xf32> to vector<512x4xf32>
    %c0_2 = arith.constant 0 : index
    %c0_3 = arith.constant 0 : index
    %2 = vector.load %arg2[%c0_2, %c0_3] : memref<4x32xf32, #tpu.memory_space<vmem>>, vector<4x32xf32>
    %cst = arith.constant dense<0.000000e+00> : vector<512x32xf32>
    %3 = tpu.matmul %1, %2, %cst {dimension_numbers = #tpu.dot_dimension_numbers<[1], [0], [0], [1], [0, 0, 1, 1], [], []>} : vector<512x4xf32>, vector<4x32xf32>, vector<512x32xf32> -> vector<512x32xf32>
    %c0_4 = arith.constant 0 : index
    %c0_5 = arith.constant 0 : index
    %4 = vector.load %arg3[%c0_4, %c0_5] : memref<1x32xf32, #tpu.memory_space<vmem>>, vector<1x32xf32>
    %5 = vector.broadcast %4 : vector<1x32xf32> to vector<512x32xf32>
    %6 = arith.addf %3, %5 : vector<512x32xf32>
    %cst_6 = arith.constant 0.000000e+00 : f32
    %7 = vector.broadcast %cst_6 : f32 to vector<512x32xf32>
    %8 = arith.maximumf %6, %7 : vector<512x32xf32>
    %cst_7 = arith.constant 0.000000e+00 : f32
    %9 = vector.broadcast %cst_7 : f32 to vector<2x1x26x32xf32>
    %c0_8 = arith.constant 0 : index
    %c0_9 = arith.constant 0 : index
    %c0_10 = arith.constant 0 : index
    %c0_11 = arith.constant 0 : index
    %10 = vector.load %arg11[%c0_8, %c0_9, %c0_10, %c0_11] : memref<2x18x26x32xf32, #tpu.memory_space<vmem>>, vector<2x1x26x32xf32>
    tpu.vector_store %arg11[%c0_8, %c0_9, %c0_10, %c0_11], %9 {strides = array<i32>} : memref<2x18x26x32xf32, #tpu.memory_space<vmem>>, vector<2x1x26x32xf32>,
    %c0_12 = arith.constant 0 : index
    %c17 = arith.constant 17 : index
    %c0_13 = arith.constant 0 : index
    %c0_14 = arith.constant 0 : index
    %11 = vector.load %arg11[%c0_12, %c17, %c0_13, %c0_14] : memref<2x18x26x32xf32, #tpu.memory_space<vmem>>, vector<2x1x26x32xf32>
    tpu.vector_store %arg11[%c0_12, %c17, %c0_13, %c0_14], %9 {strides = array<i32>} : memref<2x18x26x32xf32, #tpu.memory_space<vmem>>, vector<2x1x26x32xf32>,
    %cst_15 = arith.constant 0.000000e+00 : f32
    %12 = vector.broadcast %cst_15 : f32 to vector<2x18x8x32xf32>
    %c0_16 = arith.constant 0 : index
    %c0_17 = arith.constant 0 : index
    %c0_18 = arith.constant 0 : index
    %c0_19 = arith.constant 0 : index
    %13 = vector.load %arg11[%c0_16, %c0_17, %c0_18, %c0_19] : memref<2x18x26x32xf32, #tpu.memory_space<vmem>>, vector<2x18x8x32xf32>
    tpu.vector_store %arg11[%c0_16, %c0_17, %c0_18, %c0_19], %12 {strides = array<i32>} : memref<2x18x26x32xf32, #tpu.memory_space<vmem>>, vector<2x18x8x32xf32>,
    %cst_20 = arith.constant 0.000000e+00 : f32
    %14 = vector.broadcast %cst_20 : f32 to vector<2x18x2x32xf32>
    %c0_21 = arith.constant 0 : index
    %c0_22 = arith.constant 0 : index
    %c24 = arith.constant 24 : index
    %c0_23 = arith.constant 0 : index
    %15 = vector.load %arg11[%c0_21, %c0_22, %c24, %c0_23] : memref<2x18x26x32xf32, #tpu.memory_space<vmem>>, vector<2x18x2x32xf32>
    tpu.vector_store %arg11[%c0_21, %c0_22, %c24, %c0_23], %14 {strides = array<i32>} : memref<2x18x26x32xf32, #tpu.memory_space<vmem>>, vector<2x18x2x32xf32>,
    %16 = vector.shape_cast %8 : vector<512x32xf32> to vector<2x16x16x32xf32>
    %c0_24 = arith.constant 0 : index
    %c1 = arith.constant 1 : index
    %c8 = arith.constant 8 : index
    %c0_25 = arith.constant 0 : index
    %17 = vector.load %arg11[%c0_24, %c1, %c8, %c0_25] : memref<2x18x26x32xf32, #tpu.memory_space<vmem>>, vector<2x16x16x32xf32>
    tpu.vector_store %arg11[%c0_24, %c1, %c8, %c0_25], %16 {strides = array<i32>} : memref<2x18x26x32xf32, #tpu.memory_space<vmem>>, vector<2x16x16x32xf32>,
    %cst_26 = arith.constant 0.000000e+00 : f32
    %18 = vector.broadcast %cst_26 : f32 to vector<512x32xf32>
    %c0_27 = arith.constant 0 : index
    %c0_28 = arith.constant 0 : index
    %c7 = arith.constant 7 : index
    %c0_29 = arith.constant 0 : index
    %19 = vector.load %arg11[%c0_27, %c0_28, %c7, %c0_29] : memref<2x18x26x32xf32, #tpu.memory_space<vmem>>, vector<2x16x16x32xf32>
    %20 = vector.shape_cast %19 : vector<2x16x16x32xf32> to vector<512x32xf32>
    %c0_30 = arith.constant 0 : index
    %c0_31 = arith.constant 0 : index
    %c0_32 = arith.constant 0 : index
    %21 = vector.load %arg4[%c0_30, %c0_31, %c0_32] : memref<9x32x32xf32, #tpu.memory_space<vmem>>, vector<1x32x32xf32>
    %22 = vector.shape_cast %21 : vector<1x32x32xf32> to vector<32x32xf32>
    %cst_33 = arith.constant dense<0.000000e+00> : vector<512x32xf32>
    %23 = tpu.matmul %20, %22, %cst_33 {dimension_numbers = #tpu.dot_dimension_numbers<[1], [0], [0], [1], [0, 0, 1, 1], [], []>} : vector<512x32xf32>, vector<32x32xf32>, vector<512x32xf32> -> vector<512x32xf32>
    %24 = arith.addf %18, %23 : vector<512x32xf32>
    %c0_34 = arith.constant 0 : index
    %c0_35 = arith.constant 0 : index
    %c8_36 = arith.constant 8 : index
    %c0_37 = arith.constant 0 : index
    %25 = vector.load %arg11[%c0_34, %c0_35, %c8_36, %c0_37] : memref<2x18x26x32xf32, #tpu.memory_space<vmem>>, vector<2x16x16x32xf32>
    %26 = vector.shape_cast %25 : vector<2x16x16x32xf32> to vector<512x32xf32>
    %c1_38 = arith.constant 1 : index
    %c0_39 = arith.constant 0 : index
    %c0_40 = arith.constant 0 : index
    %27 = vector.load %arg4[%c1_38, %c0_39, %c0_40] : memref<9x32x32xf32, #tpu.memory_space<vmem>>, vector<1x32x32xf32>
    %28 = vector.shape_cast %27 : vector<1x32x32xf32> to vector<32x32xf32>
    %cst_41 = arith.constant dense<0.000000e+00> : vector<512x32xf32>
    %29 = tpu.matmul %26, %28, %cst_41 {dimension_numbers = #tpu.dot_dimension_numbers<[1], [0], [0], [1], [0, 0, 1, 1], [], []>} : vector<512x32xf32>, vector<32x32xf32>, vector<512x32xf32> -> vector<512x32xf32>
    %30 = arith.addf %24, %29 : vector<512x32xf32>
    %c0_42 = arith.constant 0 : index
    %c0_43 = arith.constant 0 : index
    %c9 = arith.constant 9 : index
    %c0_44 = arith.constant 0 : index
    %31 = vector.load %arg11[%c0_42, %c0_43, %c9, %c0_44] : memref<2x18x26x32xf32, #tpu.memory_space<vmem>>, vector<2x16x16x32xf32>
    %32 = vector.shape_cast %31 : vector<2x16x16x32xf32> to vector<512x32xf32>
    %c2 = arith.constant 2 : index
    %c0_45 = arith.constant 0 : index
    %c0_46 = arith.constant 0 : index
    %33 = vector.load %arg4[%c2, %c0_45, %c0_46] : memref<9x32x32xf32, #tpu.memory_space<vmem>>, vector<1x32x32xf32>
    %34 = vector.shape_cast %33 : vector<1x32x32xf32> to vector<32x32xf32>
    %cst_47 = arith.constant dense<0.000000e+00> : vector<512x32xf32>
    %35 = tpu.matmul %32, %34, %cst_47 {dimension_numbers = #tpu.dot_dimension_numbers<[1], [0], [0], [1], [0, 0, 1, 1], [], []>} : vector<512x32xf32>, vector<32x32xf32>, vector<512x32xf32> -> vector<512x32xf32>
    %36 = arith.addf %30, %35 : vector<512x32xf32>
    %c0_48 = arith.constant 0 : index
    %c1_49 = arith.constant 1 : index
    %c7_50 = arith.constant 7 : index
    %c0_51 = arith.constant 0 : index
    %37 = vector.load %arg11[%c0_48, %c1_49, %c7_50, %c0_51] : memref<2x18x26x32xf32, #tpu.memory_space<vmem>>, vector<2x16x16x32xf32>
    %38 = vector.shape_cast %37 : vector<2x16x16x32xf32> to vector<512x32xf32>
    %c3 = arith.constant 3 : index
    %c0_52 = arith.constant 0 : index
    %c0_53 = arith.constant 0 : index
    %39 = vector.load %arg4[%c3, %c0_52, %c0_53] : memref<9x32x32xf32, #tpu.memory_space<vmem>>, vector<1x32x32xf32>
    %40 = vector.shape_cast %39 : vector<1x32x32xf32> to vector<32x32xf32>
    %cst_54 = arith.constant dense<0.000000e+00> : vector<512x32xf32>
    %41 = tpu.matmul %38, %40, %cst_54 {dimension_numbers = #tpu.dot_dimension_numbers<[1], [0], [0], [1], [0, 0, 1, 1], [], []>} : vector<512x32xf32>, vector<32x32xf32>, vector<512x32xf32> -> vector<512x32xf32>
    %42 = arith.addf %36, %41 : vector<512x32xf32>
    %c0_55 = arith.constant 0 : index
    %c1_56 = arith.constant 1 : index
    %c8_57 = arith.constant 8 : index
    %c0_58 = arith.constant 0 : index
    %43 = vector.load %arg11[%c0_55, %c1_56, %c8_57, %c0_58] : memref<2x18x26x32xf32, #tpu.memory_space<vmem>>, vector<2x16x16x32xf32>
    %44 = vector.shape_cast %43 : vector<2x16x16x32xf32> to vector<512x32xf32>
    %c4 = arith.constant 4 : index
    %c0_59 = arith.constant 0 : index
    %c0_60 = arith.constant 0 : index
    %45 = vector.load %arg4[%c4, %c0_59, %c0_60] : memref<9x32x32xf32, #tpu.memory_space<vmem>>, vector<1x32x32xf32>
    %46 = vector.shape_cast %45 : vector<1x32x32xf32> to vector<32x32xf32>
    %cst_61 = arith.constant dense<0.000000e+00> : vector<512x32xf32>
    %47 = tpu.matmul %44, %46, %cst_61 {dimension_numbers = #tpu.dot_dimension_numbers<[1], [0], [0], [1], [0, 0, 1, 1], [], []>} : vector<512x32xf32>, vector<32x32xf32>, vector<512x32xf32> -> vector<512x32xf32>
    %48 = arith.addf %42, %47 : vector<512x32xf32>
    %c0_62 = arith.constant 0 : index
    %c1_63 = arith.constant 1 : index
    %c9_64 = arith.constant 9 : index
    %c0_65 = arith.constant 0 : index
    %49 = vector.load %arg11[%c0_62, %c1_63, %c9_64, %c0_65] : memref<2x18x26x32xf32, #tpu.memory_space<vmem>>, vector<2x16x16x32xf32>
    %50 = vector.shape_cast %49 : vector<2x16x16x32xf32> to vector<512x32xf32>
    %c5 = arith.constant 5 : index
    %c0_66 = arith.constant 0 : index
    %c0_67 = arith.constant 0 : index
    %51 = vector.load %arg4[%c5, %c0_66, %c0_67] : memref<9x32x32xf32, #tpu.memory_space<vmem>>, vector<1x32x32xf32>
    %52 = vector.shape_cast %51 : vector<1x32x32xf32> to vector<32x32xf32>
    %cst_68 = arith.constant dense<0.000000e+00> : vector<512x32xf32>
    %53 = tpu.matmul %50, %52, %cst_68 {dimension_numbers = #tpu.dot_dimension_numbers<[1], [0], [0], [1], [0, 0, 1, 1], [], []>} : vector<512x32xf32>, vector<32x32xf32>, vector<512x32xf32> -> vector<512x32xf32>
    %54 = arith.addf %48, %53 : vector<512x32xf32>
    %c0_69 = arith.constant 0 : index
    %c2_70 = arith.constant 2 : index
    %c7_71 = arith.constant 7 : index
    %c0_72 = arith.constant 0 : index
    %55 = vector.load %arg11[%c0_69, %c2_70, %c7_71, %c0_72] : memref<2x18x26x32xf32, #tpu.memory_space<vmem>>, vector<2x16x16x32xf32>
    %56 = vector.shape_cast %55 : vector<2x16x16x32xf32> to vector<512x32xf32>
    %c6 = arith.constant 6 : index
    %c0_73 = arith.constant 0 : index
    %c0_74 = arith.constant 0 : index
    %57 = vector.load %arg4[%c6, %c0_73, %c0_74] : memref<9x32x32xf32, #tpu.memory_space<vmem>>, vector<1x32x32xf32>
    %58 = vector.shape_cast %57 : vector<1x32x32xf32> to vector<32x32xf32>
    %cst_75 = arith.constant dense<0.000000e+00> : vector<512x32xf32>
    %59 = tpu.matmul %56, %58, %cst_75 {dimension_numbers = #tpu.dot_dimension_numbers<[1], [0], [0], [1], [0, 0, 1, 1], [], []>} : vector<512x32xf32>, vector<32x32xf32>, vector<512x32xf32> -> vector<512x32xf32>
    %60 = arith.addf %54, %59 : vector<512x32xf32>
    %c0_76 = arith.constant 0 : index
    %c2_77 = arith.constant 2 : index
    %c8_78 = arith.constant 8 : index
    %c0_79 = arith.constant 0 : index
    %61 = vector.load %arg11[%c0_76, %c2_77, %c8_78, %c0_79] : memref<2x18x26x32xf32, #tpu.memory_space<vmem>>, vector<2x16x16x32xf32>
    %62 = vector.shape_cast %61 : vector<2x16x16x32xf32> to vector<512x32xf32>
    %c7_80 = arith.constant 7 : index
    %c0_81 = arith.constant 0 : index
    %c0_82 = arith.constant 0 : index
    %63 = vector.load %arg4[%c7_80, %c0_81, %c0_82] : memref<9x32x32xf32, #tpu.memory_space<vmem>>, vector<1x32x32xf32>
    %64 = vector.shape_cast %63 : vector<1x32x32xf32> to vector<32x32xf32>
    %cst_83 = arith.constant dense<0.000000e+00> : vector<512x32xf32>
    %65 = tpu.matmul %62, %64, %cst_83 {dimension_numbers = #tpu.dot_dimension_numbers<[1], [0], [0], [1], [0, 0, 1, 1], [], []>} : vector<512x32xf32>, vector<32x32xf32>, vector<512x32xf32> -> vector<512x32xf32>
    %66 = arith.addf %60, %65 : vector<512x32xf32>
    %c0_84 = arith.constant 0 : index
    %c2_85 = arith.constant 2 : index
    %c9_86 = arith.constant 9 : index
    %c0_87 = arith.constant 0 : index
    %67 = vector.load %arg11[%c0_84, %c2_85, %c9_86, %c0_87] : memref<2x18x26x32xf32, #tpu.memory_space<vmem>>, vector<2x16x16x32xf32>
    %68 = vector.shape_cast %67 : vector<2x16x16x32xf32> to vector<512x32xf32>
    %c8_88 = arith.constant 8 : index
    %c0_89 = arith.constant 0 : index
    %c0_90 = arith.constant 0 : index
    %69 = vector.load %arg4[%c8_88, %c0_89, %c0_90] : memref<9x32x32xf32, #tpu.memory_space<vmem>>, vector<1x32x32xf32>
    %70 = vector.shape_cast %69 : vector<1x32x32xf32> to vector<32x32xf32>
    %cst_91 = arith.constant dense<0.000000e+00> : vector<512x32xf32>
    %71 = tpu.matmul %68, %70, %cst_91 {dimension_numbers = #tpu.dot_dimension_numbers<[1], [0], [0], [1], [0, 0, 1, 1], [], []>} : vector<512x32xf32>, vector<32x32xf32>, vector<512x32xf32> -> vector<512x32xf32>
    %72 = arith.addf %66, %71 : vector<512x32xf32>
    %c0_92 = arith.constant 0 : index
    %c0_93 = arith.constant 0 : index
    %73 = vector.load %arg5[%c0_92, %c0_93] : memref<1x32xf32, #tpu.memory_space<vmem>>, vector<1x32xf32>
    %74 = vector.broadcast %73 : vector<1x32xf32> to vector<512x32xf32>
    %75 = arith.addf %72, %74 : vector<512x32xf32>
    %cst_94 = arith.constant 0.000000e+00 : f32
    %76 = vector.broadcast %cst_94 : f32 to vector<512x32xf32>
    %77 = arith.maximumf %75, %76 : vector<512x32xf32>
    %78 = vector.shape_cast %77 : vector<512x32xf32> to vector<2x8x2x16x32xf32>
    %79 = vector.extract_strided_slice %78 {offsets = [0, 0, 0, 0, 0], sizes = [2, 8, 1, 16, 32], strides = [1, 1, 1, 1, 1]} : vector<2x8x2x16x32xf32> to vector<2x8x1x16x32xf32>
    %80 = vector.shape_cast %79 : vector<2x8x1x16x32xf32> to vector<2x8x16x32xf32>
    %81 = vector.extract_strided_slice %78 {offsets = [0, 0, 1, 0, 0], sizes = [2, 8, 1, 16, 32], strides = [1, 1, 1, 1, 1]} : vector<2x8x2x16x32xf32> to vector<2x8x1x16x32xf32>
    %82 = vector.shape_cast %81 : vector<2x8x1x16x32xf32> to vector<2x8x16x32xf32>
    %83 = arith.maximumf %80, %82 : vector<2x8x16x32xf32>
    %c0_95 = arith.constant 0 : index
    %c1_96 = arith.constant 1 : index
    %c8_97 = arith.constant 8 : index
    %c0_98 = arith.constant 0 : index
    %84 = vector.load %arg11[%c0_95, %c1_96, %c8_97, %c0_98] : memref<2x18x26x32xf32, #tpu.memory_space<vmem>>, vector<2x8x16x32xf32>
    tpu.vector_store %arg11[%c0_95, %c1_96, %c8_97, %c0_98], %83 {strides = array<i32>} : memref<2x18x26x32xf32, #tpu.memory_space<vmem>>, vector<2x8x16x32xf32>,
    %c0_99 = arith.constant 0 : index
    %c1_100 = arith.constant 1 : index
    %c8_101 = arith.constant 8 : index
    %c0_102 = arith.constant 0 : index
    %85 = tpu.strided_load %arg11[%c0_99, %c1_100, %c8_101, %c0_102] {strides = array<i32: 1, 1, 2, 1>} : memref<2x18x26x32xf32, #tpu.memory_space<vmem>>, vector<2x8x8x32xf32>
    %c0_103 = arith.constant 0 : index
    %c1_104 = arith.constant 1 : index
    %c9_105 = arith.constant 9 : index
    %c0_106 = arith.constant 0 : index
    %86 = tpu.strided_load %arg11[%c0_103, %c1_104, %c9_105, %c0_106] {strides = array<i32: 1, 1, 2, 1>} : memref<2x18x26x32xf32, #tpu.memory_space<vmem>>, vector<2x8x8x32xf32>
    %87 = arith.maximumf %85, %86 : vector<2x8x8x32xf32>
    %cst_107 = arith.constant 0.000000e+00 : f32
    %88 = vector.broadcast %cst_107 : f32 to vector<2x1x18x32xf32>
    %c0_108 = arith.constant 0 : index
    %c0_109 = arith.constant 0 : index
    %c0_110 = arith.constant 0 : index
    %c0_111 = arith.constant 0 : index
    %89 = vector.load %arg12[%c0_108, %c0_109, %c0_110, %c0_111] : memref<2x10x18x32xf32, #tpu.memory_space<vmem>>, vector<2x1x18x32xf32>
    tpu.vector_store %arg12[%c0_108, %c0_109, %c0_110, %c0_111], %88 {strides = array<i32>} : memref<2x10x18x32xf32, #tpu.memory_space<vmem>>, vector<2x1x18x32xf32>,
    %c0_112 = arith.constant 0 : index
    %c9_113 = arith.constant 9 : index
    %c0_114 = arith.constant 0 : index
    %c0_115 = arith.constant 0 : index
    %90 = vector.load %arg12[%c0_112, %c9_113, %c0_114, %c0_115] : memref<2x10x18x32xf32, #tpu.memory_space<vmem>>, vector<2x1x18x32xf32>
    tpu.vector_store %arg12[%c0_112, %c9_113, %c0_114, %c0_115], %88 {strides = array<i32>} : memref<2x10x18x32xf32, #tpu.memory_space<vmem>>, vector<2x1x18x32xf32>,
    %cst_116 = arith.constant 0.000000e+00 : f32
    %91 = vector.broadcast %cst_116 : f32 to vector<2x10x8x32xf32>
    %c0_117 = arith.constant 0 : index
    %c0_118 = arith.constant 0 : index
    %c0_119 = arith.constant 0 : index
    %c0_120 = arith.constant 0 : index
    %92 = vector.load %arg12[%c0_117, %c0_118, %c0_119, %c0_120] : memref<2x10x18x32xf32, #tpu.memory_space<vmem>>, vector<2x10x8x32xf32>
    tpu.vector_store %arg12[%c0_117, %c0_118, %c0_119, %c0_120], %91 {strides = array<i32>} : memref<2x10x18x32xf32, #tpu.memory_space<vmem>>, vector<2x10x8x32xf32>,
    %cst_121 = arith.constant 0.000000e+00 : f32
    %93 = vector.broadcast %cst_121 : f32 to vector<2x10x2x32xf32>
    %c0_122 = arith.constant 0 : index
    %c0_123 = arith.constant 0 : index
    %c16 = arith.constant 16 : index
    %c0_124 = arith.constant 0 : index
    %94 = vector.load %arg12[%c0_122, %c0_123, %c16, %c0_124] : memref<2x10x18x32xf32, #tpu.memory_space<vmem>>, vector<2x10x2x32xf32>
    tpu.vector_store %arg12[%c0_122, %c0_123, %c16, %c0_124], %93 {strides = array<i32>} : memref<2x10x18x32xf32, #tpu.memory_space<vmem>>, vector<2x10x2x32xf32>,
    %c0_125 = arith.constant 0 : index
    %c1_126 = arith.constant 1 : index
    %c8_127 = arith.constant 8 : index
    %c0_128 = arith.constant 0 : index
    %95 = vector.load %arg12[%c0_125, %c1_126, %c8_127, %c0_128] : memref<2x10x18x32xf32, #tpu.memory_space<vmem>>, vector<2x8x8x32xf32>
    tpu.vector_store %arg12[%c0_125, %c1_126, %c8_127, %c0_128], %87 {strides = array<i32>} : memref<2x10x18x32xf32, #tpu.memory_space<vmem>>, vector<2x8x8x32xf32>,
    %cst_129 = arith.constant 0.000000e+00 : f32
    %96 = vector.broadcast %cst_129 : f32 to vector<128x64xf32>
    %c0_130 = arith.constant 0 : index
    %c0_131 = arith.constant 0 : index
    %c7_132 = arith.constant 7 : index
    %c0_133 = arith.constant 0 : index
    %97 = vector.load %arg12[%c0_130, %c0_131, %c7_132, %c0_133] : memref<2x10x18x32xf32, #tpu.memory_space<vmem>>, vector<2x8x8x32xf32>
    %98 = vector.shape_cast %97 : vector<2x8x8x32xf32> to vector<128x32xf32>
    %c0_134 = arith.constant 0 : index
    %c0_135 = arith.constant 0 : index
    %c0_136 = arith.constant 0 : index
    %99 = vector.load %arg6[%c0_134, %c0_135, %c0_136] : memref<9x32x64xf32, #tpu.memory_space<vmem>>, vector<1x32x64xf32>
    %100 = vector.shape_cast %99 : vector<1x32x64xf32> to vector<32x64xf32>
    %cst_137 = arith.constant dense<0.000000e+00> : vector<128x64xf32>
    %101 = tpu.matmul %98, %100, %cst_137 {dimension_numbers = #tpu.dot_dimension_numbers<[1], [0], [0], [1], [0, 0, 1, 1], [], []>} : vector<128x32xf32>, vector<32x64xf32>, vector<128x64xf32> -> vector<128x64xf32>
    %102 = arith.addf %96, %101 : vector<128x64xf32>
    %c0_138 = arith.constant 0 : index
    %c0_139 = arith.constant 0 : index
    %c8_140 = arith.constant 8 : index
    %c0_141 = arith.constant 0 : index
    %103 = vector.load %arg12[%c0_138, %c0_139, %c8_140, %c0_141] : memref<2x10x18x32xf32, #tpu.memory_space<vmem>>, vector<2x8x8x32xf32>
    %104 = vector.shape_cast %103 : vector<2x8x8x32xf32> to vector<128x32xf32>
    %c1_142 = arith.constant 1 : index
    %c0_143 = arith.constant 0 : index
    %c0_144 = arith.constant 0 : index
    %105 = vector.load %arg6[%c1_142, %c0_143, %c0_144] : memref<9x32x64xf32, #tpu.memory_space<vmem>>, vector<1x32x64xf32>
    %106 = vector.shape_cast %105 : vector<1x32x64xf32> to vector<32x64xf32>
    %cst_145 = arith.constant dense<0.000000e+00> : vector<128x64xf32>
    %107 = tpu.matmul %104, %106, %cst_145 {dimension_numbers = #tpu.dot_dimension_numbers<[1], [0], [0], [1], [0, 0, 1, 1], [], []>} : vector<128x32xf32>, vector<32x64xf32>, vector<128x64xf32> -> vector<128x64xf32>
    %108 = arith.addf %102, %107 : vector<128x64xf32>
    %c0_146 = arith.constant 0 : index
    %c0_147 = arith.constant 0 : index
    %c9_148 = arith.constant 9 : index
    %c0_149 = arith.constant 0 : index
    %109 = vector.load %arg12[%c0_146, %c0_147, %c9_148, %c0_149] : memref<2x10x18x32xf32, #tpu.memory_space<vmem>>, vector<2x8x8x32xf32>
    %110 = vector.shape_cast %109 : vector<2x8x8x32xf32> to vector<128x32xf32>
    %c2_150 = arith.constant 2 : index
    %c0_151 = arith.constant 0 : index
    %c0_152 = arith.constant 0 : index
    %111 = vector.load %arg6[%c2_150, %c0_151, %c0_152] : memref<9x32x64xf32, #tpu.memory_space<vmem>>, vector<1x32x64xf32>
    %112 = vector.shape_cast %111 : vector<1x32x64xf32> to vector<32x64xf32>
    %cst_153 = arith.constant dense<0.000000e+00> : vector<128x64xf32>
    %113 = tpu.matmul %110, %112, %cst_153 {dimension_numbers = #tpu.dot_dimension_numbers<[1], [0], [0], [1], [0, 0, 1, 1], [], []>} : vector<128x32xf32>, vector<32x64xf32>, vector<128x64xf32> -> vector<128x64xf32>
    %114 = arith.addf %108, %113 : vector<128x64xf32>
    %c0_154 = arith.constant 0 : index
    %c1_155 = arith.constant 1 : index
    %c7_156 = arith.constant 7 : index
    %c0_157 = arith.constant 0 : index
    %115 = vector.load %arg12[%c0_154, %c1_155, %c7_156, %c0_157] : memref<2x10x18x32xf32, #tpu.memory_space<vmem>>, vector<2x8x8x32xf32>
    %116 = vector.shape_cast %115 : vector<2x8x8x32xf32> to vector<128x32xf32>
    %c3_158 = arith.constant 3 : index
    %c0_159 = arith.constant 0 : index
    %c0_160 = arith.constant 0 : index
    %117 = vector.load %arg6[%c3_158, %c0_159, %c0_160] : memref<9x32x64xf32, #tpu.memory_space<vmem>>, vector<1x32x64xf32>
    %118 = vector.shape_cast %117 : vector<1x32x64xf32> to vector<32x64xf32>
    %cst_161 = arith.constant dense<0.000000e+00> : vector<128x64xf32>
    %119 = tpu.matmul %116, %118, %cst_161 {dimension_numbers = #tpu.dot_dimension_numbers<[1], [0], [0], [1], [0, 0, 1, 1], [], []>} : vector<128x32xf32>, vector<32x64xf32>, vector<128x64xf32> -> vector<128x64xf32>
    %120 = arith.addf %114, %119 : vector<128x64xf32>
    %c0_162 = arith.constant 0 : index
    %c1_163 = arith.constant 1 : index
    %c8_164 = arith.constant 8 : index
    %c0_165 = arith.constant 0 : index
    %121 = vector.load %arg12[%c0_162, %c1_163, %c8_164, %c0_165] : memref<2x10x18x32xf32, #tpu.memory_space<vmem>>, vector<2x8x8x32xf32>
    %122 = vector.shape_cast %121 : vector<2x8x8x32xf32> to vector<128x32xf32>
    %c4_166 = arith.constant 4 : index
    %c0_167 = arith.constant 0 : index
    %c0_168 = arith.constant 0 : index
    %123 = vector.load %arg6[%c4_166, %c0_167, %c0_168] : memref<9x32x64xf32, #tpu.memory_space<vmem>>, vector<1x32x64xf32>
    %124 = vector.shape_cast %123 : vector<1x32x64xf32> to vector<32x64xf32>
    %cst_169 = arith.constant dense<0.000000e+00> : vector<128x64xf32>
    %125 = tpu.matmul %122, %124, %cst_169 {dimension_numbers = #tpu.dot_dimension_numbers<[1], [0], [0], [1], [0, 0, 1, 1], [], []>} : vector<128x32xf32>, vector<32x64xf32>, vector<128x64xf32> -> vector<128x64xf32>
    %126 = arith.addf %120, %125 : vector<128x64xf32>
    %c0_170 = arith.constant 0 : index
    %c1_171 = arith.constant 1 : index
    %c9_172 = arith.constant 9 : index
    %c0_173 = arith.constant 0 : index
    %127 = vector.load %arg12[%c0_170, %c1_171, %c9_172, %c0_173] : memref<2x10x18x32xf32, #tpu.memory_space<vmem>>, vector<2x8x8x32xf32>
    %128 = vector.shape_cast %127 : vector<2x8x8x32xf32> to vector<128x32xf32>
    %c5_174 = arith.constant 5 : index
    %c0_175 = arith.constant 0 : index
    %c0_176 = arith.constant 0 : index
    %129 = vector.load %arg6[%c5_174, %c0_175, %c0_176] : memref<9x32x64xf32, #tpu.memory_space<vmem>>, vector<1x32x64xf32>
    %130 = vector.shape_cast %129 : vector<1x32x64xf32> to vector<32x64xf32>
    %cst_177 = arith.constant dense<0.000000e+00> : vector<128x64xf32>
    %131 = tpu.matmul %128, %130, %cst_177 {dimension_numbers = #tpu.dot_dimension_numbers<[1], [0], [0], [1], [0, 0, 1, 1], [], []>} : vector<128x32xf32>, vector<32x64xf32>, vector<128x64xf32> -> vector<128x64xf32>
    %132 = arith.addf %126, %131 : vector<128x64xf32>
    %c0_178 = arith.constant 0 : index
    %c2_179 = arith.constant 2 : index
    %c7_180 = arith.constant 7 : index
    %c0_181 = arith.constant 0 : index
    %133 = vector.load %arg12[%c0_178, %c2_179, %c7_180, %c0_181] : memref<2x10x18x32xf32, #tpu.memory_space<vmem>>, vector<2x8x8x32xf32>
    %134 = vector.shape_cast %133 : vector<2x8x8x32xf32> to vector<128x32xf32>
    %c6_182 = arith.constant 6 : index
    %c0_183 = arith.constant 0 : index
    %c0_184 = arith.constant 0 : index
    %135 = vector.load %arg6[%c6_182, %c0_183, %c0_184] : memref<9x32x64xf32, #tpu.memory_space<vmem>>, vector<1x32x64xf32>
    %136 = vector.shape_cast %135 : vector<1x32x64xf32> to vector<32x64xf32>
    %cst_185 = arith.constant dense<0.000000e+00> : vector<128x64xf32>
    %137 = tpu.matmul %134, %136, %cst_185 {dimension_numbers = #tpu.dot_dimension_numbers<[1], [0], [0], [1], [0, 0, 1, 1], [], []>} : vector<128x32xf32>, vector<32x64xf32>, vector<128x64xf32> -> vector<128x64xf32>
    %138 = arith.addf %132, %137 : vector<128x64xf32>
    %c0_186 = arith.constant 0 : index
    %c2_187 = arith.constant 2 : index
    %c8_188 = arith.constant 8 : index
    %c0_189 = arith.constant 0 : index
    %139 = vector.load %arg12[%c0_186, %c2_187, %c8_188, %c0_189] : memref<2x10x18x32xf32, #tpu.memory_space<vmem>>, vector<2x8x8x32xf32>
    %140 = vector.shape_cast %139 : vector<2x8x8x32xf32> to vector<128x32xf32>
    %c7_190 = arith.constant 7 : index
    %c0_191 = arith.constant 0 : index
    %c0_192 = arith.constant 0 : index
    %141 = vector.load %arg6[%c7_190, %c0_191, %c0_192] : memref<9x32x64xf32, #tpu.memory_space<vmem>>, vector<1x32x64xf32>
    %142 = vector.shape_cast %141 : vector<1x32x64xf32> to vector<32x64xf32>
    %cst_193 = arith.constant dense<0.000000e+00> : vector<128x64xf32>
    %143 = tpu.matmul %140, %142, %cst_193 {dimension_numbers = #tpu.dot_dimension_numbers<[1], [0], [0], [1], [0, 0, 1, 1], [], []>} : vector<128x32xf32>, vector<32x64xf32>, vector<128x64xf32> -> vector<128x64xf32>
    %144 = arith.addf %138, %143 : vector<128x64xf32>
    %c0_194 = arith.constant 0 : index
    %c2_195 = arith.constant 2 : index
    %c9_196 = arith.constant 9 : index
    %c0_197 = arith.constant 0 : index
    %145 = vector.load %arg12[%c0_194, %c2_195, %c9_196, %c0_197] : memref<2x10x18x32xf32, #tpu.memory_space<vmem>>, vector<2x8x8x32xf32>
    %146 = vector.shape_cast %145 : vector<2x8x8x32xf32> to vector<128x32xf32>
    %c8_198 = arith.constant 8 : index
    %c0_199 = arith.constant 0 : index
    %c0_200 = arith.constant 0 : index
    %147 = vector.load %arg6[%c8_198, %c0_199, %c0_200] : memref<9x32x64xf32, #tpu.memory_space<vmem>>, vector<1x32x64xf32>
    %148 = vector.shape_cast %147 : vector<1x32x64xf32> to vector<32x64xf32>
    %cst_201 = arith.constant dense<0.000000e+00> : vector<128x64xf32>
    %149 = tpu.matmul %146, %148, %cst_201 {dimension_numbers = #tpu.dot_dimension_numbers<[1], [0], [0], [1], [0, 0, 1, 1], [], []>} : vector<128x32xf32>, vector<32x64xf32>, vector<128x64xf32> -> vector<128x64xf32>
    %150 = arith.addf %144, %149 : vector<128x64xf32>
    %c0_202 = arith.constant 0 : index
    %c0_203 = arith.constant 0 : index
    %151 = vector.load %arg7[%c0_202, %c0_203] : memref<1x64xf32, #tpu.memory_space<vmem>>, vector<1x64xf32>
    %152 = vector.broadcast %151 : vector<1x64xf32> to vector<128x64xf32>
    %153 = arith.addf %150, %152 : vector<128x64xf32>
    %cst_204 = arith.constant 0.000000e+00 : f32
    %154 = vector.broadcast %cst_204 : f32 to vector<128x64xf32>
    %155 = arith.maximumf %153, %154 : vector<128x64xf32>
    %cst_205 = arith.constant 0.000000e+00 : f32
    %156 = vector.broadcast %cst_205 : f32 to vector<2x1x18x64xf32>
    %c0_206 = arith.constant 0 : index
    %c0_207 = arith.constant 0 : index
    %c0_208 = arith.constant 0 : index
    %c0_209 = arith.constant 0 : index
    %157 = vector.load %arg13[%c0_206, %c0_207, %c0_208, %c0_209] : memref<2x10x18x64xf32, #tpu.memory_space<vmem>>, vector<2x1x18x64xf32>
    tpu.vector_store %arg13[%c0_206, %c0_207, %c0_208, %c0_209], %156 {strides = array<i32>} : memref<2x10x18x64xf32, #tpu.memory_space<vmem>>, vector<2x1x18x64xf32>,
    %c0_210 = arith.constant 0 : index
    %c9_211 = arith.constant 9 : index
    %c0_212 = arith.constant 0 : index
    %c0_213 = arith.constant 0 : index
    %158 = vector.load %arg13[%c0_210, %c9_211, %c0_212, %c0_213] : memref<2x10x18x64xf32, #tpu.memory_space<vmem>>, vector<2x1x18x64xf32>
    tpu.vector_store %arg13[%c0_210, %c9_211, %c0_212, %c0_213], %156 {strides = array<i32>} : memref<2x10x18x64xf32, #tpu.memory_space<vmem>>, vector<2x1x18x64xf32>,
    %cst_214 = arith.constant 0.000000e+00 : f32
    %159 = vector.broadcast %cst_214 : f32 to vector<2x10x8x64xf32>
    %c0_215 = arith.constant 0 : index
    %c0_216 = arith.constant 0 : index
    %c0_217 = arith.constant 0 : index
    %c0_218 = arith.constant 0 : index
    %160 = vector.load %arg13[%c0_215, %c0_216, %c0_217, %c0_218] : memref<2x10x18x64xf32, #tpu.memory_space<vmem>>, vector<2x10x8x64xf32>
    tpu.vector_store %arg13[%c0_215, %c0_216, %c0_217, %c0_218], %159 {strides = array<i32>} : memref<2x10x18x64xf32, #tpu.memory_space<vmem>>, vector<2x10x8x64xf32>,
    %cst_219 = arith.constant 0.000000e+00 : f32
    %161 = vector.broadcast %cst_219 : f32 to vector<2x10x2x64xf32>
    %c0_220 = arith.constant 0 : index
    %c0_221 = arith.constant 0 : index
    %c16_222 = arith.constant 16 : index
    %c0_223 = arith.constant 0 : index
    %162 = vector.load %arg13[%c0_220, %c0_221, %c16_222, %c0_223] : memref<2x10x18x64xf32, #tpu.memory_space<vmem>>, vector<2x10x2x64xf32>
    tpu.vector_store %arg13[%c0_220, %c0_221, %c16_222, %c0_223], %161 {strides = array<i32>} : memref<2x10x18x64xf32, #tpu.memory_space<vmem>>, vector<2x10x2x64xf32>,
    %163 = vector.shape_cast %155 : vector<128x64xf32> to vector<2x8x8x64xf32>
    %c0_224 = arith.constant 0 : index
    %c1_225 = arith.constant 1 : index
    %c8_226 = arith.constant 8 : index
    %c0_227 = arith.constant 0 : index
    %164 = vector.load %arg13[%c0_224, %c1_225, %c8_226, %c0_227] : memref<2x10x18x64xf32, #tpu.memory_space<vmem>>, vector<2x8x8x64xf32>
    tpu.vector_store %arg13[%c0_224, %c1_225, %c8_226, %c0_227], %163 {strides = array<i32>} : memref<2x10x18x64xf32, #tpu.memory_space<vmem>>, vector<2x8x8x64xf32>,
    %cst_228 = arith.constant 0.000000e+00 : f32
    %165 = vector.broadcast %cst_228 : f32 to vector<128x64xf32>
    %c0_229 = arith.constant 0 : index
    %c0_230 = arith.constant 0 : index
    %c7_231 = arith.constant 7 : index
    %c0_232 = arith.constant 0 : index
    %166 = vector.load %arg13[%c0_229, %c0_230, %c7_231, %c0_232] : memref<2x10x18x64xf32, #tpu.memory_space<vmem>>, vector<2x8x8x64xf32>
    %167 = vector.shape_cast %166 : vector<2x8x8x64xf32> to vector<128x64xf32>
    %c0_233 = arith.constant 0 : index
    %c0_234 = arith.constant 0 : index
    %c0_235 = arith.constant 0 : index
    %168 = vector.load %arg8[%c0_233, %c0_234, %c0_235] : memref<9x64x64xf32, #tpu.memory_space<vmem>>, vector<1x64x64xf32>
    %169 = vector.shape_cast %168 : vector<1x64x64xf32> to vector<64x64xf32>
    %cst_236 = arith.constant dense<0.000000e+00> : vector<128x64xf32>
    %170 = tpu.matmul %167, %169, %cst_236 {dimension_numbers = #tpu.dot_dimension_numbers<[1], [0], [0], [1], [0, 0, 1, 1], [], []>} : vector<128x64xf32>, vector<64x64xf32>, vector<128x64xf32> -> vector<128x64xf32>
    %171 = arith.addf %165, %170 : vector<128x64xf32>
    %c0_237 = arith.constant 0 : index
    %c0_238 = arith.constant 0 : index
    %c8_239 = arith.constant 8 : index
    %c0_240 = arith.constant 0 : index
    %172 = vector.load %arg13[%c0_237, %c0_238, %c8_239, %c0_240] : memref<2x10x18x64xf32, #tpu.memory_space<vmem>>, vector<2x8x8x64xf32>
    %173 = vector.shape_cast %172 : vector<2x8x8x64xf32> to vector<128x64xf32>
    %c1_241 = arith.constant 1 : index
    %c0_242 = arith.constant 0 : index
    %c0_243 = arith.constant 0 : index
    %174 = vector.load %arg8[%c1_241, %c0_242, %c0_243] : memref<9x64x64xf32, #tpu.memory_space<vmem>>, vector<1x64x64xf32>
    %175 = vector.shape_cast %174 : vector<1x64x64xf32> to vector<64x64xf32>
    %cst_244 = arith.constant dense<0.000000e+00> : vector<128x64xf32>
    %176 = tpu.matmul %173, %175, %cst_244 {dimension_numbers = #tpu.dot_dimension_numbers<[1], [0], [0], [1], [0, 0, 1, 1], [], []>} : vector<128x64xf32>, vector<64x64xf32>, vector<128x64xf32> -> vector<128x64xf32>
    %177 = arith.addf %171, %176 : vector<128x64xf32>
    %c0_245 = arith.constant 0 : index
    %c0_246 = arith.constant 0 : index
    %c9_247 = arith.constant 9 : index
    %c0_248 = arith.constant 0 : index
    %178 = vector.load %arg13[%c0_245, %c0_246, %c9_247, %c0_248] : memref<2x10x18x64xf32, #tpu.memory_space<vmem>>, vector<2x8x8x64xf32>
    %179 = vector.shape_cast %178 : vector<2x8x8x64xf32> to vector<128x64xf32>
    %c2_249 = arith.constant 2 : index
    %c0_250 = arith.constant 0 : index
    %c0_251 = arith.constant 0 : index
    %180 = vector.load %arg8[%c2_249, %c0_250, %c0_251] : memref<9x64x64xf32, #tpu.memory_space<vmem>>, vector<1x64x64xf32>
    %181 = vector.shape_cast %180 : vector<1x64x64xf32> to vector<64x64xf32>
    %cst_252 = arith.constant dense<0.000000e+00> : vector<128x64xf32>
    %182 = tpu.matmul %179, %181, %cst_252 {dimension_numbers = #tpu.dot_dimension_numbers<[1], [0], [0], [1], [0, 0, 1, 1], [], []>} : vector<128x64xf32>, vector<64x64xf32>, vector<128x64xf32> -> vector<128x64xf32>
    %183 = arith.addf %177, %182 : vector<128x64xf32>
    %c0_253 = arith.constant 0 : index
    %c1_254 = arith.constant 1 : index
    %c7_255 = arith.constant 7 : index
    %c0_256 = arith.constant 0 : index
    %184 = vector.load %arg13[%c0_253, %c1_254, %c7_255, %c0_256] : memref<2x10x18x64xf32, #tpu.memory_space<vmem>>, vector<2x8x8x64xf32>
    %185 = vector.shape_cast %184 : vector<2x8x8x64xf32> to vector<128x64xf32>
    %c3_257 = arith.constant 3 : index
    %c0_258 = arith.constant 0 : index
    %c0_259 = arith.constant 0 : index
    %186 = vector.load %arg8[%c3_257, %c0_258, %c0_259] : memref<9x64x64xf32, #tpu.memory_space<vmem>>, vector<1x64x64xf32>
    %187 = vector.shape_cast %186 : vector<1x64x64xf32> to vector<64x64xf32>
    %cst_260 = arith.constant dense<0.000000e+00> : vector<128x64xf32>
    %188 = tpu.matmul %185, %187, %cst_260 {dimension_numbers = #tpu.dot_dimension_numbers<[1], [0], [0], [1], [0, 0, 1, 1], [], []>} : vector<128x64xf32>, vector<64x64xf32>, vector<128x64xf32> -> vector<128x64xf32>
    %189 = arith.addf %183, %188 : vector<128x64xf32>
    %c0_261 = arith.constant 0 : index
    %c1_262 = arith.constant 1 : index
    %c8_263 = arith.constant 8 : index
    %c0_264 = arith.constant 0 : index
    %190 = vector.load %arg13[%c0_261, %c1_262, %c8_263, %c0_264] : memref<2x10x18x64xf32, #tpu.memory_space<vmem>>, vector<2x8x8x64xf32>
    %191 = vector.shape_cast %190 : vector<2x8x8x64xf32> to vector<128x64xf32>
    %c4_265 = arith.constant 4 : index
    %c0_266 = arith.constant 0 : index
    %c0_267 = arith.constant 0 : index
    %192 = vector.load %arg8[%c4_265, %c0_266, %c0_267] : memref<9x64x64xf32, #tpu.memory_space<vmem>>, vector<1x64x64xf32>
    %193 = vector.shape_cast %192 : vector<1x64x64xf32> to vector<64x64xf32>
    %cst_268 = arith.constant dense<0.000000e+00> : vector<128x64xf32>
    %194 = tpu.matmul %191, %193, %cst_268 {dimension_numbers = #tpu.dot_dimension_numbers<[1], [0], [0], [1], [0, 0, 1, 1], [], []>} : vector<128x64xf32>, vector<64x64xf32>, vector<128x64xf32> -> vector<128x64xf32>
    %195 = arith.addf %189, %194 : vector<128x64xf32>
    %c0_269 = arith.constant 0 : index
    %c1_270 = arith.constant 1 : index
    %c9_271 = arith.constant 9 : index
    %c0_272 = arith.constant 0 : index
    %196 = vector.load %arg13[%c0_269, %c1_270, %c9_271, %c0_272] : memref<2x10x18x64xf32, #tpu.memory_space<vmem>>, vector<2x8x8x64xf32>
    %197 = vector.shape_cast %196 : vector<2x8x8x64xf32> to vector<128x64xf32>
    %c5_273 = arith.constant 5 : index
    %c0_274 = arith.constant 0 : index
    %c0_275 = arith.constant 0 : index
    %198 = vector.load %arg8[%c5_273, %c0_274, %c0_275] : memref<9x64x64xf32, #tpu.memory_space<vmem>>, vector<1x64x64xf32>
    %199 = vector.shape_cast %198 : vector<1x64x64xf32> to vector<64x64xf32>
    %cst_276 = arith.constant dense<0.000000e+00> : vector<128x64xf32>
    %200 = tpu.matmul %197, %199, %cst_276 {dimension_numbers = #tpu.dot_dimension_numbers<[1], [0], [0], [1], [0, 0, 1, 1], [], []>} : vector<128x64xf32>, vector<64x64xf32>, vector<128x64xf32> -> vector<128x64xf32>
    %201 = arith.addf %195, %200 : vector<128x64xf32>
    %c0_277 = arith.constant 0 : index
    %c2_278 = arith.constant 2 : index
    %c7_279 = arith.constant 7 : index
    %c0_280 = arith.constant 0 : index
    %202 = vector.load %arg13[%c0_277, %c2_278, %c7_279, %c0_280] : memref<2x10x18x64xf32, #tpu.memory_space<vmem>>, vector<2x8x8x64xf32>
    %203 = vector.shape_cast %202 : vector<2x8x8x64xf32> to vector<128x64xf32>
    %c6_281 = arith.constant 6 : index
    %c0_282 = arith.constant 0 : index
    %c0_283 = arith.constant 0 : index
    %204 = vector.load %arg8[%c6_281, %c0_282, %c0_283] : memref<9x64x64xf32, #tpu.memory_space<vmem>>, vector<1x64x64xf32>
    %205 = vector.shape_cast %204 : vector<1x64x64xf32> to vector<64x64xf32>
    %cst_284 = arith.constant dense<0.000000e+00> : vector<128x64xf32>
    %206 = tpu.matmul %203, %205, %cst_284 {dimension_numbers = #tpu.dot_dimension_numbers<[1], [0], [0], [1], [0, 0, 1, 1], [], []>} : vector<128x64xf32>, vector<64x64xf32>, vector<128x64xf32> -> vector<128x64xf32>
    %207 = arith.addf %201, %206 : vector<128x64xf32>
    %c0_285 = arith.constant 0 : index
    %c2_286 = arith.constant 2 : index
    %c8_287 = arith.constant 8 : index
    %c0_288 = arith.constant 0 : index
    %208 = vector.load %arg13[%c0_285, %c2_286, %c8_287, %c0_288] : memref<2x10x18x64xf32, #tpu.memory_space<vmem>>, vector<2x8x8x64xf32>
    %209 = vector.shape_cast %208 : vector<2x8x8x64xf32> to vector<128x64xf32>
    %c7_289 = arith.constant 7 : index
    %c0_290 = arith.constant 0 : index
    %c0_291 = arith.constant 0 : index
    %210 = vector.load %arg8[%c7_289, %c0_290, %c0_291] : memref<9x64x64xf32, #tpu.memory_space<vmem>>, vector<1x64x64xf32>
    %211 = vector.shape_cast %210 : vector<1x64x64xf32> to vector<64x64xf32>
    %cst_292 = arith.constant dense<0.000000e+00> : vector<128x64xf32>
    %212 = tpu.matmul %209, %211, %cst_292 {dimension_numbers = #tpu.dot_dimension_numbers<[1], [0], [0], [1], [0, 0, 1, 1], [], []>} : vector<128x64xf32>, vector<64x64xf32>, vector<128x64xf32> -> vector<128x64xf32>
    %213 = arith.addf %207, %212 : vector<128x64xf32>
    %c0_293 = arith.constant 0 : index
    %c2_294 = arith.constant 2 : index
    %c9_295 = arith.constant 9 : index
    %c0_296 = arith.constant 0 : index
    %214 = vector.load %arg13[%c0_293, %c2_294, %c9_295, %c0_296] : memref<2x10x18x64xf32, #tpu.memory_space<vmem>>, vector<2x8x8x64xf32>
    %215 = vector.shape_cast %214 : vector<2x8x8x64xf32> to vector<128x64xf32>
    %c8_297 = arith.constant 8 : index
    %c0_298 = arith.constant 0 : index
    %c0_299 = arith.constant 0 : index
    %216 = vector.load %arg8[%c8_297, %c0_298, %c0_299] : memref<9x64x64xf32, #tpu.memory_space<vmem>>, vector<1x64x64xf32>
    %217 = vector.shape_cast %216 : vector<1x64x64xf32> to vector<64x64xf32>
    %cst_300 = arith.constant dense<0.000000e+00> : vector<128x64xf32>
    %218 = tpu.matmul %215, %217, %cst_300 {dimension_numbers = #tpu.dot_dimension_numbers<[1], [0], [0], [1], [0, 0, 1, 1], [], []>} : vector<128x64xf32>, vector<64x64xf32>, vector<128x64xf32> -> vector<128x64xf32>
    %219 = arith.addf %213, %218 : vector<128x64xf32>
    %c0_301 = arith.constant 0 : index
    %c0_302 = arith.constant 0 : index
    %220 = vector.load %arg9[%c0_301, %c0_302] : memref<1x64xf32, #tpu.memory_space<vmem>>, vector<1x64xf32>
    %221 = vector.broadcast %220 : vector<1x64xf32> to vector<128x64xf32>
    %222 = arith.addf %219, %221 : vector<128x64xf32>
    %cst_303 = arith.constant 0.000000e+00 : f32
    %223 = vector.broadcast %cst_303 : f32 to vector<128x64xf32>
    %224 = arith.maximumf %222, %223 : vector<128x64xf32>
    %225 = vector.shape_cast %224 : vector<128x64xf32> to vector<2x64x64xf32>
    %c0_304 = arith.constant 0 : index
    %c0_305 = arith.constant 0 : index
    %c0_306 = arith.constant 0 : index
    %226 = vector.load %arg10[%c0_304, %c0_305, %c0_306] : memref<2x64x64xf32, #tpu.memory_space<vmem>>, vector<2x64x64xf32>
    tpu.vector_store %arg10[%c0_304, %c0_305, %c0_306], %225 {strides = array<i32>} : memref<2x64x64xf32, #tpu.memory_space<vmem>>, vector<2x64x64xf32>,
    return
  }
  func.func @transform_0(%arg0: i32) -> (i32, i32, i32) {
    %c0_i32 = arith.constant 0 : i32
    %c0_i32_0 = arith.constant 0 : i32
    %c0_i32_1 = arith.constant 0 : i32
    return %arg0, %c0_i32, %c0_i32_0 : i32, i32, i32
  }
  func.func @transform_1(%arg0: i32) -> (i32, i32) {
    %c0_i32 = arith.constant 0 : i32
    %c0_i32_0 = arith.constant 0 : i32
    %c0_i32_1 = arith.constant 0 : i32
    return %c0_i32, %c0_i32_0 : i32, i32
  }
  func.func @transform_2(%arg0: i32) -> (i32, i32) {
    %c0_i32 = arith.constant 0 : i32
    %c0_i32_0 = arith.constant 0 : i32
    %c0_i32_1 = arith.constant 0 : i32
    return %c0_i32, %c0_i32_0 : i32, i32
  }
  func.func @transform_3(%arg0: i32) -> (i32, i32, i32) {
    %c0_i32 = arith.constant 0 : i32
    %c0_i32_0 = arith.constant 0 : i32
    %c0_i32_1 = arith.constant 0 : i32
    %c0_i32_2 = arith.constant 0 : i32
    return %c0_i32, %c0_i32_0, %c0_i32_1 : i32, i32, i32
  }
  func.func @transform_4(%arg0: i32) -> (i32, i32) {
    %c0_i32 = arith.constant 0 : i32
    %c0_i32_0 = arith.constant 0 : i32
    %c0_i32_1 = arith.constant 0 : i32
    return %c0_i32, %c0_i32_0 : i32, i32
  }
  func.func @transform_5(%arg0: i32) -> (i32, i32, i32) {
    %c0_i32 = arith.constant 0 : i32
    %c0_i32_0 = arith.constant 0 : i32
    %c0_i32_1 = arith.constant 0 : i32
    %c0_i32_2 = arith.constant 0 : i32
    return %c0_i32, %c0_i32_0, %c0_i32_1 : i32, i32, i32
  }
  func.func @transform_6(%arg0: i32) -> (i32, i32) {
    %c0_i32 = arith.constant 0 : i32
    %c0_i32_0 = arith.constant 0 : i32
    %c0_i32_1 = arith.constant 0 : i32
    return %c0_i32, %c0_i32_0 : i32, i32
  }
  func.func @transform_7(%arg0: i32) -> (i32, i32, i32) {
    %c0_i32 = arith.constant 0 : i32
    %c0_i32_0 = arith.constant 0 : i32
    %c0_i32_1 = arith.constant 0 : i32
    %c0_i32_2 = arith.constant 0 : i32
    return %c0_i32, %c0_i32_0, %c0_i32_1 : i32, i32, i32
  }
  func.func @transform_8(%arg0: i32) -> (i32, i32) {
    %c0_i32 = arith.constant 0 : i32
    %c0_i32_0 = arith.constant 0 : i32
    %c0_i32_1 = arith.constant 0 : i32
    return %c0_i32, %c0_i32_0 : i32, i32
  }
  func.func @transform_9(%arg0: i32) -> (i32, i32, i32) {
    %c0_i32 = arith.constant 0 : i32
    %c0_i32_0 = arith.constant 0 : i32
    %c0_i32_1 = arith.constant 0 : i32
    return %arg0, %c0_i32, %c0_i32_0 : i32, i32, i32
  }
}

</mosaic_0001>

<bundles_post_ra>
// kernel: tpu_custom_call.1
= control target key start
LH: loop header
LB: loop body
LE: loop exit
PB: predicated region body
PF: predicated region fallthrough
CT: control target
= control target key end

     0   :  { %14 = vsyncpa [#allocation6], 0  ;;  %s20195_s0 = inlined_call_operand.vmem [shape: f32[2,256,4], index: 0, kind: input, shape index: {}]   ;;  %s20196_s1 = inlined_call_operand.vmem [shape: f32[4,32], index: 1, kind: input, shape index: {}]   ;;  %s20197_s2 = inlined_call_operand.vmem [shape: f32[1,32], index: 2, kind: input, shape index: {}]   ;;  %s20198_s3 = inlined_call_operand.vmem [shape: f32[9,32,32], index: 3, kind: input, shape index: {}]   ;;  %s20199_s4 = inlined_call_operand.vmem [shape: f32[1,32], index: 4, kind: input, shape index: {}]   ;;  %s20200_s5 = inlined_call_operand.hbm [shape: f32[9,32,64], index: 5, kind: input, shape index: {}]   ;;  %s20201_s6 = inlined_call_operand.vmem [shape: f32[1,64], index: 6, kind: input, shape index: {}]   ;;  %s20202_s7 = inlined_call_operand.hbm [shape: f32[9,64,64], index: 7, kind: input, shape index: {}]   ;;  %s20203_s8 = inlined_call_operand.vmem [shape: f32[1,64], index: 8, kind: input, shape index: {}]   ;;  %s20204_s9 = inlined_call_operand.hbm [shape: f32[2,64,64], index: 9, kind: output, shape index: {}]  }
   0x1   :  { %15 = vsyncpa [#allocation9], 0 }
   0x2   :  { %16 = vsyncpa [#allocation7], 0  ;;  %s16733_s30 = smov [#allocation5]   ;;  %s16661_s13 = scalar_lea.hbm %s20200_s5, 4608 }
   0x3   :  { %s32_s10 = sshll.u32 %s16733_s30, 4  ;;  %p16662_p0 = scmp.ne.s32.totalorder %s20200_s5, %s16661_s13  ;;  %s33_s10 = int_to_ptr.vmem [resolvable:$true] %s32_s10 }
   0x4   :  { %p16665_p1 = scmp.lt.u32.totalorder %s16661_s13, %s20200_s5 }
   0x6   :  { %p16667_p2 = pnand %p16665_p1, %p16662_p0 }
   0x8   :  { %16670 = shalt.err (!%p16667_p2)
}
   0x9   :  { %s16671_s18 = scalar_lea.vmem %s33_s10, 4608  ;;  %p16676_p4 = scmp.lt.s32.totalorder %s33_s10, %s33_s10 }
   0xa   :  { %p16672_p3 = scmp.ne.s32.totalorder %s33_s10, %s16671_s18  ;;  %p16677_p5 = scmp.lt.s32.totalorder %s16671_s18, %s16671_s18 }
   0xc   :  { %p16678_p6 = por %p16677_p5, %p16676_p4 }
   0xe   :  { %p16679_p7 = pnand %p16678_p6, %p16672_p3 }
  0x10   :  { %16682 = shalt.err (!%p16679_p7)
}
  0x11   :  { %s16734_s19 = smov 128   ;;  %s16735_s20 = smov 8  }
  0x12   :  { %38 = dma.hbm_to_vmem [thread:$0]  %s20200_s5, 4608, %s33_s10, [#allocation6], %s16734_s19, %s16734_s19, %s16735_s20  }
  0x13   :  { %s16736_s23 = smov [#allocation8]   ;;  %s16683_s27 = scalar_lea.hbm %s20202_s7, 9216 }
  0x14   :  { %s46_s24 = sshll.u32 %s16736_s23, 4  ;;  %p16684_p8 = scmp.ne.s32.totalorder %s20202_s7, %s16683_s27  ;;  %s47_s24 = int_to_ptr.vmem [resolvable:$true] %s46_s24 }
  0x15   :  { %p16687_p9 = scmp.lt.u32.totalorder %s16683_s27, %s20202_s7 }
  0x17   :  { %p16689_p10 = pnand %p16687_p9, %p16684_p8 }
  0x19   :  { %16692 = shalt.err (!%p16689_p10)
}
  0x1a   :  { %s16693_s12 = scalar_lea.vmem %s47_s24, 9216  ;;  %p16698_p12 = scmp.lt.s32.totalorder %s47_s24, %s47_s24 }
  0x1b   :  { %p16694_p11 = scmp.ne.s32.totalorder %s47_s24, %s16693_s12  ;;  %p16699_p13 = scmp.lt.s32.totalorder %s16693_s12, %s16693_s12 }
  0x1d   :  { %p16700_p0 = por %p16699_p13, %p16698_p12 }
  0x1f   :  { %p16701_p1 = pnand %p16700_p0, %p16694_p11 }
  0x21   :  { %16704 = shalt.err (!%p16701_p1)
}
  0x22   :  { %52 = dma.hbm_to_vmem [thread:$0]  %s20202_s7, 9216, %s47_s24, [#allocation9], %s16734_s19, %s16734_s19, %s16735_s20  }
  0x23   :  { %16727 = dma.done.wait [#allocation6], 4608  }
  0x24   :  { %16728 = vsyncadd [#allocation6], 4294962688 }
  0x25   :  { %16729 = dma.done.wait [#allocation9], 9216  }
  0x26   :  { %16730 = vsyncadd [#allocation9], 4294958080  ;;  %vm326_vm0 = vcmask 1043456   ;;  %vm133_vm1 = vcmask 31744   ;;  %v125_v0 = vld [vmem:[%s20196_s1] sm:$0xf] }
  0x27   :  { %v61_v1 = vld [vmem:[%s20195_s0] sm:$0xff]  ;;  %v62_v2 = vld [vmem:[%s20195_s0 + $0x8] sm:$0xff]  ;;  %13912 = vmatprep.subr.msk.mxu0 %vm326_vm0, %v125_v0  ;;  %v63_v3 = vld [vmem:[%s20195_s0 + $0x10] sm:$0xff]  ;;  %vm779_vm2 = vcmask 261120   ;;  %v20205_v50 = vmov 0.0   ;;  %vm783_vm3 = vcmask 254976  }
  0x28   :  { %13914 = vmatprep.mubr.msk.f32.mxu0 %vm133_vm1, %v61_v1  ;;  %13913 = vmatpush3.msk.msra.mxu0 %vm326_vm0, %v125_v0  ;;  %v64_v4 = vld [vmem:[%s20195_s0 + $0x18] sm:$0xff]  ;;  %v65_v5 = vld [vmem:[%s20195_s0 + $0x20] sm:$0xff]  ;;  %v66_v6 = vld [vmem:[%s20195_s0 + $0x28] sm:$0xff]  ;;  %781 = vst.msk [vmem:[#allocation2 + $0x8] sm:$0xff] %vm779_vm2, %v20205_v50  ;;  %vm9623_vm4 = vcmask 523264   ;;  %vm9626_vm5 = vcmask 517120  }
  0x29   :  { %13915 = vmatmul.mubr.msk.f32.vlgmr.msra.gmra.mrb[0].mxu0 %vm133_vm1, %v62_v2  ;;  %v67_v7 = vld [vmem:[%s20195_s0 + $0x30] sm:$0xff]  ;;  %v68_v8 = vld [vmem:[%s20195_s0 + $0x38] sm:$0xff]  ;;  %v69_v9 = vld [vmem:[%s20195_s0 + $0x40] sm:$0xff]  ;;  %780 = vst.msk [vmem:[#allocation2] sm:$0xff] %vm779_vm2, %v20205_v50 }
  0x2a   :  { %13917 = vmatprep.mubr.msk.f32.mxu0 %vm133_vm1, %v63_v3  ;;  %v70_v10 = vld [vmem:[%s20195_s0 + $0x48] sm:$0xff]  ;;  %v71_v11 = vld [vmem:[%s20195_s0 + $0x50] sm:$0xff]  ;;  %v72_v12 = vld [vmem:[%s20195_s0 + $0x58] sm:$0xff]  ;;  %782 = vst.msk [vmem:[#allocation2 + $0x10] sm:$0xff] %vm779_vm2, %v20205_v50 }
  0x2b   :  { %v73_v13 = vld [vmem:[%s20195_s0 + $0x60] sm:$0xff]  ;;  %v74_v14 = vld [vmem:[%s20195_s0 + $0x68] sm:$0xff]  ;;  %v75_v15 = vld [vmem:[%s20195_s0 + $0x70] sm:$0xff]  ;;  %785 = vst.msk [vmem:[#allocation2 + $0x240] sm:$0xff] %vm779_vm2, %v20205_v50 }
  0x2c   :  { %v76_v16 = vld [vmem:[%s20195_s0 + $0x78] sm:$0xff]  ;;  %v77_v17 = vld [vmem:[%s20195_s0 + $0x80] sm:$0xff]  ;;  %v78_v18 = vld [vmem:[%s20195_s0 + $0x88] sm:$0xff]  ;;  %786 = vst.msk [vmem:[#allocation2 + $0x248] sm:$0xff] %vm779_vm2, %v20205_v50 }
  0x2d   :  { %13918 = vmatmul.mubr.msk.f32.gmra.mrb[2].mxu0 %vm133_vm1, %v64_v4  ;;  %v79_v19 = vld [vmem:[%s20195_s0 + $0x90] sm:$0xff]  ;;  %v80_v20 = vld [vmem:[%s20195_s0 + $0x98] sm:$0xff]  ;;  %v81_v21 = vld [vmem:[%s20195_s0 + $0xa0] sm:$0xff]  ;;  %787 = vst.msk [vmem:[#allocation2 + $0x250] sm:$0xff] %vm779_vm2, %v20205_v50 }
  0x2e   :  { %13920 = vmatprep.mubr.msk.f32.mxu0 %vm133_vm1, %v65_v5  ;;  %v82_v22 = vld [vmem:[%s20195_s0 + $0xa8] sm:$0xff]  ;;  %v83_v23 = vld [vmem:[%s20195_s0 + $0xb0] sm:$0xff]  ;;  %v84_v24 = vld [vmem:[%s20195_s0 + $0xb8] sm:$0xff]  ;;  %790 = vst.msk [vmem:[#allocation2 + $0x220] sm:$0xff] %vm779_vm2, %v20205_v50 }
  0x2f   :  { %v85_v25 = vld [vmem:[%s20195_s0 + $0xc0] sm:$0xff]  ;;  %v86_v26 = vld [vmem:[%s20195_s0 + $0xc8] sm:$0xff]  ;;  %v87_v27 = vld [vmem:[%s20195_s0 + $0xd0] sm:$0xff]  ;;  %791 = vst.msk [vmem:[#allocation2 + $0x228] sm:$0xff] %vm779_vm2, %v20205_v50 }
  0x30   :  { %v88_v28 = vld [vmem:[%s20195_s0 + $0xd8] sm:$0xff]  ;;  %v89_v29 = vld [vmem:[%s20195_s0 + $0xe0] sm:$0xff]  ;;  %v90_v30 = vld [vmem:[%s20195_s0 + $0xe8] sm:$0xff]  ;;  %792 = vst.msk [vmem:[#allocation2 + $0x230] sm:$0xff] %vm779_vm2, %v20205_v50 }
  0x31   :  { %13921 = vmatmul.mubr.msk.f32.gmra.mrb[4].mxu0 %vm133_vm1, %v66_v6  ;;  %v91_v31 = vld [vmem:[%s20195_s0 + $0xf0] sm:$0xff]  ;;  %v92_v32 = vld [vmem:[%s20195_s0 + $0xf8] sm:$0xff]  ;;  %v93_v33 = vld [vmem:[%s20195_s0 + $0x100] sm:$0xff]  ;;  %794 = vst.msk [vmem:[#allocation2 + $0x460] sm:$0xff] %vm779_vm2, %v20205_v50 }
  0x32   :  { %13923 = vmatprep.mubr.msk.f32.mxu0 %vm133_vm1, %v67_v7  ;;  %v94_v34 = vld [vmem:[%s20195_s0 + $0x108] sm:$0xff]  ;;  %v95_v35 = vld [vmem:[%s20195_s0 + $0x110] sm:$0xff]  ;;  %v96_v36 = vld [vmem:[%s20195_s0 + $0x118] sm:$0xff]  ;;  %795 = vst.msk [vmem:[#allocation2 + $0x468] sm:$0xff] %vm779_vm2, %v20205_v50 }
  0x33   :  { %v97_v37 = vld [vmem:[%s20195_s0 + $0x120] sm:$0xff]  ;;  %v98_v38 = vld [vmem:[%s20195_s0 + $0x128] sm:$0xff]  ;;  %v99_v39 = vld [vmem:[%s20195_s0 + $0x130] sm:$0xff]  ;;  %796 = vst.msk [vmem:[#allocation2 + $0x470] sm:$0xff] %vm779_vm2, %v20205_v50 }
  0x34   :  { %v100_v40 = vld [vmem:[%s20195_s0 + $0x138] sm:$0xff]  ;;  %v101_v41 = vld [vmem:[%s20195_s0 + $0x140] sm:$0xff]  ;;  %v102_v42 = vld [vmem:[%s20195_s0 + $0x148] sm:$0xff]  ;;  %799 = vst.msk [vmem:[#allocation2 + $0x20] sm:$0xff] %vm779_vm2, %v20205_v50 }
  0x35   :  { %13924 = vmatmul.mubr.msk.f32.gmra.mrb[6].mxu0 %vm133_vm1, %v68_v8  ;;  %v103_v43 = vld [vmem:[%s20195_s0 + $0x150] sm:$0xff]  ;;  %v104_v44 = vld [vmem:[%s20195_s0 + $0x158] sm:$0xff]  ;;  %v105_v45 = vld [vmem:[%s20195_s0 + $0x160] sm:$0xff]  ;;  %800 = vst.msk [vmem:[#allocation2 + $0x40] sm:$0xff] %vm779_vm2, %v20205_v50 }
  0x36   :  { %13926 = vmatprep.mubr.msk.f32.mxu0 %vm133_vm1, %v69_v9  ;;  %v11940_v46 = vld [vmem:[%s20198_s3 + $0x20] sm:$0xff]  ;;  %v11941_v47 = vld [vmem:[%s20198_s3 + $0x28] sm:$0xff]  ;;  %801 = vst.msk [vmem:[#allocation2 + $0x60] sm:$0xff] %vm779_vm2, %v20205_v50  ;;  %802 = vst.msk [vmem:[#allocation2 + $0x80] sm:$0xff] %vm779_vm2, %v20205_v50 }
  0x37   :  { %v17007_v48 = vpack.c.bf16 %v11941_v47, %v11940_v46  ;;  %v17013_v49 = vld [vmem:[%s20195_s0 + $0x168] sm:$0xff]  ;;  %803 = vst.msk [vmem:[#allocation2 + $0xa0] sm:$0xff] %vm779_vm2, %v20205_v50  ;;  %804 = vst.msk [vmem:[#allocation2 + $0xc0] sm:$0xff] %vm779_vm2, %v20205_v50  ;;  %v17154_v51 = vld [vmem:[%s20195_s0 + $0x170] sm:$0xff] }
  0x38   :  { %805 = vst.msk [vmem:[#allocation2 + $0xe0] sm:$0xff] %vm779_vm2, %v20205_v50  ;;  %806 = vst.msk [vmem:[#allocation2 + $0x100] sm:$0xff] %vm779_vm2, %v20205_v50  ;;  %v11942_v52 = vld [vmem:[%s20198_s3 + $0x30] sm:$0xff]  ;;  %v11943_v53 = vld [vmem:[%s20198_s3 + $0x38] sm:$0xff] }
  0x39   :  { %13927 = vmatmul.mubr.msk.f32.gmra.mrb[8].mxu0 %vm133_vm1, %v70_v10  ;;  %807 = vst.msk [vmem:[#allocation2 + $0x120] sm:$0xff] %vm779_vm2, %v20205_v50  ;;  %808 = vst.msk [vmem:[#allocation2 + $0x140] sm:$0xff] %vm779_vm2, %v20205_v50  ;;  %15595 = vmatprep.subr.bf16.mxu0 %v17007_v48  ;;  %v17182_v54 = vpack.c.bf16 %v11943_v53, %v11942_v52  ;;  %v108_v55 = vld [vmem:[%s20195_s0 + $0x178] sm:$0xff]  ;;  %v109_v56 = vld [vmem:[%s20195_s0 + $0x180] sm:$0xff] }
  0x3a   :  { %13929 = vmatprep.mubr.msk.f32.mxu0 %vm133_vm1, %v71_v11  ;;  %809 = vst.msk [vmem:[#allocation2 + $0x160] sm:$0xff] %vm779_vm2, %v20205_v50  ;;  %810 = vst.msk [vmem:[#allocation2 + $0x180] sm:$0xff] %vm779_vm2, %v20205_v50  ;;  %15597 = vmatpush3.bf16.msra.mxu0 %v17007_v48  ;;  %v110_v57 = vld [vmem:[%s20195_s0 + $0x188] sm:$0xff]  ;;  %v111_v58 = vld [vmem:[%s20195_s0 + $0x190] sm:$0xff] }
  0x3b   :  { %811 = vst.msk [vmem:[#allocation2 + $0x1a0] sm:$0xff] %vm779_vm2, %v20205_v50  ;;  %812 = vst.msk [vmem:[#allocation2 + $0x1c0] sm:$0xff] %vm779_vm2, %v20205_v50  ;;  %15599 = vmatprep.subr.bf16.mxu0 %v17182_v54  ;;  %v112_v59 = vld [vmem:[%s20195_s0 + $0x198] sm:$0xff]  ;;  %v113_v60 = vld [vmem:[%s20195_s0 + $0x1a0] sm:$0xff] }
  0x3c   :  { %813 = vst.msk [vmem:[#allocation2 + $0x1e0] sm:$0xff] %vm779_vm2, %v20205_v50  ;;  %814 = vst.msk [vmem:[#allocation2 + $0x200] sm:$0xff] %vm779_vm2, %v20205_v50  ;;  %v114_v61 = vld [vmem:[%s20195_s0 + $0x1a8] sm:$0xff]  ;;  %v115_v62 = vld [vmem:[%s20195_s0 + $0x1b0] sm:$0xff] }
  0x3d   :  { %13930 = vmatmul.mubr.msk.f32.gmra.mrb[10].mxu0 %vm133_vm1, %v72_v12  ;;  %817 = vst.msk [vmem:[#allocation2 + $0x260] sm:$0xff] %vm779_vm2, %v20205_v50  ;;  %818 = vst.msk [vmem:[#allocation2 + $0x280] sm:$0xff] %vm779_vm2, %v20205_v50  ;;  %v116_v63 = vld [vmem:[%s20195_s0 + $0x1b8] sm:$0xff]  ;;  %v117_v0 = vld [vmem:[%s20195_s0 + $0x1c0] sm:$0xff] }
  0x3e   :  { %13932 = vmatprep.mubr.msk.f32.mxu0 %vm133_vm1, %v73_v13  ;;  %819 = vst.msk [vmem:[#allocation2 + $0x2a0] sm:$0xff] %vm779_vm2, %v20205_v50  ;;  %820 = vst.msk [vmem:[#allocation2 + $0x2c0] sm:$0xff] %vm779_vm2, %v20205_v50  ;;  %15601 = vmatpush3.bf16.msra.mxu0 %v17182_v54  ;;  %v118_v1 = vld [vmem:[%s20195_s0 + $0x1c8] sm:$0xff]  ;;  %v119_v2 = vld [vmem:[%s20195_s0 + $0x1d0] sm:$0xff] }
  0x3f   :  { %821 = vst.msk [vmem:[#allocation2 + $0x2e0] sm:$0xff] %vm779_vm2, %v20205_v50  ;;  %822 = vst.msk [vmem:[#allocation2 + $0x300] sm:$0xff] %vm779_vm2, %v20205_v50  ;;  %v120_v3 = vld [vmem:[%s20195_s0 + $0x1d8] sm:$0xff]  ;;  %v121_v4 = vld [vmem:[%s20195_s0 + $0x1e0] sm:$0xff] }
  0x40   :  { %823 = vst.msk [vmem:[#allocation2 + $0x320] sm:$0xff] %vm779_vm2, %v20205_v50  ;;  %824 = vst.msk [vmem:[#allocation2 + $0x340] sm:$0xff] %vm779_vm2, %v20205_v50  ;;  %v122_v5 = vld [vmem:[%s20195_s0 + $0x1e8] sm:$0xff]  ;;  %v123_v6 = vld [vmem:[%s20195_s0 + $0x1f0] sm:$0xff] }
  0x41   :  { %13933 = vmatmul.mubr.msk.f32.gmra.mrb[12].mxu0 %vm133_vm1, %v74_v14  ;;  %825 = vst.msk [vmem:[#allocation2 + $0x360] sm:$0xff] %vm779_vm2, %v20205_v50  ;;  %826 = vst.msk [vmem:[#allocation2 + $0x380] sm:$0xff] %vm779_vm2, %v20205_v50  ;;  %v124_v7 = vld [vmem:[%s20195_s0 + $0x1f8] sm:$0xff]  ;;  %v1003_v8 = vld [vmem:[#allocation2 + $0x8] sm:$0xff] }
  0x42   :  { %13935 = vmatprep.mubr.msk.f32.mxu0 %vm133_vm1, %v75_v15  ;;  %827 = vst.msk [vmem:[#allocation2 + $0x3a0] sm:$0xff] %vm779_vm2, %v20205_v50  ;;  %828 = vst.msk [vmem:[#allocation2 + $0x3c0] sm:$0xff] %vm779_vm2, %v20205_v50  ;;  %v1004_v9 = vld [vmem:[#allocation2 + $0x10] sm:$0xff]  ;;  %v999_v10 = vld [vmem:[%s20198_s3] sm:$0xff] }
  0x43   :  { %829 = vst.msk [vmem:[#allocation2 + $0x3e0] sm:$0xff] %vm779_vm2, %v20205_v50  ;;  %830 = vst.msk [vmem:[#allocation2 + $0x400] sm:$0xff] %vm779_vm2, %v20205_v50  ;;  %v1000_v11 = vld [vmem:[%s20198_s3 + $0x8] sm:$0xff]  ;;  %v1001_v13 = vld [vmem:[%s20198_s3 + $0x10] sm:$0xff] }
  0x44   :  { %831 = vst.msk [vmem:[#allocation2 + $0x420] sm:$0xff] %vm779_vm2, %v20205_v50  ;;  %832 = vst.msk [vmem:[#allocation2 + $0x440] sm:$0xff] %vm779_vm2, %v20205_v50  ;;  %v15602_v12 = vpack.c.bf16 %v1000_v11, %v999_v10  ;;  %v1002_v14 = vld [vmem:[%s20198_s3 + $0x18] sm:$0xff] }
  0x45   :  { %13936 = vmatmul.mubr.msk.f32.gmra.mrb[14].mxu0 %vm133_vm1, %v76_v16  ;;  %7476 = vst.msk [vmem:[#allocation3] sm:$0xff] %vm779_vm2, %v20205_v50  ;;  %7477 = vst.msk [vmem:[#allocation3 + $0x8] sm:$0xff] %vm779_vm2, %v20205_v50  ;;  %v15606_v15 = vpack.c.bf16 %v1002_v14, %v1001_v13  ;;  %v12072_v16 = vld [vmem:[%s20198_s3 + $0x40] sm:$0xff] }
  0x46   :  { %13938 = vmatprep.mubr.msk.f32.mxu0 %vm133_vm1, %v77_v17  ;;  %7479 = vst.msk [vmem:[#allocation3 + $0xf0] sm:$0xff] %vm779_vm2, %v20205_v50  ;;  %7480 = vst.msk [vmem:[#allocation3 + $0xf8] sm:$0xff] %vm779_vm2, %v20205_v50  ;;  %15882 = vmatprep.subr.bf16.mxu1 %v15602_v12  ;;  %v12073_v17 = vld [vmem:[%s20198_s3 + $0x48] sm:$0xff] }
  0x47   :  { %7483 = vst.msk [vmem:[#allocation3 + $0xd8] sm:$0xff] %vm779_vm2, %v20205_v50  ;;  %7484 = vst.msk [vmem:[#allocation3 + $0xe0] sm:$0xff] %vm779_vm2, %v20205_v50  ;;  %15603 = vmatprep.subr.bf16.mxu0 %v15602_v12  ;;  %15884 = vmatpush3.bf16.msra.mxu1 %v15602_v12 }
  0x48   :  { %7486 = vst.msk [vmem:[#allocation3 + $0x1c8] sm:$0xff] %vm779_vm2, %v20205_v50  ;;  %7487 = vst.msk [vmem:[#allocation3 + $0x1d0] sm:$0xff] %vm779_vm2, %v20205_v50  ;;  %15883 = vmatprep.subr.bf16.mxu1 %v15606_v15 }
  0x49   :  { %13939 = vmatmul.mubr.msk.f32.gmra.mrb[16].mxu0 %vm133_vm1, %v78_v18  ;;  %7490 = vst.msk [vmem:[#allocation3 + $0x18] sm:$0xff] %vm779_vm2, %v20205_v50  ;;  %7491 = vst.msk [vmem:[#allocation3 + $0x30] sm:$0xff] %vm779_vm2, %v20205_v50  ;;  %v17404_v18 = vpack.c.bf16 %v12073_v17, %v12072_v16 }
  0x4a   :  { %13941 = vmatprep.mubr.msk.f32.mxu0 %vm133_vm1, %v79_v19  ;;  %7492 = vst.msk [vmem:[#allocation3 + $0x48] sm:$0xff] %vm779_vm2, %v20205_v50  ;;  %7493 = vst.msk [vmem:[#allocation3 + $0x60] sm:$0xff] %vm779_vm2, %v20205_v50  ;;  %v17410_v19 = vld [vmem:[%s20197_s2] ss:$0 sm:$0xff] }
  0x4b   :  { %7494 = vst.msk [vmem:[#allocation3 + $0x78] sm:$0xff] %vm779_vm2, %v20205_v50  ;;  %7495 = vst.msk [vmem:[#allocation3 + $0x90] sm:$0xff] %vm779_vm2, %v20205_v50  ;;  %15885 = vmatpush3.bf16.msra.mxu1 %v15606_v15 }
  0x4c   :  { %7496 = vst.msk [vmem:[#allocation3 + $0xa8] sm:$0xff] %vm779_vm2, %v20205_v50  ;;  %7497 = vst.msk [vmem:[#allocation3 + $0xc0] sm:$0xff] %vm779_vm2, %v20205_v50  ;;  %15611 = vmatprep.subr.bf16.mxu1 %v17404_v18 }
  0x4d   :  { %13942 = vmatmul.mubr.msk.f32.gmra.mrb[18].mxu0 %vm133_vm1, %v80_v20  ;;  %7500 = vst.msk [vmem:[#allocation3 + $0x108] sm:$0xff] %vm779_vm2, %v20205_v50  ;;  %7501 = vst.msk [vmem:[#allocation3 + $0x120] sm:$0xff] %vm779_vm2, %v20205_v50 }
  0x4e   :  { %13944 = vmatprep.mubr.msk.f32.mxu0 %vm133_vm1, %v81_v21  ;;  %7502 = vst.msk [vmem:[#allocation3 + $0x138] sm:$0xff] %vm779_vm2, %v20205_v50  ;;  %7503 = vst.msk [vmem:[#allocation3 + $0x150] sm:$0xff] %vm779_vm2, %v20205_v50 }
  0x4f   :  { %7504 = vst.msk [vmem:[#allocation3 + $0x168] sm:$0xff] %vm779_vm2, %v20205_v50  ;;  %7505 = vst.msk [vmem:[#allocation3 + $0x180] sm:$0xff] %vm779_vm2, %v20205_v50 }
  0x50   :  { %7506 = vst.msk [vmem:[#allocation3 + $0x198] sm:$0xff] %vm779_vm2, %v20205_v50  ;;  %7507 = vst.msk [vmem:[#allocation3 + $0x1b0] sm:$0xff] %vm779_vm2, %v20205_v50 }
  0x51   :  { %13945 = vmatmul.mubr.msk.f32.gmra.mrb[20].mxu0 %vm133_vm1, %v82_v22  ;;  %798 = vst.msk [vmem:[#allocation2] sm:$0xff] %vm779_vm2, %v20205_v50  ;;  %815 = vst.msk [vmem:[#allocation2 + $0x220] sm:$0xff] %vm779_vm2, %v20205_v50 }
  0x52   :  { %13947 = vmatprep.mubr.msk.f32.mxu0 %vm133_vm1, %v83_v23  ;;  %816 = vst.msk [vmem:[#allocation2 + $0x240] sm:$0xff] %vm779_vm2, %v20205_v50  ;;  %833 = vst.msk [vmem:[#allocation2 + $0x460] sm:$0xff] %vm779_vm2, %v20205_v50 }
  0x53   :  { %7489 = vst.msk [vmem:[#allocation3] sm:$0xff] %vm779_vm2, %v20205_v50  ;;  %7498 = vst.msk [vmem:[#allocation3 + $0xd8] sm:$0xff] %vm779_vm2, %v20205_v50 }
  0x54   :  { %7499 = vst.msk [vmem:[#allocation3 + $0xf0] sm:$0xff] %vm779_vm2, %v20205_v50  ;;  %7508 = vst.msk [vmem:[#allocation3 + $0x1c8] sm:$0xff] %vm779_vm2, %v20205_v50 }
  0x55   :  { %13948 = vmatmul.mubr.msk.f32.gmra.mrb[22].mxu0 %vm133_vm1, %v84_v24  ;;  %784 = vst.msk [vmem:[#allocation2 + $0x18] sm:$0x3] %vm783_vm3, %v20205_v50  ;;  %788 = vst.msk [vmem:[#allocation2 + $0x258] sm:$0x3] %vm783_vm3, %v20205_v50 }
  0x56   :  { %13950 = vmatprep.mubr.msk.f32.mxu0 %vm133_vm1, %v85_v25  ;;  %793 = vst.msk [vmem:[#allocation2 + $0x238] sm:$0x3] %vm783_vm3, %v20205_v50  ;;  %797 = vst.msk [vmem:[#allocation2 + $0x478] sm:$0x3] %vm783_vm3, %v20205_v50 }
  0x57   :  { %835 = vst.msk [vmem:[#allocation2 + $0x38] sm:$0x3] %vm783_vm3, %v20205_v50  ;;  %836 = vst.msk [vmem:[#allocation2 + $0x58] sm:$0x3] %vm783_vm3, %v20205_v50 }
  0x58   :  { %837 = vst.msk [vmem:[#allocation2 + $0x78] sm:$0x3] %vm783_vm3, %v20205_v50  ;;  %838 = vst.msk [vmem:[#allocation2 + $0x98] sm:$0x3] %vm783_vm3, %v20205_v50 }
  0x59   :  { %13951 = vmatmul.mubr.msk.f32.gmra.mrb[24].mxu0 %vm133_vm1, %v86_v26  ;;  %839 = vst.msk [vmem:[#allocation2 + $0xb8] sm:$0x3] %vm783_vm3, %v20205_v50  ;;  %840 = vst.msk [vmem:[#allocation2 + $0xd8] sm:$0x3] %vm783_vm3, %v20205_v50 }
  0x5a   :  { %13953 = vmatprep.mubr.msk.f32.mxu0 %vm133_vm1, %v87_v27  ;;  %841 = vst.msk [vmem:[#allocation2 + $0xf8] sm:$0x3] %vm783_vm3, %v20205_v50  ;;  %842 = vst.msk [vmem:[#allocation2 + $0x118] sm:$0x3] %vm783_vm3, %v20205_v50 }
  0x5b   :  { %843 = vst.msk [vmem:[#allocation2 + $0x138] sm:$0x3] %vm783_vm3, %v20205_v50  ;;  %844 = vst.msk [vmem:[#allocation2 + $0x158] sm:$0x3] %vm783_vm3, %v20205_v50 }
  0x5c   :  { %845 = vst.msk [vmem:[#allocation2 + $0x178] sm:$0x3] %vm783_vm3, %v20205_v50  ;;  %846 = vst.msk [vmem:[#allocation2 + $0x198] sm:$0x3] %vm783_vm3, %v20205_v50 }
  0x5d   :  { %13954 = vmatmul.mubr.msk.f32.gmra.mrb[26].mxu0 %vm133_vm1, %v88_v28  ;;  %847 = vst.msk [vmem:[#allocation2 + $0x1b8] sm:$0x3] %vm783_vm3, %v20205_v50  ;;  %848 = vst.msk [vmem:[#allocation2 + $0x1d8] sm:$0x3] %vm783_vm3, %v20205_v50 }
  0x5e   :  { %13956 = vmatprep.mubr.msk.f32.mxu0 %vm133_vm1, %v89_v29  ;;  %849 = vst.msk [vmem:[#allocation2 + $0x1f8] sm:$0x3] %vm783_vm3, %v20205_v50  ;;  %850 = vst.msk [vmem:[#allocation2 + $0x218] sm:$0x3] %vm783_vm3, %v20205_v50 }
  0x5f   :  { %853 = vst.msk [vmem:[#allocation2 + $0x278] sm:$0x3] %vm783_vm3, %v20205_v50  ;;  %854 = vst.msk [vmem:[#allocation2 + $0x298] sm:$0x3] %vm783_vm3, %v20205_v50 }
  0x60   :  { %855 = vst.msk [vmem:[#allocation2 + $0x2b8] sm:$0x3] %vm783_vm3, %v20205_v50  ;;  %856 = vst.msk [vmem:[#allocation2 + $0x2d8] sm:$0x3] %vm783_vm3, %v20205_v50 }
  0x61   :  { %13957 = vmatmul.mubr.msk.f32.gmra.mrb[28].mxu0 %vm133_vm1, %v90_v30  ;;  %857 = vst.msk [vmem:[#allocation2 + $0x2f8] sm:$0x3] %vm783_vm3, %v20205_v50  ;;  %858 = vst.msk [vmem:[#allocation2 + $0x318] sm:$0x3] %vm783_vm3, %v20205_v50 }
  0x62   :  { %13959 = vmatprep.mubr.msk.f32.mxu0 %vm133_vm1, %v91_v31  ;;  %859 = vst.msk [vmem:[#allocation2 + $0x338] sm:$0x3] %vm783_vm3, %v20205_v50  ;;  %860 = vst.msk [vmem:[#allocation2 + $0x358] sm:$0x3] %vm783_vm3, %v20205_v50 }
  0x63   :  { %861 = vst.msk [vmem:[#allocation2 + $0x378] sm:$0x3] %vm783_vm3, %v20205_v50  ;;  %862 = vst.msk [vmem:[#allocation2 + $0x398] sm:$0x3] %vm783_vm3, %v20205_v50 }
  0x64   :  { %863 = vst.msk [vmem:[#allocation2 + $0x3b8] sm:$0x3] %vm783_vm3, %v20205_v50  ;;  %864 = vst.msk [vmem:[#allocation2 + $0x3d8] sm:$0x3] %vm783_vm3, %v20205_v50 }
  0x65   :  { %13960 = vmatmul.mubr.msk.f32.gmra.mrb[30].mxu0 %vm133_vm1, %v92_v32  ;;  %865 = vst.msk [vmem:[#allocation2 + $0x3f8] sm:$0x3] %vm783_vm3, %v20205_v50  ;;  %866 = vst.msk [vmem:[#allocation2 + $0x418] sm:$0x3] %vm783_vm3, %v20205_v50 }
  0x66   :  { %13962 = vmatprep.mubr.msk.f32.mxu0 %vm133_vm1, %v93_v33  ;;  %867 = vst.msk [vmem:[#allocation2 + $0x438] sm:$0x3] %vm783_vm3, %v20205_v50  ;;  %868 = vst.msk [vmem:[#allocation2 + $0x458] sm:$0x3] %vm783_vm3, %v20205_v50 }
  0x67   :  { %7478 = vst.msk [vmem:[#allocation3 + $0x10] sm:$0x3] %vm783_vm3, %v20205_v50  ;;  %7481 = vst.msk [vmem:[#allocation3 + $0x100] sm:$0x3] %vm783_vm3, %v20205_v50 }
  0x68   :  { %7485 = vst.msk [vmem:[#allocation3 + $0xe8] sm:$0x3] %vm783_vm3, %v20205_v50  ;;  %7488 = vst.msk [vmem:[#allocation3 + $0x1d8] sm:$0x3] %vm783_vm3, %v20205_v50 }
  0x69   :  { %13963 = vmatmul.mubr.msk.f32.gmra.mrb[32].mxu0 %vm133_vm1, %v94_v34  ;;  %7510 = vst.msk [vmem:[#allocation3 + $0x28] sm:$0x3] %vm783_vm3, %v20205_v50  ;;  %7511 = vst.msk [vmem:[#allocation3 + $0x40] sm:$0x3] %vm783_vm3, %v20205_v50 }
  0x6a   :  { %13965 = vmatprep.mubr.msk.f32.mxu0 %vm133_vm1, %v95_v35  ;;  %7512 = vst.msk [vmem:[#allocation3 + $0x58] sm:$0x3] %vm783_vm3, %v20205_v50  ;;  %7513 = vst.msk [vmem:[#allocation3 + $0x70] sm:$0x3] %vm783_vm3, %v20205_v50 }
  0x6b   :  { %7514 = vst.msk [vmem:[#allocation3 + $0x88] sm:$0x3] %vm783_vm3, %v20205_v50  ;;  %7515 = vst.msk [vmem:[#allocation3 + $0xa0] sm:$0x3] %vm783_vm3, %v20205_v50 }
  0x6c   :  { %7516 = vst.msk [vmem:[#allocation3 + $0xb8] sm:$0x3] %vm783_vm3, %v20205_v50  ;;  %7517 = vst.msk [vmem:[#allocation3 + $0xd0] sm:$0x3] %vm783_vm3, %v20205_v50 }
  0x6d   :  { %13966 = vmatmul.mubr.msk.f32.gmra.mrb[34].mxu0 %vm133_vm1, %v96_v36  ;;  %7520 = vst.msk [vmem:[#allocation3 + $0x118] sm:$0x3] %vm783_vm3, %v20205_v50  ;;  %7521 = vst.msk [vmem:[#allocation3 + $0x130] sm:$0x3] %vm783_vm3, %v20205_v50 }
  0x6e   :  { %13968 = vmatprep.mubr.msk.f32.mxu0 %vm133_vm1, %v97_v37  ;;  %7522 = vst.msk [vmem:[#allocation3 + $0x148] sm:$0x3] %vm783_vm3, %v20205_v50  ;;  %7523 = vst.msk [vmem:[#allocation3 + $0x160] sm:$0x3] %vm783_vm3, %v20205_v50 }
  0x6f   :  { %7524 = vst.msk [vmem:[#allocation3 + $0x178] sm:$0x3] %vm783_vm3, %v20205_v50  ;;  %7525 = vst.msk [vmem:[#allocation3 + $0x190] sm:$0x3] %vm783_vm3, %v20205_v50 }
  0x70   :  { %7526 = vst.msk [vmem:[#allocation3 + $0x1a8] sm:$0x3] %vm783_vm3, %v20205_v50  ;;  %7527 = vst.msk [vmem:[#allocation3 + $0x1c0] sm:$0x3] %vm783_vm3, %v20205_v50 }
  0x71   :  { %13969 = vmatmul.mubr.msk.f32.gmra.mrb[36].mxu0 %vm133_vm1, %v98_v38  ;;  %834 = vst.msk [vmem:[#allocation2 + $0x18] sm:$0x3] %vm783_vm3, %v20205_v50  ;;  %851 = vst.msk [vmem:[#allocation2 + $0x238] sm:$0x3] %vm783_vm3, %v20205_v50 }
  0x72   :  { %13971 = vmatprep.mubr.msk.f32.mxu0 %vm133_vm1, %v99_v39  ;;  %852 = vst.msk [vmem:[#allocation2 + $0x258] sm:$0x3] %vm783_vm3, %v20205_v50  ;;  %869 = vst.msk [vmem:[#allocation2 + $0x478] sm:$0x3] %vm783_vm3, %v20205_v50 }
  0x73   :  { %7509 = vst.msk [vmem:[#allocation3 + $0x10] sm:$0x3] %vm783_vm3, %v20205_v50  ;;  %7518 = vst.msk [vmem:[#allocation3 + $0xe8] sm:$0x3] %vm783_vm3, %v20205_v50 }
  0x74   :  { %7519 = vst.msk [vmem:[#allocation3 + $0x100] sm:$0x3] %vm783_vm3, %v20205_v50  ;;  %7528 = vst.msk [vmem:[#allocation3 + $0x1d8] sm:$0x3] %vm783_vm3, %v20205_v50 }
  0x75   :  { %13972 = vmatmul.mubr.msk.f32.gmra.mrb[38].mxu0 %vm133_vm1, %v100_v40 }
  0x76   :  { %13974 = vmatprep.mubr.msk.f32.mxu0 %vm133_vm1, %v101_v41 }
  0x79   :  { %13975 = vmatmul.mubr.msk.f32.gmra.mrb[40].mxu0 %vm133_vm1, %v102_v42 }
  0x7a   :  { %13977 = vmatprep.mubr.msk.f32.mxu0 %vm133_vm1, %v103_v43 }
  0x7d   :  { %13978 = vmatmul.mubr.msk.f32.gmra.mrb[42].mxu0 %vm133_vm1, %v104_v44 }
  0x7e   :  { %13980 = vmatprep.mubr.msk.f32.mxu0 %vm133_vm1, %v105_v45 }
  0x81   :  { %13981 = vmatmul.mubr.msk.f32.gmra.mrb[44].mxu0 %vm133_vm1, %v17013_v49 }
  0x82   :  { %13983 = vmatprep.mubr.msk.f32.mxu0 %vm133_vm1, %v17154_v51 }
  0x85   :  { %13984 = vmatmul.mubr.msk.f32.gmra.mrb[46].mxu0 %vm133_vm1, %v108_v55 }
  0x86   :  { %13986 = vmatprep.mubr.msk.f32.mxu0 %vm133_vm1, %v109_v56 }
  0x89   :  { %13987 = vmatmul.mubr.msk.f32.gmra.mrb[48].mxu0 %vm133_vm1, %v110_v57 }
  0x8a   :  { %13989 = vmatprep.mubr.msk.f32.mxu0 %vm133_vm1, %v111_v58 }
  0x8d   :  { %13990 = vmatmul.mubr.msk.f32.gmra.mrb[50].mxu0 %vm133_vm1, %v112_v59 }
  0x8e   :  { %13992 = vmatprep.mubr.msk.f32.mxu0 %vm133_vm1, %v113_v60 }
  0x91   :  { %13993 = vmatmul.mubr.msk.f32.gmra.mrb[52].mxu0 %vm133_vm1, %v114_v61 }
  0x92   :  { %13995 = vmatprep.mubr.msk.f32.mxu0 %vm133_vm1, %v115_v62 }
  0x95   :  { %13996 = vmatmul.mubr.msk.f32.gmra.mrb[54].mxu0 %vm133_vm1, %v116_v63 }
  0x96   :  { %13998 = vmatprep.mubr.msk.f32.mxu0 %vm133_vm1, %v117_v0 }
  0x99   :  { %13999 = vmatmul.mubr.msk.f32.gmra.mrb[56].mxu0 %vm133_vm1, %v118_v1 }
  0x9a   :  { %14001 = vmatprep.mubr.msk.f32.mxu0 %vm133_vm1, %v119_v2 }
  0x9d   :  { %14002 = vmatmul.mubr.msk.f32.gmra.mrb[58].mxu0 %vm133_vm1, %v120_v3 }
  0x9e   :  { %14004 = vmatprep.mubr.msk.f32.mxu0 %vm133_vm1, %v121_v4 }
  0xa1   :  { %14005 = vmatmul.mubr.msk.f32.gmra.mrb[60].mxu0 %vm133_vm1, %v122_v5 }
  0xa2   :  { %14007 = vmatprep.mubr.msk.f32.mxu0 %vm133_vm1, %v123_v6 }
  0xa5   :  { %14008 = vmatmul.mubr.msk.f32.gmra.mrb[62].mxu0 %vm133_vm1, %v124_v7 }
  0xa6   :  { %14018 = vmatprep.mubr.msk.f32.mxu0 %vm779_vm2, %v1003_v8 }
  0xa9   :  { %14019 = vmatmul.mubr.msk.f32.vlgmr.msra.gmra.mrb[64].mxu0 %vm779_vm2, %v1004_v9 }
  0xaa   :  { %15605 = vmatpush3.bf16.msra.mxu0 %v15602_v12 }
  0xab   :  { %15607 = vmatprep.subr.bf16.mxu0 %v15606_v15 }
  0xae   :  { %15609 = vmatpush3.bf16.msra.mxu0 %v15606_v15 }
  0xfc   :  { %v13916_v20 = vpop.f32.mrb[0].mxu0 }
  0xfd   :  { %v402_v21 = vadd.f32 %v13916_v20, %v17410_v19  ;;  %v396_v22 = vpop.f32.mrb[1].mxu0 }
  0xfe   :  { %v397_v23 = vadd.f32 %v17410_v19, %v396_v22 }
  0xff   :  { %v716_v24 = vmax.f32 %v402_v21, 0.0 }
 0x100   :  { %v715_v25 = vmax.f32 %v397_v23, 0.0  ;;  %v13919_v26 = vpop.f32.mrb[2].mxu0 }
 0x101   :  { %872 = vst.msk [vmem:[#allocation2 + $0x30] sm:$0xff] %vm779_vm2, %v716_v24  ;;  %v412_v27 = vadd.f32 %v13919_v26, %v17410_v19  ;;  %v406_v28 = vpop.f32.mrb[3].mxu0 }
 0x102   :  { %871 = vst.msk [vmem:[#allocation2 + $0x28] sm:$0xff] %vm779_vm2, %v715_v25  ;;  %v407_v29 = vadd.f32 %v17410_v19, %v406_v28 }
 0x103   :  { %v718_v30 = vmax.f32 %v412_v27, 0.0 }
 0x104   :  { %v717_v31 = vmax.f32 %v407_v29, 0.0  ;;  %v13922_v32 = vpop.f32.mrb[4].mxu0 }
 0x105   :  { %874 = vst.msk [vmem:[#allocation2 + $0x50] sm:$0xff] %vm779_vm2, %v718_v30  ;;  %v422_v33 = vadd.f32 %v13922_v32, %v17410_v19  ;;  %v416_v34 = vpop.f32.mrb[5].mxu0 }
 0x106   :  { %873 = vst.msk [vmem:[#allocation2 + $0x48] sm:$0xff] %vm779_vm2, %v717_v31  ;;  %v417_v35 = vadd.f32 %v17410_v19, %v416_v34 }
 0x107   :  { %v720_v36 = vmax.f32 %v422_v33, 0.0 }
 0x108   :  { %v719_v37 = vmax.f32 %v417_v35, 0.0  ;;  %v13925_v38 = vpop.f32.mrb[6].mxu0  ;;  %v1006_v43 = vld [vmem:[#allocation2 + $0x30] sm:$0xff] }
 0x109   :  { %876 = vst.msk [vmem:[#allocation2 + $0x70] sm:$0xff] %vm779_vm2, %v720_v36  ;;  %v432_v39 = vadd.f32 %v13925_v38, %v17410_v19  ;;  %v426_v40 = vpop.f32.mrb[7].mxu0  ;;  %v1005_v41 = vld [vmem:[#allocation2 + $0x28] sm:$0xff] }
 0x10a   :  { %875 = vst.msk [vmem:[#allocation2 + $0x68] sm:$0xff] %vm779_vm2, %v719_v37  ;;  %v427_v42 = vadd.f32 %v17410_v19, %v426_v40  ;;  %14021 = vmatprep.mubr.msk.f32.mxu0 %vm779_vm2, %v1005_v41 }
 0x10b   :  { %v722_v44 = vmax.f32 %v432_v39, 0.0  ;;  %14022 = vmatmul.mubr.msk.f32.gmra.mrb[66].mxu0 %vm779_vm2, %v1006_v43 }
 0x10c   :  { %v721_v45 = vmax.f32 %v427_v42, 0.0  ;;  %v13928_v46 = vpop.f32.mrb[8].mxu0  ;;  %v1008_v52 = vld [vmem:[#allocation2 + $0x50] sm:$0xff] }
 0x10d   :  { %878 = vst.msk [vmem:[#allocation2 + $0x90] sm:$0xff] %vm779_vm2, %v722_v44  ;;  %v442_v47 = vadd.f32 %v13928_v46, %v17410_v19  ;;  %v436_v48 = vpop.f32.mrb[9].mxu0  ;;  %v1007_v49 = vld [vmem:[#allocation2 + $0x48] sm:$0xff] }
 0x10e   :  { %877 = vst.msk [vmem:[#allocation2 + $0x88] sm:$0xff] %vm779_vm2, %v721_v45  ;;  %v437_v51 = vadd.f32 %v17410_v19, %v436_v48  ;;  %14024 = vmatprep.mubr.msk.f32.mxu0 %vm779_vm2, %v1007_v49 }
 0x10f   :  { %v724_v53 = vmax.f32 %v442_v47, 0.0  ;;  %14025 = vmatmul.mubr.msk.f32.gmra.mrb[68].mxu0 %vm779_vm2, %v1008_v52 }
 0x110   :  { %v723_v54 = vmax.f32 %v437_v51, 0.0  ;;  %v13931_v55 = vpop.f32.mrb[10].mxu0  ;;  %v1010_v60 = vld [vmem:[#allocation2 + $0x70] sm:$0xff] }
 0x111   :  { %880 = vst.msk [vmem:[#allocation2 + $0xb0] sm:$0xff] %vm779_vm2, %v724_v53  ;;  %v452_v56 = vadd.f32 %v13931_v55, %v17410_v19  ;;  %v446_v57 = vpop.f32.mrb[11].mxu0  ;;  %v1009_v58 = vld [vmem:[#allocation2 + $0x68] sm:$0xff] }
 0x112   :  { %879 = vst.msk [vmem:[#allocation2 + $0xa8] sm:$0xff] %vm779_vm2, %v723_v54  ;;  %v447_v59 = vadd.f32 %v17410_v19, %v446_v57  ;;  %14027 = vmatprep.mubr.msk.f32.mxu0 %vm779_vm2, %v1009_v58 }
 0x113   :  { %v726_v61 = vmax.f32 %v452_v56, 0.0  ;;  %14028 = vmatmul.mubr.msk.f32.gmra.mrb[70].mxu0 %vm779_vm2, %v1010_v60 }
 0x114   :  { %v725_v62 = vmax.f32 %v447_v59, 0.0  ;;  %v13934_v63 = vpop.f32.mrb[12].mxu0  ;;  %v1012_v4 = vld [vmem:[#allocation2 + $0x90] sm:$0xff] }
 0x115   :  { %882 = vst.msk [vmem:[#allocation2 + $0xd0] sm:$0xff] %vm779_vm2, %v726_v61  ;;  %v462_v0 = vadd.f32 %v13934_v63, %v17410_v19  ;;  %v456_v1 = vpop.f32.mrb[13].mxu0  ;;  %v1011_v2 = vld [vmem:[#allocation2 + $0x88] sm:$0xff] }
 0x116   :  { %881 = vst.msk [vmem:[#allocation2 + $0xc8] sm:$0xff] %vm779_vm2, %v725_v62  ;;  %v457_v3 = vadd.f32 %v17410_v19, %v456_v1  ;;  %14030 = vmatprep.mubr.msk.f32.mxu0 %vm779_vm2, %v1011_v2 }
 0x117   :  { %v728_v5 = vmax.f32 %v462_v0, 0.0  ;;  %14031 = vmatmul.mubr.msk.f32.gmra.mrb[72].mxu0 %vm779_vm2, %v1012_v4 }
 0x118   :  { %v727_v6 = vmax.f32 %v457_v3, 0.0  ;;  %v13937_v7 = vpop.f32.mrb[14].mxu0  ;;  %v1014_v12 = vld [vmem:[#allocation2 + $0xb0] sm:$0xff] }
 0x119   :  { %884 = vst.msk [vmem:[#allocation2 + $0xf0] sm:$0xff] %vm779_vm2, %v728_v5  ;;  %v472_v8 = vadd.f32 %v13937_v7, %v17410_v19  ;;  %v466_v9 = vpop.f32.mrb[15].mxu0  ;;  %v1013_v10 = vld [vmem:[#allocation2 + $0xa8] sm:$0xff] }
 0x11a   :  { %883 = vst.msk [vmem:[#allocation2 + $0xe8] sm:$0xff] %vm779_vm2, %v727_v6  ;;  %v467_v11 = vadd.f32 %v17410_v19, %v466_v9  ;;  %14033 = vmatprep.mubr.msk.f32.mxu0 %vm779_vm2, %v1013_v10 }
 0x11b   :  { %v730_v13 = vmax.f32 %v472_v8, 0.0  ;;  %14034 = vmatmul.mubr.msk.f32.gmra.mrb[74].mxu0 %vm779_vm2, %v1014_v12 }
 0x11c   :  { %v729_v14 = vmax.f32 %v467_v11, 0.0  ;;  %v13940_v15 = vpop.f32.mrb[16].mxu0  ;;  %v1016_v22 = vld [vmem:[#allocation2 + $0xd0] sm:$0xff] }
 0x11d   :  { %886 = vst.msk [vmem:[#allocation2 + $0x110] sm:$0xff] %vm779_vm2, %v730_v13  ;;  %v482_v16 = vadd.f32 %v13940_v15, %v17410_v19  ;;  %v476_v17 = vpop.f32.mrb[17].mxu0  ;;  %v1015_v20 = vld [vmem:[#allocation2 + $0xc8] sm:$0xff] }
 0x11e   :  { %885 = vst.msk [vmem:[#allocation2 + $0x108] sm:$0xff] %vm779_vm2, %v729_v14  ;;  %v477_v21 = vadd.f32 %v17410_v19, %v476_v17  ;;  %14036 = vmatprep.mubr.msk.f32.mxu0 %vm779_vm2, %v1015_v20 }
 0x11f   :  { %v732_v23 = vmax.f32 %v482_v16, 0.0  ;;  %14037 = vmatmul.mubr.msk.f32.gmra.mrb[76].mxu0 %vm779_vm2, %v1016_v22 }
 0x120   :  { %v731_v24 = vmax.f32 %v477_v21, 0.0  ;;  %v13943_v25 = vpop.f32.mrb[18].mxu0  ;;  %v1018_v30 = vld [vmem:[#allocation2 + $0xf0] sm:$0xff] }
 0x121   :  { %888 = vst.msk [vmem:[#allocation2 + $0x130] sm:$0xff] %vm779_vm2, %v732_v23  ;;  %v492_v26 = vadd.f32 %v13943_v25, %v17410_v19  ;;  %v486_v27 = vpop.f32.mrb[19].mxu0  ;;  %v1017_v28 = vld [vmem:[#allocation2 + $0xe8] sm:$0xff] }
 0x122   :  { %887 = vst.msk [vmem:[#allocation2 + $0x128] sm:$0xff] %vm779_vm2, %v731_v24  ;;  %v487_v29 = vadd.f32 %v17410_v19, %v486_v27  ;;  %14039 = vmatprep.mubr.msk.f32.mxu0 %vm779_vm2, %v1017_v28 }
 0x123   :  { %v734_v31 = vmax.f32 %v492_v26, 0.0  ;;  %14040 = vmatmul.mubr.msk.f32.gmra.mrb[78].mxu0 %vm779_vm2, %v1018_v30 }
 0x124   :  { %v733_v32 = vmax.f32 %v487_v29, 0.0  ;;  %v13946_v33 = vpop.f32.mrb[20].mxu0  ;;  %v1020_v38 = vld [vmem:[#allocation2 + $0x110] sm:$0xff] }
 0x125   :  { %890 = vst.msk [vmem:[#allocation2 + $0x150] sm:$0xff] %vm779_vm2, %v734_v31  ;;  %v502_v34 = vadd.f32 %v13946_v33, %v17410_v19  ;;  %v496_v35 = vpop.f32.mrb[21].mxu0  ;;  %v1019_v36 = vld [vmem:[#allocation2 + $0x108] sm:$0xff] }
 0x126   :  { %889 = vst.msk [vmem:[#allocation2 + $0x148] sm:$0xff] %vm779_vm2, %v733_v32  ;;  %v497_v37 = vadd.f32 %v17410_v19, %v496_v35  ;;  %14042 = vmatprep.mubr.msk.f32.mxu0 %vm779_vm2, %v1019_v36  ;;  %v1035_v32 = vld [vmem:[#allocation2 + $0x248] sm:$0xff] }
 0x127   :  { %v736_v39 = vmax.f32 %v502_v34, 0.0  ;;  %14043 = vmatmul.mubr.msk.f32.gmra.mrb[80].mxu0 %vm779_vm2, %v1020_v38  ;;  %v1036_v38 = vld [vmem:[#allocation2 + $0x250] sm:$0xff] }
 0x128   :  { %v735_v40 = vmax.f32 %v497_v37, 0.0  ;;  %v13949_v41 = vpop.f32.mrb[22].mxu0  ;;  %v1022_v46 = vld [vmem:[#allocation2 + $0x130] sm:$0xff] }
 0x129   :  { %892 = vst.msk [vmem:[#allocation2 + $0x170] sm:$0xff] %vm779_vm2, %v736_v39  ;;  %v512_v42 = vadd.f32 %v13949_v41, %v17410_v19  ;;  %v506_v43 = vpop.f32.mrb[23].mxu0  ;;  %v1021_v44 = vld [vmem:[#allocation2 + $0x128] sm:$0xff] }
 0x12a   :  { %891 = vst.msk [vmem:[#allocation2 + $0x168] sm:$0xff] %vm779_vm2, %v735_v40  ;;  %v507_v45 = vadd.f32 %v17410_v19, %v506_v43  ;;  %14045 = vmatprep.mubr.msk.f32.mxu0 %vm779_vm2, %v1021_v44 }
 0x12b   :  { %v738_v47 = vmax.f32 %v512_v42, 0.0  ;;  %14046 = vmatmul.mubr.msk.f32.gmra.mrb[82].mxu0 %vm779_vm2, %v1022_v46 }
 0x12c   :  { %v737_v48 = vmax.f32 %v507_v45, 0.0  ;;  %v13952_v49 = vpop.f32.mrb[24].mxu0  ;;  %v1024_v55 = vld [vmem:[#allocation2 + $0x150] sm:$0xff] }
 0x12d   :  { %894 = vst.msk [vmem:[#allocation2 + $0x190] sm:$0xff] %vm779_vm2, %v738_v47  ;;  %v522_v51 = vadd.f32 %v13952_v49, %v17410_v19  ;;  %v516_v52 = vpop.f32.mrb[25].mxu0  ;;  %v1023_v53 = vld [vmem:[#allocation2 + $0x148] sm:$0xff] }
 0x12e   :  { %893 = vst.msk [vmem:[#allocation2 + $0x188] sm:$0xff] %vm779_vm2, %v737_v48  ;;  %v517_v54 = vadd.f32 %v17410_v19, %v516_v52  ;;  %14048 = vmatprep.mubr.msk.f32.mxu0 %vm779_vm2, %v1023_v53 }
 0x12f   :  { %v740_v56 = vmax.f32 %v522_v51, 0.0  ;;  %14049 = vmatmul.mubr.msk.f32.gmra.mrb[84].mxu0 %vm779_vm2, %v1024_v55 }
 0x130   :  { %v739_v57 = vmax.f32 %v517_v54, 0.0  ;;  %v13955_v58 = vpop.f32.mrb[26].mxu0  ;;  %v1026_v63 = vld [vmem:[#allocation2 + $0x170] sm:$0xff] }
 0x131   :  { %896 = vst.msk [vmem:[#allocation2 + $0x1b0] sm:$0xff] %vm779_vm2, %v740_v56  ;;  %v532_v59 = vadd.f32 %v13955_v58, %v17410_v19  ;;  %v526_v60 = vpop.f32.mrb[27].mxu0  ;;  %v1025_v61 = vld [vmem:[#allocation2 + $0x168] sm:$0xff] }
 0x132   :  { %895 = vst.msk [vmem:[#allocation2 + $0x1a8] sm:$0xff] %vm779_vm2, %v739_v57  ;;  %v527_v62 = vadd.f32 %v17410_v19, %v526_v60  ;;  %14051 = vmatprep.mubr.msk.f32.mxu0 %vm779_vm2, %v1025_v61 }
 0x133   :  { %v742_v0 = vmax.f32 %v532_v59, 0.0  ;;  %14052 = vmatmul.mubr.msk.f32.gmra.mrb[86].mxu0 %vm779_vm2, %v1026_v63 }
 0x134   :  { %v741_v1 = vmax.f32 %v527_v62, 0.0  ;;  %v13958_v2 = vpop.f32.mrb[28].mxu0  ;;  %v1028_v7 = vld [vmem:[#allocation2 + $0x190] sm:$0xff] }
 0x135   :  { %898 = vst.msk [vmem:[#allocation2 + $0x1d0] sm:$0xff] %vm779_vm2, %v742_v0  ;;  %v542_v3 = vadd.f32 %v13958_v2, %v17410_v19  ;;  %v536_v4 = vpop.f32.mrb[29].mxu0  ;;  %v1027_v5 = vld [vmem:[#allocation2 + $0x188] sm:$0xff] }
 0x136   :  { %897 = vst.msk [vmem:[#allocation2 + $0x1c8] sm:$0xff] %vm779_vm2, %v741_v1  ;;  %v537_v6 = vadd.f32 %v17410_v19, %v536_v4  ;;  %14054 = vmatprep.mubr.msk.f32.mxu0 %vm779_vm2, %v1027_v5 }
 0x137   :  { %v744_v8 = vmax.f32 %v542_v3, 0.0  ;;  %14055 = vmatmul.mubr.msk.f32.gmra.mrb[88].mxu0 %vm779_vm2, %v1028_v7 }
 0x138   :  { %v743_v9 = vmax.f32 %v537_v6, 0.0  ;;  %v13961_v10 = vpop.f32.mrb[30].mxu0  ;;  %v1030_v15 = vld [vmem:[#allocation2 + $0x1b0] sm:$0xff] }
 0x139   :  { %900 = vst.msk [vmem:[#allocation2 + $0x1f0] sm:$0xff] %vm779_vm2, %v744_v8  ;;  %v552_v11 = vadd.f32 %v13961_v10, %v17410_v19  ;;  %v546_v12 = vpop.f32.mrb[31].mxu0  ;;  %v1029_v13 = vld [vmem:[#allocation2 + $0x1a8] sm:$0xff] }
 0x13a   :  { %899 = vst.msk [vmem:[#allocation2 + $0x1e8] sm:$0xff] %vm779_vm2, %v743_v9  ;;  %v547_v14 = vadd.f32 %v17410_v19, %v546_v12  ;;  %14057 = vmatprep.mubr.msk.f32.mxu0 %vm779_vm2, %v1029_v13 }
 0x13b   :  { %v746_v16 = vmax.f32 %v552_v11, 0.0  ;;  %14058 = vmatmul.mubr.msk.f32.gmra.mrb[90].mxu0 %vm779_vm2, %v1030_v15 }
 0x13c   :  { %v745_v17 = vmax.f32 %v547_v14, 0.0  ;;  %v13964_v20 = vpop.f32.mrb[32].mxu0  ;;  %v1032_v25 = vld [vmem:[#allocation2 + $0x1d0] sm:$0xff] }
 0x13d   :  { %902 = vst.msk [vmem:[#allocation2 + $0x210] sm:$0xff] %vm779_vm2, %v746_v16  ;;  %v562_v21 = vadd.f32 %v13964_v20, %v17410_v19  ;;  %v556_v22 = vpop.f32.mrb[33].mxu0  ;;  %v1031_v23 = vld [vmem:[#allocation2 + $0x1c8] sm:$0xff] }
 0x13e   :  { %901 = vst.msk [vmem:[#allocation2 + $0x208] sm:$0xff] %vm779_vm2, %v745_v17  ;;  %v557_v24 = vadd.f32 %v17410_v19, %v556_v22  ;;  %14060 = vmatprep.mubr.msk.f32.mxu0 %vm779_vm2, %v1031_v23 }
 0x13f   :  { %v748_v26 = vmax.f32 %v562_v21, 0.0  ;;  %14061 = vmatmul.mubr.msk.f32.gmra.mrb[92].mxu0 %vm779_vm2, %v1032_v25 }
 0x140   :  { %v747_v27 = vmax.f32 %v557_v24, 0.0  ;;  %v13967_v28 = vpop.f32.mrb[34].mxu0  ;;  %v1034_v34 = vld [vmem:[#allocation2 + $0x1f0] sm:$0xff] }
 0x141   :  { %904 = vst.msk [vmem:[#allocation2 + $0x270] sm:$0xff] %vm779_vm2, %v748_v26  ;;  %v572_v29 = vadd.f32 %v13967_v28, %v17410_v19  ;;  %v566_v30 = vpop.f32.mrb[35].mxu0  ;;  %v1033_v31 = vld [vmem:[#allocation2 + $0x1e8] sm:$0xff] }
 0x142   :  { %903 = vst.msk [vmem:[#allocation2 + $0x268] sm:$0xff] %vm779_vm2, %v747_v27  ;;  %v567_v33 = vadd.f32 %v17410_v19, %v566_v30  ;;  %14063 = vmatprep.mubr.msk.f32.mxu0 %vm779_vm2, %v1033_v31 }
 0x143   :  { %v750_v35 = vmax.f32 %v572_v29, 0.0  ;;  %14064 = vmatmul.mubr.msk.f32.gmra.mrb[94].mxu0 %vm779_vm2, %v1034_v34 }
 0x144   :  { %v749_v36 = vmax.f32 %v567_v33, 0.0  ;;  %v13970_v37 = vpop.f32.mrb[36].mxu0  ;;  %14066 = vmatprep.mubr.msk.f32.mxu0 %vm779_vm2, %v1035_v32 }
 0x145   :  { %906 = vst.msk [vmem:[#allocation2 + $0x290] sm:$0xff] %vm779_vm2, %v750_v35  ;;  %v582_v39 = vadd.f32 %v13970_v37, %v17410_v19  ;;  %v576_v40 = vpop.f32.mrb[37].mxu0  ;;  %v12074_v37 = vld [vmem:[%s20198_s3 + $0x50] sm:$0xff] }
 0x146   :  { %905 = vst.msk [vmem:[#allocation2 + $0x288] sm:$0xff] %vm779_vm2, %v749_v36  ;;  %v577_v41 = vadd.f32 %v17410_v19, %v576_v40 }
 0x147   :  { %v752_v42 = vmax.f32 %v582_v39, 0.0  ;;  %14067 = vmatmul.mubr.msk.f32.gmra.mrb[96].mxu0 %vm779_vm2, %v1036_v38  ;;  %v12075_v38 = vld [vmem:[%s20198_s3 + $0x58] sm:$0xff] }
 0x148   :  { %v751_v43 = vmax.f32 %v577_v41, 0.0  ;;  %v13973_v44 = vpop.f32.mrb[38].mxu0  ;;  %v1038_v49 = vld [vmem:[#allocation2 + $0x270] sm:$0xff] }
 0x149   :  { %908 = vst.msk [vmem:[#allocation2 + $0x2b0] sm:$0xff] %vm779_vm2, %v752_v42  ;;  %v592_v45 = vadd.f32 %v13973_v44, %v17410_v19  ;;  %v586_v46 = vpop.f32.mrb[39].mxu0  ;;  %v1037_v47 = vld [vmem:[#allocation2 + $0x268] sm:$0xff] }
 0x14a   :  { %907 = vst.msk [vmem:[#allocation2 + $0x2a8] sm:$0xff] %vm779_vm2, %v751_v43  ;;  %v587_v48 = vadd.f32 %v17410_v19, %v586_v46  ;;  %14069 = vmatprep.mubr.msk.f32.mxu0 %vm779_vm2, %v1037_v47  ;;  %v15614_v47 = vpack.c.bf16 %v12075_v38, %v12074_v37 }
 0x14b   :  { %v754_v51 = vmax.f32 %v592_v45, 0.0  ;;  %14070 = vmatmul.mubr.msk.f32.gmra.mrb[98].mxu0 %vm779_vm2, %v1038_v49 }
 0x14c   :  { %v753_v52 = vmax.f32 %v587_v48, 0.0  ;;  %v13976_v53 = vpop.f32.mrb[40].mxu0  ;;  %v1040_v58 = vld [vmem:[#allocation2 + $0x290] sm:$0xff] }
 0x14d   :  { %910 = vst.msk [vmem:[#allocation2 + $0x2d0] sm:$0xff] %vm779_vm2, %v754_v51  ;;  %v602_v54 = vadd.f32 %v13976_v53, %v17410_v19  ;;  %v596_v55 = vpop.f32.mrb[41].mxu0  ;;  %v1039_v56 = vld [vmem:[#allocation2 + $0x288] sm:$0xff]  ;;  %v12140_v51 = vld [vmem:[%s20198_s3 + $0x60] sm:$0xff] }
 0x14e   :  { %909 = vst.msk [vmem:[#allocation2 + $0x2c8] sm:$0xff] %vm779_vm2, %v753_v52  ;;  %v597_v57 = vadd.f32 %v17410_v19, %v596_v55  ;;  %14072 = vmatprep.mubr.msk.f32.mxu0 %vm779_vm2, %v1039_v56  ;;  %v12141_v52 = vld [vmem:[%s20198_s3 + $0x68] sm:$0xff] }
 0x14f   :  { %v756_v59 = vmax.f32 %v602_v54, 0.0  ;;  %14073 = vmatmul.mubr.msk.f32.gmra.mrb[100].mxu0 %vm779_vm2, %v1040_v58 }
 0x150   :  { %v755_v60 = vmax.f32 %v597_v57, 0.0  ;;  %v13979_v61 = vpop.f32.mrb[42].mxu0  ;;  %v1042_v2 = vld [vmem:[#allocation2 + $0x2b0] sm:$0xff] }
 0x151   :  { %912 = vst.msk [vmem:[#allocation2 + $0x2f0] sm:$0xff] %vm779_vm2, %v756_v59  ;;  %v612_v62 = vadd.f32 %v13979_v61, %v17410_v19  ;;  %v606_v63 = vpop.f32.mrb[43].mxu0  ;;  %v1041_v0 = vld [vmem:[#allocation2 + $0x2a8] sm:$0xff]  ;;  %v17583_v61 = vpack.c.bf16 %v12141_v52, %v12140_v51 }
 0x152   :  { %911 = vst.msk [vmem:[#allocation2 + $0x2e8] sm:$0xff] %vm779_vm2, %v755_v60  ;;  %v607_v1 = vadd.f32 %v17410_v19, %v606_v63  ;;  %14075 = vmatprep.mubr.msk.f32.mxu0 %vm779_vm2, %v1041_v0  ;;  %v17676_v52 = vld [vmem:[#allocation2 + $0x27] sm:$0xff] }
 0x153   :  { %v758_v3 = vmax.f32 %v612_v62, 0.0  ;;  %14076 = vmatmul.mubr.msk.f32.gmra.mrb[102].mxu0 %vm779_vm2, %v1042_v2 }
 0x154   :  { %v757_v4 = vmax.f32 %v607_v1, 0.0  ;;  %v13982_v5 = vpop.f32.mrb[44].mxu0  ;;  %v1044_v10 = vld [vmem:[#allocation2 + $0x2d0] sm:$0xff] }
 0x155   :  { %914 = vst.msk [vmem:[#allocation2 + $0x310] sm:$0xff] %vm779_vm2, %v758_v3  ;;  %v622_v6 = vadd.f32 %v13982_v5, %v17410_v19  ;;  %v616_v7 = vpop.f32.mrb[45].mxu0  ;;  %v1043_v8 = vld [vmem:[#allocation2 + $0x2c8] sm:$0xff] }
 0x156   :  { %913 = vst.msk [vmem:[#allocation2 + $0x308] sm:$0xff] %vm779_vm2, %v757_v4  ;;  %v617_v9 = vadd.f32 %v17410_v19, %v616_v7  ;;  %14078 = vmatprep.mubr.msk.f32.mxu0 %vm779_vm2, %v1043_v8 }
 0x157   :  { %v760_v11 = vmax.f32 %v622_v6, 0.0  ;;  %14079 = vmatmul.mubr.msk.f32.gmra.mrb[104].mxu0 %vm779_vm2, %v1044_v10 }
 0x158   :  { %v759_v12 = vmax.f32 %v617_v9, 0.0  ;;  %v13985_v13 = vpop.f32.mrb[46].mxu0  ;;  %v1046_v20 = vld [vmem:[#allocation2 + $0x2f0] sm:$0xff] }
 0x159   :  { %916 = vst.msk [vmem:[#allocation2 + $0x330] sm:$0xff] %vm779_vm2, %v760_v11  ;;  %v632_v14 = vadd.f32 %v13985_v13, %v17410_v19  ;;  %v626_v15 = vpop.f32.mrb[47].mxu0  ;;  %v1045_v16 = vld [vmem:[#allocation2 + $0x2e8] sm:$0xff] }
 0x15a   :  { %915 = vst.msk [vmem:[#allocation2 + $0x328] sm:$0xff] %vm779_vm2, %v759_v12  ;;  %v627_v17 = vadd.f32 %v17410_v19, %v626_v15  ;;  %14081 = vmatprep.mubr.msk.f32.mxu0 %vm779_vm2, %v1045_v16 }
 0x15b   :  { %v762_v21 = vmax.f32 %v632_v14, 0.0  ;;  %14082 = vmatmul.mubr.msk.f32.gmra.mrb[106].mxu0 %vm779_vm2, %v1046_v20 }
 0x15c   :  { %v761_v22 = vmax.f32 %v627_v17, 0.0  ;;  %v13988_v23 = vpop.f32.mrb[48].mxu0  ;;  %v1048_v28 = vld [vmem:[#allocation2 + $0x310] sm:$0xff] }
 0x15d   :  { %918 = vst.msk [vmem:[#allocation2 + $0x350] sm:$0xff] %vm779_vm2, %v762_v21  ;;  %v642_v24 = vadd.f32 %v13988_v23, %v17410_v19  ;;  %v636_v25 = vpop.f32.mrb[49].mxu0  ;;  %v1047_v26 = vld [vmem:[#allocation2 + $0x308] sm:$0xff] }
 0x15e   :  { %917 = vst.msk [vmem:[#allocation2 + $0x348] sm:$0xff] %vm779_vm2, %v761_v22  ;;  %v637_v27 = vadd.f32 %v17410_v19, %v636_v25  ;;  %14084 = vmatprep.mubr.msk.f32.mxu0 %vm779_vm2, %v1047_v26  ;;  %v17925_v50 = vld [vmem:[#allocation2 + $0x307] sm:$0xff] }
 0x15f   :  { %v764_v29 = vmax.f32 %v642_v24, 0.0  ;;  %14085 = vmatmul.mubr.msk.f32.gmra.mrb[108].mxu0 %vm779_vm2, %v1048_v28 }
 0x160   :  { %v763_v30 = vmax.f32 %v637_v27, 0.0  ;;  %v13991_v31 = vpop.f32.mrb[50].mxu0  ;;  %v1050_v36 = vld [vmem:[#allocation2 + $0x330] sm:$0xff] }
 0x161   :  { %920 = vst.msk [vmem:[#allocation2 + $0x370] sm:$0xff] %vm779_vm2, %v764_v29  ;;  %v652_v32 = vadd.f32 %v13991_v31, %v17410_v19  ;;  %v646_v33 = vpop.f32.mrb[51].mxu0  ;;  %v1049_v34 = vld [vmem:[#allocation2 + $0x328] sm:$0xff] }
 0x162   :  { %919 = vst.msk [vmem:[#allocation2 + $0x368] sm:$0xff] %vm779_vm2, %v763_v30  ;;  %v647_v35 = vadd.f32 %v17410_v19, %v646_v33  ;;  %14087 = vmatprep.mubr.msk.f32.mxu0 %vm779_vm2, %v1049_v34 }
 0x163   :  { %v766_v39 = vmax.f32 %v652_v32, 0.0  ;;  %14088 = vmatmul.mubr.msk.f32.gmra.mrb[110].mxu0 %vm779_vm2, %v1050_v36 }
 0x164   :  { %v765_v40 = vmax.f32 %v647_v35, 0.0  ;;  %v13994_v41 = vpop.f32.mrb[52].mxu0  ;;  %v1052_v49 = vld [vmem:[#allocation2 + $0x350] sm:$0xff] }
 0x165   :  { %922 = vst.msk [vmem:[#allocation2 + $0x390] sm:$0xff] %vm779_vm2, %v766_v39  ;;  %v662_v42 = vadd.f32 %v13994_v41, %v17410_v19  ;;  %v656_v43 = vpop.f32.mrb[53].mxu0  ;;  %v1051_v44 = vld [vmem:[#allocation2 + $0x348] sm:$0xff] }
 0x166   :  { %v983_v45 = vld [vmem:[#allocation2 + $0x347] sm:$0xff]  ;;  %v984_v46 = vld [vmem:[#allocation2 + $0x34f] sm:$0xff]  ;;  %921 = vst.msk [vmem:[#allocation2 + $0x388] sm:$0xff] %vm779_vm2, %v765_v40  ;;  %v657_v48 = vadd.f32 %v17410_v19, %v656_v43  ;;  %14090 = vmatprep.mubr.msk.f32.mxu0 %vm779_vm2, %v1051_v44 }
 0x167   :  { %14194 = vmatprep.mubr.msk.f32.mxu1 %vm779_vm2, %v983_v45  ;;  %v768_v53 = vmax.f32 %v662_v42, 0.0  ;;  %14091 = vmatmul.mubr.msk.f32.gmra.mrb[112].mxu0 %vm779_vm2, %v1052_v49  ;;  %v935_v40 = vld [vmem:[#allocation2 + $0x7] sm:$0xff]  ;;  %v2227_v49 = vld [vmem:[#allocation2 + $0x11] sm:$0xff] }
 0x168   :  { %14195 = vmatmul.mubr.msk.f32.vlgmr.msra.gmra.mrb[0].mxu1 %vm779_vm2, %v984_v46  ;;  %v767_v54 = vmax.f32 %v657_v48, 0.0  ;;  %v13997_v55 = vpop.f32.mrb[54].mxu0  ;;  %v2226_v41 = vld [vmem:[#allocation2 + $0x9] sm:$0xff] }
 0x169   :  { %15613 = vmatpush3.bf16.msra.mxu1 %v17404_v18  ;;  %924 = vst.msk [vmem:[#allocation2 + $0x3b0] sm:$0xff] %vm779_vm2, %v768_v53  ;;  %v672_v56 = vadd.f32 %v13997_v55, %v17410_v19  ;;  %v666_v57 = vpop.f32.mrb[55].mxu0  ;;  %v1053_v58 = vld [vmem:[#allocation2 + $0x368] sm:$0xff]  ;;  %v1054_v18 = vld [vmem:[#allocation2 + $0x370] sm:$0xff]  ;;  %v12208_v53 = vld [vmem:[%s20198_s3 + $0x80] sm:$0xff] }
 0x16a   :  { %v985_v59 = vld [vmem:[#allocation2 + $0x367] sm:$0xff]  ;;  %v986_v60 = vld [vmem:[#allocation2 + $0x36f] sm:$0xff]  ;;  %15615 = vmatprep.subr.bf16.mxu1 %v15614_v47  ;;  %923 = vst.msk [vmem:[#allocation2 + $0x3a8] sm:$0xff] %vm779_vm2, %v767_v54  ;;  %v667_v62 = vadd.f32 %v17410_v19, %v666_v57  ;;  %14093 = vmatprep.mubr.msk.f32.mxu0 %vm779_vm2, %v1053_v58 }
 0x16b   :  { %14197 = vmatprep.mubr.msk.f32.mxu1 %vm779_vm2, %v985_v59  ;;  %v770_v63 = vmax.f32 %v672_v56, 0.0  ;;  %14094 = vmatmul.mubr.msk.f32.gmra.mrb[114].mxu0 %vm779_vm2, %v1054_v18  ;;  %v12142_v46 = vld [vmem:[%s20198_s3 + $0x70] sm:$0xff]  ;;  %v12209_v54 = vld [vmem:[%s20198_s3 + $0x88] sm:$0xff] }
 0x16c   :  { %14198 = vmatmul.mubr.msk.f32.gmra.mrb[2].mxu1 %vm779_vm2, %v986_v60  ;;  %v769_v0 = vmax.f32 %v667_v62, 0.0  ;;  %v14000_v1 = vpop.f32.mrb[56].mxu0  ;;  %v1056_v8 = vld [vmem:[#allocation2 + $0x390] sm:$0xff]  ;;  %v17690_v58 = vpack.c.bf16 %v12209_v54, %v12208_v53  ;;  %v17695_v59 = vld [vmem:[#allocation2 + $0x47] sm:$0xff] }
 0x16d   :  { %15617 = vmatpush3.bf16.msra.mxu1 %v15614_v47  ;;  %926 = vst.msk [vmem:[#allocation2 + $0x3d0] sm:$0xff] %vm779_vm2, %v770_v63  ;;  %v682_v2 = vadd.f32 %v14000_v1, %v17410_v19  ;;  %v676_v3 = vpop.f32.mrb[57].mxu0  ;;  %v1055_v4 = vld [vmem:[#allocation2 + $0x388] sm:$0xff]  ;;  %v12143_v47 = vld [vmem:[%s20198_s3 + $0x78] sm:$0xff] }
 0x16e   :  { %v17593_v5 = vld [vmem:[#allocation2 + $0x387] sm:$0xff]  ;;  %v17595_v6 = vld [vmem:[#allocation2 + $0x38f] sm:$0xff]  ;;  %15619 = vmatprep.subr.bf16.mxu1 %v17583_v61  ;;  %925 = vst.msk [vmem:[#allocation2 + $0x3c8] sm:$0xff] %vm779_vm2, %v769_v0  ;;  %v677_v7 = vadd.f32 %v17410_v19, %v676_v3  ;;  %14096 = vmatprep.mubr.msk.f32.mxu0 %vm779_vm2, %v1055_v4  ;;  %v15622_v51 = vpack.c.bf16 %v12143_v47, %v12142_v46 }
 0x16f   :  { %14200 = vmatprep.mubr.msk.f32.mxu1 %vm779_vm2, %v17593_v5  ;;  %v772_v9 = vmax.f32 %v682_v2, 0.0  ;;  %14097 = vmatmul.mubr.msk.f32.gmra.mrb[116].mxu0 %vm779_vm2, %v1056_v8  ;;  %v936_v48 = vld [vmem:[#allocation2 + $0xf] sm:$0xff]  ;;  %v17706_v18 = vld [vmem:[#allocation2 + $0x67] sm:$0xff] }
 0x170   :  { %14201 = vmatmul.mubr.msk.f32.gmra.mrb[4].mxu1 %vm779_vm2, %v17595_v6  ;;  %v771_v10 = vmax.f32 %v677_v7, 0.0  ;;  %v14003_v11 = vpop.f32.mrb[58].mxu0  ;;  %v1058_v20 = vld [vmem:[#allocation2 + $0x3b0] sm:$0xff]  ;;  %v17716_v2 = vld [vmem:[#allocation2 + $0x87] sm:$0xff] }
 0x171   :  { %928 = vst.msk [vmem:[#allocation2 + $0x3f0] sm:$0xff] %vm779_vm2, %v772_v9  ;;  %v692_v12 = vadd.f32 %v14003_v11, %v17410_v19  ;;  %v686_v13 = vpop.f32.mrb[59].mxu0  ;;  %v1057_v14 = vld [vmem:[#allocation2 + $0x3a8] sm:$0xff]  ;;  %v2229_v57 = vld [vmem:[#allocation2 + $0x31] sm:$0xff] }
 0x172   :  { %v17608_v15 = vld [vmem:[#allocation2 + $0x3a7] sm:$0xff]  ;;  %v17610_v16 = vld [vmem:[#allocation2 + $0x3af] sm:$0xff]  ;;  %927 = vst.msk [vmem:[#allocation2 + $0x3e8] sm:$0xff] %vm779_vm2, %v771_v10  ;;  %v687_v17 = vadd.f32 %v17410_v19, %v686_v13  ;;  %14099 = vmatprep.mubr.msk.f32.mxu0 %vm779_vm2, %v1057_v14 }
 0x173   :  { %14203 = vmatprep.mubr.msk.f32.mxu1 %vm779_vm2, %v17608_v15  ;;  %v774_v21 = vmax.f32 %v692_v12, 0.0  ;;  %14100 = vmatmul.mubr.msk.f32.gmra.mrb[118].mxu0 %vm779_vm2, %v1058_v20  ;;  %v2228_v55 = vld [vmem:[#allocation2 + $0x29] sm:$0xff]  ;;  %v2231_v62 = vld [vmem:[#allocation2 + $0x51] sm:$0xff] }
 0x174   :  { %14204 = vmatmul.mubr.msk.f32.gmra.mrb[6].mxu1 %vm779_vm2, %v17610_v16  ;;  %v773_v22 = vmax.f32 %v687_v17, 0.0  ;;  %v14006_v23 = vpop.f32.mrb[60].mxu0  ;;  %v1060_v30 = vld [vmem:[#allocation2 + $0x3d0] sm:$0xff]  ;;  %v17726_v8 = vld [vmem:[#allocation2 + $0xa7] sm:$0xff] }
 0x175   :  { %930 = vst.msk [vmem:[#allocation2 + $0x410] sm:$0xff] %vm779_vm2, %v774_v21  ;;  %v702_v24 = vadd.f32 %v14006_v23, %v17410_v19  ;;  %v696_v25 = vpop.f32.mrb[61].mxu0  ;;  %v1059_v26 = vld [vmem:[#allocation2 + $0x3c8] sm:$0xff]  ;;  %v2233_v1 = vld [vmem:[#allocation2 + $0x71] sm:$0xff] }
 0x176   :  { %v17622_v27 = vld [vmem:[#allocation2 + $0x3c7] sm:$0xff]  ;;  %v17624_v28 = vld [vmem:[#allocation2 + $0x3cf] sm:$0xff]  ;;  %929 = vst.msk [vmem:[#allocation2 + $0x408] sm:$0xff] %vm779_vm2, %v773_v22  ;;  %v697_v29 = vadd.f32 %v17410_v19, %v696_v25  ;;  %14102 = vmatprep.mubr.msk.f32.mxu0 %vm779_vm2, %v1059_v26 }
 0x177   :  { %14206 = vmatprep.mubr.msk.f32.mxu1 %vm779_vm2, %v17622_v27  ;;  %v776_v31 = vmax.f32 %v702_v24, 0.0  ;;  %14103 = vmatmul.mubr.msk.f32.gmra.mrb[120].mxu0 %vm779_vm2, %v1060_v30  ;;  %v17688_v56 = vld [vmem:[#allocation2 + $0x2f] sm:$0xff]  ;;  %v17736_v12 = vld [vmem:[#allocation2 + $0xc7] sm:$0xff] }
 0x178   :  { %14207 = vmatmul.mubr.msk.f32.gmra.mrb[8].mxu1 %vm779_vm2, %v17624_v28  ;;  %v775_v32 = vmax.f32 %v697_v29, 0.0  ;;  %v1062_v19 = vld [vmem:[#allocation2 + $0x3f0] sm:$0xff]  ;;  %v17746_v20 = vld [vmem:[#allocation2 + $0xe7] sm:$0xff] }
 0x179   :  { %932 = vst.msk [vmem:[#allocation2 + $0x430] sm:$0xff] %vm779_vm2, %v776_v31  ;;  %v1061_v33 = vld [vmem:[#allocation2 + $0x3e8] sm:$0xff]  ;;  %v2235_v7 = vld [vmem:[#allocation2 + $0x91] sm:$0xff] }
 0x17a   :  { %v17635_v34 = vld [vmem:[#allocation2 + $0x3e7] sm:$0xff]  ;;  %v17637_v35 = vld [vmem:[#allocation2 + $0x3ef] sm:$0xff]  ;;  %931 = vst.msk [vmem:[#allocation2 + $0x428] sm:$0xff] %vm779_vm2, %v775_v32  ;;  %14105 = vmatprep.mubr.msk.f32.mxu0 %vm779_vm2, %v1061_v33 }
 0x17b   :  { %14209 = vmatprep.mubr.msk.f32.mxu1 %vm779_vm2, %v17635_v34  ;;  %14106 = vmatmul.mubr.msk.f32.gmra.mrb[122].mxu0 %vm779_vm2, %v1062_v19  ;;  %v2230_v60 = vld [vmem:[#allocation2 + $0x49] sm:$0xff]  ;;  %v2237_v11 = vld [vmem:[#allocation2 + $0xb1] sm:$0xff] }
 0x17c   :  { %14210 = vmatmul.mubr.msk.f32.gmra.mrb[10].mxu1 %vm779_vm2, %v17637_v35  ;;  %v1064_v39 = vld [vmem:[#allocation2 + $0x410] sm:$0xff]  ;;  %v17756_v24 = vld [vmem:[#allocation2 + $0x107] sm:$0xff] }
 0x17d   :  { %v1063_v36 = vld [vmem:[#allocation2 + $0x408] sm:$0xff]  ;;  %v2239_v17 = vld [vmem:[#allocation2 + $0xd1] sm:$0xff] }
 0x17e   :  { %v17646_v37 = vld [vmem:[#allocation2 + $0x407] sm:$0xff]  ;;  %v17648_v38 = vld [vmem:[#allocation2 + $0x40f] sm:$0xff]  ;;  %14108 = vmatprep.mubr.msk.f32.mxu0 %vm779_vm2, %v1063_v36 }
 0x17f   :  { %14212 = vmatprep.mubr.msk.f32.mxu1 %vm779_vm2, %v17646_v37  ;;  %14109 = vmatmul.mubr.msk.f32.gmra.mrb[124].mxu0 %vm779_vm2, %v1064_v39  ;;  %v2232_v63 = vld [vmem:[#allocation2 + $0x69] sm:$0xff]  ;;  %v2241_v23 = vld [vmem:[#allocation2 + $0xf1] sm:$0xff] }
 0x180   :  { %14213 = vmatmul.mubr.msk.f32.gmra.mrb[12].mxu1 %vm779_vm2, %v17648_v38  ;;  %v1066_v45 = vld [vmem:[#allocation2 + $0x430] sm:$0xff]  ;;  %v17766_v30 = vld [vmem:[#allocation2 + $0x127] sm:$0xff] }
 0x181   :  { %v1065_v42 = vld [vmem:[#allocation2 + $0x428] sm:$0xff]  ;;  %v2243_v29 = vld [vmem:[#allocation2 + $0x111] sm:$0xff] }
 0x182   :  { %v17656_v43 = vld [vmem:[#allocation2 + $0x427] sm:$0xff]  ;;  %v17658_v44 = vld [vmem:[#allocation2 + $0x42f] sm:$0xff]  ;;  %14111 = vmatprep.mubr.msk.f32.mxu0 %vm779_vm2, %v1065_v42 }
 0x183   :  { %14215 = vmatprep.mubr.msk.f32.mxu1 %vm779_vm2, %v17656_v43  ;;  %14112 = vmatmul.mubr.msk.f32.gmra.mrb[126].mxu0 %vm779_vm2, %v1066_v45  ;;  %v17711_v0 = vld [vmem:[#allocation2 + $0x6f] sm:$0xff]  ;;  %v17776_v19 = vld [vmem:[#allocation2 + $0x147] sm:$0xff] }
 0x184   :  { %14216 = vmatmul.mubr.msk.f32.gmra.mrb[14].mxu1 %vm779_vm2, %v17658_v44  ;;  %14122 = vmatprep.mubr.msk.f32.mxu0 %vm779_vm2, %v935_v40  ;;  %v2234_v3 = vld [vmem:[#allocation2 + $0x89] sm:$0xff]  ;;  %v2245_v33 = vld [vmem:[#allocation2 + $0x131] sm:$0xff] }
 0x185   :  { %14226 = vmatprep.mubr.msk.f32.mxu1 %vm779_vm2, %v2226_v41  ;;  %v17721_v4 = vld [vmem:[#allocation2 + $0x8f] sm:$0xff]  ;;  %v17786_v41 = vld [vmem:[#allocation2 + $0x167] sm:$0xff] }
 0x186   :  { %v2236_v9 = vld [vmem:[#allocation2 + $0xa9] sm:$0xff]  ;;  %v2247_v40 = vld [vmem:[#allocation2 + $0x151] sm:$0xff] }
 0x187   :  { %14123 = vmatmul.mubr.msk.f32.vlgmr.msra.gmra.mrb[64].mxu0 %vm779_vm2, %v936_v48  ;;  %v17731_v10 = vld [vmem:[#allocation2 + $0xaf] sm:$0xff]  ;;  %v17796_v47 = vld [vmem:[#allocation2 + $0x187] sm:$0xff] }
 0x188   :  { %14227 = vmatmul.mubr.msk.f32.vlgmr.msra.gmra.mrb[16].mxu1 %vm779_vm2, %v2227_v49  ;;  %14125 = vmatprep.mubr.msk.f32.mxu0 %vm779_vm2, %v17676_v52  ;;  %v2238_v13 = vld [vmem:[#allocation2 + $0xc9] sm:$0xff]  ;;  %v2249_v46 = vld [vmem:[#allocation2 + $0x171] sm:$0xff] }
 0x189   :  { %15621 = vmatpush3.bf16.msra.mxu1 %v17583_v61  ;;  %14229 = vmatprep.mubr.msk.f32.mxu1 %vm779_vm2, %v2228_v55  ;;  %v17700_v61 = vld [vmem:[#allocation2 + $0x4f] sm:$0xff]  ;;  %v17806_v53 = vld [vmem:[#allocation2 + $0x1a7] sm:$0xff]  ;;  %v14009_v55 = vpop.f32.mrb[62].mxu0 }
 0x18a   :  { %15623 = vmatprep.subr.bf16.mxu1 %v15622_v51  ;;  %v17741_v14 = vld [vmem:[#allocation2 + $0xcf] sm:$0xff] }
 0x18b   :  { %14126 = vmatmul.mubr.msk.f32.gmra.mrb[66].mxu0 %vm779_vm2, %v17688_v56  ;;  %v2240_v21 = vld [vmem:[#allocation2 + $0xe9] sm:$0xff] }
 0x18c   :  { %14230 = vmatmul.mubr.msk.f32.gmra.mrb[18].mxu1 %vm779_vm2, %v2229_v57  ;;  %14128 = vmatprep.mubr.msk.f32.mxu0 %vm779_vm2, %v17695_v59  ;;  %v17751_v22 = vld [vmem:[#allocation2 + $0xef] sm:$0xff]  ;;  %v16660_v57 = vld [vmem:[%s20197_s2] ss:$0 sm:$0xff] }
 0x18d   :  { %14232 = vmatprep.mubr.msk.f32.mxu1 %vm779_vm2, %v2230_v60  ;;  %15625 = vmatpush3.bf16.msra.mxu1 %v15622_v51  ;;  %v2242_v25 = vld [vmem:[#allocation2 + $0x109] sm:$0xff]  ;;  %v2251_v51 = vld [vmem:[#allocation2 + $0x191] sm:$0xff]  ;;  %v712_v60 = vadd.f32 %v16660_v57, %v14009_v55 }
 0x18e   :  { %15627 = vmatprep.subr.bf16.mxu1 %v17690_v58  ;;  %v17761_v26 = vld [vmem:[#allocation2 + $0x10f] sm:$0xff]  ;;  %v17861_v55 = vld [vmem:[#allocation2 + $0x287] sm:$0xff] }
 0x18f   :  { %14129 = vmatmul.mubr.msk.f32.gmra.mrb[68].mxu0 %vm779_vm2, %v17700_v61  ;;  %v2244_v31 = vld [vmem:[#allocation2 + $0x129] sm:$0xff] }
 0x190   :  { %14233 = vmatmul.mubr.msk.f32.gmra.mrb[20].mxu1 %vm779_vm2, %v2231_v62  ;;  %14131 = vmatprep.mubr.msk.f32.mxu0 %vm779_vm2, %v17706_v18  ;;  %v17771_v32 = vld [vmem:[#allocation2 + $0x12f] sm:$0xff]  ;;  %v706_v62 = vpop.f32.mrb[63].mxu0 }
 0x191   :  { %14235 = vmatprep.mubr.msk.f32.mxu1 %vm779_vm2, %v2232_v63  ;;  %v2246_v36 = vld [vmem:[#allocation2 + $0x149] sm:$0xff]  ;;  %v707_v63 = vadd.f32 %v16660_v57, %v706_v62  ;;  %v17871_v62 = vld [vmem:[#allocation2 + $0x291] sm:$0xff] }
 0x192   :  { %v17781_v39 = vld [vmem:[#allocation2 + $0x14f] sm:$0xff]  ;;  %20284 = vst [vmem:[#allocation16_spill] sm:$0xff] %v17871_v62 }
 0x193   :  { %14132 = vmatmul.mubr.msk.f32.gmra.mrb[70].mxu0 %vm779_vm2, %v17711_v0  ;;  %v2248_v42 = vld [vmem:[#allocation2 + $0x169] sm:$0xff] }
 0x194   :  { %14236 = vmatmul.mubr.msk.f32.gmra.mrb[22].mxu1 %vm779_vm2, %v2233_v1  ;;  %14134 = vmatprep.mubr.msk.f32.mxu0 %vm779_vm2, %v17716_v2  ;;  %v17791_v45 = vld [vmem:[#allocation2 + $0x16f] sm:$0xff] }
 0x195   :  { %14238 = vmatprep.mubr.msk.f32.mxu1 %vm779_vm2, %v2234_v3  ;;  %v2250_v48 = vld [vmem:[#allocation2 + $0x189] sm:$0xff]  ;;  %v2253_v3 = vld [vmem:[#allocation2 + $0x1b1] sm:$0xff] }
 0x196   :  { %v17801_v49 = vld [vmem:[#allocation2 + $0x18f] sm:$0xff] }
 0x197   :  { %14135 = vmatmul.mubr.msk.f32.gmra.mrb[72].mxu0 %vm779_vm2, %v17721_v4  ;;  %v2252_v54 = vld [vmem:[#allocation2 + $0x1a9] sm:$0xff] }
 0x198   :  { %14239 = vmatmul.mubr.msk.f32.gmra.mrb[24].mxu1 %vm779_vm2, %v2235_v7  ;;  %14137 = vmatprep.mubr.msk.f32.mxu0 %vm779_vm2, %v17726_v8  ;;  %v17814_v1 = vld [vmem:[#allocation2 + $0x1af] sm:$0xff]  ;;  %v778_v7 = vmax.f32 %v712_v60, 0.0 }
 0x199   :  { %14241 = vmatprep.mubr.msk.f32.mxu1 %vm779_vm2, %v2236_v9  ;;  %v17819_v9 = vld [vmem:[#allocation2 + $0x1c7] sm:$0xff]  ;;  %v17869_v60 = vld [vmem:[#allocation2 + $0x28f] sm:$0xff] }
 0x19a   :  { %934 = vst.msk [vmem:[#allocation2 + $0x450] sm:$0xff] %vm779_vm2, %v778_v7  ;;  %v17863_v57 = vld [vmem:[#allocation2 + $0x289] sm:$0xff] }
 0x19b   :  { %14138 = vmatmul.mubr.msk.f32.gmra.mrb[74].mxu0 %vm779_vm2, %v17731_v10  ;;  %20283 = vst [vmem:[#allocation15_spill] sm:$0xff] %v17863_v57  ;;  %v17885_v7 = vld [vmem:[#allocation2 + $0x2af] sm:$0xff] }
 0x19c   :  { %14242 = vmatmul.mubr.msk.f32.gmra.mrb[26].mxu1 %vm779_vm2, %v2237_v11  ;;  %14140 = vmatprep.mubr.msk.f32.mxu0 %vm779_vm2, %v17736_v12  ;;  %v2254_v11 = vld [vmem:[#allocation2 + $0x1c9] sm:$0xff] }
 0x19d   :  { %14244 = vmatprep.mubr.msk.f32.mxu1 %vm779_vm2, %v2238_v13  ;;  %v777_v13 = vmax.f32 %v707_v63, 0.0  ;;  %v17877_v63 = vld [vmem:[#allocation2 + $0x2a7] sm:$0xff] }
 0x19f   :  { %14141 = vmatmul.mubr.msk.f32.gmra.mrb[76].mxu0 %vm779_vm2, %v17741_v14  ;;  %933 = vst.msk [vmem:[#allocation2 + $0x448] sm:$0xff] %vm779_vm2, %v777_v13  ;;  %v17893_v13 = vld [vmem:[#allocation2 + $0x2c7] sm:$0xff] }
 0x1a0   :  { %14245 = vmatmul.mubr.msk.f32.gmra.mrb[28].mxu1 %vm779_vm2, %v2239_v17  ;;  %14143 = vmatprep.mubr.msk.f32.mxu0 %vm779_vm2, %v17746_v20  ;;  %v17826_v17 = vld [vmem:[#allocation2 + $0x1cf] sm:$0xff] }
 0x1a1   :  { %14247 = vmatprep.mubr.msk.f32.mxu1 %vm779_vm2, %v2240_v21  ;;  %v2255_v21 = vld [vmem:[#allocation2 + $0x1d1] sm:$0xff] }
 0x1a3   :  { %14144 = vmatmul.mubr.msk.f32.gmra.mrb[78].mxu0 %vm779_vm2, %v17751_v22 }
 0x1a4   :  { %14248 = vmatmul.mubr.msk.f32.gmra.mrb[30].mxu1 %vm779_vm2, %v2241_v23  ;;  %14146 = vmatprep.mubr.msk.f32.mxu0 %vm779_vm2, %v17756_v24  ;;  %v17831_v23 = vld [vmem:[#allocation2 + $0x1e7] sm:$0xff] }
 0x1a5   :  { %14250 = vmatprep.mubr.msk.f32.mxu1 %vm779_vm2, %v2242_v25  ;;  %v2256_v25 = vld [vmem:[#allocation2 + $0x1e9] sm:$0xff] }
 0x1a7   :  { %14147 = vmatmul.mubr.msk.f32.gmra.mrb[80].mxu0 %vm779_vm2, %v17761_v26 }
 0x1a8   :  { %14251 = vmatmul.mubr.msk.f32.gmra.mrb[32].mxu1 %vm779_vm2, %v2243_v29  ;;  %14149 = vmatprep.mubr.msk.f32.mxu0 %vm779_vm2, %v17766_v30  ;;  %v967_v29 = vld [vmem:[#allocation2 + $0x247] sm:$0xff] }
 0x1a9   :  { %14253 = vmatprep.mubr.msk.f32.mxu1 %vm779_vm2, %v2244_v31  ;;  %v2258_v31 = vld [vmem:[#allocation2 + $0x249] sm:$0xff] }
 0x1ab   :  { %14150 = vmatmul.mubr.msk.f32.gmra.mrb[82].mxu0 %vm779_vm2, %v17771_v32 }
 0x1ac   :  { %14254 = vmatmul.mubr.msk.f32.gmra.mrb[34].mxu1 %vm779_vm2, %v2245_v33  ;;  %14152 = vmatprep.mubr.msk.f32.mxu0 %vm779_vm2, %v17776_v19  ;;  %v17836_v33 = vld [vmem:[#allocation2 + $0x1ef] sm:$0xff] }
 0x1ad   :  { %14256 = vmatprep.mubr.msk.f32.mxu1 %vm779_vm2, %v2246_v36  ;;  %v2257_v36 = vld [vmem:[#allocation2 + $0x1f1] sm:$0xff] }
 0x1af   :  { %14153 = vmatmul.mubr.msk.f32.gmra.mrb[84].mxu0 %vm779_vm2, %v17781_v39 }
 0x1b0   :  { %14257 = vmatmul.mubr.msk.f32.gmra.mrb[36].mxu1 %vm779_vm2, %v2247_v40  ;;  %14155 = vmatprep.mubr.msk.f32.mxu0 %vm779_vm2, %v17786_v41  ;;  %v968_v40 = vld [vmem:[#allocation2 + $0x24f] sm:$0xff] }
 0x1b1   :  { %14259 = vmatprep.mubr.msk.f32.mxu1 %vm779_vm2, %v2248_v42  ;;  %v2259_v42 = vld [vmem:[#allocation2 + $0x251] sm:$0xff] }
 0x1b3   :  { %14156 = vmatmul.mubr.msk.f32.gmra.mrb[86].mxu0 %vm779_vm2, %v17791_v45 }
 0x1b4   :  { %14260 = vmatmul.mubr.msk.f32.gmra.mrb[38].mxu1 %vm779_vm2, %v2249_v46  ;;  %14158 = vmatprep.mubr.msk.f32.mxu0 %vm779_vm2, %v17796_v47  ;;  %v17845_v46 = vld [vmem:[#allocation2 + $0x267] sm:$0xff] }
 0x1b5   :  { %14262 = vmatprep.mubr.msk.f32.mxu1 %vm779_vm2, %v2250_v48  ;;  %v17847_v48 = vld [vmem:[#allocation2 + $0x269] sm:$0xff] }
 0x1b7   :  { %14159 = vmatmul.mubr.msk.f32.gmra.mrb[88].mxu0 %vm779_vm2, %v17801_v49 }
 0x1b8   :  { %14263 = vmatmul.mubr.msk.f32.gmra.mrb[40].mxu1 %vm779_vm2, %v2251_v51  ;;  %14161 = vmatprep.mubr.msk.f32.mxu0 %vm779_vm2, %v17806_v53  ;;  %v17853_v51 = vld [vmem:[#allocation2 + $0x26f] sm:$0xff] }
 0x1b9   :  { %14265 = vmatprep.mubr.msk.f32.mxu1 %vm779_vm2, %v2252_v54  ;;  %v17855_v54 = vld [vmem:[#allocation2 + $0x271] sm:$0xff] }
 0x1ba   :  { %20282 = vst [vmem:[#allocation14_spill] sm:$0xff] %v17855_v54 }
 0x1bb   :  { %14162 = vmatmul.mubr.msk.f32.gmra.mrb[90].mxu0 %vm779_vm2, %v17814_v1 }
 0x1bc   :  { %14266 = vmatmul.mubr.msk.f32.gmra.mrb[42].mxu1 %vm779_vm2, %v2253_v3  ;;  %14164 = vmatprep.mubr.msk.f32.mxu0 %vm779_vm2, %v17819_v9  ;;  %v17879_v3 = vld [vmem:[#allocation2 + $0x2a9] sm:$0xff] }
 0x1bd   :  { %14268 = vmatprep.mubr.msk.f32.mxu1 %vm779_vm2, %v2254_v11  ;;  %20285 = vst [vmem:[#allocation17_spill] sm:$0xff] %v17879_v3  ;;  %v17887_v11 = vld [vmem:[#allocation2 + $0x2b1] sm:$0xff] }
 0x1be   :  { %20286 = vst [vmem:[#allocation18_spill] sm:$0xff] %v17887_v11 }
 0x1bf   :  { %14165 = vmatmul.mubr.msk.f32.gmra.mrb[92].mxu0 %vm779_vm2, %v17826_v17 }
 0x1c0   :  { %14269 = vmatmul.mubr.msk.f32.gmra.mrb[44].mxu1 %vm779_vm2, %v2255_v21  ;;  %14167 = vmatprep.mubr.msk.f32.mxu0 %vm779_vm2, %v17831_v23  ;;  %v17895_v21 = vld [vmem:[#allocation2 + $0x2c9] sm:$0xff] }
 0x1c1   :  { %14271 = vmatprep.mubr.msk.f32.mxu1 %vm779_vm2, %v2256_v25  ;;  %20287 = vst [vmem:[#allocation19_spill] sm:$0xff] %v17895_v21  ;;  %v17901_v25 = vld [vmem:[#allocation2 + $0x2cf] sm:$0xff] }
 0x1c3   :  { %14168 = vmatmul.mubr.msk.f32.gmra.mrb[94].mxu0 %vm779_vm2, %v17836_v33 }
 0x1c4   :  { %14272 = vmatmul.mubr.msk.f32.gmra.mrb[46].mxu1 %vm779_vm2, %v2257_v36  ;;  %14170 = vmatprep.mubr.msk.f32.mxu0 %vm779_vm2, %v967_v29  ;;  %v17903_v29 = vld [vmem:[#allocation2 + $0x2d1] sm:$0xff]  ;;  %v17911_v36 = vld [vmem:[#allocation2 + $0x2e9] sm:$0xff] }
 0x1c5   :  { %14274 = vmatprep.mubr.msk.f32.mxu1 %vm779_vm2, %v2258_v31  ;;  %20288 = vst [vmem:[#allocation20_spill] sm:$0xff] %v17903_v29  ;;  %v17909_v31 = vld [vmem:[#allocation2 + $0x2e7] sm:$0xff]  ;;  %20289 = vst [vmem:[#allocation21_spill] sm:$0xff] %v17911_v36 }
 0x1c7   :  { %14171 = vmatmul.mubr.msk.f32.gmra.mrb[96].mxu0 %vm779_vm2, %v968_v40  ;;  %v17917_v40 = vld [vmem:[#allocation2 + $0x2ef] sm:$0xff] }
 0x1c8   :  { %14275 = vmatmul.mubr.msk.f32.gmra.mrb[48].mxu1 %vm779_vm2, %v2259_v42  ;;  %14173 = vmatprep.mubr.msk.f32.mxu0 %vm779_vm2, %v17845_v46  ;;  %v17919_v42 = vld [vmem:[#allocation2 + $0x2f1] sm:$0xff] }
 0x1c9   :  { %14277 = vmatprep.mubr.msk.f32.mxu1 %vm779_vm2, %v17847_v48  ;;  %20290 = vst [vmem:[#allocation22_spill] sm:$0xff] %v17919_v42 }
 0x1cb   :  { %14174 = vmatmul.mubr.msk.f32.gmra.mrb[98].mxu0 %vm779_vm2, %v17853_v51 }
 0x1cc   :  { %14278 = vmatmul.mubr.msk.f32.gmra.mrb[50].mxu1 %vm779_vm2, %v17855_v54  ;;  %14176 = vmatprep.mubr.msk.f32.mxu0 %vm779_vm2, %v17861_v55  ;;  %v12277_v54 = vld [vmem:[%s20198_s3 + $0xa8] sm:$0xff] }
 0x1cd   :  { %14280 = vmatprep.mubr.msk.f32.mxu1 %vm779_vm2, %v17863_v57  ;;  %v17969_v57 = vld [vmem:[#allocation2 + $0x371] sm:$0xff] }
 0x1ce   :  { %20298 = vst [vmem:[#allocation30_spill] sm:$0xff] %v17969_v57 }
 0x1cf   :  { %14177 = vmatmul.mubr.msk.f32.gmra.mrb[100].mxu0 %vm779_vm2, %v17869_v60 }
 0x1d0   :  { %14281 = vmatmul.mubr.msk.f32.gmra.mrb[52].mxu1 %vm779_vm2, %v17871_v62  ;;  %14179 = vmatprep.mubr.msk.f32.mxu0 %vm779_vm2, %v17877_v63  ;;  %v17961_v62 = vld [vmem:[#allocation2 + $0x351] sm:$0xff] }
 0x1d1   :  { %14283 = vmatprep.mubr.msk.f32.mxu1 %vm779_vm2, %v17879_v3  ;;  %v17951_v3 = vld [vmem:[#allocation2 + $0x331] sm:$0xff]  ;;  %20296 = vst [vmem:[#allocation28_spill] sm:$0xff] %v17961_v62 }
 0x1d2   :  { %20294 = vst [vmem:[#allocation26_spill] sm:$0xff] %v17951_v3 }
 0x1d3   :  { %14180 = vmatmul.mubr.msk.f32.gmra.mrb[102].mxu0 %vm779_vm2, %v17885_v7 }
 0x1d4   :  { %14284 = vmatmul.mubr.msk.f32.gmra.mrb[54].mxu1 %vm779_vm2, %v17887_v11  ;;  %14182 = vmatprep.mubr.msk.f32.mxu0 %vm779_vm2, %v17893_v13  ;;  %v17943_v11 = vld [vmem:[#allocation2 + $0x329] sm:$0xff] }
 0x1d5   :  { %14286 = vmatprep.mubr.msk.f32.mxu1 %vm779_vm2, %v17895_v21  ;;  %v17935_v21 = vld [vmem:[#allocation2 + $0x311] sm:$0xff]  ;;  %20293 = vst [vmem:[#allocation25_spill] sm:$0xff] %v17943_v11 }
 0x1d6   :  { %20292 = vst [vmem:[#allocation24_spill] sm:$0xff] %v17935_v21 }
 0x1d7   :  { %14183 = vmatmul.mubr.msk.f32.gmra.mrb[104].mxu0 %vm779_vm2, %v17901_v25 }
 0x1d8   :  { %14287 = vmatmul.mubr.msk.f32.gmra.mrb[56].mxu1 %vm779_vm2, %v17903_v29  ;;  %14185 = vmatprep.mubr.msk.f32.mxu0 %vm779_vm2, %v17909_v31  ;;  %v17927_v29 = vld [vmem:[#allocation2 + $0x309] sm:$0xff] }
 0x1d9   :  { %14289 = vmatprep.mubr.msk.f32.mxu1 %vm779_vm2, %v17911_v36  ;;  %20291 = vst [vmem:[#allocation23_spill] sm:$0xff] %v17927_v29  ;;  %v17933_v36 = vld [vmem:[#allocation2 + $0x30f] sm:$0xff] }
 0x1db   :  { %14186 = vmatmul.mubr.msk.f32.gmra.mrb[106].mxu0 %vm779_vm2, %v17917_v40 }
 0x1dc   :  { %14290 = vmatmul.mubr.msk.f32.gmra.mrb[58].mxu1 %vm779_vm2, %v17919_v42  ;;  %14188 = vmatprep.mubr.msk.f32.mxu0 %vm779_vm2, %v17925_v50  ;;  %v17941_v42 = vld [vmem:[#allocation2 + $0x327] sm:$0xff] }
 0x1dd   :  { %14292 = vmatprep.mubr.msk.f32.mxu1 %vm779_vm2, %v17927_v29  ;;  %v17949_v29 = vld [vmem:[#allocation2 + $0x32f] sm:$0xff] }
 0x1df   :  { %14189 = vmatmul.mubr.msk.f32.gmra.mrb[108].mxu0 %vm779_vm2, %v17933_v36 }
 0x1e0   :  { %14293 = vmatmul.mubr.msk.f32.gmra.mrb[60].mxu1 %vm779_vm2, %v17935_v21  ;;  %14191 = vmatprep.mubr.msk.f32.mxu0 %vm779_vm2, %v17941_v42  ;;  %v17957_v21 = vld [vmem:[#allocation2 + $0x349] sm:$0xff] }
 0x1e1   :  { %14295 = vmatprep.mubr.msk.f32.mxu1 %vm779_vm2, %v17943_v11  ;;  %20295 = vst [vmem:[#allocation27_spill] sm:$0xff] %v17957_v21  ;;  %v17965_v11 = vld [vmem:[#allocation2 + $0x369] sm:$0xff] }
 0x1e2   :  { %20297 = vst [vmem:[#allocation29_spill] sm:$0xff] %v17965_v11 }
 0x1e3   :  { %14192 = vmatmul.mubr.msk.f32.gmra.mrb[110].mxu0 %vm779_vm2, %v17949_v29 }
 0x1e4   :  { %14296 = vmatmul.mubr.msk.f32.gmra.mrb[62].mxu1 %vm779_vm2, %v17951_v3  ;;  %v17973_v3 = vld [vmem:[#allocation2 + $0x389] sm:$0xff] }
 0x1e5   :  { %14298 = vmatprep.mubr.msk.f32.mxu1 %vm779_vm2, %v17957_v21  ;;  %20299 = vst [vmem:[#allocation31_spill] sm:$0xff] %v17973_v3  ;;  %v17977_v21 = vld [vmem:[#allocation2 + $0x391] sm:$0xff] }
 0x1e6   :  { %20300 = vst [vmem:[#allocation32_spill] sm:$0xff] %v17977_v21 }
 0x1e8   :  { %14299 = vmatmul.mubr.msk.f32.gmra.mrb[0].mxu1 %vm779_vm2, %v17961_v62  ;;  %v17981_v62 = vld [vmem:[#allocation2 + $0x3a9] sm:$0xff] }
 0x1e9   :  { %14301 = vmatprep.mubr.msk.f32.mxu1 %vm779_vm2, %v17965_v11  ;;  %20301 = vst [vmem:[#allocation33_spill] sm:$0xff] %v17981_v62  ;;  %v17985_v11 = vld [vmem:[#allocation2 + $0x3b1] sm:$0xff] }
 0x1ea   :  { %20302 = vst [vmem:[#allocation34_spill] sm:$0xff] %v17985_v11 }
 0x1ec   :  { %14302 = vmatmul.mubr.msk.f32.gmra.mrb[2].mxu1 %vm779_vm2, %v17969_v57  ;;  %v17989_v57 = vld [vmem:[#allocation2 + $0x3c9] sm:$0xff] }
 0x1ed   :  { %14304 = vmatprep.mubr.msk.f32.mxu1 %vm779_vm2, %v17973_v3  ;;  %20303 = vst [vmem:[#allocation35_spill] sm:$0xff] %v17989_v57  ;;  %v17993_v3 = vld [vmem:[#allocation2 + $0x3d1] sm:$0xff] }
 0x1ee   :  { %20304 = vst [vmem:[#allocation36_spill] sm:$0xff] %v17993_v3 }
 0x1f0   :  { %14305 = vmatmul.mubr.msk.f32.gmra.mrb[4].mxu1 %vm779_vm2, %v17977_v21  ;;  %v17997_v21 = vld [vmem:[#allocation2 + $0x3e9] sm:$0xff] }
 0x1f1   :  { %14307 = vmatprep.mubr.msk.f32.mxu1 %vm779_vm2, %v17981_v62  ;;  %20305 = vst [vmem:[#allocation37_spill] sm:$0xff] %v17997_v21  ;;  %v18001_v62 = vld [vmem:[#allocation2 + $0x3f1] sm:$0xff] }
 0x1f2   :  { %20306 = vst [vmem:[#allocation38_spill] sm:$0xff] %v18001_v62 }
 0x1f4   :  { %14308 = vmatmul.mubr.msk.f32.gmra.mrb[6].mxu1 %vm779_vm2, %v17985_v11  ;;  %v18005_v11 = vld [vmem:[#allocation2 + $0x409] sm:$0xff] }
 0x1f5   :  { %14310 = vmatprep.mubr.msk.f32.mxu1 %vm779_vm2, %v17989_v57  ;;  %20307 = vst [vmem:[#allocation39_spill] sm:$0xff] %v18005_v11  ;;  %v18009_v57 = vld [vmem:[#allocation2 + $0x411] sm:$0xff] }
 0x1f6   :  { %20308 = vst [vmem:[#allocation40_spill] sm:$0xff] %v18009_v57 }
 0x1f8   :  { %14311 = vmatmul.mubr.msk.f32.gmra.mrb[8].mxu1 %vm779_vm2, %v17993_v3  ;;  %v18013_v3 = vld [vmem:[#allocation2 + $0x429] sm:$0xff] }
 0x1f9   :  { %14313 = vmatprep.mubr.msk.f32.mxu1 %vm779_vm2, %v17997_v21  ;;  %20309 = vst [vmem:[#allocation41_spill] sm:$0xff] %v18013_v3  ;;  %v18017_v21 = vld [vmem:[#allocation2 + $0x431] sm:$0xff] }
 0x1fa   :  { %20310 = vst [vmem:[#allocation42_spill] sm:$0xff] %v18017_v21 }
 0x1fc   :  { %14314 = vmatmul.mubr.msk.f32.gmra.mrb[10].mxu1 %vm779_vm2, %v18001_v62  ;;  %v12210_v62 = vld [vmem:[%s20198_s3 + $0x90] sm:$0xff] }
 0x1fd   :  { %14316 = vmatprep.mubr.msk.f32.mxu1 %vm779_vm2, %v18005_v11  ;;  %v12211_v11 = vld [vmem:[%s20198_s3 + $0x98] sm:$0xff] }
 0x200   :  { %14317 = vmatmul.mubr.msk.f32.gmra.mrb[12].mxu1 %vm779_vm2, %v18009_v57  ;;  %v15630_v57 = vpack.c.bf16 %v12211_v11, %v12210_v62 }
 0x201   :  { %14319 = vmatprep.mubr.msk.f32.mxu1 %vm779_vm2, %v18013_v3  ;;  %v12276_v3 = vld [vmem:[%s20198_s3 + $0xa0] sm:$0xff] }
 0x204   :  { %14320 = vmatmul.mubr.msk.f32.gmra.mrb[14].mxu1 %vm779_vm2, %v18017_v21  ;;  %v18040_v21 = vpack.c.bf16 %v12277_v54, %v12276_v3  ;;  %v12344_v3 = vld [vmem:[%s20198_s3 + $0xc0] sm:$0xff] }
 0x205   :  { %14330 = vmatprep.mubr.msk.f32.mxu1 %vm779_vm2, %v17676_v52 }
 0x208   :  { %14331 = vmatmul.mubr.msk.f32.vlgmr.msra.gmra.mrb[16].mxu1 %vm779_vm2, %v17688_v56 }
 0x209   :  { %15629 = vmatpush3.bf16.msra.mxu1 %v17690_v58  ;;  %14333 = vmatprep.mubr.msk.f32.mxu1 %vm779_vm2, %v17695_v59 }
 0x20a   :  { %15631 = vmatprep.subr.bf16.mxu1 %v15630_v57 }
 0x20c   :  { %14334 = vmatmul.mubr.msk.f32.gmra.mrb[18].mxu1 %vm779_vm2, %v17700_v61  ;;  %v18105_v61 = vld [vmem:[#allocation2 + $0x207] sm:$0xff] }
 0x20d   :  { %14336 = vmatprep.mubr.msk.f32.mxu1 %vm779_vm2, %v17706_v18  ;;  %15633 = vmatpush3.bf16.msra.mxu1 %v15630_v57 }
 0x20e   :  { %15635 = vmatprep.subr.bf16.mxu1 %v18040_v21 }
 0x210   :  { %14337 = vmatmul.mubr.msk.f32.gmra.mrb[20].mxu1 %vm779_vm2, %v17711_v0  ;;  %v18111_v0 = vld [vmem:[#allocation2 + $0x20f] sm:$0xff] }
 0x211   :  { %14339 = vmatprep.mubr.msk.f32.mxu1 %vm779_vm2, %v17716_v2 }
 0x214   :  { %14340 = vmatmul.mubr.msk.f32.gmra.mrb[22].mxu1 %vm779_vm2, %v17721_v4 }
 0x215   :  { %14342 = vmatprep.mubr.msk.f32.mxu1 %vm779_vm2, %v17726_v8 }
 0x218   :  { %14343 = vmatmul.mubr.msk.f32.gmra.mrb[24].mxu1 %vm779_vm2, %v17731_v10 }
 0x219   :  { %14345 = vmatprep.mubr.msk.f32.mxu1 %vm779_vm2, %v17736_v12 }
 0x21c   :  { %14346 = vmatmul.mubr.msk.f32.gmra.mrb[26].mxu1 %vm779_vm2, %v17741_v14 }
 0x21d   :  { %14348 = vmatprep.mubr.msk.f32.mxu1 %vm779_vm2, %v17746_v20 }
 0x220   :  { %14349 = vmatmul.mubr.msk.f32.gmra.mrb[28].mxu1 %vm779_vm2, %v17751_v22 }
 0x221   :  { %14351 = vmatprep.mubr.msk.f32.mxu1 %vm779_vm2, %v17756_v24 }
 0x224   :  { %14352 = vmatmul.mubr.msk.f32.gmra.mrb[30].mxu1 %vm779_vm2, %v17761_v26 }
 0x225   :  { %14354 = vmatprep.mubr.msk.f32.mxu1 %vm779_vm2, %v17766_v30 }
 0x228   :  { %14355 = vmatmul.mubr.msk.f32.gmra.mrb[32].mxu1 %vm779_vm2, %v17771_v32 }
 0x229   :  { %14357 = vmatprep.mubr.msk.f32.mxu1 %vm779_vm2, %v17776_v19 }
 0x22c   :  { %14358 = vmatmul.mubr.msk.f32.gmra.mrb[34].mxu1 %vm779_vm2, %v17781_v39 }
 0x22d   :  { %14360 = vmatprep.mubr.msk.f32.mxu1 %vm779_vm2, %v17786_v41 }
 0x230   :  { %14361 = vmatmul.mubr.msk.f32.gmra.mrb[36].mxu1 %vm779_vm2, %v17791_v45  ;;  %v18173_v45 = vld [vmem:[#allocation2 + $0x347] sm:$0xff] }
 0x231   :  { %14363 = vmatprep.mubr.msk.f32.mxu1 %vm779_vm2, %v17796_v47  ;;  %v18179_v47 = vld [vmem:[#allocation2 + $0x34f] sm:$0xff] }
 0x234   :  { %14364 = vmatmul.mubr.msk.f32.gmra.mrb[38].mxu1 %vm779_vm2, %v17801_v49 }
 0x235   :  { %14366 = vmatprep.mubr.msk.f32.mxu1 %vm779_vm2, %v17806_v53  ;;  %v18185_v53 = vld [vmem:[#allocation2 + $0x367] sm:$0xff] }
 0x238   :  { %14367 = vmatmul.mubr.msk.f32.gmra.mrb[40].mxu1 %vm779_vm2, %v17814_v1 }
 0x239   :  { %14369 = vmatprep.mubr.msk.f32.mxu1 %vm779_vm2, %v17819_v9  ;;  %v18191_v9 = vld [vmem:[#allocation2 + $0x36f] sm:$0xff] }
 0x23a   :  { %v18091_v52 = vpop.f32.mrb[112].mxu0 }
 0x23b   :  { %20311 = vst [vmem:[#allocation43_spill] sm:$0xff] %v18091_v52  ;;  %v18093_v56 = vpop.f32.mrb[113].mxu0 }
 0x23c   :  { %20312 = vst [vmem:[#allocation44_spill] sm:$0xff] %v18093_v56  ;;  %14370 = vmatmul.mubr.msk.f32.gmra.mrb[42].mxu1 %vm779_vm2, %v17826_v17  ;;  %v18363_v56 = vld [vmem:[#allocation2 + $0x128] sm:$0xff] }
 0x23d   :  { %14372 = vmatprep.mubr.msk.f32.mxu1 %vm779_vm2, %v17831_v23 }
 0x23e   :  { %v18099_v58 = vpop.f32.mrb[114].mxu0 }
 0x23f   :  { %20313 = vst [vmem:[#allocation45_spill] sm:$0xff] %v18099_v58  ;;  %v18101_v59 = vpop.f32.mrb[115].mxu0 }
 0x240   :  { %20314 = vst [vmem:[#allocation46_spill] sm:$0xff] %v18101_v59  ;;  %14373 = vmatmul.mubr.msk.f32.gmra.mrb[44].mxu1 %vm779_vm2, %v17836_v33  ;;  %v18357_v59 = vld [vmem:[#allocation2 + $0x110] sm:$0xff] }
 0x241   :  { %14375 = vmatprep.mubr.msk.f32.mxu1 %vm779_vm2, %v18105_v61 }
 0x242   :  { %v18109_v18 = vpop.f32.mrb[116].mxu0 }
 0x243   :  { %20315 = vst [vmem:[#allocation47_spill] sm:$0xff] %v18109_v18  ;;  %v18113_v2 = vpop.f32.mrb[117].mxu0 }
 0x244   :  { %20316 = vst [vmem:[#allocation48_spill] sm:$0xff] %v18113_v2  ;;  %14376 = vmatmul.mubr.msk.f32.gmra.mrb[46].mxu1 %vm779_vm2, %v18111_v0  ;;  %v18351_v2 = vld [vmem:[#allocation2 + $0x108] sm:$0xff] }
 0x245   :  { %14378 = vmatprep.mubr.msk.f32.mxu1 %vm779_vm2, %v17845_v46 }
 0x246   :  { %v18119_v4 = vpop.f32.mrb[118].mxu0 }
 0x247   :  { %20317 = vst [vmem:[#allocation49_spill] sm:$0xff] %v18119_v4  ;;  %v18121_v8 = vpop.f32.mrb[119].mxu0 }
 0x248   :  { %20318 = vst [vmem:[#allocation50_spill] sm:$0xff] %v18121_v8  ;;  %14379 = vmatmul.mubr.msk.f32.gmra.mrb[48].mxu1 %vm779_vm2, %v17853_v51  ;;  %v18345_v8 = vld [vmem:[#allocation2 + $0xf0] sm:$0xff] }
 0x249   :  { %14381 = vmatprep.mubr.msk.f32.mxu1 %vm779_vm2, %v17861_v55 }
 0x24a   :  { %v18127_v10 = vpop.f32.mrb[120].mxu0 }
 0x24b   :  { %20319 = vst [vmem:[#allocation51_spill] sm:$0xff] %v18127_v10  ;;  %v18129_v12 = vpop.f32.mrb[121].mxu0 }
 0x24c   :  { %20320 = vst [vmem:[#allocation52_spill] sm:$0xff] %v18129_v12  ;;  %14382 = vmatmul.mubr.msk.f32.gmra.mrb[50].mxu1 %vm779_vm2, %v17869_v60 }
 0x24d   :  { %14384 = vmatprep.mubr.msk.f32.mxu1 %vm779_vm2, %v17877_v63  ;;  %v3647_v63 = vld [vmem:[#allocation2 + $0x30] sm:$0xff] }
 0x24e   :  { %v18135_v14 = vpop.f32.mrb[122].mxu0 }
 0x24f   :  { %20321 = vst [vmem:[#allocation53_spill] sm:$0xff] %v18135_v14  ;;  %v18137_v20 = vpop.f32.mrb[123].mxu0  ;;  %v18337_v14 = vld [vmem:[#allocation2 + $0xe8] sm:$0xff] }
 0x250   :  { %20322 = vst [vmem:[#allocation54_spill] sm:$0xff] %v18137_v20  ;;  %14385 = vmatmul.mubr.msk.f32.gmra.mrb[52].mxu1 %vm779_vm2, %v17885_v7  ;;  %v12345_v7 = vld [vmem:[%s20198_s3 + $0xc8] sm:$0xff] }
 0x251   :  { %14387 = vmatprep.mubr.msk.f32.mxu1 %vm779_vm2, %v17893_v13  ;;  %v18275_v13 = vld [vmem:[#allocation2 + $0x48] sm:$0xff] }
 0x252   :  { %v18143_v22 = vpop.f32.mrb[124].mxu0 }
 0x253   :  { %20323 = vst [vmem:[#allocation55_spill] sm:$0xff] %v18143_v22  ;;  %v18145_v24 = vpop.f32.mrb[125].mxu0  ;;  %v18331_v22 = vld [vmem:[#allocation2 + $0xd0] sm:$0xff] }
 0x254   :  { %20324 = vst [vmem:[#allocation56_spill] sm:$0xff] %v18145_v24  ;;  %14388 = vmatmul.mubr.msk.f32.gmra.mrb[54].mxu1 %vm779_vm2, %v17901_v25  ;;  %v18280_v25 = vpack.c.bf16 %v12345_v7, %v12344_v3  ;;  %v18315_v3 = vld [vmem:[#allocation2 + $0xa8] sm:$0xff] }
 0x255   :  { %14390 = vmatprep.mubr.msk.f32.mxu1 %vm779_vm2, %v17909_v31  ;;  %v18284_v31 = vld [vmem:[#allocation2 + $0x50] sm:$0xff]  ;;  %v18327_v24 = vld [vmem:[#allocation2 + $0xc8] sm:$0xff] }
 0x256   :  { %v18151_v26 = vpop.f32.mrb[126].mxu0 }
 0x257   :  { %20325 = vst [vmem:[#allocation57_spill] sm:$0xff] %v18151_v26  ;;  %v18153_v30 = vpop.f32.mrb[127].mxu0 }
 0x258   :  { %20326 = vst [vmem:[#allocation58_spill] sm:$0xff] %v18153_v30  ;;  %14391 = vmatmul.mubr.msk.f32.gmra.mrb[56].mxu1 %vm779_vm2, %v17917_v40  ;;  %v18290_v40 = vld [vmem:[#allocation2 + $0x68] sm:$0xff]  ;;  %v18321_v30 = vld [vmem:[#allocation2 + $0xb0] sm:$0xff] }
 0x259   :  { %14393 = vmatprep.mubr.msk.f32.mxu1 %vm779_vm2, %v17925_v50 }
 0x25a   :  { %v18159_v32 = vpop.f32.mrb[64].mxu0 }
 0x25b   :  { %20327 = vst [vmem:[#allocation59_spill] sm:$0xff] %v18159_v32  ;;  %v18163_v19 = vpop.f32.mrb[65].mxu0  ;;  %v18541_v32 = vld [vmem:[#allocation2 + $0x3f0] sm:$0xff] }
 0x25c   :  { %14394 = vmatmul.mubr.msk.f32.gmra.mrb[58].mxu1 %vm779_vm2, %v17933_v36  ;;  %20328 = vst [vmem:[#allocation60_spill] sm:$0xff] %v18163_v19  ;;  %v18537_v19 = vld [vmem:[#allocation2 + $0x3e8] sm:$0xff]  ;;  %20383 = vst [vmem:[#allocation115_spill] sm:$0xff] %v18541_v32 }
 0x25d   :  { %14396 = vmatprep.mubr.msk.f32.mxu1 %vm779_vm2, %v17941_v42  ;;  %v18297_v42 = vld [vmem:[#allocation2 + $0x70] sm:$0xff]  ;;  %20382 = vst [vmem:[#allocation114_spill] sm:$0xff] %v18537_v19 }
 0x25e   :  { %v18167_v39 = vpop.f32.mrb[66].mxu0 }
 0x25f   :  { %20329 = vst [vmem:[#allocation61_spill] sm:$0xff] %v18167_v39  ;;  %v18169_v41 = vpop.f32.mrb[67].mxu0  ;;  %v18533_v39 = vld [vmem:[#allocation2 + $0x3d0] sm:$0xff] }
 0x260   :  { %20330 = vst [vmem:[#allocation62_spill] sm:$0xff] %v18169_v41  ;;  %14397 = vmatmul.mubr.msk.f32.gmra.mrb[60].mxu1 %vm779_vm2, %v17949_v29  ;;  %v18529_v41 = vld [vmem:[#allocation2 + $0x3c8] sm:$0xff]  ;;  %20381 = vst [vmem:[#allocation113_spill] sm:$0xff] %v18533_v39 }
 0x261   :  { %14399 = vmatprep.mubr.msk.f32.mxu1 %vm779_vm2, %v18173_v45  ;;  %20380 = vst [vmem:[#allocation112_spill] sm:$0xff] %v18529_v41 }
 0x262   :  { %v18177_v50 = vpop.f32.mrb[68].mxu0 }
 0x263   :  { %20331 = vst [vmem:[#allocation63_spill] sm:$0xff] %v18177_v50  ;;  %v18181_v49 = vpop.f32.mrb[69].mxu0  ;;  %v18525_v50 = vld [vmem:[#allocation2 + $0x3b0] sm:$0xff] }
 0x264   :  { %20332 = vst [vmem:[#allocation64_spill] sm:$0xff] %v18181_v49  ;;  %14400 = vmatmul.mubr.msk.f32.gmra.mrb[62].mxu1 %vm779_vm2, %v18179_v47  ;;  %v18521_v49 = vld [vmem:[#allocation2 + $0x3a8] sm:$0xff]  ;;  %20379 = vst [vmem:[#allocation111_spill] sm:$0xff] %v18525_v50 }
 0x265   :  { %14402 = vmatprep.mubr.msk.f32.mxu1 %vm779_vm2, %v18185_v53  ;;  %20378 = vst [vmem:[#allocation110_spill] sm:$0xff] %v18521_v49 }
 0x266   :  { %v18189_v1 = vpop.f32.mrb[70].mxu0 }
 0x267   :  { %20333 = vst [vmem:[#allocation65_spill] sm:$0xff] %v18189_v1  ;;  %v18193_v17 = vpop.f32.mrb[71].mxu0  ;;  %v18517_v1 = vld [vmem:[#allocation2 + $0x390] sm:$0xff] }
 0x268   :  { %20334 = vst [vmem:[#allocation66_spill] sm:$0xff] %v18193_v17  ;;  %14403 = vmatmul.mubr.msk.f32.gmra.mrb[0].mxu1 %vm779_vm2, %v18191_v9  ;;  %v18513_v17 = vld [vmem:[#allocation2 + $0x388] sm:$0xff]  ;;  %20377 = vst [vmem:[#allocation109_spill] sm:$0xff] %v18517_v1 }
 0x269   :  { %14405 = vmatprep.mubr.msk.f32.mxu1 %vm779_vm2, %v17593_v5  ;;  %20376 = vst [vmem:[#allocation108_spill] sm:$0xff] %v18513_v17 }
 0x26a   :  { %v18199_v23 = vpop.f32.mrb[72].mxu0 }
 0x26b   :  { %20335 = vst [vmem:[#allocation67_spill] sm:$0xff] %v18199_v23  ;;  %v18201_v33 = vpop.f32.mrb[73].mxu0  ;;  %v18509_v23 = vld [vmem:[#allocation2 + $0x370] sm:$0xff] }
 0x26c   :  { %20336 = vst [vmem:[#allocation68_spill] sm:$0xff] %v18201_v33  ;;  %14406 = vmatmul.mubr.msk.f32.gmra.mrb[2].mxu1 %vm779_vm2, %v17595_v6  ;;  %v18505_v33 = vld [vmem:[#allocation2 + $0x368] sm:$0xff]  ;;  %20375 = vst [vmem:[#allocation107_spill] sm:$0xff] %v18509_v23 }
 0x26d   :  { %14408 = vmatprep.mubr.msk.f32.mxu1 %vm779_vm2, %v17608_v15 }
 0x26e   :  { %v18207_v46 = vpop.f32.mrb[74].mxu0 }
 0x26f   :  { %20337 = vst [vmem:[#allocation69_spill] sm:$0xff] %v18207_v46  ;;  %v18209_v51 = vpop.f32.mrb[75].mxu0  ;;  %v18501_v46 = vld [vmem:[#allocation2 + $0x350] sm:$0xff] }
 0x270   :  { %20338 = vst [vmem:[#allocation70_spill] sm:$0xff] %v18209_v51  ;;  %14409 = vmatmul.mubr.msk.f32.gmra.mrb[4].mxu1 %vm779_vm2, %v17610_v16  ;;  %v18497_v51 = vld [vmem:[#allocation2 + $0x348] sm:$0xff] }
 0x271   :  { %14411 = vmatprep.mubr.msk.f32.mxu1 %vm779_vm2, %v17622_v27 }
 0x272   :  { %v18215_v5 = vpop.f32.mrb[76].mxu0 }
 0x273   :  { %20339 = vst [vmem:[#allocation71_spill] sm:$0xff] %v18215_v5  ;;  %v18217_v54 = vpop.f32.mrb[77].mxu0  ;;  %v18493_v5 = vld [vmem:[#allocation2 + $0x330] sm:$0xff] }
 0x274   :  { %20340 = vst [vmem:[#allocation72_spill] sm:$0xff] %v18217_v54  ;;  %14412 = vmatmul.mubr.msk.f32.gmra.mrb[6].mxu1 %vm779_vm2, %v17624_v28  ;;  %v18239_v28 = vld [vmem:[#allocation2 + $0x447] sm:$0xff] }
 0x275   :  { %14414 = vmatprep.mubr.msk.f32.mxu1 %vm779_vm2, %v17635_v34  ;;  %v18489_v54 = vld [vmem:[#allocation2 + $0x328] sm:$0xff] }
 0x276   :  { %v18223_v6 = vpop.f32.mrb[78].mxu0 }
 0x277   :  { %20341 = vst [vmem:[#allocation73_spill] sm:$0xff] %v18223_v6  ;;  %v18225_v15 = vpop.f32.mrb[79].mxu0  ;;  %v18485_v6 = vld [vmem:[#allocation2 + $0x310] sm:$0xff] }
 0x278   :  { %20342 = vst [vmem:[#allocation74_spill] sm:$0xff] %v18225_v15  ;;  %14415 = vmatmul.mubr.msk.f32.gmra.mrb[8].mxu1 %vm779_vm2, %v17637_v35  ;;  %v18481_v15 = vld [vmem:[#allocation2 + $0x308] sm:$0xff] }
 0x279   :  { %14417 = vmatprep.mubr.msk.f32.mxu1 %vm779_vm2, %v17646_v37  ;;  %v18251_v37 = vld [vmem:[#allocation2 + $0x44f] sm:$0xff] }
 0x27a   :  { %v18231_v16 = vpop.f32.mrb[80].mxu0 }
 0x27b   :  { %20343 = vst [vmem:[#allocation75_spill] sm:$0xff] %v18231_v16  ;;  %v18233_v27 = vpop.f32.mrb[81].mxu0  ;;  %v18477_v16 = vld [vmem:[#allocation2 + $0x2f0] sm:$0xff] }
 0x27c   :  { %20344 = vst [vmem:[#allocation76_spill] sm:$0xff] %v18233_v27  ;;  %14418 = vmatmul.mubr.msk.f32.gmra.mrb[10].mxu1 %vm779_vm2, %v17648_v38  ;;  %v12278_v38 = vld [vmem:[%s20198_s3 + $0xb0] sm:$0xff]  ;;  %v18473_v27 = vld [vmem:[#allocation2 + $0x2e8] sm:$0xff] }
 0x27d   :  { %14420 = vmatprep.mubr.msk.f32.mxu1 %vm779_vm2, %v17656_v43  ;;  %v12279_v43 = vld [vmem:[%s20198_s3 + $0xb8] sm:$0xff] }
 0x27e   :  { %v18241_v34 = vpop.f32.mrb[82].mxu0  ;;  %v15638_v60 = vpack.c.bf16 %v12279_v43, %v12278_v38  ;;  %v18303_v43 = vld [vmem:[#allocation2 + $0x88] sm:$0xff] }
 0x27f   :  { %20345 = vst [vmem:[#allocation77_spill] sm:$0xff] %v18241_v34  ;;  %v18243_v55 = vpop.f32.mrb[83].mxu0  ;;  %v18461_v34 = vld [vmem:[#allocation2 + $0x2b0] sm:$0xff] }
 0x280   :  { %20346 = vst [vmem:[#allocation78_spill] sm:$0xff] %v18243_v55  ;;  %14421 = vmatmul.mubr.msk.f32.gmra.mrb[12].mxu1 %vm779_vm2, %v17658_v44  ;;  %v3646_v44 = vld [vmem:[#allocation2 + $0x28] sm:$0xff] }
 0x281   :  { %14423 = vmatprep.mubr.msk.f32.mxu1 %vm779_vm2, %v18239_v28  ;;  %v18457_v55 = vld [vmem:[#allocation2 + $0x2a8] sm:$0xff] }
 0x282   :  { %v18249_v35 = vpop.f32.mrb[84].mxu0 }
 0x283   :  { %20347 = vst [vmem:[#allocation79_spill] sm:$0xff] %v18249_v35  ;;  %v18259_v57 = vpop.f32.mrb[85].mxu0  ;;  %v18453_v35 = vld [vmem:[#allocation2 + $0x290] sm:$0xff] }
 0x284   :  { %20348 = vst [vmem:[#allocation80_spill] sm:$0xff] %v18259_v57  ;;  %14424 = vmatmul.mubr.msk.f32.gmra.mrb[14].mxu1 %vm779_vm2, %v18251_v37  ;;  %v18449_v57 = vld [vmem:[#allocation2 + $0x288] sm:$0xff] }
 0x285   :  { %14434 = vmatprep.mubr.msk.f32.mxu1 %vm779_vm2, %v3646_v44 }
 0x286   :  { %v18264_v62 = vpop.f32.mrb[86].mxu0 }
 0x287   :  { %20349 = vst [vmem:[#allocation81_spill] sm:$0xff] %v18264_v62  ;;  %v18272_v11 = vpop.f32.mrb[87].mxu0  ;;  %v3679_v62 = vld [vmem:[#allocation2 + $0x270] sm:$0xff] }
 0x288   :  { %20350 = vst [vmem:[#allocation82_spill] sm:$0xff] %v18272_v11  ;;  %14435 = vmatmul.mubr.msk.f32.vlgmr.msra.gmra.mrb[16].mxu1 %vm779_vm2, %v3647_v63  ;;  %v18309_v63 = vld [vmem:[#allocation2 + $0x90] sm:$0xff]  ;;  %v3678_v11 = vld [vmem:[#allocation2 + $0x268] sm:$0xff] }
 0x289   :  { %15637 = vmatpush3.bf16.msra.mxu1 %v18040_v21  ;;  %14437 = vmatprep.mubr.msk.f32.mxu1 %vm779_vm2, %v18275_v13 }
 0x28a   :  { %15639 = vmatprep.subr.bf16.mxu1 %v15638_v60  ;;  %v18282_v29 = vpop.f32.mrb[88].mxu0 }
 0x28b   :  { %20351 = vst [vmem:[#allocation83_spill] sm:$0xff] %v18282_v29  ;;  %v18286_v36 = vpop.f32.mrb[89].mxu0  ;;  %v18443_v29 = vld [vmem:[#allocation2 + $0x210] sm:$0xff] }
 0x28c   :  { %20352 = vst [vmem:[#allocation84_spill] sm:$0xff] %v18286_v36  ;;  %14438 = vmatmul.mubr.msk.f32.gmra.mrb[18].mxu1 %vm779_vm2, %v18284_v31  ;;  %v18431_v36 = vld [vmem:[#allocation2 + $0x1e8] sm:$0xff] }
 0x28d   :  { %14440 = vmatprep.mubr.msk.f32.mxu1 %vm779_vm2, %v18290_v40  ;;  %15641 = vmatpush3.bf16.msra.mxu1 %v15638_v60 }
 0x28e   :  { %15643 = vmatprep.subr.bf16.mxu1 %v18280_v25  ;;  %v18295_v21 = vpop.f32.mrb[90].mxu0 }
 0x28f   :  { %20353 = vst [vmem:[#allocation85_spill] sm:$0xff] %v18295_v21  ;;  %v18299_v38 = vpop.f32.mrb[91].mxu0 }
 0x290   :  { %20354 = vst [vmem:[#allocation86_spill] sm:$0xff] %v18299_v38  ;;  %14441 = vmatmul.mubr.msk.f32.gmra.mrb[20].mxu1 %vm779_vm2, %v18297_v42  ;;  %v18417_v38 = vld [vmem:[#allocation2 + $0x1b0] sm:$0xff] }
 0x291   :  { %14443 = vmatprep.mubr.msk.f32.mxu1 %vm779_vm2, %v18303_v43 }
 0x292   :  { %v18307_v44 = vpop.f32.mrb[92].mxu0 }
 0x293   :  { %20355 = vst [vmem:[#allocation87_spill] sm:$0xff] %v18307_v44  ;;  %v18311_v60 = vpop.f32.mrb[93].mxu0 }
 0x294   :  { %20356 = vst [vmem:[#allocation88_spill] sm:$0xff] %v18311_v60  ;;  %14444 = vmatmul.mubr.msk.f32.gmra.mrb[22].mxu1 %vm779_vm2, %v18309_v63  ;;  %v18405_v60 = vld [vmem:[#allocation2 + $0x190] sm:$0xff] }
 0x295   :  { %14446 = vmatprep.mubr.msk.f32.mxu1 %vm779_vm2, %v18315_v3 }
 0x296   :  { %v18319_v7 = vpop.f32.mrb[94].mxu0 }
 0x297   :  { %20357 = vst [vmem:[#allocation89_spill] sm:$0xff] %v18319_v7  ;;  %v18323_v26 = vpop.f32.mrb[95].mxu0 }
 0x298   :  { %20358 = vst [vmem:[#allocation90_spill] sm:$0xff] %v18323_v26  ;;  %14447 = vmatmul.mubr.msk.f32.gmra.mrb[24].mxu1 %vm779_vm2, %v18321_v30  ;;  %v18393_v26 = vld [vmem:[#allocation2 + $0x170] sm:$0xff] }
 0x299   :  { %14449 = vmatprep.mubr.msk.f32.mxu1 %vm779_vm2, %v18327_v24 }
 0x29a   :  { %v18333_v20 = vpop.f32.mrb[96].mxu0 }
 0x29b   :  { %20359 = vst [vmem:[#allocation91_spill] sm:$0xff] %v18333_v20  ;;  %v18339_v12 = vpop.f32.mrb[97].mxu0 }
 0x29c   :  { %14450 = vmatmul.mubr.msk.f32.gmra.mrb[26].mxu1 %vm779_vm2, %v18331_v22  ;;  %20360 = vst [vmem:[#allocation92_spill] sm:$0xff] %v18339_v12  ;;  %v18381_v12 = vld [vmem:[#allocation2 + $0x150] sm:$0xff] }
 0x29d   :  { %14452 = vmatprep.mubr.msk.f32.mxu1 %vm779_vm2, %v18337_v14 }
 0x29e   :  { %v18343_v10 = vpop.f32.mrb[98].mxu0 }
 0x29f   :  { %20361 = vst [vmem:[#allocation93_spill] sm:$0xff] %v18343_v10  ;;  %v18347_v4 = vpop.f32.mrb[99].mxu0 }
 0x2a0   :  { %20362 = vst [vmem:[#allocation94_spill] sm:$0xff] %v18347_v4  ;;  %14453 = vmatmul.mubr.msk.f32.gmra.mrb[28].mxu1 %vm779_vm2, %v18345_v8  ;;  %v18369_v4 = vld [vmem:[#allocation2 + $0x130] sm:$0xff] }
 0x2a1   :  { %14455 = vmatprep.mubr.msk.f32.mxu1 %vm779_vm2, %v18351_v2 }
 0x2a2   :  { %v18355_v18 = vpop.f32.mrb[100].mxu0 }
 0x2a3   :  { %20363 = vst [vmem:[#allocation95_spill] sm:$0xff] %v18355_v18  ;;  %v18359_v58 = vpop.f32.mrb[101].mxu0  ;;  %v18375_v18 = vld [vmem:[#allocation2 + $0x148] sm:$0xff] }
 0x2a4   :  { %20364 = vst [vmem:[#allocation96_spill] sm:$0xff] %v18359_v58  ;;  %14456 = vmatmul.mubr.msk.f32.gmra.mrb[30].mxu1 %vm779_vm2, %v18357_v59 }
 0x2a5   :  { %14458 = vmatprep.mubr.msk.f32.mxu1 %vm779_vm2, %v18363_v56 }
 0x2a6   :  { %v18367_v52 = vpop.f32.mrb[102].mxu0 }
 0x2a7   :  { %20365 = vst [vmem:[#allocation97_spill] sm:$0xff] %v18367_v52  ;;  %v18371_v10 = vpop.f32.mrb[103].mxu0  ;;  %v18387_v52 = vld [vmem:[#allocation2 + $0x168] sm:$0xff] }
 0x2a8   :  { %20366 = vst [vmem:[#allocation98_spill] sm:$0xff] %v18371_v10  ;;  %14459 = vmatmul.mubr.msk.f32.gmra.mrb[32].mxu1 %vm779_vm2, %v18369_v4 }
 0x2a9   :  { %14461 = vmatprep.mubr.msk.f32.mxu1 %vm779_vm2, %v18375_v18 }
 0x2aa   :  { %v18379_v58 = vpop.f32.mrb[104].mxu0 }
 0x2ab   :  { %20367 = vst [vmem:[#allocation99_spill] sm:$0xff] %v18379_v58  ;;  %v18383_v20 = vpop.f32.mrb[105].mxu0  ;;  %v18399_v58 = vld [vmem:[#allocation2 + $0x188] sm:$0xff] }
 0x2ac   :  { %20368 = vst [vmem:[#allocation100_spill] sm:$0xff] %v18383_v20  ;;  %14462 = vmatmul.mubr.msk.f32.gmra.mrb[34].mxu1 %vm779_vm2, %v18381_v12 }
 0x2ad   :  { %14464 = vmatprep.mubr.msk.f32.mxu1 %vm779_vm2, %v18387_v52 }
 0x2ae   :  { %v18391_v10 = vpop.f32.mrb[106].mxu0 }
 0x2af   :  { %20369 = vst [vmem:[#allocation101_spill] sm:$0xff] %v18391_v10  ;;  %v18395_v7 = vpop.f32.mrb[107].mxu0  ;;  %v18411_v10 = vld [vmem:[#allocation2 + $0x1a8] sm:$0xff] }
 0x2b0   :  { %20370 = vst [vmem:[#allocation102_spill] sm:$0xff] %v18395_v7  ;;  %14465 = vmatmul.mubr.msk.f32.gmra.mrb[36].mxu1 %vm779_vm2, %v18393_v26 }
 0x2b1   :  { %14467 = vmatprep.mubr.msk.f32.mxu1 %vm779_vm2, %v18399_v58 }
 0x2b2   :  { %v18403_v20 = vpop.f32.mrb[108].mxu0 }
 0x2b3   :  { %20371 = vst [vmem:[#allocation103_spill] sm:$0xff] %v18403_v20  ;;  %v18407_v44 = vpop.f32.mrb[109].mxu0  ;;  %v18423_v20 = vld [vmem:[#allocation2 + $0x1c8] sm:$0xff] }
 0x2b4   :  { %20372 = vst [vmem:[#allocation104_spill] sm:$0xff] %v18407_v44  ;;  %14468 = vmatmul.mubr.msk.f32.gmra.mrb[38].mxu1 %vm779_vm2, %v18405_v60  ;;  %v18427_v44 = vld [vmem:[#allocation2 + $0x1d0] sm:$0xff] }
 0x2b5   :  { %14470 = vmatprep.mubr.msk.f32.mxu1 %vm779_vm2, %v18411_v10 }
 0x2b6   :  { %v18415_v7 = vpop.f32.mrb[110].mxu0 }
 0x2b7   :  { %20373 = vst [vmem:[#allocation105_spill] sm:$0xff] %v18415_v7  ;;  %v18419_v21 = vpop.f32.mrb[111].mxu0  ;;  %v18435_v7 = vld [vmem:[#allocation2 + $0x1f0] sm:$0xff] }
 0x2b8   :  { %20374 = vst [vmem:[#allocation106_spill] sm:$0xff] %v18419_v21  ;;  %14471 = vmatmul.mubr.msk.f32.gmra.mrb[40].mxu1 %vm779_vm2, %v18417_v38  ;;  %v18439_v21 = vld [vmem:[#allocation2 + $0x208] sm:$0xff] }
 0x2b9   :  { %14473 = vmatprep.mubr.msk.f32.mxu1 %vm779_vm2, %v18423_v20 }
 0x2bc   :  { %14474 = vmatmul.mubr.msk.f32.gmra.mrb[42].mxu1 %vm779_vm2, %v18427_v44 }
 0x2bd   :  { %14476 = vmatprep.mubr.msk.f32.mxu1 %vm779_vm2, %v18431_v36 }
 0x2c0   :  { %14477 = vmatmul.mubr.msk.f32.gmra.mrb[44].mxu1 %vm779_vm2, %v18435_v7 }
 0x2c1   :  { %14479 = vmatprep.mubr.msk.f32.mxu1 %vm779_vm2, %v18439_v21 }
 0x2c4   :  { %14480 = vmatmul.mubr.msk.f32.gmra.mrb[46].mxu1 %vm779_vm2, %v18443_v29 }
 0x2c5   :  { %14482 = vmatprep.mubr.msk.f32.mxu1 %vm779_vm2, %v3678_v11  ;;  %v18469_v11 = vld [vmem:[#allocation2 + $0x2d0] sm:$0xff] }
 0x2c8   :  { %14483 = vmatmul.mubr.msk.f32.gmra.mrb[48].mxu1 %vm779_vm2, %v3679_v62  ;;  %v18465_v62 = vld [vmem:[#allocation2 + $0x2c8] sm:$0xff] }
 0x2c9   :  { %14485 = vmatprep.mubr.msk.f32.mxu1 %vm779_vm2, %v18449_v57 }
 0x2cc   :  { %14486 = vmatmul.mubr.msk.f32.gmra.mrb[50].mxu1 %vm779_vm2, %v18453_v35 }
 0x2cd   :  { %14488 = vmatprep.mubr.msk.f32.mxu1 %vm779_vm2, %v18457_v55 }
 0x2d0   :  { %14489 = vmatmul.mubr.msk.f32.gmra.mrb[52].mxu1 %vm779_vm2, %v18461_v34 }
 0x2d1   :  { %14491 = vmatprep.mubr.msk.f32.mxu1 %vm779_vm2, %v18465_v62 }
 0x2d4   :  { %14492 = vmatmul.mubr.msk.f32.gmra.mrb[54].mxu1 %vm779_vm2, %v18469_v11 }
 0x2d5   :  { %14494 = vmatprep.mubr.msk.f32.mxu1 %vm779_vm2, %v18473_v27 }
 0x2d8   :  { %14495 = vmatmul.mubr.msk.f32.gmra.mrb[56].mxu1 %vm779_vm2, %v18477_v16 }
 0x2d9   :  { %14497 = vmatprep.mubr.msk.f32.mxu1 %vm779_vm2, %v18481_v15 }
 0x2dc   :  { %14498 = vmatmul.mubr.msk.f32.gmra.mrb[58].mxu1 %vm779_vm2, %v18485_v6 }
 0x2dd   :  { %14500 = vmatprep.mubr.msk.f32.mxu1 %vm779_vm2, %v18489_v54 }
 0x2e0   :  { %14501 = vmatmul.mubr.msk.f32.gmra.mrb[60].mxu1 %vm779_vm2, %v18493_v5 }
 0x2e1   :  { %14503 = vmatprep.mubr.msk.f32.mxu1 %vm779_vm2, %v18497_v51 }
 0x2e4   :  { %14504 = vmatmul.mubr.msk.f32.gmra.mrb[62].mxu1 %vm779_vm2, %v18501_v46 }
 0x2e5   :  { %14506 = vmatprep.mubr.msk.f32.mxu1 %vm779_vm2, %v18505_v33 }
 0x2e8   :  { %14507 = vmatmul.mubr.msk.f32.gmra.mrb[0].mxu1 %vm779_vm2, %v18509_v23  ;;  %v18583_v23 = vld [vmem:[#allocation2 + $0x49] sm:$0xff] }
 0x2e9   :  { %14509 = vmatprep.mubr.msk.f32.mxu1 %vm779_vm2, %v18513_v17  ;;  %v12413_v17 = vld [vmem:[%s20198_s3 + $0xe8] sm:$0xff]  ;;  %20389 = vst [vmem:[#allocation121_spill] sm:$0xff] %v18583_v23 }
 0x2ec   :  { %14510 = vmatmul.mubr.msk.f32.gmra.mrb[2].mxu1 %vm779_vm2, %v18517_v1  ;;  %v4357_v1 = vld [vmem:[#allocation2 + $0x31] sm:$0xff] }
 0x2ed   :  { %14512 = vmatprep.mubr.msk.f32.mxu1 %vm779_vm2, %v18521_v49  ;;  %v4356_v49 = vld [vmem:[#allocation2 + $0x29] sm:$0xff] }
 0x2f0   :  { %14513 = vmatmul.mubr.msk.f32.gmra.mrb[4].mxu1 %vm779_vm2, %v18525_v50  ;;  %v18545_v50 = vld [vmem:[#allocation2 + $0x408] sm:$0xff] }
 0x2f1   :  { %14515 = vmatprep.mubr.msk.f32.mxu1 %vm779_vm2, %v18529_v41  ;;  %20384 = vst [vmem:[#allocation116_spill] sm:$0xff] %v18545_v50  ;;  %v18549_v41 = vld [vmem:[#allocation2 + $0x410] sm:$0xff] }
 0x2f2   :  { %20385 = vst [vmem:[#allocation117_spill] sm:$0xff] %v18549_v41 }
 0x2f4   :  { %14516 = vmatmul.mubr.msk.f32.gmra.mrb[6].mxu1 %vm779_vm2, %v18533_v39  ;;  %v18553_v39 = vld [vmem:[#allocation2 + $0x428] sm:$0xff] }
 0x2f5   :  { %14518 = vmatprep.mubr.msk.f32.mxu1 %vm779_vm2, %v18537_v19  ;;  %20386 = vst [vmem:[#allocation118_spill] sm:$0xff] %v18553_v39  ;;  %v18557_v19 = vld [vmem:[#allocation2 + $0x430] sm:$0xff] }
 0x2f6   :  { %20387 = vst [vmem:[#allocation119_spill] sm:$0xff] %v18557_v19 }
 0x2f8   :  { %14519 = vmatmul.mubr.msk.f32.gmra.mrb[8].mxu1 %vm779_vm2, %v18541_v32  ;;  %v18561_v32 = vld [vmem:[#allocation2 + $0x448] sm:$0xff] }
 0x2f9   :  { %14521 = vmatprep.mubr.msk.f32.mxu1 %vm779_vm2, %v18545_v50  ;;  %20388 = vst [vmem:[#allocation120_spill] sm:$0xff] %v18561_v32  ;;  %v18565_v50 = vld [vmem:[#allocation2 + $0x450] sm:$0xff] }
 0x2fc   :  { %14522 = vmatmul.mubr.msk.f32.gmra.mrb[10].mxu1 %vm779_vm2, %v18549_v41  ;;  %v12346_v41 = vld [vmem:[%s20198_s3 + $0xd0] sm:$0xff] }
 0x2fd   :  { %14524 = vmatprep.mubr.msk.f32.mxu1 %vm779_vm2, %v18553_v39  ;;  %v12347_v39 = vld [vmem:[%s20198_s3 + $0xd8] sm:$0xff] }
 0x300   :  { %14525 = vmatmul.mubr.msk.f32.gmra.mrb[12].mxu1 %vm779_vm2, %v18557_v19  ;;  %v15646_v19 = vpack.c.bf16 %v12347_v39, %v12346_v41  ;;  %v18590_v41 = vld [vmem:[#allocation2 + $0x51] sm:$0xff] }
 0x301   :  { %14527 = vmatprep.mubr.msk.f32.mxu1 %vm779_vm2, %v18561_v32  ;;  %v12412_v32 = vld [vmem:[%s20198_s3 + $0xe0] sm:$0xff]  ;;  %20390 = vst [vmem:[#allocation122_spill] sm:$0xff] %v18590_v41 }
 0x302   :  { %v18588_v39 = vpack.c.bf16 %v12413_v17, %v12412_v32  ;;  %v18603_v32 = vld [vmem:[#allocation2 + $0x89] sm:$0xff]  ;;  %v18607_v17 = vld [vmem:[#allocation2 + $0x91] sm:$0xff] }
 0x303   :  { %20393 = vst [vmem:[#allocation125_spill] sm:$0xff] %v18603_v32  ;;  %20394 = vst [vmem:[#allocation126_spill] sm:$0xff] %v18607_v17 }
 0x304   :  { %14528 = vmatmul.mubr.msk.f32.gmra.mrb[14].mxu1 %vm779_vm2, %v18565_v50 }
 0x305   :  { %14538 = vmatprep.mubr.msk.f32.mxu1 %vm779_vm2, %v4356_v49  ;;  %v18594_v49 = vld [vmem:[#allocation2 + $0x69] sm:$0xff] }
 0x306   :  { %20391 = vst [vmem:[#allocation123_spill] sm:$0xff] %v18594_v49 }
 0x308   :  { %14539 = vmatmul.mubr.msk.f32.vlgmr.msra.gmra.mrb[16].mxu1 %vm779_vm2, %v4357_v1  ;;  %v18599_v1 = vld [vmem:[#allocation2 + $0x71] sm:$0xff] }
 0x309   :  { %15645 = vmatpush3.bf16.msra.mxu1 %v18280_v25  ;;  %14541 = vmatprep.mubr.msk.f32.mxu1 %vm779_vm2, %v18583_v23  ;;  %20392 = vst [vmem:[#allocation124_spill] sm:$0xff] %v18599_v1  ;;  %v18611_v25 = vld [vmem:[#allocation2 + $0xa9] sm:$0xff] }
 0x30a   :  { %15647 = vmatprep.subr.bf16.mxu1 %v15646_v19  ;;  %20395 = vst [vmem:[#allocation127_spill] sm:$0xff] %v18611_v25  ;;  %v5069_v23 = vld [vmem:[#allocation2 + $0x67] sm:$0xff] }
 0x30c   :  { %14542 = vmatmul.mubr.msk.f32.gmra.mrb[18].mxu1 %vm779_vm2, %v18590_v41  ;;  %v20424_v41 = vld [vmem:[#allocation19_spill] sm:$0xff] }
 0x30d   :  { %14544 = vmatprep.mubr.msk.f32.mxu1 %vm779_vm2, %v18594_v49  ;;  %15649 = vmatpush3.bf16.msra.mxu1 %v15646_v19  ;;  %v18615_v19 = vld [vmem:[#allocation2 + $0xb1] sm:$0xff] }
 0x30e   :  { %15651 = vmatprep.subr.bf16.mxu1 %v18588_v39  ;;  %20396 = vst [vmem:[#allocation128_spill] sm:$0xff] %v18615_v19  ;;  %v20422_v49 = vld [vmem:[#allocation17_spill] sm:$0xff] }
 0x310   :  { %14545 = vmatmul.mubr.msk.f32.gmra.mrb[20].mxu1 %vm779_vm2, %v18599_v1  ;;  %v18619_v1 = vld [vmem:[#allocation2 + $0xc9] sm:$0xff] }
 0x311   :  { %14547 = vmatprep.mubr.msk.f32.mxu1 %vm779_vm2, %v18603_v32  ;;  %20397 = vst [vmem:[#allocation129_spill] sm:$0xff] %v18619_v1  ;;  %v18623_v32 = vld [vmem:[#allocation2 + $0xd1] sm:$0xff] }
 0x312   :  { %20398 = vst [vmem:[#allocation130_spill] sm:$0xff] %v18623_v32 }
 0x314   :  { %14548 = vmatmul.mubr.msk.f32.gmra.mrb[22].mxu1 %vm779_vm2, %v18607_v17  ;;  %v18627_v17 = vld [vmem:[#allocation2 + $0xe9] sm:$0xff] }
 0x315   :  { %14550 = vmatprep.mubr.msk.f32.mxu1 %vm779_vm2, %v18611_v25  ;;  %20399 = vst [vmem:[#allocation131_spill] sm:$0xff] %v18627_v17  ;;  %v18631_v25 = vld [vmem:[#allocation2 + $0xf1] sm:$0xff] }
 0x316   :  { %20400 = vst [vmem:[#allocation132_spill] sm:$0xff] %v18631_v25 }
 0x318   :  { %14551 = vmatmul.mubr.msk.f32.gmra.mrb[24].mxu1 %vm779_vm2, %v18615_v19  ;;  %v18635_v19 = vld [vmem:[#allocation2 + $0x109] sm:$0xff] }
 0x319   :  { %14553 = vmatprep.mubr.msk.f32.mxu1 %vm779_vm2, %v18619_v1  ;;  %20401 = vst [vmem:[#allocation133_spill] sm:$0xff] %v18635_v19  ;;  %v18639_v1 = vld [vmem:[#allocation2 + $0x111] sm:$0xff] }
 0x31a   :  { %20402 = vst [vmem:[#allocation134_spill] sm:$0xff] %v18639_v1 }
 0x31c   :  { %14554 = vmatmul.mubr.msk.f32.gmra.mrb[26].mxu1 %vm779_vm2, %v18623_v32  ;;  %v18643_v32 = vld [vmem:[#allocation2 + $0x129] sm:$0xff] }
 0x31d   :  { %14556 = vmatprep.mubr.msk.f32.mxu1 %vm779_vm2, %v18627_v17  ;;  %20403 = vst [vmem:[#allocation135_spill] sm:$0xff] %v18643_v32  ;;  %v18647_v17 = vld [vmem:[#allocation2 + $0x131] sm:$0xff] }
 0x31e   :  { %20404 = vst [vmem:[#allocation136_spill] sm:$0xff] %v18647_v17 }
 0x320   :  { %14557 = vmatmul.mubr.msk.f32.gmra.mrb[28].mxu1 %vm779_vm2, %v18631_v25  ;;  %v18651_v25 = vld [vmem:[#allocation2 + $0x149] sm:$0xff] }
 0x321   :  { %14559 = vmatprep.mubr.msk.f32.mxu1 %vm779_vm2, %v18635_v19  ;;  %20405 = vst [vmem:[#allocation137_spill] sm:$0xff] %v18651_v25  ;;  %v18655_v19 = vld [vmem:[#allocation2 + $0x151] sm:$0xff] }
 0x322   :  { %20406 = vst [vmem:[#allocation138_spill] sm:$0xff] %v18655_v19 }
 0x324   :  { %14560 = vmatmul.mubr.msk.f32.gmra.mrb[30].mxu1 %vm779_vm2, %v18639_v1  ;;  %v18659_v1 = vld [vmem:[#allocation2 + $0x169] sm:$0xff] }
 0x325   :  { %14562 = vmatprep.mubr.msk.f32.mxu1 %vm779_vm2, %v18643_v32  ;;  %20407 = vst [vmem:[#allocation139_spill] sm:$0xff] %v18659_v1  ;;  %v18663_v32 = vld [vmem:[#allocation2 + $0x171] sm:$0xff] }
 0x326   :  { %20408 = vst [vmem:[#allocation140_spill] sm:$0xff] %v18663_v32 }
 0x328   :  { %14563 = vmatmul.mubr.msk.f32.gmra.mrb[32].mxu1 %vm779_vm2, %v18647_v17  ;;  %v18667_v17 = vld [vmem:[#allocation2 + $0x189] sm:$0xff] }
 0x329   :  { %14565 = vmatprep.mubr.msk.f32.mxu1 %vm779_vm2, %v18651_v25  ;;  %20409 = vst [vmem:[#allocation141_spill] sm:$0xff] %v18667_v17  ;;  %v18671_v25 = vld [vmem:[#allocation2 + $0x191] sm:$0xff] }
 0x32a   :  { %20410 = vst [vmem:[#allocation142_spill] sm:$0xff] %v18671_v25 }
 0x32c   :  { %14566 = vmatmul.mubr.msk.f32.gmra.mrb[34].mxu1 %vm779_vm2, %v18655_v19  ;;  %v18675_v19 = vld [vmem:[#allocation2 + $0x1a9] sm:$0xff] }
 0x32d   :  { %14568 = vmatprep.mubr.msk.f32.mxu1 %vm779_vm2, %v18659_v1  ;;  %20411 = vst [vmem:[#allocation143_spill] sm:$0xff] %v18675_v19  ;;  %v18679_v1 = vld [vmem:[#allocation2 + $0x1b1] sm:$0xff] }
 0x32e   :  { %20412 = vst [vmem:[#allocation144_spill] sm:$0xff] %v18679_v1 }
 0x330   :  { %14569 = vmatmul.mubr.msk.f32.gmra.mrb[36].mxu1 %vm779_vm2, %v18663_v32  ;;  %v18683_v32 = vld [vmem:[#allocation2 + $0x1c9] sm:$0xff] }
 0x331   :  { %14571 = vmatprep.mubr.msk.f32.mxu1 %vm779_vm2, %v18667_v17  ;;  %20413 = vst [vmem:[#allocation145_spill] sm:$0xff] %v18683_v32  ;;  %v18687_v17 = vld [vmem:[#allocation2 + $0x1d1] sm:$0xff] }
 0x332   :  { %20414 = vst [vmem:[#allocation146_spill] sm:$0xff] %v18687_v17 }
 0x334   :  { %14572 = vmatmul.mubr.msk.f32.gmra.mrb[38].mxu1 %vm779_vm2, %v18671_v25  ;;  %v18691_v25 = vld [vmem:[#allocation2 + $0x1e9] sm:$0xff] }
 0x335   :  { %14574 = vmatprep.mubr.msk.f32.mxu1 %vm779_vm2, %v18675_v19  ;;  %20415 = vst [vmem:[#allocation147_spill] sm:$0xff] %v18691_v25  ;;  %v18695_v19 = vld [vmem:[#allocation2 + $0x1f1] sm:$0xff] }
 0x336   :  { %20416 = vst [vmem:[#allocation148_spill] sm:$0xff] %v18695_v19 }
 0x338   :  { %14575 = vmatmul.mubr.msk.f32.gmra.mrb[40].mxu1 %vm779_vm2, %v18679_v1  ;;  %v18699_v1 = vld [vmem:[#allocation2 + $0x209] sm:$0xff] }
 0x339   :  { %14577 = vmatprep.mubr.msk.f32.mxu1 %vm779_vm2, %v18683_v32  ;;  %20417 = vst [vmem:[#allocation149_spill] sm:$0xff] %v18699_v1  ;;  %v18703_v32 = vld [vmem:[#allocation2 + $0x211] sm:$0xff] }
 0x33a   :  { %20418 = vst [vmem:[#allocation150_spill] sm:$0xff] %v18703_v32 }
 0x33c   :  { %14578 = vmatmul.mubr.msk.f32.gmra.mrb[42].mxu1 %vm779_vm2, %v18687_v17  ;;  %v20419_v17 = vld [vmem:[#allocation14_spill] sm:$0xff] }
 0x33d   :  { %14580 = vmatprep.mubr.msk.f32.mxu1 %vm779_vm2, %v18691_v25  ;;  %v20420_v25 = vld [vmem:[#allocation15_spill] sm:$0xff] }
 0x340   :  { %14581 = vmatmul.mubr.msk.f32.gmra.mrb[44].mxu1 %vm779_vm2, %v18695_v19  ;;  %v20421_v19 = vld [vmem:[#allocation16_spill] sm:$0xff] }
 0x341   :  { %14583 = vmatprep.mubr.msk.f32.mxu1 %vm779_vm2, %v18699_v1  ;;  %v20423_v1 = vld [vmem:[#allocation18_spill] sm:$0xff] }
 0x344   :  { %14584 = vmatmul.mubr.msk.f32.gmra.mrb[46].mxu1 %vm779_vm2, %v18703_v32  ;;  %v20425_v32 = vld [vmem:[#allocation20_spill] sm:$0xff] }
 0x345   :  { %14586 = vmatprep.mubr.msk.f32.mxu1 %vm779_vm2, %v17847_v48  ;;  %v20426_v48 = vld [vmem:[#allocation21_spill] sm:$0xff] }
 0x348   :  { %14587 = vmatmul.mubr.msk.f32.gmra.mrb[48].mxu1 %vm779_vm2, %v20419_v17  ;;  %v20427_v17 = vld [vmem:[#allocation22_spill] sm:$0xff] }
 0x349   :  { %14589 = vmatprep.mubr.msk.f32.mxu1 %vm779_vm2, %v20420_v25  ;;  %v20428_v25 = vld [vmem:[#allocation23_spill] sm:$0xff] }
 0x34c   :  { %14590 = vmatmul.mubr.msk.f32.gmra.mrb[50].mxu1 %vm779_vm2, %v20421_v19  ;;  %v20429_v19 = vld [vmem:[#allocation24_spill] sm:$0xff] }
 0x34d   :  { %14592 = vmatprep.mubr.msk.f32.mxu1 %vm779_vm2, %v20422_v49  ;;  %v20430_v49 = vld [vmem:[#allocation25_spill] sm:$0xff] }
 0x350   :  { %14593 = vmatmul.mubr.msk.f32.gmra.mrb[52].mxu1 %vm779_vm2, %v20423_v1  ;;  %v20431_v1 = vld [vmem:[#allocation26_spill] sm:$0xff] }
 0x351   :  { %14595 = vmatprep.mubr.msk.f32.mxu1 %vm779_vm2, %v20424_v41  ;;  %v20432_v41 = vld [vmem:[#allocation27_spill] sm:$0xff] }
 0x354   :  { %14596 = vmatmul.mubr.msk.f32.gmra.mrb[54].mxu1 %vm779_vm2, %v20425_v32  ;;  %v20433_v32 = vld [vmem:[#allocation28_spill] sm:$0xff] }
 0x355   :  { %14598 = vmatprep.mubr.msk.f32.mxu1 %vm779_vm2, %v20426_v48  ;;  %v20434_v48 = vld [vmem:[#allocation29_spill] sm:$0xff] }
 0x358   :  { %14599 = vmatmul.mubr.msk.f32.gmra.mrb[56].mxu1 %vm779_vm2, %v20427_v17  ;;  %v20435_v17 = vld [vmem:[#allocation30_spill] sm:$0xff] }
 0x359   :  { %14601 = vmatprep.mubr.msk.f32.mxu1 %vm779_vm2, %v20428_v25  ;;  %v20436_v25 = vld [vmem:[#allocation31_spill] sm:$0xff] }
 0x35c   :  { %14602 = vmatmul.mubr.msk.f32.gmra.mrb[58].mxu1 %vm779_vm2, %v20429_v19  ;;  %v20437_v19 = vld [vmem:[#allocation32_spill] sm:$0xff] }
 0x35d   :  { %14604 = vmatprep.mubr.msk.f32.mxu1 %vm779_vm2, %v20430_v49  ;;  %v20438_v49 = vld [vmem:[#allocation33_spill] sm:$0xff] }
 0x360   :  { %14605 = vmatmul.mubr.msk.f32.gmra.mrb[60].mxu1 %vm779_vm2, %v20431_v1  ;;  %v20439_v1 = vld [vmem:[#allocation34_spill] sm:$0xff] }
 0x361   :  { %14607 = vmatprep.mubr.msk.f32.mxu1 %vm779_vm2, %v20432_v41  ;;  %v20440_v41 = vld [vmem:[#allocation35_spill] sm:$0xff] }
 0x364   :  { %14608 = vmatmul.mubr.msk.f32.gmra.mrb[62].mxu1 %vm779_vm2, %v20433_v32  ;;  %v20441_v32 = vld [vmem:[#allocation36_spill] sm:$0xff] }
 0x365   :  { %14610 = vmatprep.mubr.msk.f32.mxu1 %vm779_vm2, %v20434_v48  ;;  %v20442_v48 = vld [vmem:[#allocation37_spill] sm:$0xff] }
 0x368   :  { %14611 = vmatmul.mubr.msk.f32.gmra.mrb[0].mxu1 %vm779_vm2, %v20435_v17  ;;  %v20443_v17 = vld [vmem:[#allocation38_spill] sm:$0xff] }
 0x369   :  { %14613 = vmatprep.mubr.msk.f32.mxu1 %vm779_vm2, %v20436_v25  ;;  %v20444_v25 = vld [vmem:[#allocation39_spill] sm:$0xff] }
 0x36c   :  { %14614 = vmatmul.mubr.msk.f32.gmra.mrb[2].mxu1 %vm779_vm2, %v20437_v19  ;;  %v20445_v19 = vld [vmem:[#allocation40_spill] sm:$0xff] }
 0x36d   :  { %14616 = vmatprep.mubr.msk.f32.mxu1 %vm779_vm2, %v20438_v49  ;;  %v20446_v49 = vld [vmem:[#allocation41_spill] sm:$0xff] }
 0x370   :  { %14617 = vmatmul.mubr.msk.f32.gmra.mrb[4].mxu1 %vm779_vm2, %v20439_v1  ;;  %v20447_v1 = vld [vmem:[#allocation42_spill] sm:$0xff] }
 0x371   :  { %14619 = vmatprep.mubr.msk.f32.mxu1 %vm779_vm2, %v20440_v41  ;;  %v18767_v41 = vld [vmem:[#allocation2 + $0x449] sm:$0xff] }
 0x372   :  { %20448 = vst [vmem:[#allocation14_spill] sm:$0xff] %v18767_v41 }
 0x374   :  { %14620 = vmatmul.mubr.msk.f32.gmra.mrb[6].mxu1 %vm779_vm2, %v20441_v32  ;;  %v18771_v32 = vld [vmem:[#allocation2 + $0x451] sm:$0xff] }
 0x375   :  { %14622 = vmatprep.mubr.msk.f32.mxu1 %vm779_vm2, %v20442_v48  ;;  %20449 = vst [vmem:[#allocation15_spill] sm:$0xff] %v18771_v32  ;;  %v12414_v48 = vld [vmem:[%s20198_s3 + $0xf0] sm:$0xff] }
 0x378   :  { %14623 = vmatmul.mubr.msk.f32.gmra.mrb[8].mxu1 %vm779_vm2, %v20443_v17  ;;  %v12415_v17 = vld [vmem:[%s20198_s3 + $0xf8] sm:$0xff] }
 0x379   :  { %14625 = vmatprep.mubr.msk.f32.mxu1 %vm779_vm2, %v20444_v25  ;;  %v5067_v25 = vld [vmem:[#allocation2 + $0x47] sm:$0xff] }
 0x37c   :  { %14626 = vmatmul.mubr.msk.f32.gmra.mrb[10].mxu1 %vm779_vm2, %v20445_v19  ;;  %v15654_v19 = vpack.c.bf16 %v12415_v17, %v12414_v48  ;;  %v5070_v48 = vld [vmem:[#allocation2 + $0x6f] sm:$0xff]  ;;  %v5071_v17 = vld [vmem:[#allocation2 + $0x87] sm:$0xff] }
 0x37d   :  { %14628 = vmatprep.mubr.msk.f32.mxu1 %vm779_vm2, %v20446_v49  ;;  %v5068_v49 = vld [vmem:[#allocation2 + $0x4f] sm:$0xff] }
 0x380   :  { %14629 = vmatmul.mubr.msk.f32.gmra.mrb[12].mxu1 %vm779_vm2, %v20447_v1  ;;  %v12480_v1 = vld [vmem:[%s20198_s3 + $0x100] sm:$0xff] }
 0x381   :  { %14631 = vmatprep.mubr.msk.f32.mxu1 %vm779_vm2, %v18767_v41  ;;  %v12481_v41 = vld [vmem:[%s20198_s3 + $0x108] sm:$0xff] }
 0x384   :  { %14632 = vmatmul.mubr.msk.f32.gmra.mrb[14].mxu1 %vm779_vm2, %v18771_v32  ;;  %v18791_v32 = vpack.c.bf16 %v12481_v41, %v12480_v1  ;;  %v5076_v41 = vld [vmem:[#allocation2 + $0xcf] sm:$0xff]  ;;  %v5077_v1 = vld [vmem:[#allocation2 + $0xe7] sm:$0xff] }
 0x385   :  { %14642 = vmatprep.mubr.msk.f32.mxu1 %vm779_vm2, %v5067_v25  ;;  %v5072_v25 = vld [vmem:[#allocation2 + $0x8f] sm:$0xff] }
 0x388   :  { %14643 = vmatmul.mubr.msk.f32.vlgmr.msra.gmra.mrb[16].mxu1 %vm779_vm2, %v5068_v49  ;;  %v5073_v49 = vld [vmem:[#allocation2 + $0xa7] sm:$0xff] }
 0x389   :  { %15653 = vmatpush3.bf16.msra.mxu1 %v18588_v39  ;;  %14645 = vmatprep.mubr.msk.f32.mxu1 %vm779_vm2, %v5069_v23  ;;  %v5074_v39 = vld [vmem:[#allocation2 + $0xaf] sm:$0xff]  ;;  %v5075_v23 = vld [vmem:[#allocation2 + $0xc7] sm:$0xff] }
 0x38a   :  { %15655 = vmatprep.subr.bf16.mxu1 %v15654_v19 }
 0x38c   :  { %14646 = vmatmul.mubr.msk.f32.gmra.mrb[18].mxu1 %vm779_vm2, %v5070_v48  ;;  %v5079_v48 = vld [vmem:[#allocation2 + $0x107] sm:$0xff] }
 0x38d   :  { %14648 = vmatprep.mubr.msk.f32.mxu1 %vm779_vm2, %v5071_v17  ;;  %15657 = vmatpush3.bf16.msra.mxu1 %v15654_v19  ;;  %v5078_v19 = vld [vmem:[#allocation2 + $0xef] sm:$0xff] }
 0x38e   :  { %15659 = vmatprep.subr.bf16.mxu1 %v18791_v32  ;;  %v5080_v17 = vld [vmem:[#allocation2 + $0x10f] sm:$0xff] }
 0x390   :  { %14649 = vmatmul.mubr.msk.f32.gmra.mrb[20].mxu1 %vm779_vm2, %v5072_v25  ;;  %v5081_v25 = vld [vmem:[#allocation2 + $0x127] sm:$0xff] }
 0x391   :  { %14651 = vmatprep.mubr.msk.f32.mxu1 %vm779_vm2, %v5073_v49  ;;  %v5082_v49 = vld [vmem:[#allocation2 + $0x12f] sm:$0xff] }
 0x394   :  { %14652 = vmatmul.mubr.msk.f32.gmra.mrb[22].mxu1 %vm779_vm2, %v5074_v39  ;;  %v5083_v39 = vld [vmem:[#allocation2 + $0x147] sm:$0xff] }
 0x395   :  { %14654 = vmatprep.mubr.msk.f32.mxu1 %vm779_vm2, %v5075_v23  ;;  %v5084_v23 = vld [vmem:[#allocation2 + $0x14f] sm:$0xff] }
 0x398   :  { %14655 = vmatmul.mubr.msk.f32.gmra.mrb[24].mxu1 %vm779_vm2, %v5076_v41  ;;  %v5085_v41 = vld [vmem:[#allocation2 + $0x167] sm:$0xff] }
 0x399   :  { %14657 = vmatprep.mubr.msk.f32.mxu1 %vm779_vm2, %v5077_v1  ;;  %v5086_v1 = vld [vmem:[#allocation2 + $0x16f] sm:$0xff] }
 0x39c   :  { %14658 = vmatmul.mubr.msk.f32.gmra.mrb[26].mxu1 %vm779_vm2, %v5078_v19  ;;  %v5087_v19 = vld [vmem:[#allocation2 + $0x187] sm:$0xff] }
 0x39d   :  { %14660 = vmatprep.mubr.msk.f32.mxu1 %vm779_vm2, %v5079_v48  ;;  %v5088_v48 = vld [vmem:[#allocation2 + $0x18f] sm:$0xff] }
 0x3a0   :  { %14661 = vmatmul.mubr.msk.f32.gmra.mrb[28].mxu1 %vm779_vm2, %v5080_v17  ;;  %v5089_v17 = vld [vmem:[#allocation2 + $0x1a7] sm:$0xff] }
 0x3a1   :  { %14663 = vmatprep.mubr.msk.f32.mxu1 %vm779_vm2, %v5081_v25  ;;  %v5090_v25 = vld [vmem:[#allocation2 + $0x1af] sm:$0xff] }
 0x3a4   :  { %14664 = vmatmul.mubr.msk.f32.gmra.mrb[30].mxu1 %vm779_vm2, %v5082_v49  ;;  %v5091_v49 = vld [vmem:[#allocation2 + $0x1c7] sm:$0xff] }
 0x3a5   :  { %14666 = vmatprep.mubr.msk.f32.mxu1 %vm779_vm2, %v5083_v39  ;;  %v5092_v39 = vld [vmem:[#allocation2 + $0x1cf] sm:$0xff] }
 0x3a8   :  { %14667 = vmatmul.mubr.msk.f32.gmra.mrb[32].mxu1 %vm779_vm2, %v5084_v23  ;;  %v5093_v23 = vld [vmem:[#allocation2 + $0x1e7] sm:$0xff] }
 0x3a9   :  { %14669 = vmatprep.mubr.msk.f32.mxu1 %vm779_vm2, %v5085_v41  ;;  %v5094_v41 = vld [vmem:[#allocation2 + $0x1ef] sm:$0xff] }
 0x3ac   :  { %14670 = vmatmul.mubr.msk.f32.gmra.mrb[34].mxu1 %vm779_vm2, %v5086_v1  ;;  %v5097_v1 = vld [vmem:[#allocation2 + $0x227] sm:$0xff] }
 0x3ad   :  { %14672 = vmatprep.mubr.msk.f32.mxu1 %vm779_vm2, %v5087_v19  ;;  %v5098_v19 = vld [vmem:[#allocation2 + $0x22f] sm:$0xff] }
 0x3b0   :  { %14673 = vmatmul.mubr.msk.f32.gmra.mrb[36].mxu1 %vm779_vm2, %v5088_v48  ;;  %v5099_v48 = vld [vmem:[#allocation2 + $0x287] sm:$0xff] }
 0x3b1   :  { %14675 = vmatprep.mubr.msk.f32.mxu1 %vm779_vm2, %v5089_v17  ;;  %v5100_v17 = vld [vmem:[#allocation2 + $0x28f] sm:$0xff] }
 0x3b4   :  { %14676 = vmatmul.mubr.msk.f32.gmra.mrb[38].mxu1 %vm779_vm2, %v5090_v25  ;;  %v5101_v25 = vld [vmem:[#allocation2 + $0x2a7] sm:$0xff] }
 0x3b5   :  { %14678 = vmatprep.mubr.msk.f32.mxu1 %vm779_vm2, %v5091_v49  ;;  %v5102_v49 = vld [vmem:[#allocation2 + $0x2af] sm:$0xff] }
 0x3b8   :  { %14679 = vmatmul.mubr.msk.f32.gmra.mrb[40].mxu1 %vm779_vm2, %v5092_v39  ;;  %v5105_v39 = vld [vmem:[#allocation2 + $0x2e7] sm:$0xff] }
 0x3b9   :  { %14681 = vmatprep.mubr.msk.f32.mxu1 %vm779_vm2, %v5093_v23  ;;  %v5106_v23 = vld [vmem:[#allocation2 + $0x2ef] sm:$0xff] }
 0x3bc   :  { %14682 = vmatmul.mubr.msk.f32.gmra.mrb[42].mxu1 %vm779_vm2, %v5094_v41  ;;  %v5107_v41 = vld [vmem:[#allocation2 + $0x307] sm:$0xff] }
 0x3bd   :  { %14684 = vmatprep.mubr.msk.f32.mxu1 %vm779_vm2, %v18105_v61  ;;  %v5103_v61 = vld [vmem:[#allocation2 + $0x2c7] sm:$0xff] }
 0x3c0   :  { %14685 = vmatmul.mubr.msk.f32.gmra.mrb[44].mxu1 %vm779_vm2, %v18111_v0  ;;  %v5104_v0 = vld [vmem:[#allocation2 + $0x2cf] sm:$0xff] }
 0x3c1   :  { %14687 = vmatprep.mubr.msk.f32.mxu1 %vm779_vm2, %v5097_v1  ;;  %v5108_v1 = vld [vmem:[#allocation2 + $0x30f] sm:$0xff] }
 0x3c4   :  { %14688 = vmatmul.mubr.msk.f32.gmra.mrb[46].mxu1 %vm779_vm2, %v5098_v19  ;;  %v5109_v19 = vld [vmem:[#allocation2 + $0x327] sm:$0xff] }
 0x3c5   :  { %14690 = vmatprep.mubr.msk.f32.mxu1 %vm779_vm2, %v5099_v48  ;;  %v5110_v48 = vld [vmem:[#allocation2 + $0x32f] sm:$0xff] }
 0x3c8   :  { %14691 = vmatmul.mubr.msk.f32.gmra.mrb[48].mxu1 %vm779_vm2, %v5100_v17  ;;  %v5115_v17 = vld [vmem:[#allocation2 + $0x387] sm:$0xff] }
 0x3c9   :  { %14693 = vmatprep.mubr.msk.f32.mxu1 %vm779_vm2, %v5101_v25  ;;  %v5116_v25 = vld [vmem:[#allocation2 + $0x38f] sm:$0xff] }
 0x3cc   :  { %14694 = vmatmul.mubr.msk.f32.gmra.mrb[50].mxu1 %vm779_vm2, %v5102_v49  ;;  %v5117_v49 = vld [vmem:[#allocation2 + $0x3a7] sm:$0xff] }
 0x3cd   :  { %14696 = vmatprep.mubr.msk.f32.mxu1 %vm779_vm2, %v5103_v61  ;;  %v5118_v61 = vld [vmem:[#allocation2 + $0x3af] sm:$0xff] }
 0x3d0   :  { %14697 = vmatmul.mubr.msk.f32.gmra.mrb[52].mxu1 %vm779_vm2, %v5104_v0  ;;  %v5123_v0 = vld [vmem:[#allocation2 + $0x407] sm:$0xff] }
 0x3d1   :  { %14699 = vmatprep.mubr.msk.f32.mxu1 %vm779_vm2, %v5105_v39  ;;  %v5124_v39 = vld [vmem:[#allocation2 + $0x40f] sm:$0xff] }
 0x3d4   :  { %14700 = vmatmul.mubr.msk.f32.gmra.mrb[54].mxu1 %vm779_vm2, %v5106_v23  ;;  %v5125_v23 = vld [vmem:[#allocation2 + $0x427] sm:$0xff] }
 0x3d5   :  { %14702 = vmatprep.mubr.msk.f32.mxu1 %vm779_vm2, %v5107_v41  ;;  %v5126_v41 = vld [vmem:[#allocation2 + $0x42f] sm:$0xff] }
 0x3d8   :  { %14703 = vmatmul.mubr.msk.f32.gmra.mrb[56].mxu1 %vm779_vm2, %v5108_v1  ;;  %v5129_v1 = vld [vmem:[#allocation2 + $0x467] sm:$0xff] }
 0x3d9   :  { %14705 = vmatprep.mubr.msk.f32.mxu1 %vm779_vm2, %v5109_v19  ;;  %v5130_v19 = vld [vmem:[#allocation2 + $0x46f] sm:$0xff] }
 0x3dc   :  { %14706 = vmatmul.mubr.msk.f32.gmra.mrb[58].mxu1 %vm779_vm2, %v5110_v48  ;;  %v12482_v48 = vld [vmem:[%s20198_s3 + $0x110] sm:$0xff] }
 0x3dd   :  { %14708 = vmatprep.mubr.msk.f32.mxu1 %vm779_vm2, %v18173_v45  ;;  %v5119_v45 = vld [vmem:[#allocation2 + $0x3c7] sm:$0xff] }
 0x3e0   :  { %14709 = vmatmul.mubr.msk.f32.gmra.mrb[60].mxu1 %vm779_vm2, %v18179_v47  ;;  %v5120_v47 = vld [vmem:[#allocation2 + $0x3cf] sm:$0xff] }
 0x3e1   :  { %14711 = vmatprep.mubr.msk.f32.mxu1 %vm779_vm2, %v18185_v53  ;;  %v5121_v53 = vld [vmem:[#allocation2 + $0x3e7] sm:$0xff] }
 0x3e4   :  { %14712 = vmatmul.mubr.msk.f32.gmra.mrb[62].mxu1 %vm779_vm2, %v18191_v9  ;;  %v5122_v9 = vld [vmem:[#allocation2 + $0x3ef] sm:$0xff] }
 0x3e5   :  { %14714 = vmatprep.mubr.msk.f32.mxu1 %vm779_vm2, %v5115_v17  ;;  %v12483_v17 = vld [vmem:[%s20198_s3 + $0x118] sm:$0xff] }
 0x3e8   :  { %14715 = vmatmul.mubr.msk.f32.gmra.mrb[0].mxu1 %vm779_vm2, %v5116_v25  ;;  %v20493_v25 = vld [vmem:[#allocation150_spill] sm:$0xff] }
 0x3e9   :  { %14717 = vmatprep.mubr.msk.f32.mxu1 %vm779_vm2, %v5117_v49  ;;  %v6518_v49 = vld [vmem:[#allocation2 + $0x231] sm:$0xff] }
 0x3ec   :  { %14718 = vmatmul.mubr.msk.f32.gmra.mrb[2].mxu1 %vm779_vm2, %v5118_v61  ;;  %v6519_v61 = vld [vmem:[#allocation2 + $0x289] sm:$0xff] }
 0x3ed   :  { %14720 = vmatprep.mubr.msk.f32.mxu1 %vm779_vm2, %v5119_v45  ;;  %v6520_v45 = vld [vmem:[#allocation2 + $0x291] sm:$0xff] }
 0x3f0   :  { %14721 = vmatmul.mubr.msk.f32.gmra.mrb[4].mxu1 %vm779_vm2, %v5120_v47  ;;  %v6521_v47 = vld [vmem:[#allocation2 + $0x2a9] sm:$0xff] }
 0x3f1   :  { %14723 = vmatprep.mubr.msk.f32.mxu1 %vm779_vm2, %v5121_v53  ;;  %v6522_v53 = vld [vmem:[#allocation2 + $0x2b1] sm:$0xff] }
 0x3f4   :  { %14724 = vmatmul.mubr.msk.f32.gmra.mrb[6].mxu1 %vm779_vm2, %v5122_v9  ;;  %v6523_v9 = vld [vmem:[#allocation2 + $0x2c9] sm:$0xff] }
 0x3f5   :  { %14726 = vmatprep.mubr.msk.f32.mxu1 %vm779_vm2, %v5123_v0  ;;  %v6524_v0 = vld [vmem:[#allocation2 + $0x2d1] sm:$0xff] }
 0x3f8   :  { %14727 = vmatmul.mubr.msk.f32.gmra.mrb[8].mxu1 %vm779_vm2, %v5124_v39  ;;  %v6525_v39 = vld [vmem:[#allocation2 + $0x2e9] sm:$0xff] }
 0x3f9   :  { %14729 = vmatprep.mubr.msk.f32.mxu1 %vm779_vm2, %v5125_v23  ;;  %v6526_v23 = vld [vmem:[#allocation2 + $0x2f1] sm:$0xff] }
 0x3fc   :  { %14730 = vmatmul.mubr.msk.f32.gmra.mrb[10].mxu1 %vm779_vm2, %v5126_v41  ;;  %v6527_v41 = vld [vmem:[#allocation2 + $0x309] sm:$0xff] }
 0x3fd   :  { %14732 = vmatprep.mubr.msk.f32.mxu1 %vm779_vm2, %v18239_v28  ;;  %v15662_v28 = vpack.c.bf16 %v12483_v17, %v12482_v48  ;;  %v6530_v48 = vld [vmem:[#allocation2 + $0x331] sm:$0xff]  ;;  %v6531_v17 = vld [vmem:[#allocation2 + $0x349] sm:$0xff] }
 0x400   :  { %14733 = vmatmul.mubr.msk.f32.gmra.mrb[12].mxu1 %vm779_vm2, %v18251_v37  ;;  %v20475_v37 = vld [vmem:[#allocation132_spill] sm:$0xff] }
 0x401   :  { %14735 = vmatprep.mubr.msk.f32.mxu1 %vm779_vm2, %v5129_v1  ;;  %v6528_v1 = vld [vmem:[#allocation2 + $0x311] sm:$0xff] }
 0x404   :  { %14736 = vmatmul.mubr.msk.f32.gmra.mrb[14].mxu1 %vm779_vm2, %v5130_v19  ;;  %v6529_v19 = vld [vmem:[#allocation2 + $0x329] sm:$0xff] }
 0x405   :  { %14746 = vmatprep.mubr.msk.f32.mxu1 %vm779_vm2, %v18275_v13  ;;  %v20477_v13 = vld [vmem:[#allocation134_spill] sm:$0xff] }
 0x408   :  { %14747 = vmatmul.mubr.msk.f32.vlgmr.msra.gmra.mrb[16].mxu1 %vm779_vm2, %v18284_v31  ;;  %v20479_v31 = vld [vmem:[#allocation136_spill] sm:$0xff] }
 0x409   :  { %15661 = vmatpush3.bf16.msra.mxu1 %v18791_v32  ;;  %14749 = vmatprep.mubr.msk.f32.mxu1 %vm779_vm2, %v18290_v40  ;;  %v20481_v40 = vld [vmem:[#allocation138_spill] sm:$0xff]  ;;  %v6517_v32 = vld [vmem:[#allocation2 + $0x229] sm:$0xff] }
 0x40a   :  { %15663 = vmatprep.subr.bf16.mxu1 %v15662_v28 }
 0x40c   :  { %14750 = vmatmul.mubr.msk.f32.gmra.mrb[18].mxu1 %vm779_vm2, %v18297_v42  ;;  %v20483_v42 = vld [vmem:[#allocation140_spill] sm:$0xff] }
 0x40d   :  { %14752 = vmatprep.mubr.msk.f32.mxu1 %vm779_vm2, %v18303_v43  ;;  %15665 = vmatpush3.bf16.msra.mxu1 %v15662_v28  ;;  %v20485_v43 = vld [vmem:[#allocation142_spill] sm:$0xff]  ;;  %v6532_v28 = vld [vmem:[#allocation2 + $0x351] sm:$0xff] }
 0x410   :  { %14753 = vmatmul.mubr.msk.f32.gmra.mrb[20].mxu1 %vm779_vm2, %v18309_v63  ;;  %v20487_v63 = vld [vmem:[#allocation144_spill] sm:$0xff] }
 0x411   :  { %14755 = vmatprep.mubr.msk.f32.mxu1 %vm779_vm2, %v18315_v3  ;;  %v20489_v3 = vld [vmem:[#allocation146_spill] sm:$0xff] }
 0x414   :  { %14756 = vmatmul.mubr.msk.f32.gmra.mrb[22].mxu1 %vm779_vm2, %v18321_v30  ;;  %v20463_v30 = vld [vmem:[#allocation120_spill] sm:$0xff] }
 0x415   :  { %14758 = vmatprep.mubr.msk.f32.mxu1 %vm779_vm2, %v18327_v24  ;;  %v20461_v24 = vld [vmem:[#allocation118_spill] sm:$0xff] }
 0x418   :  { %14759 = vmatmul.mubr.msk.f32.gmra.mrb[24].mxu1 %vm779_vm2, %v18331_v22  ;;  %v20460_v22 = vld [vmem:[#allocation117_spill] sm:$0xff] }
 0x419   :  { %14761 = vmatprep.mubr.msk.f32.mxu1 %vm779_vm2, %v18337_v14  ;;  %v20458_v14 = vld [vmem:[#allocation115_spill] sm:$0xff] }
 0x41c   :  { %14762 = vmatmul.mubr.msk.f32.gmra.mrb[26].mxu1 %vm779_vm2, %v18345_v8  ;;  %v20455_v8 = vld [vmem:[#allocation112_spill] sm:$0xff] }
 0x41d   :  { %14764 = vmatprep.mubr.msk.f32.mxu1 %vm779_vm2, %v18351_v2  ;;  %v20453_v2 = vld [vmem:[#allocation110_spill] sm:$0xff] }
 0x420   :  { %14765 = vmatmul.mubr.msk.f32.gmra.mrb[28].mxu1 %vm779_vm2, %v18357_v59  ;;  %v20451_v59 = vld [vmem:[#allocation108_spill] sm:$0xff] }
 0x421   :  { %14767 = vmatprep.mubr.msk.f32.mxu1 %vm779_vm2, %v18363_v56  ;;  %v5808_v56 = vld [vmem:[#allocation2 + $0x230] sm:$0xff] }
 0x424   :  { %14768 = vmatmul.mubr.msk.f32.gmra.mrb[30].mxu1 %vm779_vm2, %v18369_v4  ;;  %v20454_v4 = vld [vmem:[#allocation111_spill] sm:$0xff] }
 0x425   :  { %14770 = vmatprep.mubr.msk.f32.mxu1 %vm779_vm2, %v18375_v18  ;;  %v20452_v18 = vld [vmem:[#allocation109_spill] sm:$0xff] }
 0x428   :  { %14771 = vmatmul.mubr.msk.f32.gmra.mrb[32].mxu1 %vm779_vm2, %v18381_v12  ;;  %v20457_v12 = vld [vmem:[#allocation114_spill] sm:$0xff] }
 0x429   :  { %14773 = vmatprep.mubr.msk.f32.mxu1 %vm779_vm2, %v18387_v52  ;;  %v5807_v52 = vld [vmem:[#allocation2 + $0x228] sm:$0xff] }
 0x42c   :  { %14774 = vmatmul.mubr.msk.f32.gmra.mrb[34].mxu1 %vm779_vm2, %v18393_v26  ;;  %v20462_v26 = vld [vmem:[#allocation119_spill] sm:$0xff] }
 0x42d   :  { %14776 = vmatprep.mubr.msk.f32.mxu1 %vm779_vm2, %v18399_v58  ;;  %v20450_v58 = vld [vmem:[#allocation107_spill] sm:$0xff] }
 0x430   :  { %14777 = vmatmul.mubr.msk.f32.gmra.mrb[36].mxu1 %vm779_vm2, %v18405_v60  ;;  %v20488_v60 = vld [vmem:[#allocation145_spill] sm:$0xff] }
 0x431   :  { %14779 = vmatprep.mubr.msk.f32.mxu1 %vm779_vm2, %v18411_v10  ;;  %v20456_v10 = vld [vmem:[#allocation113_spill] sm:$0xff] }
 0x434   :  { %14780 = vmatmul.mubr.msk.f32.gmra.mrb[38].mxu1 %vm779_vm2, %v18417_v38  ;;  %v20484_v38 = vld [vmem:[#allocation141_spill] sm:$0xff] }
 0x435   :  { %14782 = vmatprep.mubr.msk.f32.mxu1 %vm779_vm2, %v18423_v20  ;;  %v20459_v20 = vld [vmem:[#allocation116_spill] sm:$0xff] }
 0x438   :  { %14783 = vmatmul.mubr.msk.f32.gmra.mrb[40].mxu1 %vm779_vm2, %v18427_v44  ;;  %v20486_v44 = vld [vmem:[#allocation143_spill] sm:$0xff] }
 0x439   :  { %14785 = vmatprep.mubr.msk.f32.mxu1 %vm779_vm2, %v18431_v36  ;;  %v20480_v36 = vld [vmem:[#allocation137_spill] sm:$0xff] }
 0x43c   :  { %14786 = vmatmul.mubr.msk.f32.gmra.mrb[42].mxu1 %vm779_vm2, %v18435_v7  ;;  %v20490_v7 = vld [vmem:[#allocation147_spill] sm:$0xff] }
 0x43d   :  { %14788 = vmatprep.mubr.msk.f32.mxu1 %vm779_vm2, %v18439_v21  ;;  %v20482_v21 = vld [vmem:[#allocation139_spill] sm:$0xff] }
 0x440   :  { %14789 = vmatmul.mubr.msk.f32.gmra.mrb[44].mxu1 %vm779_vm2, %v18443_v29  ;;  %v20478_v29 = vld [vmem:[#allocation135_spill] sm:$0xff] }
 0x441   :  { %14791 = vmatprep.mubr.msk.f32.mxu1 %vm779_vm2, %v5807_v52  ;;  %v6533_v52 = vld [vmem:[#allocation2 + $0x369] sm:$0xff] }
 0x444   :  { %14792 = vmatmul.mubr.msk.f32.gmra.mrb[46].mxu1 %vm779_vm2, %v5808_v56  ;;  %v6534_v56 = vld [vmem:[#allocation2 + $0x371] sm:$0xff] }
 0x445   :  { %14794 = vmatprep.mubr.msk.f32.mxu1 %vm779_vm2, %v18449_v57  ;;  %v20476_v57 = vld [vmem:[#allocation133_spill] sm:$0xff] }
 0x448   :  { %14795 = vmatmul.mubr.msk.f32.gmra.mrb[48].mxu1 %vm779_vm2, %v18453_v35  ;;  %v20474_v35 = vld [vmem:[#allocation131_spill] sm:$0xff] }
 0x449   :  { %14797 = vmatprep.mubr.msk.f32.mxu1 %vm779_vm2, %v18457_v55  ;;  %v20473_v55 = vld [vmem:[#allocation130_spill] sm:$0xff] }
 0x44c   :  { %14798 = vmatmul.mubr.msk.f32.gmra.mrb[50].mxu1 %vm779_vm2, %v18461_v34  ;;  %v20472_v34 = vld [vmem:[#allocation129_spill] sm:$0xff] }
 0x44d   :  { %14800 = vmatprep.mubr.msk.f32.mxu1 %vm779_vm2, %v18465_v62  ;;  %v20491_v62 = vld [vmem:[#allocation148_spill] sm:$0xff] }
 0x450   :  { %14801 = vmatmul.mubr.msk.f32.gmra.mrb[52].mxu1 %vm779_vm2, %v18469_v11  ;;  %v20492_v11 = vld [vmem:[#allocation149_spill] sm:$0xff] }
 0x451   :  { %14803 = vmatprep.mubr.msk.f32.mxu1 %vm779_vm2, %v18473_v27  ;;  %v20471_v27 = vld [vmem:[#allocation128_spill] sm:$0xff] }
 0x454   :  { %14804 = vmatmul.mubr.msk.f32.gmra.mrb[54].mxu1 %vm779_vm2, %v18477_v16  ;;  %v20470_v16 = vld [vmem:[#allocation127_spill] sm:$0xff] }
 0x455   :  { %14806 = vmatprep.mubr.msk.f32.mxu1 %vm779_vm2, %v18481_v15  ;;  %v20468_v15 = vld [vmem:[#allocation125_spill] sm:$0xff] }
 0x458   :  { %14807 = vmatmul.mubr.msk.f32.gmra.mrb[56].mxu1 %vm779_vm2, %v18485_v6  ;;  %v20467_v6 = vld [vmem:[#allocation124_spill] sm:$0xff] }
 0x459   :  { %14809 = vmatprep.mubr.msk.f32.mxu1 %vm779_vm2, %v18489_v54  ;;  %v20466_v54 = vld [vmem:[#allocation123_spill] sm:$0xff] }
 0x45c   :  { %14810 = vmatmul.mubr.msk.f32.gmra.mrb[58].mxu1 %vm779_vm2, %v18493_v5  ;;  %v20465_v5 = vld [vmem:[#allocation122_spill] sm:$0xff] }
 0x45d   :  { %14812 = vmatprep.mubr.msk.f32.mxu1 %vm779_vm2, %v18497_v51  ;;  %v20464_v51 = vld [vmem:[#allocation121_spill] sm:$0xff] }
 0x460   :  { %14813 = vmatmul.mubr.msk.f32.gmra.mrb[60].mxu1 %vm779_vm2, %v18501_v46  ;;  %v5840_v46 = vld [vmem:[#allocation2 + $0x470] sm:$0xff] }
 0x461   :  { %14815 = vmatprep.mubr.msk.f32.mxu1 %vm779_vm2, %v18505_v33  ;;  %v5839_v33 = vld [vmem:[#allocation2 + $0x468] sm:$0xff] }
 0x464   :  { %14816 = vmatmul.mubr.msk.f32.gmra.mrb[62].mxu1 %vm779_vm2, %v20450_v58  ;;  %v6535_v58 = vld [vmem:[#allocation2 + $0x389] sm:$0xff] }
 0x465   :  { %14818 = vmatprep.mubr.msk.f32.mxu1 %vm779_vm2, %v20451_v59  ;;  %v6536_v59 = vld [vmem:[#allocation2 + $0x391] sm:$0xff] }
 0x468   :  { %14819 = vmatmul.mubr.msk.f32.gmra.mrb[0].mxu1 %vm779_vm2, %v20452_v18  ;;  %v6537_v18 = vld [vmem:[#allocation2 + $0x3a9] sm:$0xff] }
 0x469   :  { %14821 = vmatprep.mubr.msk.f32.mxu1 %vm779_vm2, %v20453_v2  ;;  %v6538_v2 = vld [vmem:[#allocation2 + $0x3b1] sm:$0xff] }
 0x46c   :  { %14822 = vmatmul.mubr.msk.f32.gmra.mrb[2].mxu1 %vm779_vm2, %v20454_v4  ;;  %v6539_v4 = vld [vmem:[#allocation2 + $0x3c9] sm:$0xff] }
 0x46d   :  { %14824 = vmatprep.mubr.msk.f32.mxu1 %vm779_vm2, %v20455_v8  ;;  %v6540_v8 = vld [vmem:[#allocation2 + $0x3d1] sm:$0xff] }
 0x470   :  { %14825 = vmatmul.mubr.msk.f32.gmra.mrb[4].mxu1 %vm779_vm2, %v20456_v10  ;;  %v6541_v10 = vld [vmem:[#allocation2 + $0x3e9] sm:$0xff] }
 0x471   :  { %14827 = vmatprep.mubr.msk.f32.mxu1 %vm779_vm2, %v20457_v12  ;;  %v7583_v12 = vld [vmem:[#allocation5 + $0x20] sm:$0xff] }
 0x474   :  { %14828 = vmatmul.mubr.msk.f32.gmra.mrb[6].mxu1 %vm779_vm2, %v20458_v14  ;;  %v7584_v14 = vld [vmem:[#allocation5 + $0x28] sm:$0xff] }
 0x475   :  { %14830 = vmatprep.mubr.msk.f32.mxu1 %vm779_vm2, %v20459_v20  ;;  %v15666_v20 = vpack.c.bf16 %v7584_v14, %v7583_v12 }
 0x477   :  { %15667 = vmatprep.subr.bf16.mxu0 %v15666_v20 }
 0x478   :  { %14831 = vmatmul.mubr.msk.f32.gmra.mrb[8].mxu1 %vm779_vm2, %v20460_v22  ;;  %v6542_v22 = vld [vmem:[#allocation2 + $0x3f1] sm:$0xff]  ;;  %15669 = vmatpush3.bf16.msra.mxu0 %v15666_v20 }
 0x479   :  { %14833 = vmatprep.mubr.msk.f32.mxu1 %vm779_vm2, %v20461_v24  ;;  %v6543_v24 = vld [vmem:[#allocation2 + $0x409] sm:$0xff] }
 0x47a   :  { %v20505_v20 = vld [vmem:[#allocation68_spill] sm:$0xff] }
 0x47c   :  { %14834 = vmatmul.mubr.msk.f32.gmra.mrb[10].mxu1 %vm779_vm2, %v20462_v26  ;;  %v6544_v26 = vld [vmem:[#allocation2 + $0x411] sm:$0xff] }
 0x47d   :  { %14836 = vmatprep.mubr.msk.f32.mxu1 %vm779_vm2, %v20463_v30  ;;  %v6545_v30 = vld [vmem:[#allocation2 + $0x429] sm:$0xff] }
 0x480   :  { %14837 = vmatmul.mubr.msk.f32.gmra.mrb[12].mxu1 %vm779_vm2, %v18565_v50  ;;  %v20469_v50 = vld [vmem:[#allocation126_spill] sm:$0xff] }
 0x481   :  { %14839 = vmatprep.mubr.msk.f32.mxu1 %vm779_vm2, %v5839_v33  ;;  %v7585_v33 = vld [vmem:[#allocation5 + $0x30] sm:$0xff] }
 0x484   :  { %14840 = vmatmul.mubr.msk.f32.gmra.mrb[14].mxu1 %vm779_vm2, %v5840_v46  ;;  %v7586_v46 = vld [vmem:[#allocation5 + $0x38] sm:$0xff] }
 0x485   :  { %14850 = vmatprep.mubr.msk.f32.mxu1 %vm779_vm2, %v20464_v51  ;;  %v6546_v51 = vld [vmem:[#allocation2 + $0x431] sm:$0xff] }
 0x488   :  { %14851 = vmatmul.mubr.msk.f32.vlgmr.msra.gmra.mrb[16].mxu1 %vm779_vm2, %v20465_v5  ;;  %v15670_v5 = vpack.c.bf16 %v7586_v46, %v7585_v33  ;;  %v20506_v46 = vld [vmem:[#allocation69_spill] sm:$0xff] }
 0x489   :  { %14853 = vmatprep.mubr.msk.f32.mxu1 %vm779_vm2, %v20466_v54  ;;  %v20494_v54 = vld [vmem:[#allocation14_spill] sm:$0xff] }
 0x48a   :  { %15671 = vmatprep.subr.bf16.mxu0 %v15670_v5 }
 0x48b   :  { %15673 = vmatpush3.bf16.msra.mxu0 %v15670_v5 }
 0x48c   :  { %14854 = vmatmul.mubr.msk.f32.gmra.mrb[18].mxu1 %vm779_vm2, %v20467_v6  ;;  %v6549_v6 = vld [vmem:[#allocation2 + $0x469] sm:$0xff] }
 0x48d   :  { %14856 = vmatprep.mubr.msk.f32.mxu1 %vm779_vm2, %v20468_v15  ;;  %v7566_v15 = vld [vmem:[#allocation3 + $0x8] sm:$0xff] }
 0x48e   :  { %14954 = vmatprep.mubr.msk.f32.mxu0 %vm779_vm2, %v7566_v15 }
 0x490   :  { %14857 = vmatmul.mubr.msk.f32.gmra.mrb[20].mxu1 %vm779_vm2, %v20469_v50  ;;  %v20495_v50 = vld [vmem:[#allocation15_spill] sm:$0xff] }
 0x491   :  { %14859 = vmatprep.mubr.msk.f32.mxu1 %vm779_vm2, %v20470_v16  ;;  %v6550_v16 = vld [vmem:[#allocation2 + $0x471] sm:$0xff] }
 0x494   :  { %14860 = vmatmul.mubr.msk.f32.gmra.mrb[22].mxu1 %vm779_vm2, %v20471_v27  ;;  %v7562_v27 = vld [vmem:[#allocation5] sm:$0xff] }
 0x495   :  { %14862 = vmatprep.mubr.msk.f32.mxu1 %vm779_vm2, %v20472_v34  ;;  %v7563_v34 = vld [vmem:[#allocation5 + $0x8] sm:$0xff] }
 0x498   :  { %14863 = vmatmul.mubr.msk.f32.gmra.mrb[24].mxu1 %vm779_vm2, %v20473_v55  ;;  %v19091_v55 = vpack.c.bf16 %v7563_v34, %v7562_v27 }
 0x499   :  { %14865 = vmatprep.mubr.msk.f32.mxu1 %vm779_vm2, %v20474_v35 }
 0x49a   :  { %15675 = vmatprep.subr.bf16.mxu0 %v19091_v55 }
 0x49c   :  { %14866 = vmatmul.mubr.msk.f32.gmra.mrb[26].mxu1 %vm779_vm2, %v20475_v37  ;;  %v20496_v37 = vld [vmem:[#allocation59_spill] sm:$0xff] }
 0x49d   :  { %14868 = vmatprep.mubr.msk.f32.mxu1 %vm779_vm2, %v20476_v57 }
 0x4a0   :  { %14869 = vmatmul.mubr.msk.f32.gmra.mrb[28].mxu1 %vm779_vm2, %v20477_v13 }
 0x4a1   :  { %14871 = vmatprep.mubr.msk.f32.mxu1 %vm779_vm2, %v20478_v29  ;;  %v19098_v29 = vld [vmem:[%s20199_s4] ss:$0 sm:$0xff] }
 0x4a4   :  { %14872 = vmatmul.mubr.msk.f32.gmra.mrb[30].mxu1 %vm779_vm2, %v20479_v31  ;;  %v20497_v31 = vld [vmem:[#allocation60_spill] sm:$0xff] }
 0x4a5   :  { %14874 = vmatprep.mubr.msk.f32.mxu1 %vm779_vm2, %v20480_v36 }
 0x4a8   :  { %14875 = vmatmul.mubr.msk.f32.gmra.mrb[32].mxu1 %vm779_vm2, %v20481_v40 }
 0x4a9   :  { %14877 = vmatprep.mubr.msk.f32.mxu1 %vm779_vm2, %v20482_v21 }
 0x4ac   :  { %14878 = vmatmul.mubr.msk.f32.gmra.mrb[34].mxu1 %vm779_vm2, %v20483_v42  ;;  %v20498_v42 = vld [vmem:[#allocation61_spill] sm:$0xff] }
 0x4ad   :  { %14880 = vmatprep.mubr.msk.f32.mxu1 %vm779_vm2, %v20484_v38 }
 0x4b0   :  { %14881 = vmatmul.mubr.msk.f32.gmra.mrb[36].mxu1 %vm779_vm2, %v20485_v43 }
 0x4b1   :  { %14883 = vmatprep.mubr.msk.f32.mxu1 %vm779_vm2, %v20486_v44 }
 0x4b4   :  { %14884 = vmatmul.mubr.msk.f32.gmra.mrb[38].mxu1 %vm779_vm2, %v20487_v63  ;;  %v20499_v63 = vld [vmem:[#allocation62_spill] sm:$0xff] }
 0x4b5   :  { %14886 = vmatprep.mubr.msk.f32.mxu1 %vm779_vm2, %v20488_v60 }
 0x4b8   :  { %14887 = vmatmul.mubr.msk.f32.gmra.mrb[40].mxu1 %vm779_vm2, %v20489_v3 }
 0x4b9   :  { %14889 = vmatprep.mubr.msk.f32.mxu1 %vm779_vm2, %v20490_v7 }
 0x4bc   :  { %14890 = vmatmul.mubr.msk.f32.gmra.mrb[42].mxu1 %vm779_vm2, %v20491_v62 }
 0x4bd   :  { %14892 = vmatprep.mubr.msk.f32.mxu1 %vm779_vm2, %v20492_v11 }
 0x4c0   :  { %14893 = vmatmul.mubr.msk.f32.gmra.mrb[44].mxu1 %vm779_vm2, %v20493_v25  ;;  %v20500_v25 = vld [vmem:[#allocation63_spill] sm:$0xff] }
 0x4c1   :  { %14895 = vmatprep.mubr.msk.f32.mxu1 %vm779_vm2, %v6517_v32 }
 0x4c4   :  { %14896 = vmatmul.mubr.msk.f32.gmra.mrb[46].mxu1 %vm779_vm2, %v6518_v49 }
 0x4c5   :  { %14898 = vmatprep.mubr.msk.f32.mxu1 %vm779_vm2, %v6519_v61 }
 0x4c8   :  { %14899 = vmatmul.mubr.msk.f32.gmra.mrb[48].mxu1 %vm779_vm2, %v6520_v45 }
 0x4c9   :  { %14901 = vmatprep.mubr.msk.f32.mxu1 %vm779_vm2, %v6521_v47 }
 0x4cc   :  { %14902 = vmatmul.mubr.msk.f32.gmra.mrb[50].mxu1 %vm779_vm2, %v6522_v53  ;;  %v20501_v53 = vld [vmem:[#allocation64_spill] sm:$0xff] }
 0x4cd   :  { %14904 = vmatprep.mubr.msk.f32.mxu1 %vm779_vm2, %v6523_v9 }
 0x4d0   :  { %14905 = vmatmul.mubr.msk.f32.gmra.mrb[52].mxu1 %vm779_vm2, %v6524_v0 }
 0x4d1   :  { %14907 = vmatprep.mubr.msk.f32.mxu1 %vm779_vm2, %v6525_v39 }
 0x4d4   :  { %14908 = vmatmul.mubr.msk.f32.gmra.mrb[54].mxu1 %vm779_vm2, %v6526_v23 }
 0x4d5   :  { %14910 = vmatprep.mubr.msk.f32.mxu1 %vm779_vm2, %v6527_v41 }
 0x4d8   :  { %14911 = vmatmul.mubr.msk.f32.gmra.mrb[56].mxu1 %vm779_vm2, %v6528_v1  ;;  %v20502_v1 = vld [vmem:[#allocation65_spill] sm:$0xff] }
 0x4d9   :  { %14913 = vmatprep.mubr.msk.f32.mxu1 %vm779_vm2, %v6529_v19 }
 0x4dc   :  { %14914 = vmatmul.mubr.msk.f32.gmra.mrb[58].mxu1 %vm779_vm2, %v6530_v48 }
 0x4dd   :  { %14916 = vmatprep.mubr.msk.f32.mxu1 %vm779_vm2, %v6531_v17 }
 0x4e0   :  { %14917 = vmatmul.mubr.msk.f32.gmra.mrb[60].mxu1 %vm779_vm2, %v6532_v28  ;;  %v20503_v28 = vld [vmem:[#allocation66_spill] sm:$0xff] }
 0x4e1   :  { %14919 = vmatprep.mubr.msk.f32.mxu1 %vm779_vm2, %v6533_v52 }
 0x4e4   :  { %14920 = vmatmul.mubr.msk.f32.gmra.mrb[62].mxu1 %vm779_vm2, %v6534_v56 }
 0x4e5   :  { %14922 = vmatprep.mubr.msk.f32.mxu1 %vm779_vm2, %v6535_v58 }
 0x4e8   :  { %14923 = vmatmul.mubr.msk.f32.gmra.mrb[0].mxu1 %vm779_vm2, %v6536_v59 }
 0x4e9   :  { %14925 = vmatprep.mubr.msk.f32.mxu1 %vm779_vm2, %v6537_v18 }
 0x4ec   :  { %14926 = vmatmul.mubr.msk.f32.gmra.mrb[2].mxu1 %vm779_vm2, %v6538_v2 }
 0x4ed   :  { %14928 = vmatprep.mubr.msk.f32.mxu1 %vm779_vm2, %v6539_v4  ;;  %v20504_v4 = vld [vmem:[#allocation67_spill] sm:$0xff] }
 0x4f0   :  { %14929 = vmatmul.mubr.msk.f32.gmra.mrb[4].mxu1 %vm779_vm2, %v6540_v8 }
 0x4f1   :  { %14931 = vmatprep.mubr.msk.f32.mxu1 %vm779_vm2, %v6541_v10 }
 0x4f4   :  { %14932 = vmatmul.mubr.msk.f32.gmra.mrb[6].mxu1 %vm779_vm2, %v6542_v22 }
 0x4f5   :  { %14934 = vmatprep.mubr.msk.f32.mxu1 %vm779_vm2, %v6543_v24 }
 0x4f8   :  { %14935 = vmatmul.mubr.msk.f32.gmra.mrb[8].mxu1 %vm779_vm2, %v6544_v26 }
 0x4f9   :  { %14937 = vmatprep.mubr.msk.f32.mxu1 %vm779_vm2, %v6545_v30 }
 0x4fc   :  { %14938 = vmatmul.mubr.msk.f32.gmra.mrb[10].mxu1 %vm779_vm2, %v6546_v51 }
 0x4fd   :  { %14940 = vmatprep.mubr.msk.f32.mxu1 %vm779_vm2, %v20494_v54 }
 0x500   :  { %14941 = vmatmul.mubr.msk.f32.gmra.mrb[12].mxu1 %vm779_vm2, %v20495_v50  ;;  %v20507_v50 = vld [vmem:[#allocation70_spill] sm:$0xff] }
 0x501   :  { %14943 = vmatprep.mubr.msk.f32.mxu1 %vm779_vm2, %v6549_v6 }
 0x504   :  { %14944 = vmatmul.mubr.msk.f32.gmra.mrb[14].mxu1 %vm779_vm2, %v6550_v16 }
 0x55b   :  { %v14852_v35 = vpop.f32.mrb[16].mxu1 }
 0x55c   :  { %v15886_v57 = vadd.f32 %v14852_v35, %v20496_v37  ;;  %v6814_v13 = vpop.f32.mrb[17].mxu1 }
 0x55d   :  { %v15887_v36 = vadd.f32 %v6814_v13, %v20497_v31  ;;  %v20508_v31 = vld [vmem:[#allocation71_spill] sm:$0xff] }
 0x55e   :  { %v7205_v21 = vadd.f32 %v15886_v57, %v19098_v29 }
 0x55f   :  { %v14855_v40 = vpop.f32.mrb[18].mxu1  ;;  %v7204_v44 = vadd.f32 %v15887_v36, %v19098_v29 }
 0x560   :  { %v15888_v38 = vadd.f32 %v14855_v40, %v20498_v42  ;;  %v6824_v43 = vpop.f32.mrb[19].mxu1  ;;  %v7269_v11 = vmax.f32 %v7205_v21, 0.0 }
 0x561   :  { %v15889_v60 = vadd.f32 %v6824_v43, %v20499_v63  ;;  %v7268_v45 = vmax.f32 %v7204_v44, 0.0  ;;  %v7564_v63 = vld [vmem:[#allocation5 + $0x10] sm:$0xff] }
 0x562   :  { %v7207_v3 = vadd.f32 %v15888_v38, %v19098_v29  ;;  %v20509_v38 = vld [vmem:[#allocation72_spill] sm:$0xff] }
 0x563   :  { %v7206_v7 = vadd.f32 %v15889_v60, %v19098_v29  ;;  %v14858_v62 = vpop.f32.mrb[20].mxu1  ;;  %v7565_v60 = vld [vmem:[#allocation5 + $0x18] sm:$0xff] }
 0x564   :  { %v7271_v32 = vmax.f32 %v7207_v3, 0.0  ;;  %v15890_v49 = vadd.f32 %v14858_v62, %v20500_v25  ;;  %v6834_v61 = vpop.f32.mrb[21].mxu1 }
 0x565   :  { %v7270_v47 = vmax.f32 %v7206_v7, 0.0  ;;  %v15891_v9 = vadd.f32 %v6834_v61, %v20501_v53 }
 0x566   :  { %v7333_v0 = vmax.f32 %v7269_v11, %v7271_v32  ;;  %v7209_v41 = vadd.f32 %v15890_v49, %v19098_v29  ;;  %v20510_v11 = vld [vmem:[#allocation73_spill] sm:$0xff] }
 0x567   :  { %v7332_v39 = vmax.f32 %v7268_v45, %v7270_v47  ;;  %v14861_v23 = vpop.f32.mrb[22].mxu1  ;;  %v7208_v17 = vadd.f32 %v15891_v9, %v19098_v29  ;;  %v20511_v47 = vld [vmem:[#allocation74_spill] sm:$0xff] }
 0x568   :  { %7365 = vst.msk [vmem:[#allocation2 + $0x30] sm:$0xff] %vm779_vm2, %v7333_v0  ;;  %v15892_v19 = vadd.f32 %v14861_v23, %v20502_v1  ;;  %v6844_v48 = vpop.f32.mrb[23].mxu1  ;;  %v7273_v18 = vmax.f32 %v7209_v41, 0.0  ;;  %v15678_v0 = vpack.c.bf16 %v7565_v60, %v7564_v63  ;;  %v7990_v41 = vld [vmem:[#allocation5 + $0x40] sm:$0xff]  ;;  %v7991_v1 = vld [vmem:[#allocation5 + $0x48] sm:$0xff] }
 0x569   :  { %7364 = vst.msk [vmem:[#allocation2 + $0x28] sm:$0xff] %vm779_vm2, %v7332_v39  ;;  %v15893_v52 = vadd.f32 %v6844_v48, %v20503_v28  ;;  %v7272_v12 = vmax.f32 %v7208_v17, 0.0 }
 0x56a   :  { %v7211_v56 = vadd.f32 %v15892_v19, %v19098_v29 }
 0x56b   :  { %v7210_v58 = vadd.f32 %v15893_v52, %v19098_v29  ;;  %v14864_v59 = vpop.f32.mrb[24].mxu1  ;;  %v20512_v52 = vld [vmem:[#allocation75_spill] sm:$0xff] }
 0x56c   :  { %v7275_v2 = vmax.f32 %v7211_v56, 0.0  ;;  %v15894_v8 = vadd.f32 %v14864_v59, %v20504_v4  ;;  %v6854_v10 = vpop.f32.mrb[25].mxu1 }
 0x56d   :  { %v7274_v14 = vmax.f32 %v7210_v58, 0.0  ;;  %v15895_v22 = vadd.f32 %v6854_v10, %v20505_v20 }
 0x56e   :  { %v7335_v24 = vmax.f32 %v7273_v18, %v7275_v2  ;;  %v7213_v33 = vadd.f32 %v15894_v8, %v19098_v29  ;;  %v20513_v2 = vld [vmem:[#allocation76_spill] sm:$0xff]  ;;  %v19146_v8 = vpack.c.bf16 %v7991_v1, %v7990_v41 }
 0x56f   :  { %v7334_v26 = vmax.f32 %v7272_v12, %v7274_v14  ;;  %v14867_v30 = vpop.f32.mrb[26].mxu1  ;;  %v7212_v15 = vadd.f32 %v15895_v22, %v19098_v29  ;;  %v20514_v22 = vld [vmem:[#allocation77_spill] sm:$0xff] }
 0x570   :  { %7367 = vst.msk [vmem:[#allocation2 + $0x50] sm:$0xff] %vm779_vm2, %v7335_v24  ;;  %v15896_v51 = vadd.f32 %v14867_v30, %v20506_v46  ;;  %v6864_v5 = vpop.f32.mrb[27].mxu1  ;;  %v7397_v54 = vld [vmem:[#allocation2 + $0x28] ss:$2 sm:$0xff]  ;;  %v7429_v6 = vld [vmem:[#allocation2 + $0x29] ss:$2 sm:$0xff] }
 0x571   :  { %7366 = vst.msk [vmem:[#allocation2 + $0x48] sm:$0xff] %vm779_vm2, %v7334_v26  ;;  %v15897_v16 = vadd.f32 %v6864_v5, %v20507_v50  ;;  %v7460_v27 = vmax.f32 %v7397_v54, %v7429_v6  ;;  %v7277_v57 = vmax.f32 %v7213_v33, 0.0  ;;  %v7276_v21 = vmax.f32 %v7212_v15, 0.0  ;;  %v20515_v46 = vld [vmem:[#allocation78_spill] sm:$0xff] }
 0x572   :  { %v7215_v34 = vadd.f32 %v15896_v51, %v19098_v29 }
 0x573   :  { %v7214_v35 = vadd.f32 %v15897_v16, %v19098_v29  ;;  %v14870_v37 = vpop.f32.mrb[28].mxu1  ;;  %7530 = vst.msk [vmem:[#allocation3 + $0x20] sm:$0xff] %vm779_vm2, %v7460_v27 }
 0x574   :  { %v7279_v13 = vmax.f32 %v7215_v34, 0.0  ;;  %v15898_v36 = vadd.f32 %v14870_v37, %v20508_v31  ;;  %v6874_v40 = vpop.f32.mrb[29].mxu1  ;;  %v20516_v34 = vld [vmem:[#allocation79_spill] sm:$0xff]  ;;  %v20517_v31 = vld [vmem:[#allocation80_spill] sm:$0xff] }
 0x575   :  { %v7278_v42 = vmax.f32 %v7214_v35, 0.0  ;;  %v15899_v43 = vadd.f32 %v6874_v40, %v20509_v38 }
 0x576   :  { %v7337_v44 = vmax.f32 %v7277_v57, %v7279_v13  ;;  %v7217_v62 = vadd.f32 %v15898_v36, %v19098_v29 }
 0x577   :  { %v7336_v3 = vmax.f32 %v7276_v21, %v7278_v42  ;;  %v14873_v7 = vpop.f32.mrb[30].mxu1  ;;  %v7216_v45 = vadd.f32 %v15899_v43, %v19098_v29  ;;  %v20518_v43 = vld [vmem:[#allocation81_spill] sm:$0xff] }
 0x578   :  { %7369 = vst.msk [vmem:[#allocation2 + $0x70] sm:$0xff] %vm779_vm2, %v7337_v44  ;;  %v15900_v32 = vadd.f32 %v14873_v7, %v20510_v11  ;;  %v6884_v25 = vpop.f32.mrb[31].mxu1  ;;  %v7399_v49 = vld [vmem:[#allocation2 + $0x48] ss:$2 sm:$0xff]  ;;  %v7431_v61 = vld [vmem:[#allocation2 + $0x49] ss:$2 sm:$0xff] }
 0x579   :  { %7368 = vst.msk [vmem:[#allocation2 + $0x68] sm:$0xff] %vm779_vm2, %v7336_v3  ;;  %v15901_v53 = vadd.f32 %v6884_v25, %v20511_v47  ;;  %v7461_v9 = vmax.f32 %v7399_v49, %v7431_v61  ;;  %v7281_v17 = vmax.f32 %v7217_v62, 0.0  ;;  %v7280_v59 = vmax.f32 %v7216_v45, 0.0  ;;  %v20519_v62 = vld [vmem:[#allocation82_spill] sm:$0xff] }
 0x57a   :  { %v7219_v39 = vadd.f32 %v15900_v32, %v19098_v29  ;;  %v19137_v23 = vld [vmem:[#allocation3 + $0x20] sm:$0xff] }
 0x57b   :  { %v7218_v19 = vadd.f32 %v15901_v53, %v19098_v29  ;;  %v14876_v48 = vpop.f32.mrb[32].mxu1  ;;  %14955 = vmatmul.mubr.msk.f32.vlgmr.msra.gmra.mrb[128].mxu0 %vm779_vm2, %v19137_v23  ;;  %7531 = vst.msk [vmem:[#allocation3 + $0x38] sm:$0xff] %vm779_vm2, %v7461_v9  ;;  %v20520_v9 = vld [vmem:[#allocation83_spill] sm:$0xff] }
 0x57c   :  { %v7283_v28 = vmax.f32 %v7219_v39, 0.0  ;;  %v15902_v56 = vadd.f32 %v14876_v48, %v20512_v52  ;;  %v6894_v58 = vpop.f32.mrb[33].mxu1  ;;  %15677 = vmatpush3.bf16.msra.mxu0 %v19091_v55 }
 0x57d   :  { %v7282_v18 = vmax.f32 %v7218_v19, 0.0  ;;  %v15903_v4 = vadd.f32 %v6894_v58, %v20513_v2  ;;  %15679 = vmatprep.subr.bf16.mxu0 %v15678_v0  ;;  %v20521_v19 = vld [vmem:[#allocation84_spill] sm:$0xff]  ;;  %v20522_v58 = vld [vmem:[#allocation85_spill] sm:$0xff] }
 0x57e   :  { %v7339_v10 = vmax.f32 %v7281_v17, %v7283_v28  ;;  %v7221_v20 = vadd.f32 %v15902_v56, %v19098_v29 }
 0x57f   :  { %v7338_v12 = vmax.f32 %v7280_v59, %v7282_v18  ;;  %v14879_v14 = vpop.f32.mrb[34].mxu1  ;;  %v7220_v55 = vadd.f32 %v15903_v4, %v19098_v29 }
 0x580   :  { %7371 = vst.msk [vmem:[#allocation2 + $0x90] sm:$0xff] %vm779_vm2, %v7339_v10  ;;  %v15904_v24 = vadd.f32 %v14879_v14, %v20514_v22  ;;  %v6904_v26 = vpop.f32.mrb[35].mxu1  ;;  %v7401_v30 = vld [vmem:[#allocation2 + $0x68] ss:$2 sm:$0xff]  ;;  %v7433_v33 = vld [vmem:[#allocation2 + $0x69] ss:$2 sm:$0xff]  ;;  %15681 = vmatpush3.bf16.msra.mxu0 %v15678_v0 }
 0x581   :  { %7370 = vst.msk [vmem:[#allocation2 + $0x88] sm:$0xff] %vm779_vm2, %v7338_v12  ;;  %v15905_v51 = vadd.f32 %v6904_v26, %v20515_v46  ;;  %v7462_v5 = vmax.f32 %v7401_v30, %v7433_v33  ;;  %15683 = vmatprep.subr.bf16.mxu0 %v19146_v8  ;;  %v7285_v16 = vmax.f32 %v7221_v20, 0.0  ;;  %v7284_v57 = vmax.f32 %v7220_v55, 0.0  ;;  %v20523_v12 = vld [vmem:[#allocation86_spill] sm:$0xff]  ;;  %v20524_v46 = vld [vmem:[#allocation87_spill] sm:$0xff] }
 0x582   :  { %v7223_v54 = vadd.f32 %v15904_v24, %v19098_v29  ;;  %v19156_v6 = vld [vmem:[#allocation3 + $0x38] sm:$0xff] }
 0x583   :  { %v7222_v15 = vadd.f32 %v15905_v51, %v19098_v29  ;;  %v14882_v50 = vpop.f32.mrb[36].mxu1  ;;  %14957 = vmatprep.mubr.msk.f32.mxu0 %vm779_vm2, %v19156_v6  ;;  %7532 = vst.msk [vmem:[#allocation3 + $0x50] sm:$0xff] %vm779_vm2, %v7462_v5 }
 0x584   :  { %v7287_v27 = vmax.f32 %v7223_v54, 0.0  ;;  %v15906_v35 = vadd.f32 %v14882_v50, %v20516_v34  ;;  %v6914_v37 = vpop.f32.mrb[37].mxu1  ;;  %v20525_v50 = vld [vmem:[#allocation88_spill] sm:$0xff] }
 0x585   :  { %v7286_v13 = vmax.f32 %v7222_v15, 0.0  ;;  %v15907_v36 = vadd.f32 %v6914_v37, %v20517_v31 }
 0x586   :  { %v7341_v40 = vmax.f32 %v7285_v16, %v7287_v27  ;;  %v7225_v38 = vadd.f32 %v15906_v35, %v19098_v29 }
 0x587   :  { %v7340_v21 = vmax.f32 %v7284_v57, %v7286_v13  ;;  %v14885_v42 = vpop.f32.mrb[38].mxu1  ;;  %v7224_v7 = vadd.f32 %v15907_v36, %v19098_v29  ;;  %v20526_v57 = vld [vmem:[#allocation89_spill] sm:$0xff] }
 0x588   :  { %7373 = vst.msk [vmem:[#allocation2 + $0xb0] sm:$0xff] %vm779_vm2, %v7341_v40  ;;  %v15908_v44 = vadd.f32 %v14885_v42, %v20518_v43  ;;  %v6924_v63 = vpop.f32.mrb[39].mxu1  ;;  %v7403_v60 = vld [vmem:[#allocation2 + $0x88] ss:$2 sm:$0xff]  ;;  %v7435_v3 = vld [vmem:[#allocation2 + $0x89] ss:$2 sm:$0xff] }
 0x589   :  { %7372 = vst.msk [vmem:[#allocation2 + $0xa8] sm:$0xff] %vm779_vm2, %v7340_v21  ;;  %v15909_v11 = vadd.f32 %v6924_v63, %v20519_v62  ;;  %v7463_v32 = vmax.f32 %v7403_v60, %v7435_v3  ;;  %v7289_v47 = vmax.f32 %v7225_v38, 0.0  ;;  %v7288_v41 = vmax.f32 %v7224_v7, 0.0  ;;  %v20527_v42 = vld [vmem:[#allocation90_spill] sm:$0xff] }
 0x58a   :  { %v7227_v25 = vadd.f32 %v15908_v44, %v19098_v29  ;;  %v19171_v49 = vld [vmem:[#allocation3 + $0x50] sm:$0xff] }
 0x58b   :  { %v7226_v61 = vadd.f32 %v15909_v11, %v19098_v29  ;;  %v14888_v45 = vpop.f32.mrb[40].mxu1  ;;  %14958 = vmatmul.mubr.msk.f32.gmra.mrb[130].mxu0 %vm779_vm2, %v19171_v49  ;;  %7533 = vst.msk [vmem:[#allocation3 + $0x68] sm:$0xff] %vm779_vm2, %v7463_v32  ;;  %v20528_v11 = vld [vmem:[#allocation91_spill] sm:$0xff] }
 0x58c   :  { %v7291_v53 = vmax.f32 %v7227_v25, 0.0  ;;  %v15910_v0 = vadd.f32 %v14888_v45, %v20520_v9  ;;  %v6934_v39 = vpop.f32.mrb[41].mxu1 }
 0x58d   :  { %v7290_v1 = vmax.f32 %v7226_v61, 0.0  ;;  %v15911_v48 = vadd.f32 %v6934_v39, %v20521_v19 }
 0x58e   :  { %v7343_v17 = vmax.f32 %v7289_v47, %v7291_v53  ;;  %v7229_v56 = vadd.f32 %v15910_v0, %v19098_v29  ;;  %v20529_v47 = vld [vmem:[#allocation92_spill] sm:$0xff] }
 0x58f   :  { %v7342_v28 = vmax.f32 %v7288_v41, %v7290_v1  ;;  %v14891_v52 = vpop.f32.mrb[42].mxu1  ;;  %v7228_v10 = vadd.f32 %v15911_v48, %v19098_v29  ;;  %v20530_v1 = vld [vmem:[#allocation93_spill] sm:$0xff] }
 0x590   :  { %7375 = vst.msk [vmem:[#allocation2 + $0xd0] sm:$0xff] %vm779_vm2, %v7343_v17  ;;  %v15912_v59 = vadd.f32 %v14891_v52, %v20522_v58  ;;  %v6944_v18 = vpop.f32.mrb[43].mxu1  ;;  %v7405_v2 = vld [vmem:[#allocation2 + $0xa8] ss:$2 sm:$0xff]  ;;  %v7437_v4 = vld [vmem:[#allocation2 + $0xa9] ss:$2 sm:$0xff] }
 0x591   :  { %7374 = vst.msk [vmem:[#allocation2 + $0xc8] sm:$0xff] %vm779_vm2, %v7342_v28  ;;  %v15913_v14 = vadd.f32 %v6944_v18, %v20523_v12  ;;  %v7464_v20 = vmax.f32 %v7405_v2, %v7437_v4  ;;  %v7293_v33 = vmax.f32 %v7229_v56, 0.0  ;;  %v7292_v54 = vmax.f32 %v7228_v10, 0.0  ;;  %v20531_v56 = vld [vmem:[#allocation94_spill] sm:$0xff] }
 0x592   :  { %v7231_v22 = vadd.f32 %v15912_v59, %v19098_v29  ;;  %v19186_v24 = vld [vmem:[#allocation3 + $0x68] sm:$0xff] }
 0x593   :  { %v7230_v26 = vadd.f32 %v15913_v14, %v19098_v29  ;;  %v14894_v30 = vpop.f32.mrb[44].mxu1  ;;  %14960 = vmatprep.mubr.msk.f32.mxu0 %vm779_vm2, %v19186_v24  ;;  %7534 = vst.msk [vmem:[#allocation3 + $0x80] sm:$0xff] %vm779_vm2, %v7464_v20  ;;  %v20532_v20 = vld [vmem:[#allocation95_spill] sm:$0xff] }
 0x594   :  { %v7295_v55 = vmax.f32 %v7231_v22, 0.0  ;;  %v15914_v51 = vadd.f32 %v14894_v30, %v20524_v46  ;;  %v6954_v5 = vpop.f32.mrb[45].mxu1 }
 0x595   :  { %v7294_v15 = vmax.f32 %v7230_v26, 0.0  ;;  %v15915_v16 = vadd.f32 %v6954_v5, %v20525_v50  ;;  %v20534_v50 = vld [vmem:[#allocation97_spill] sm:$0xff] }
 0x596   :  { %v7345_v27 = vmax.f32 %v7293_v33, %v7295_v55  ;;  %v7233_v37 = vadd.f32 %v15914_v51, %v19098_v29  ;;  %v20533_v55 = vld [vmem:[#allocation96_spill] sm:$0xff] }
 0x597   :  { %v7344_v34 = vmax.f32 %v7292_v54, %v7294_v15  ;;  %v14897_v35 = vpop.f32.mrb[46].mxu1  ;;  %v7232_v21 = vadd.f32 %v15915_v16, %v19098_v29 }
 0x598   :  { %7377 = vst.msk [vmem:[#allocation2 + $0xf0] sm:$0xff] %vm779_vm2, %v7345_v27  ;;  %v15916_v13 = vadd.f32 %v14897_v35, %v20526_v57  ;;  %v6964_v31 = vpop.f32.mrb[47].mxu1  ;;  %v7407_v36 = vld [vmem:[#allocation2 + $0xc8] ss:$2 sm:$0xff]  ;;  %v7439_v40 = vld [vmem:[#allocation2 + $0xc9] ss:$2 sm:$0xff] }
 0x599   :  { %7376 = vst.msk [vmem:[#allocation2 + $0xe8] sm:$0xff] %vm779_vm2, %v7344_v34  ;;  %v15917_v38 = vadd.f32 %v6964_v31, %v20527_v42  ;;  %v7465_v43 = vmax.f32 %v7407_v36, %v7439_v40  ;;  %v7297_v7 = vmax.f32 %v7233_v37, 0.0  ;;  %v7296_v61 = vmax.f32 %v7232_v21, 0.0  ;;  %v20535_v57 = vld [vmem:[#allocation98_spill] sm:$0xff]  ;;  %v7574_v31 = vld [vmem:[#allocation3 + $0xf8] sm:$0xff] }
 0x59a   :  { %v7235_v44 = vadd.f32 %v15916_v13, %v19098_v29  ;;  %v19201_v63 = vld [vmem:[#allocation3 + $0x80] sm:$0xff] }
 0x59b   :  { %v7234_v60 = vadd.f32 %v15917_v38, %v19098_v29  ;;  %v14900_v3 = vpop.f32.mrb[48].mxu1  ;;  %14961 = vmatmul.mubr.msk.f32.gmra.mrb[132].mxu0 %vm779_vm2, %v19201_v63  ;;  %7535 = vst.msk [vmem:[#allocation3 + $0x98] sm:$0xff] %vm779_vm2, %v7465_v43 }
 0x59c   :  { %v7299_v62 = vmax.f32 %v7235_v44, 0.0  ;;  %v15918_v32 = vadd.f32 %v14900_v3, %v20528_v11  ;;  %v6974_v25 = vpop.f32.mrb[49].mxu1 }
 0x59d   :  { %v7298_v45 = vmax.f32 %v7234_v60, 0.0  ;;  %v15919_v53 = vadd.f32 %v6974_v25, %v20529_v47  ;;  %v20536_v60 = vld [vmem:[#allocation99_spill] sm:$0xff] }
 0x59e   :  { %v7347_v9 = vmax.f32 %v7297_v7, %v7299_v62  ;;  %v7237_v41 = vadd.f32 %v15918_v32, %v19098_v29  ;;  %v20537_v32 = vld [vmem:[#allocation100_spill] sm:$0xff] }
 0x59f   :  { %v7346_v0 = vmax.f32 %v7296_v61, %v7298_v45  ;;  %v14903_v39 = vpop.f32.mrb[50].mxu1  ;;  %v7236_v52 = vadd.f32 %v15919_v53, %v19098_v29 }
 0x5a0   :  { %7379 = vst.msk [vmem:[#allocation2 + $0x110] sm:$0xff] %vm779_vm2, %v7347_v9  ;;  %v15920_v19 = vadd.f32 %v14903_v39, %v20530_v1  ;;  %v6984_v48 = vpop.f32.mrb[51].mxu1  ;;  %v7409_v17 = vld [vmem:[#allocation2 + $0xe8] ss:$2 sm:$0xff]  ;;  %v7441_v28 = vld [vmem:[#allocation2 + $0xe9] ss:$2 sm:$0xff] }
 0x5a1   :  { %7378 = vst.msk [vmem:[#allocation2 + $0x108] sm:$0xff] %vm779_vm2, %v7346_v0  ;;  %v15921_v58 = vadd.f32 %v6984_v48, %v20531_v56  ;;  %v7466_v59 = vmax.f32 %v7409_v17, %v7441_v28  ;;  %v7301_v12 = vmax.f32 %v7237_v41, 0.0  ;;  %v7300_v30 = vmax.f32 %v7236_v52, 0.0  ;;  %v20538_v9 = vld [vmem:[#allocation101_spill] sm:$0xff]  ;;  %v20539_v48 = vld [vmem:[#allocation102_spill] sm:$0xff] }
 0x5a2   :  { %v7239_v18 = vadd.f32 %v15920_v19, %v19098_v29  ;;  %v19216_v2 = vld [vmem:[#allocation3 + $0x98] sm:$0xff] }
 0x5a3   :  { %v7238_v4 = vadd.f32 %v15921_v58, %v19098_v29  ;;  %v14906_v10 = vpop.f32.mrb[52].mxu1  ;;  %14963 = vmatprep.mubr.msk.f32.mxu0 %vm779_vm2, %v19216_v2  ;;  %7536 = vst.msk [vmem:[#allocation3 + $0xb0] sm:$0xff] %vm779_vm2, %v7466_v59 }
 0x5a4   :  { %v7303_v14 = vmax.f32 %v7239_v18, 0.0  ;;  %v15922_v22 = vadd.f32 %v14906_v10, %v20532_v20  ;;  %v6994_v26 = vpop.f32.mrb[53].mxu1 }
 0x5a5   :  { %v7302_v33 = vmax.f32 %v7238_v4, 0.0  ;;  %v15923_v46 = vadd.f32 %v6994_v26, %v20533_v55  ;;  %v20540_v4 = vld [vmem:[#allocation103_spill] sm:$0xff] }
 0x5a6   :  { %v7349_v51 = vmax.f32 %v7301_v12, %v7303_v14  ;;  %v7241_v15 = vadd.f32 %v15922_v22, %v19098_v29  ;;  %v20541_v22 = vld [vmem:[#allocation104_spill] sm:$0xff] }
 0x5a7   :  { %v7348_v5 = vmax.f32 %v7300_v30, %v7302_v33  ;;  %v14909_v54 = vpop.f32.mrb[54].mxu1  ;;  %v7240_v37 = vadd.f32 %v15923_v46, %v19098_v29 }
 0x5a8   :  { %7381 = vst.msk [vmem:[#allocation2 + $0x270] sm:$0xff] %vm779_vm2, %v7349_v51  ;;  %v15924_v16 = vadd.f32 %v14909_v54, %v20534_v50  ;;  %v7004_v27 = vpop.f32.mrb[55].mxu1  ;;  %v7411_v34 = vld [vmem:[#allocation2 + $0x108] ss:$2 sm:$0xff]  ;;  %v7443_v35 = vld [vmem:[#allocation2 + $0x109] ss:$2 sm:$0xff] }
 0x5a9   :  { %7380 = vst.msk [vmem:[#allocation2 + $0x268] sm:$0xff] %vm779_vm2, %v7348_v5  ;;  %v15925_v13 = vadd.f32 %v7004_v27, %v20535_v57  ;;  %v7467_v36 = vmax.f32 %v7411_v34, %v7443_v35  ;;  %v7305_v43 = vmax.f32 %v7241_v15, 0.0  ;;  %v7304_v62 = vmax.f32 %v7240_v37, 0.0  ;;  %v20542_v51 = vld [vmem:[#allocation105_spill] sm:$0xff]  ;;  %v20543_v27 = vld [vmem:[#allocation106_spill] sm:$0xff] }
 0x5aa   :  { %v7243_v40 = vadd.f32 %v15924_v16, %v19098_v29  ;;  %v19231_v21 = vld [vmem:[#allocation3 + $0xb0] sm:$0xff] }
 0x5ab   :  { %v7242_v42 = vadd.f32 %v15925_v13, %v19098_v29  ;;  %v14912_v38 = vpop.f32.mrb[56].mxu1  ;;  %14964 = vmatmul.mubr.msk.f32.gmra.mrb[134].mxu0 %vm779_vm2, %v19231_v21  ;;  %7537 = vst.msk [vmem:[#allocation3 + $0xc8] sm:$0xff] %vm779_vm2, %v7467_v36 }
 0x5ac   :  { %v7307_v44 = vmax.f32 %v7243_v40, 0.0  ;;  %v15926_v3 = vadd.f32 %v14912_v38, %v20536_v60  ;;  %v7014_v7 = vpop.f32.mrb[57].mxu1  ;;  %14966 = vmatprep.mubr.msk.f32.mxu0 %vm779_vm2, %v7574_v31 }
 0x5ad   :  { %v7306_v11 = vmax.f32 %v7242_v42, 0.0  ;;  %v15927_v25 = vadd.f32 %v7014_v7, %v20537_v32  ;;  %v20544_v42 = vld [vmem:[#allocation43_spill] sm:$0xff] }
 0x5ae   :  { %v7351_v61 = vmax.f32 %v7305_v43, %v7307_v44  ;;  %v7245_v53 = vadd.f32 %v15926_v3, %v19098_v29  ;;  %v20545_v3 = vld [vmem:[#allocation44_spill] sm:$0xff] }
 0x5af   :  { %v7350_v45 = vmax.f32 %v7304_v62, %v7306_v11  ;;  %v14915_v47 = vpop.f32.mrb[58].mxu1  ;;  %v7244_v19 = vadd.f32 %v15927_v25, %v19098_v29 }
 0x5b0   :  { %7383 = vst.msk [vmem:[#allocation2 + $0x290] sm:$0xff] %vm779_vm2, %v7351_v61  ;;  %v15928_v0 = vadd.f32 %v14915_v47, %v20538_v9  ;;  %v7024_v39 = vpop.f32.mrb[59].mxu1  ;;  %v7413_v41 = vld [vmem:[#allocation2 + $0x268] ss:$2 sm:$0xff]  ;;  %v7445_v1 = vld [vmem:[#allocation2 + $0x269] ss:$2 sm:$0xff] }
 0x5b1   :  { %7382 = vst.msk [vmem:[#allocation2 + $0x288] sm:$0xff] %vm779_vm2, %v7350_v45  ;;  %v15929_v17 = vadd.f32 %v7024_v39, %v20539_v48  ;;  %v7468_v28 = vmax.f32 %v7413_v41, %v7445_v1  ;;  %v7309_v59 = vmax.f32 %v7245_v53, 0.0  ;;  %v7308_v14 = vmax.f32 %v7244_v19, 0.0  ;;  %v20546_v61 = vld [vmem:[#allocation45_spill] sm:$0xff]  ;;  %v20547_v39 = vld [vmem:[#allocation46_spill] sm:$0xff] }
 0x5b2   :  { %v7247_v52 = vadd.f32 %v15928_v0, %v19098_v29 }
 0x5b3   :  { %v7246_v56 = vadd.f32 %v15929_v17, %v19098_v29  ;;  %v14918_v58 = vpop.f32.mrb[60].mxu1  ;;  %7538 = vst.msk [vmem:[#allocation3 + $0x110] sm:$0xff] %vm779_vm2, %v7468_v28 }
 0x5b4   :  { %v7311_v18 = vmax.f32 %v7247_v52, 0.0  ;;  %v15930_v10 = vadd.f32 %v14918_v58, %v20540_v4  ;;  %v7034_v12 = vpop.f32.mrb[61].mxu1  ;;  %v20548_v58 = vld [vmem:[#allocation47_spill] sm:$0xff] }
 0x5b5   :  { %v7310_v20 = vmax.f32 %v7246_v56, 0.0  ;;  %v15931_v26 = vadd.f32 %v7034_v12, %v20541_v22  ;;  %v20549_v12 = vld [vmem:[#allocation48_spill] sm:$0xff] }
 0x5b6   :  { %v7353_v30 = vmax.f32 %v7309_v59, %v7311_v18  ;;  %v7249_v46 = vadd.f32 %v15930_v10, %v19098_v29 }
 0x5b7   :  { %v7352_v33 = vmax.f32 %v7308_v14, %v7310_v20  ;;  %v14921_v55 = vpop.f32.mrb[62].mxu1  ;;  %v7248_v16 = vadd.f32 %v15931_v26, %v19098_v29 }
 0x5b8   :  { %7385 = vst.msk [vmem:[#allocation2 + $0x2b0] sm:$0xff] %vm779_vm2, %v7353_v30  ;;  %v15932_v5 = vadd.f32 %v14921_v55, %v20542_v51  ;;  %v7044_v54 = vpop.f32.mrb[63].mxu1  ;;  %v7415_v15 = vld [vmem:[#allocation2 + $0x288] ss:$2 sm:$0xff]  ;;  %v7447_v50 = vld [vmem:[#allocation2 + $0x289] ss:$2 sm:$0xff] }
 0x5b9   :  { %7384 = vst.msk [vmem:[#allocation2 + $0x2a8] sm:$0xff] %vm779_vm2, %v7352_v33  ;;  %v15933_v34 = vadd.f32 %v7044_v54, %v20543_v27  ;;  %v7469_v35 = vmax.f32 %v7415_v15, %v7447_v50  ;;  %v7313_v36 = vmax.f32 %v7249_v46, 0.0  ;;  %v7312_v44 = vmax.f32 %v7248_v16, 0.0  ;;  %v20550_v33 = vld [vmem:[#allocation49_spill] sm:$0xff]  ;;  %v20551_v15 = vld [vmem:[#allocation50_spill] sm:$0xff] }
 0x5ba   :  { %v7251_v37 = vadd.f32 %v15932_v5, %v19098_v29  ;;  %v19258_v57 = vld [vmem:[#allocation3 + $0x110] sm:$0xff] }
 0x5bb   :  { %v7250_v13 = vadd.f32 %v15933_v34, %v19098_v29  ;;  %v14924_v31 = vpop.f32.mrb[0].mxu1  ;;  %14967 = vmatmul.mubr.msk.f32.gmra.mrb[136].mxu0 %vm779_vm2, %v19258_v57  ;;  %7539 = vst.msk [vmem:[#allocation3 + $0x128] sm:$0xff] %vm779_vm2, %v7469_v35 }
 0x5bc   :  { %v7315_v40 = vmax.f32 %v7251_v37, 0.0  ;;  %v15934_v38 = vadd.f32 %v14924_v31, %v20544_v42  ;;  %v7054_v43 = vpop.f32.mrb[1].mxu1 }
 0x5bd   :  { %v7314_v60 = vmax.f32 %v7250_v13, 0.0  ;;  %v15935_v7 = vadd.f32 %v7054_v43, %v20545_v3 }
 0x5be   :  { %v7355_v62 = vmax.f32 %v7313_v36, %v7315_v40  ;;  %v7253_v25 = vadd.f32 %v15934_v38, %v19098_v29  ;;  %v20552_v36 = vld [vmem:[#allocation51_spill] sm:$0xff] }
 0x5bf   :  { %v7354_v11 = vmax.f32 %v7312_v44, %v7314_v60  ;;  %v14927_v32 = vpop.f32.mrb[2].mxu1  ;;  %v7252_v0 = vadd.f32 %v15935_v7, %v19098_v29  ;;  %v20553_v44 = vld [vmem:[#allocation52_spill] sm:$0xff] }
 0x5c0   :  { %7387 = vst.msk [vmem:[#allocation2 + $0x2d0] sm:$0xff] %vm779_vm2, %v7355_v62  ;;  %v15936_v45 = vadd.f32 %v14927_v32, %v20546_v61  ;;  %v7064_v47 = vpop.f32.mrb[3].mxu1  ;;  %v7417_v53 = vld [vmem:[#allocation2 + $0x2a8] ss:$2 sm:$0xff]  ;;  %v7449_v9 = vld [vmem:[#allocation2 + $0x2a9] ss:$2 sm:$0xff] }
 0x5c1   :  { %7386 = vst.msk [vmem:[#allocation2 + $0x2c8] sm:$0xff] %vm779_vm2, %v7354_v11  ;;  %v15937_v41 = vadd.f32 %v7064_v47, %v20547_v39  ;;  %v7470_v1 = vmax.f32 %v7417_v53, %v7449_v9  ;;  %v7317_v52 = vmax.f32 %v7253_v25, 0.0  ;;  %v7316_v4 = vmax.f32 %v7252_v0, 0.0  ;;  %v20554_v32 = vld [vmem:[#allocation53_spill] sm:$0xff]  ;;  %v20555_v9 = vld [vmem:[#allocation54_spill] sm:$0xff] }
 0x5c2   :  { %v7255_v19 = vadd.f32 %v15936_v45, %v19098_v29  ;;  %v19273_v48 = vld [vmem:[#allocation3 + $0x128] sm:$0xff] }
 0x5c3   :  { %v7254_v17 = vadd.f32 %v15937_v41, %v19098_v29  ;;  %v14930_v28 = vpop.f32.mrb[4].mxu1  ;;  %14969 = vmatprep.mubr.msk.f32.mxu0 %vm779_vm2, %v19273_v48  ;;  %7540 = vst.msk [vmem:[#allocation3 + $0x140] sm:$0xff] %vm779_vm2, %v7470_v1 }
 0x5c4   :  { %v7319_v56 = vmax.f32 %v7255_v19, 0.0  ;;  %v15938_v59 = vadd.f32 %v14930_v28, %v20548_v58  ;;  %v7074_v18 = vpop.f32.mrb[5].mxu1 }
 0x5c5   :  { %v7318_v10 = vmax.f32 %v7254_v17, 0.0  ;;  %v15939_v14 = vadd.f32 %v7074_v18, %v20549_v12 }
 0x5c6   :  { %v7357_v20 = vmax.f32 %v7317_v52, %v7319_v56  ;;  %v7257_v30 = vadd.f32 %v15938_v59, %v19098_v29  ;;  %v20556_v56 = vld [vmem:[#allocation55_spill] sm:$0xff] }
 0x5c7   :  { %v7356_v22 = vmax.f32 %v7316_v4, %v7318_v10  ;;  %v14933_v26 = vpop.f32.mrb[6].mxu1  ;;  %v7256_v54 = vadd.f32 %v15939_v14, %v19098_v29  ;;  %v20557_v10 = vld [vmem:[#allocation56_spill] sm:$0xff] }
 0x5c8   :  { %7389 = vst.msk [vmem:[#allocation2 + $0x2f0] sm:$0xff] %vm779_vm2, %v7357_v20  ;;  %v15940_v55 = vadd.f32 %v14933_v26, %v20550_v33  ;;  %v7084_v46 = vpop.f32.mrb[7].mxu1  ;;  %v7419_v51 = vld [vmem:[#allocation2 + $0x2c8] ss:$2 sm:$0xff]  ;;  %v7451_v5 = vld [vmem:[#allocation2 + $0x2c9] ss:$2 sm:$0xff] }
 0x5c9   :  { %7388 = vst.msk [vmem:[#allocation2 + $0x2e8] sm:$0xff] %vm779_vm2, %v7356_v22  ;;  %v15941_v50 = vadd.f32 %v7084_v46, %v20551_v15  ;;  %v7471_v16 = vmax.f32 %v7419_v51, %v7451_v5  ;;  %v7321_v13 = vmax.f32 %v7257_v30, 0.0  ;;  %v7320_v38 = vmax.f32 %v7256_v54, 0.0  ;;  %v20558_v30 = vld [vmem:[#allocation57_spill] sm:$0xff]  ;;  %v20559_v54 = vld [vmem:[#allocation58_spill] sm:$0xff] }
 0x5ca   :  { %v7259_v27 = vadd.f32 %v15940_v55, %v19098_v29  ;;  %v19288_v34 = vld [vmem:[#allocation3 + $0x140] sm:$0xff] }
 0x5cb   :  { %v7258_v35 = vadd.f32 %v15941_v50, %v19098_v29  ;;  %v14936_v37 = vpop.f32.mrb[8].mxu1  ;;  %14970 = vmatmul.mubr.msk.f32.gmra.mrb[138].mxu0 %vm779_vm2, %v19288_v34  ;;  %7541 = vst.msk [vmem:[#allocation3 + $0x158] sm:$0xff] %vm779_vm2, %v7471_v16 }
 0x5cc   :  { %v7323_v31 = vmax.f32 %v7259_v27, 0.0  ;;  %v15942_v40 = vadd.f32 %v14936_v37, %v20552_v36  ;;  %v7094_v42 = vpop.f32.mrb[9].mxu1 }
 0x5cd   :  { %v7322_v43 = vmax.f32 %v7258_v35, 0.0  ;;  %v15943_v60 = vadd.f32 %v7094_v42, %v20553_v44 }
 0x5ce   :  { %v7359_v3 = vmax.f32 %v7321_v13, %v7323_v31  ;;  %v7261_v11 = vadd.f32 %v15942_v40, %v19098_v29 }
 0x5cf   :  { %v7358_v7 = vmax.f32 %v7320_v38, %v7322_v43  ;;  %v14939_v62 = vpop.f32.mrb[10].mxu1  ;;  %v7260_v53 = vadd.f32 %v15943_v60, %v19098_v29 }
 0x5d0   :  { %7391 = vst.msk [vmem:[#allocation2 + $0x310] sm:$0xff] %vm779_vm2, %v7359_v3  ;;  %v15944_v25 = vadd.f32 %v14939_v62, %v20554_v32  ;;  %v7104_v61 = vpop.f32.mrb[11].mxu1  ;;  %v7421_v45 = vld [vmem:[#allocation2 + $0x2e8] ss:$2 sm:$0xff]  ;;  %v7453_v47 = vld [vmem:[#allocation2 + $0x2e9] ss:$2 sm:$0xff] }
 0x5d1   :  { %7390 = vst.msk [vmem:[#allocation2 + $0x308] sm:$0xff] %vm779_vm2, %v7358_v7  ;;  %v15945_v0 = vadd.f32 %v7104_v61, %v20555_v9  ;;  %v7472_v39 = vmax.f32 %v7421_v45, %v7453_v47  ;;  %v7325_v28 = vmax.f32 %v7261_v11, 0.0  ;;  %v7324_v18 = vmax.f32 %v7260_v53, 0.0  ;;  %v7546_v7 = vld [vmem:[#allocation3 + $0x7] sm:$0xff]  ;;  %v7992_v32 = vld [vmem:[#allocation5 + $0x50] sm:$0xff]  ;;  %v19337_v45 = vld [vmem:[#allocation3 + $0x1f] sm:$0xff] }
 0x5d2   :  { %v7263_v41 = vadd.f32 %v15944_v25, %v19098_v29  ;;  %v19303_v1 = vld [vmem:[#allocation3 + $0x158] sm:$0xff]  ;;  %v8220_v47 = vld [vmem:[#allocation5 + $0x60] sm:$0xff]  ;;  %v8221_v53 = vld [vmem:[#allocation5 + $0x68] sm:$0xff] }
 0x5d3   :  { %v7262_v19 = vadd.f32 %v15945_v0, %v19098_v29  ;;  %v14942_v17 = vpop.f32.mrb[12].mxu1  ;;  %14972 = vmatprep.mubr.msk.f32.mxu0 %vm779_vm2, %v19303_v1  ;;  %7542 = vst.msk [vmem:[#allocation3 + $0x170] sm:$0xff] %vm779_vm2, %v7472_v39  ;;  %v7993_v25 = vld [vmem:[#allocation5 + $0x58] sm:$0xff]  ;;  %v15690_v0 = vpack.c.bf16 %v8221_v53, %v8220_v47  ;;  %v19346_v39 = vld [vmem:[#allocation3 + $0x4f] sm:$0xff]  ;;  %v8911_v47 = vld [vmem:[#allocation5 + $0xc0] sm:$0xff] }
 0x5d4   :  { %v7327_v52 = vmax.f32 %v7263_v41, 0.0  ;;  %v15946_v58 = vadd.f32 %v14942_v17, %v20556_v56  ;;  %v7114_v59 = vpop.f32.mrb[13].mxu1  ;;  %v15686_v61 = vpack.c.bf16 %v7993_v25, %v7992_v32  ;;  %v19341_v9 = vld [vmem:[#allocation3 + $0x37] sm:$0xff]  ;;  %v19350_v41 = vld [vmem:[#allocation3 + $0x67] sm:$0xff] }
 0x5d5   :  { %v7326_v4 = vmax.f32 %v7262_v19, 0.0  ;;  %v15947_v12 = vadd.f32 %v7114_v59, %v20557_v10  ;;  %v19354_v19 = vld [vmem:[#allocation3 + $0x7f] sm:$0xff]  ;;  %v7554_v17 = vld [vmem:[#allocation3 + $0xf7] sm:$0xff]  ;;  %v19371_v56 = vld [vmem:[#allocation3 + $0x127] sm:$0xff] }
 0x5d6   :  { %v7361_v14 = vmax.f32 %v7325_v28, %v7327_v52  ;;  %v7265_v26 = vadd.f32 %v15946_v58, %v19098_v29  ;;  %v19362_v28 = vld [vmem:[#allocation3 + $0xaf] sm:$0xff]  ;;  %v19375_v58 = vld [vmem:[#allocation3 + $0x13f] sm:$0xff]  ;;  %v19379_v59 = vld [vmem:[#allocation3 + $0x157] sm:$0xff] }
 0x5d7   :  { %v7360_v20 = vmax.f32 %v7324_v18, %v7326_v4  ;;  %v14945_v22 = vpop.f32.mrb[14].mxu1  ;;  %v7264_v5 = vadd.f32 %v15947_v12, %v19098_v29  ;;  %v19367_v52 = vld [vmem:[#allocation3 + $0x10f] sm:$0xff] }
 0x5d8   :  { %7393 = vst.msk [vmem:[#allocation2 + $0x330] sm:$0xff] %vm779_vm2, %v7361_v14  ;;  %v15948_v33 = vadd.f32 %v14945_v22, %v20558_v30  ;;  %v7124_v55 = vpop.f32.mrb[15].mxu1  ;;  %v7423_v46 = vld [vmem:[#allocation2 + $0x308] ss:$2 sm:$0xff]  ;;  %v7455_v51 = vld [vmem:[#allocation2 + $0x309] ss:$2 sm:$0xff] }
 0x5d9   :  { %7392 = vst.msk [vmem:[#allocation2 + $0x328] sm:$0xff] %vm779_vm2, %v7360_v20  ;;  %v15949_v15 = vadd.f32 %v7124_v55, %v20559_v54  ;;  %v7473_v50 = vmax.f32 %v7423_v46, %v7455_v51  ;;  %v7329_v37 = vmax.f32 %v7265_v26, 0.0  ;;  %v7328_v31 = vmax.f32 %v7264_v5, 0.0  ;;  %v7973_v10 = vld [vmem:[#allocation3 + $0x9] sm:$0xff]  ;;  %v8223_v20 = vld [vmem:[#allocation5 + $0x78] sm:$0xff]  ;;  %v19396_v26 = vld [vmem:[#allocation3 + $0x21] sm:$0xff] }
 0x5da   :  { %v7267_v16 = vadd.f32 %v15948_v33, %v19098_v29  ;;  %v19318_v27 = vld [vmem:[#allocation3 + $0x170] sm:$0xff]  ;;  %v8450_v30 = vld [vmem:[#allocation5 + $0x80] sm:$0xff]  ;;  %v8451_v33 = vld [vmem:[#allocation5 + $0x88] sm:$0xff] }
 0x5db   :  { %v7266_v35 = vadd.f32 %v15949_v15, %v19098_v29  ;;  %14973 = vmatmul.mubr.msk.f32.gmra.mrb[140].mxu0 %vm779_vm2, %v19318_v27  ;;  %7543 = vst.msk [vmem:[#allocation3 + $0x188] sm:$0xff] %vm779_vm2, %v7473_v50  ;;  %v19383_v18 = vld [vmem:[#allocation3 + $0x16f] sm:$0xff]  ;;  %v19400_v55 = vld [vmem:[#allocation3 + $0x39] sm:$0xff]  ;;  %v15698_v46 = vpack.c.bf16 %v8451_v33, %v8450_v30  ;;  %v19412_v54 = vld [vmem:[#allocation3 + $0x81] sm:$0xff] }
 0x5dc   :  { %v7331_v13 = vmax.f32 %v7267_v16, 0.0  ;;  %v8222_v14 = vld [vmem:[#allocation5 + $0x70] sm:$0xff]  ;;  %v19416_v15 = vld [vmem:[#allocation3 + $0x99] sm:$0xff]  ;;  %v8912_v53 = vld [vmem:[#allocation5 + $0xc8] sm:$0xff] }
 0x5dd   :  { %v7330_v36 = vmax.f32 %v7266_v35, 0.0  ;;  %v15694_v22 = vpack.c.bf16 %v8223_v20, %v8222_v14  ;;  %v19404_v51 = vld [vmem:[#allocation3 + $0x51] sm:$0xff]  ;;  %v19408_v5 = vld [vmem:[#allocation3 + $0x69] sm:$0xff]  ;;  %v7981_v50 = vld [vmem:[#allocation3 + $0xf9] sm:$0xff] }
 0x5de   :  { %v7363_v40 = vmax.f32 %v7329_v37, %v7331_v13  ;;  %v19420_v16 = vld [vmem:[#allocation3 + $0xb1] sm:$0xff]  ;;  %v19429_v37 = vld [vmem:[#allocation3 + $0x129] sm:$0xff]  ;;  %v19433_v13 = vld [vmem:[#allocation3 + $0x141] sm:$0xff] }
 0x5df   :  { %v7362_v42 = vmax.f32 %v7328_v31, %v7330_v36  ;;  %v19425_v35 = vld [vmem:[#allocation3 + $0x111] sm:$0xff]  ;;  %v19437_v31 = vld [vmem:[#allocation3 + $0x159] sm:$0xff]  ;;  %v19539_v14 = vld [vmem:[#allocation3 + $0xc9] sm:$0xff] }
 0x5e0   :  { %7395 = vst.msk [vmem:[#allocation2 + $0x350] sm:$0xff] %vm779_vm2, %v7363_v40  ;;  %v7425_v38 = vld [vmem:[#allocation2 + $0x328] ss:$2 sm:$0xff]  ;;  %v7457_v43 = vld [vmem:[#allocation2 + $0x329] ss:$2 sm:$0xff]  ;;  %v9371_v33 = vld [vmem:[#allocation5 + $0x100] sm:$0xff] }
 0x5e1   :  { %7394 = vst.msk [vmem:[#allocation2 + $0x348] sm:$0xff] %vm779_vm2, %v7362_v42  ;;  %v7474_v44 = vmax.f32 %v7425_v38, %v7457_v43  ;;  %v19441_v36 = vld [vmem:[#allocation3 + $0x171] sm:$0xff] }
 0x5e2   :  { %v19326_v60 = vld [vmem:[#allocation3 + $0x188] sm:$0xff]  ;;  %v8452_v38 = vld [vmem:[#allocation5 + $0x90] sm:$0xff]  ;;  %v8453_v43 = vld [vmem:[#allocation5 + $0x98] sm:$0xff] }
 0x5e3   :  { %14975 = vmatprep.mubr.msk.f32.mxu0 %vm779_vm2, %v19326_v60  ;;  %7544 = vst.msk [vmem:[#allocation3 + $0x1a0] sm:$0xff] %vm779_vm2, %v7474_v44  ;;  %v19387_v4 = vld [vmem:[#allocation3 + $0x187] sm:$0xff]  ;;  %v15702_v44 = vpack.c.bf16 %v8453_v43, %v8452_v38  ;;  %v8682_v25 = vld [vmem:[#allocation5 + $0xb0] sm:$0xff] }
 0x5e4   :  { %v19445_v40 = vld [vmem:[#allocation3 + $0x189] sm:$0xff] }
 0x5e8   :  { %v7427_v29 = vld [vmem:[#allocation2 + $0x348] ss:$2 sm:$0xff]  ;;  %v7459_v3 = vld [vmem:[#allocation2 + $0x349] ss:$2 sm:$0xff] }
 0x5e9   :  { %v7475_v62 = vmax.f32 %v7427_v29, %v7459_v3  ;;  %v8680_v29 = vld [vmem:[#allocation5 + $0xa0] sm:$0xff]  ;;  %v8681_v3 = vld [vmem:[#allocation5 + $0xa8] sm:$0xff] }
 0x5ea   :  { %v19331_v11 = vld [vmem:[#allocation3 + $0x1a0] sm:$0xff] }
 0x5eb   :  { %14976 = vmatmul.mubr.msk.f32.gmra.mrb[142].mxu0 %vm779_vm2, %v19331_v11  ;;  %7545 = vst.msk [vmem:[#allocation3 + $0x1b8] sm:$0xff] %vm779_vm2, %v7475_v62  ;;  %v19391_v12 = vld [vmem:[#allocation3 + $0x19f] sm:$0xff]  ;;  %v19467_v62 = vld [vmem:[#allocation3 + $0xc7] sm:$0xff] }
 0x5ec   :  { %14986 = vmatprep.mubr.msk.f32.mxu0 %vm779_vm2, %v7546_v7  ;;  %v19449_v42 = vld [vmem:[#allocation3 + $0x1a1] sm:$0xff]  ;;  %v15706_v7 = vpack.c.bf16 %v8681_v3, %v8680_v29 }
 0x5ef   :  { %14987 = vmatmul.mubr.msk.f32.vlgmr.msra.gmra.mrb[128].mxu0 %vm779_vm2, %v19337_v45 }
 0x5f0   :  { %15685 = vmatpush3.bf16.msra.mxu0 %v19146_v8  ;;  %14989 = vmatprep.mubr.msk.f32.mxu0 %vm779_vm2, %v19341_v9  ;;  %v19358_v8 = vld [vmem:[#allocation3 + $0x97] sm:$0xff] }
 0x5f1   :  { %15687 = vmatprep.subr.bf16.mxu0 %v15686_v61 }
 0x5f2   :  { %v19485_v32 = vld [vmem:[#allocation3 + $0x1b7] sm:$0xff] }
 0x5f3   :  { %14990 = vmatmul.mubr.msk.f32.gmra.mrb[130].mxu0 %vm779_vm2, %v19346_v39  ;;  %v19557_v20 = vld [vmem:[#allocation3 + $0x1b9] sm:$0xff] }
 0x5f4   :  { %14992 = vmatprep.mubr.msk.f32.mxu0 %vm779_vm2, %v19350_v41  ;;  %15689 = vmatpush3.bf16.msra.mxu0 %v15686_v61  ;;  %v8683_v61 = vld [vmem:[#allocation5 + $0xb8] sm:$0xff] }
 0x5f5   :  { %15691 = vmatprep.subr.bf16.mxu0 %v15690_v0 }
 0x5f7   :  { %14993 = vmatmul.mubr.msk.f32.gmra.mrb[132].mxu0 %vm779_vm2, %v19354_v19 }
 0x5f8   :  { %14995 = vmatprep.mubr.msk.f32.mxu0 %vm779_vm2, %v19358_v8 }
 0x5fb   :  { %14996 = vmatmul.mubr.msk.f32.gmra.mrb[134].mxu0 %vm779_vm2, %v19362_v28 }
 0x5fc   :  { %14998 = vmatprep.mubr.msk.f32.mxu0 %vm779_vm2, %v7554_v17  ;;  %v9141_v17 = vld [vmem:[#allocation5 + $0xe0] sm:$0xff] }
 0x5ff   :  { %14999 = vmatmul.mubr.msk.f32.gmra.mrb[136].mxu0 %vm779_vm2, %v19367_v52 }
 0x600   :  { %15001 = vmatprep.mubr.msk.f32.mxu0 %vm779_vm2, %v19371_v56 }
 0x603   :  { %15002 = vmatmul.mubr.msk.f32.gmra.mrb[138].mxu0 %vm779_vm2, %v19375_v58 }
 0x604   :  { %15004 = vmatprep.mubr.msk.f32.mxu0 %vm779_vm2, %v19379_v59 }
 0x607   :  { %15005 = vmatmul.mubr.msk.f32.gmra.mrb[140].mxu0 %vm779_vm2, %v19383_v18 }
 0x608   :  { %15007 = vmatprep.mubr.msk.f32.mxu0 %vm779_vm2, %v19387_v4 }
 0x60b   :  { %15008 = vmatmul.mubr.msk.f32.gmra.mrb[142].mxu0 %vm779_vm2, %v19391_v12 }
 0x60c   :  { %15018 = vmatprep.mubr.msk.f32.mxu0 %vm779_vm2, %v7973_v10 }
 0x60f   :  { %15019 = vmatmul.mubr.msk.f32.vlgmr.msra.gmra.mrb[128].mxu0 %vm779_vm2, %v19396_v26 }
 0x610   :  { %15693 = vmatpush3.bf16.msra.mxu0 %v15690_v0  ;;  %15021 = vmatprep.mubr.msk.f32.mxu0 %vm779_vm2, %v19400_v55  ;;  %v15714_v0 = vpack.c.bf16 %v8912_v53, %v8911_v47  ;;  %v9713_v47 = vld [vmem:[#allocation8 + $0x10] sm:$0xff]  ;;  %v9714_v53 = vld [vmem:[#allocation8 + $0x18] sm:$0xff] }
 0x611   :  { %15695 = vmatprep.subr.bf16.mxu0 %v15694_v22 }
 0x613   :  { %15022 = vmatmul.mubr.msk.f32.gmra.mrb[130].mxu0 %vm779_vm2, %v19404_v51 }
 0x614   :  { %15024 = vmatprep.mubr.msk.f32.mxu0 %vm779_vm2, %v19408_v5  ;;  %15697 = vmatpush3.bf16.msra.mxu0 %v15694_v22  ;;  %v9143_v22 = vld [vmem:[#allocation5 + $0xf0] sm:$0xff] }
 0x615   :  { %15699 = vmatprep.subr.bf16.mxu0 %v15698_v46 }
 0x617   :  { %15025 = vmatmul.mubr.msk.f32.gmra.mrb[132].mxu0 %vm779_vm2, %v19412_v54 }
 0x618   :  { %15027 = vmatprep.mubr.msk.f32.mxu0 %vm779_vm2, %v19416_v15 }
 0x61b   :  { %15028 = vmatmul.mubr.msk.f32.gmra.mrb[134].mxu0 %vm779_vm2, %v19420_v16 }
 0x61c   :  { %15030 = vmatprep.mubr.msk.f32.mxu0 %vm779_vm2, %v7981_v50 }
 0x61f   :  { %15031 = vmatmul.mubr.msk.f32.gmra.mrb[136].mxu0 %vm779_vm2, %v19425_v35 }
 0x620   :  { %15033 = vmatprep.mubr.msk.f32.mxu0 %vm779_vm2, %v19429_v37 }
 0x623   :  { %15034 = vmatmul.mubr.msk.f32.gmra.mrb[138].mxu0 %vm779_vm2, %v19433_v13 }
 0x624   :  { %15036 = vmatprep.mubr.msk.f32.mxu0 %vm779_vm2, %v19437_v31 }
 0x627   :  { %15037 = vmatmul.mubr.msk.f32.gmra.mrb[140].mxu0 %vm779_vm2, %v19441_v36 }
 0x628   :  { %15039 = vmatprep.mubr.msk.f32.mxu0 %vm779_vm2, %v19445_v40 }
 0x62b   :  { %15040 = vmatmul.mubr.msk.f32.gmra.mrb[142].mxu0 %vm779_vm2, %v19449_v42 }
 0x62c   :  { %15050 = vmatprep.mubr.msk.f32.mxu0 %vm779_vm2, %v19337_v45  ;;  %v15710_v45 = vpack.c.bf16 %v8683_v61, %v8682_v25 }
 0x62f   :  { %15051 = vmatmul.mubr.msk.f32.vlgmr.msra.gmra.mrb[128].mxu0 %vm779_vm2, %v19341_v9 }
 0x630   :  { %15701 = vmatpush3.bf16.msra.mxu0 %v15698_v46  ;;  %15053 = vmatprep.mubr.msk.f32.mxu0 %vm779_vm2, %v19346_v39  ;;  %v9372_v46 = vld [vmem:[#allocation5 + $0x108] sm:$0xff] }
 0x631   :  { %15703 = vmatprep.subr.bf16.mxu0 %v15702_v44  ;;  %v15730_v50 = vpack.c.bf16 %v9372_v46, %v9371_v33 }
 0x633   :  { %15054 = vmatmul.mubr.msk.f32.gmra.mrb[130].mxu0 %vm779_vm2, %v19350_v41 }
 0x634   :  { %15056 = vmatprep.mubr.msk.f32.mxu0 %vm779_vm2, %v19354_v19  ;;  %15705 = vmatpush3.bf16.msra.mxu0 %v15702_v44 }
 0x635   :  { %15707 = vmatprep.subr.bf16.mxu0 %v15706_v7 }
 0x637   :  { %15057 = vmatmul.mubr.msk.f32.gmra.mrb[132].mxu0 %vm779_vm2, %v19358_v8 }
 0x638   :  { %15059 = vmatprep.mubr.msk.f32.mxu0 %vm779_vm2, %v19362_v28 }
 0x63b   :  { %15060 = vmatmul.mubr.msk.f32.gmra.mrb[134].mxu0 %vm779_vm2, %v19467_v62 }
 0x63c   :  { %15062 = vmatprep.mubr.msk.f32.mxu0 %vm779_vm2, %v19367_v52  ;;  %v9142_v52 = vld [vmem:[#allocation5 + $0xe8] sm:$0xff] }
 0x63d   :  { %v15722_v10 = vpack.c.bf16 %v9142_v52, %v9141_v17 }
 0x63f   :  { %15063 = vmatmul.mubr.msk.f32.gmra.mrb[136].mxu0 %vm779_vm2, %v19371_v56 }
 0x640   :  { %15065 = vmatprep.mubr.msk.f32.mxu0 %vm779_vm2, %v19375_v58 }
 0x643   :  { %15066 = vmatmul.mubr.msk.f32.gmra.mrb[138].mxu0 %vm779_vm2, %v19379_v59 }
 0x644   :  { %15068 = vmatprep.mubr.msk.f32.mxu0 %vm779_vm2, %v19383_v18 }
 0x647   :  { %15069 = vmatmul.mubr.msk.f32.gmra.mrb[140].mxu0 %vm779_vm2, %v19387_v4 }
 0x648   :  { %15071 = vmatprep.mubr.msk.f32.mxu0 %vm779_vm2, %v19391_v12 }
 0x64b   :  { %15072 = vmatmul.mubr.msk.f32.gmra.mrb[142].mxu0 %vm779_vm2, %v19485_v32 }
 0x64c   :  { %15082 = vmatprep.mubr.msk.f32.mxu0 %vm779_vm2, %v19137_v23  ;;  %v19503_v23 = vld [vmem:[#allocation3 + $0xc8] sm:$0xff] }
 0x64f   :  { %15083 = vmatmul.mubr.msk.f32.vlgmr.msra.gmra.mrb[128].mxu0 %vm779_vm2, %v19156_v6  ;;  %v19521_v6 = vld [vmem:[#allocation3 + $0x1b8] sm:$0xff] }
 0x650   :  { %15709 = vmatpush3.bf16.msra.mxu0 %v15706_v7  ;;  %15085 = vmatprep.mubr.msk.f32.mxu0 %vm779_vm2, %v19171_v49  ;;  %v8913_v49 = vld [vmem:[#allocation5 + $0xd0] sm:$0xff] }
 0x651   :  { %15711 = vmatprep.subr.bf16.mxu0 %v15710_v45 }
 0x653   :  { %15086 = vmatmul.mubr.msk.f32.gmra.mrb[130].mxu0 %vm779_vm2, %v19186_v24  ;;  %v8914_v24 = vld [vmem:[#allocation5 + $0xd8] sm:$0xff] }
 0x654   :  { %15088 = vmatprep.mubr.msk.f32.mxu0 %vm779_vm2, %v19201_v63  ;;  %15713 = vmatpush3.bf16.msra.mxu0 %v15710_v45 }
 0x655   :  { %15715 = vmatprep.subr.bf16.mxu0 %v15714_v0 }
 0x657   :  { %15089 = vmatmul.mubr.msk.f32.gmra.mrb[132].mxu0 %vm779_vm2, %v19216_v2 }
 0x658   :  { %15091 = vmatprep.mubr.msk.f32.mxu0 %vm779_vm2, %v19231_v21 }
 0x65b   :  { %15092 = vmatmul.mubr.msk.f32.gmra.mrb[134].mxu0 %vm779_vm2, %v19503_v23 }
 0x65c   :  { %15094 = vmatprep.mubr.msk.f32.mxu0 %vm779_vm2, %v19258_v57  ;;  %v15718_v57 = vpack.c.bf16 %v8914_v24, %v8913_v49  ;;  %v15758_v24 = vpack.c.bf16 %v9714_v53, %v9713_v47  ;;  %v10151_v53 = vld [vmem:[#allocation8 + $0xa0] sm:$0xff] }
 0x65f   :  { %15095 = vmatmul.mubr.msk.f32.gmra.mrb[136].mxu0 %vm779_vm2, %v19273_v48 }
 0x660   :  { %15097 = vmatprep.mubr.msk.f32.mxu0 %vm779_vm2, %v19288_v34 }
 0x663   :  { %15098 = vmatmul.mubr.msk.f32.gmra.mrb[138].mxu0 %vm779_vm2, %v19303_v1 }
 0x664   :  { %15100 = vmatprep.mubr.msk.f32.mxu0 %vm779_vm2, %v19318_v27 }
 0x667   :  { %15101 = vmatmul.mubr.msk.f32.gmra.mrb[140].mxu0 %vm779_vm2, %v19326_v60 }
 0x668   :  { %15103 = vmatprep.mubr.msk.f32.mxu0 %vm779_vm2, %v19331_v11 }
 0x66b   :  { %15104 = vmatmul.mubr.msk.f32.gmra.mrb[142].mxu0 %vm779_vm2, %v19521_v6 }
 0x66c   :  { %15114 = vmatprep.mubr.msk.f32.mxu0 %vm779_vm2, %v19396_v26  ;;  %v9144_v26 = vld [vmem:[#allocation5 + $0xf8] sm:$0xff] }
 0x66d   :  { %v15726_v30 = vpack.c.bf16 %v9144_v26, %v9143_v22 }
 0x66f   :  { %15115 = vmatmul.mubr.msk.f32.vlgmr.msra.gmra.mrb[128].mxu0 %vm779_vm2, %v19400_v55 }
 0x670   :  { %15717 = vmatpush3.bf16.msra.mxu0 %v15714_v0  ;;  %15117 = vmatprep.mubr.msk.f32.mxu0 %vm779_vm2, %v19404_v51 }
 0x671   :  { %15719 = vmatprep.subr.bf16.mxu0 %v15718_v57 }
 0x673   :  { %15118 = vmatmul.mubr.msk.f32.gmra.mrb[130].mxu0 %vm779_vm2, %v19408_v5 }
 0x674   :  { %15120 = vmatprep.mubr.msk.f32.mxu0 %vm779_vm2, %v19412_v54  ;;  %15721 = vmatpush3.bf16.msra.mxu0 %v15718_v57 }
 0x675   :  { %15723 = vmatprep.subr.bf16.mxu0 %v15722_v10 }
 0x677   :  { %15121 = vmatmul.mubr.msk.f32.gmra.mrb[132].mxu0 %vm779_vm2, %v19416_v15 }
 0x678   :  { %15123 = vmatprep.mubr.msk.f32.mxu0 %vm779_vm2, %v19420_v16 }
 0x67b   :  { %15124 = vmatmul.mubr.msk.f32.gmra.mrb[134].mxu0 %vm779_vm2, %v19539_v14 }
 0x67c   :  { %15126 = vmatprep.mubr.msk.f32.mxu0 %vm779_vm2, %v19425_v35  ;;  %v9712_v35 = vld [vmem:[#allocation8 + $0x8] sm:$0xff] }
 0x67f   :  { %15127 = vmatmul.mubr.msk.f32.gmra.mrb[136].mxu0 %vm779_vm2, %v19429_v37 }
 0x680   :  { %15129 = vmatprep.mubr.msk.f32.mxu0 %vm779_vm2, %v19433_v13 }
 0x683   :  { %15130 = vmatmul.mubr.msk.f32.gmra.mrb[138].mxu0 %vm779_vm2, %v19437_v31 }
 0x684   :  { %15132 = vmatprep.mubr.msk.f32.mxu0 %vm779_vm2, %v19441_v36 }
 0x687   :  { %15133 = vmatmul.mubr.msk.f32.gmra.mrb[140].mxu0 %vm779_vm2, %v19445_v40 }
 0x688   :  { %15135 = vmatprep.mubr.msk.f32.mxu0 %vm779_vm2, %v19449_v42 }
 0x68b   :  { %15136 = vmatmul.mubr.msk.f32.gmra.mrb[142].mxu0 %vm779_vm2, %v19557_v20 }
 0x68c   :  { %15146 = vmatprep.mubr.msk.f32.mxu0 %vm779_vm2, %v19341_v9  ;;  %v8901_v9 = vld [vmem:[#allocation3 + $0xdf] sm:$0xff] }
 0x68f   :  { %15147 = vmatmul.mubr.msk.f32.vlgmr.msra.gmra.mrb[128].mxu0 %vm779_vm2, %v19346_v39  ;;  %v8909_v39 = vld [vmem:[#allocation3 + $0x1cf] sm:$0xff] }
 0x690   :  { %15725 = vmatpush3.bf16.msra.mxu0 %v15722_v10  ;;  %15149 = vmatprep.mubr.msk.f32.mxu0 %vm779_vm2, %v19350_v41  ;;  %v9373_v41 = vld [vmem:[#allocation5 + $0x110] sm:$0xff]  ;;  %v9715_v10 = vld [vmem:[#allocation8 + $0x20] sm:$0xff] }
 0x691   :  { %15727 = vmatprep.subr.bf16.mxu0 %v15726_v30 }
 0x693   :  { %15150 = vmatmul.mubr.msk.f32.gmra.mrb[130].mxu0 %vm779_vm2, %v19354_v19  ;;  %v9374_v19 = vld [vmem:[#allocation5 + $0x118] sm:$0xff] }
 0x694   :  { %15152 = vmatprep.mubr.msk.f32.mxu0 %vm779_vm2, %v19358_v8  ;;  %15729 = vmatpush3.bf16.msra.mxu0 %v15726_v30  ;;  %v9124_v8 = vld [vmem:[#allocation3 + $0x38] sm:$0xff] }
 0x695   :  { %15731 = vmatprep.subr.bf16.mxu0 %v15730_v50 }
 0x697   :  { %15153 = vmatmul.mubr.msk.f32.gmra.mrb[132].mxu0 %vm779_vm2, %v19362_v28  ;;  %v15734_v28 = vpack.c.bf16 %v9374_v19, %v9373_v41  ;;  %v9717_v41 = vld [vmem:[#allocation8 + $0x30] sm:$0xff]  ;;  %v9718_v19 = vld [vmem:[#allocation8 + $0x38] sm:$0xff] }
 0x698   :  { %15155 = vmatprep.mubr.msk.f32.mxu0 %vm779_vm2, %v19467_v62 }
 0x69b   :  { %15156 = vmatmul.mubr.msk.f32.gmra.mrb[134].mxu0 %vm779_vm2, %v8901_v9 }
 0x69c   :  { %15158 = vmatprep.mubr.msk.f32.mxu0 %vm779_vm2, %v19371_v56  ;;  %v9125_v56 = vld [vmem:[#allocation3 + $0x50] sm:$0xff] }
 0x69f   :  { %15159 = vmatmul.mubr.msk.f32.gmra.mrb[136].mxu0 %vm779_vm2, %v19375_v58  ;;  %v9736_v58 = vld [vmem:[#allocation8 + $0x40] sm:$0xff] }
 0x6a0   :  { %15161 = vmatprep.mubr.msk.f32.mxu0 %vm779_vm2, %v19379_v59  ;;  %v9737_v59 = vld [vmem:[#allocation8 + $0x48] sm:$0xff] }
 0x6a3   :  { %15162 = vmatmul.mubr.msk.f32.gmra.mrb[138].mxu0 %vm779_vm2, %v19383_v18  ;;  %v9126_v18 = vld [vmem:[#allocation3 + $0x68] sm:$0xff] }
 0x6a4   :  { %15164 = vmatprep.mubr.msk.f32.mxu0 %vm779_vm2, %v19387_v4  ;;  %v15738_v4 = vpack.c.bf16 %v9737_v59, %v9736_v58 }
 0x6a7   :  { %15165 = vmatmul.mubr.msk.f32.gmra.mrb[140].mxu0 %vm779_vm2, %v19391_v12  ;;  %v9131_v12 = vld [vmem:[#allocation3 + $0xe0] sm:$0xff] }
 0x6a8   :  { %15167 = vmatprep.mubr.msk.f32.mxu0 %vm779_vm2, %v19485_v32 }
 0x6ab   :  { %15168 = vmatmul.mubr.msk.f32.gmra.mrb[142].mxu0 %vm779_vm2, %v8909_v39 }
 0x6ac   :  { %15178 = vmatprep.mubr.msk.f32.mxu0 %vm779_vm2, %v9124_v8 }
 0x6af   :  { %15179 = vmatmul.mubr.msk.f32.vlgmr.msra.gmra.mrb[128].mxu0 %vm779_vm2, %v9125_v56 }
 0x6b0   :  { %15733 = vmatpush3.bf16.msra.mxu0 %v15730_v50  ;;  %15181 = vmatprep.mubr.msk.f32.mxu0 %vm779_vm2, %v9126_v18  ;;  %v15766_v18 = vpack.c.bf16 %v9718_v19, %v9717_v41 }
 0x6b1   :  { %15735 = vmatprep.subr.bf16.mxu0 %v15734_v28 }
 0x6b3   :  { %15182 = vmatmul.mubr.msk.f32.gmra.mrb[130].mxu0 %vm779_vm2, %v19201_v63  ;;  %v9139_v63 = vld [vmem:[#allocation3 + $0x1d0] sm:$0xff] }
 0x6b4   :  { %15184 = vmatprep.mubr.msk.f32.mxu0 %vm779_vm2, %v19216_v2  ;;  %15737 = vmatpush3.bf16.msra.mxu0 %v15734_v28  ;;  %v9738_v2 = vld [vmem:[#allocation8 + $0x50] sm:$0xff] }
 0x6b5   :  { %15739 = vmatprep.subr.bf16.mxu0 %v15738_v4 }
 0x6b7   :  { %15185 = vmatmul.mubr.msk.f32.gmra.mrb[132].mxu0 %vm779_vm2, %v19231_v21  ;;  %v9739_v21 = vld [vmem:[#allocation8 + $0x58] sm:$0xff] }
 0x6b8   :  { %15187 = vmatprep.mubr.msk.f32.mxu0 %vm779_vm2, %v19503_v23 }
 0x6bb   :  { %15188 = vmatmul.mubr.msk.f32.gmra.mrb[134].mxu0 %vm779_vm2, %v9131_v12 }
 0x6bc   :  { %15190 = vmatprep.mubr.msk.f32.mxu0 %vm779_vm2, %v19273_v48  ;;  %v15742_v48 = vpack.c.bf16 %v9739_v21, %v9738_v2  ;;  %v10147_v2 = vld [vmem:[#allocation8 + $0x80] sm:$0xff]  ;;  %v10148_v21 = vld [vmem:[#allocation8 + $0x88] sm:$0xff] }
 0x6bf   :  { %15191 = vmatmul.mubr.msk.f32.gmra.mrb[136].mxu0 %vm779_vm2, %v19288_v34  ;;  %v9740_v34 = vld [vmem:[#allocation8 + $0x60] sm:$0xff] }
 0x6c0   :  { %15193 = vmatprep.mubr.msk.f32.mxu0 %vm779_vm2, %v19303_v1  ;;  %v9741_v1 = vld [vmem:[#allocation8 + $0x68] sm:$0xff] }
 0x6c3   :  { %15194 = vmatmul.mubr.msk.f32.gmra.mrb[138].mxu0 %vm779_vm2, %v19318_v27  ;;  %v15746_v27 = vpack.c.bf16 %v9741_v1, %v9740_v34 }
 0x6c4   :  { %15196 = vmatprep.mubr.msk.f32.mxu0 %vm779_vm2, %v19326_v60  ;;  %v9361_v60 = vld [vmem:[#allocation3 + $0xe1] sm:$0xff] }
 0x6c7   :  { %15197 = vmatmul.mubr.msk.f32.gmra.mrb[140].mxu0 %vm779_vm2, %v19331_v11  ;;  %v9369_v11 = vld [vmem:[#allocation3 + $0x1d1] sm:$0xff] }
 0x6c8   :  { %15199 = vmatprep.mubr.msk.f32.mxu0 %vm779_vm2, %v19521_v6 }
 0x6cb   :  { %15200 = vmatmul.mubr.msk.f32.gmra.mrb[142].mxu0 %vm779_vm2, %v9139_v63 }
 0x6cc   :  { %15210 = vmatprep.mubr.msk.f32.mxu0 %vm779_vm2, %v19400_v55  ;;  %v20560_v55 = vmov 0.0  }
 0x6cd   :  { %9624 = vst.msk [vmem:[#allocation4] sm:$0xff] %vm9623_vm4, %v20560_v55  ;;  %9625 = vst.msk [vmem:[#allocation4 + $0x8] sm:$0xff] %vm9623_vm4, %v20560_v55 }
 0x6ce   :  { %9628 = vst.msk [vmem:[#allocation4 + $0xf0] sm:$0xff] %vm9623_vm4, %v20560_v55  ;;  %9629 = vst.msk [vmem:[#allocation4 + $0xf8] sm:$0xff] %vm9623_vm4, %v20560_v55 }
 0x6cf   :  { %15211 = vmatmul.mubr.msk.f32.vlgmr.msra.gmra.mrb[128].mxu0 %vm779_vm2, %v19404_v51  ;;  %9632 = vst.msk [vmem:[#allocation4 + $0xd8] sm:$0xff] %vm9623_vm4, %v20560_v55  ;;  %9633 = vst.msk [vmem:[#allocation4 + $0xe0] sm:$0xff] %vm9623_vm4, %v20560_v55  ;;  %v9742_v51 = vld [vmem:[#allocation8 + $0x70] sm:$0xff] }
 0x6d0   :  { %15213 = vmatprep.mubr.msk.f32.mxu0 %vm779_vm2, %v19408_v5  ;;  %15741 = vmatpush3.bf16.msra.mxu0 %v15738_v4  ;;  %9635 = vst.msk [vmem:[#allocation4 + $0x1c8] sm:$0xff] %vm9623_vm4, %v20560_v55  ;;  %9636 = vst.msk [vmem:[#allocation4 + $0x1d0] sm:$0xff] %vm9623_vm4, %v20560_v55  ;;  %v9743_v5 = vld [vmem:[#allocation8 + $0x78] sm:$0xff] }
 0x6d1   :  { %15743 = vmatprep.subr.bf16.mxu0 %v15742_v48  ;;  %9639 = vst.msk [vmem:[#allocation4 + $0x18] sm:$0xff] %vm9623_vm4, %v20560_v55  ;;  %9640 = vst.msk [vmem:[#allocation4 + $0x30] sm:$0xff] %vm9623_vm4, %v20560_v55 }
 0x6d2   :  { %9641 = vst.msk [vmem:[#allocation4 + $0x48] sm:$0xff] %vm9623_vm4, %v20560_v55  ;;  %9642 = vst.msk [vmem:[#allocation4 + $0x60] sm:$0xff] %vm9623_vm4, %v20560_v55 }
 0x6d3   :  { %15214 = vmatmul.mubr.msk.f32.gmra.mrb[130].mxu0 %vm779_vm2, %v19412_v54  ;;  %9643 = vst.msk [vmem:[#allocation4 + $0x78] sm:$0xff] %vm9623_vm4, %v20560_v55  ;;  %9644 = vst.msk [vmem:[#allocation4 + $0x90] sm:$0xff] %vm9623_vm4, %v20560_v55  ;;  %v15750_v54 = vpack.c.bf16 %v9743_v5, %v9742_v51 }
 0x6d4   :  { %15216 = vmatprep.mubr.msk.f32.mxu0 %vm779_vm2, %v19416_v15  ;;  %15745 = vmatpush3.bf16.msra.mxu0 %v15742_v48  ;;  %9645 = vst.msk [vmem:[#allocation4 + $0xa8] sm:$0xff] %vm9623_vm4, %v20560_v55  ;;  %9646 = vst.msk [vmem:[#allocation4 + $0xc0] sm:$0xff] %vm9623_vm4, %v20560_v55  ;;  %v9719_v15 = vld [vmem:[#allocation4 + $0x8] sm:$0xff] }
 0x6d5   :  { %15747 = vmatprep.subr.bf16.mxu0 %v15746_v27  ;;  %9649 = vst.msk [vmem:[#allocation4 + $0x108] sm:$0xff] %vm9623_vm4, %v20560_v55  ;;  %9650 = vst.msk [vmem:[#allocation4 + $0x120] sm:$0xff] %vm9623_vm4, %v20560_v55 }
 0x6d6   :  { %9651 = vst.msk [vmem:[#allocation4 + $0x138] sm:$0xff] %vm9623_vm4, %v20560_v55  ;;  %9652 = vst.msk [vmem:[#allocation4 + $0x150] sm:$0xff] %vm9623_vm4, %v20560_v55 }
 0x6d7   :  { %15217 = vmatmul.mubr.msk.f32.gmra.mrb[132].mxu0 %vm779_vm2, %v19420_v16  ;;  %9653 = vst.msk [vmem:[#allocation4 + $0x168] sm:$0xff] %vm9623_vm4, %v20560_v55  ;;  %9654 = vst.msk [vmem:[#allocation4 + $0x180] sm:$0xff] %vm9623_vm4, %v20560_v55  ;;  %v9711_v16 = vld [vmem:[#allocation8] sm:$0xff] }
 0x6d8   :  { %15219 = vmatprep.mubr.msk.f32.mxu0 %vm779_vm2, %v19539_v14  ;;  %15749 = vmatpush3.bf16.msra.mxu0 %v15746_v27  ;;  %9655 = vst.msk [vmem:[#allocation4 + $0x198] sm:$0xff] %vm9623_vm4, %v20560_v55  ;;  %9656 = vst.msk [vmem:[#allocation4 + $0x1b0] sm:$0xff] %vm9623_vm4, %v20560_v55  ;;  %v9716_v14 = vld [vmem:[#allocation8 + $0x28] sm:$0xff] }
 0x6d9   :  { %9638 = vst.msk [vmem:[#allocation4] sm:$0xff] %vm9623_vm4, %v20560_v55  ;;  %9647 = vst.msk [vmem:[#allocation4 + $0xd8] sm:$0xff] %vm9623_vm4, %v20560_v55  ;;  %15751 = vmatprep.subr.bf16.mxu0 %v15750_v54  ;;  %v15762_v46 = vpack.c.bf16 %v9716_v14, %v9715_v10 }
 0x6da   :  { %9648 = vst.msk [vmem:[#allocation4 + $0xf0] sm:$0xff] %vm9623_vm4, %v20560_v55  ;;  %9657 = vst.msk [vmem:[#allocation4 + $0x1c8] sm:$0xff] %vm9623_vm4, %v20560_v55 }
 0x6db   :  { %15220 = vmatmul.mubr.msk.f32.gmra.mrb[134].mxu0 %vm779_vm2, %v9361_v60  ;;  %9627 = vst.msk [vmem:[#allocation4 + $0x10] sm:$0x3] %vm9626_vm5, %v20560_v55  ;;  %9630 = vst.msk [vmem:[#allocation4 + $0x100] sm:$0x3] %vm9626_vm5, %v20560_v55 }
 0x6dc   :  { %15222 = vmatprep.mubr.msk.f32.mxu0 %vm779_vm2, %v19429_v37  ;;  %9634 = vst.msk [vmem:[#allocation4 + $0xe8] sm:$0x3] %vm9626_vm5, %v20560_v55  ;;  %9637 = vst.msk [vmem:[#allocation4 + $0x1d8] sm:$0x3] %vm9626_vm5, %v20560_v55  ;;  %15753 = vmatpush3.bf16.msra.mxu0 %v15750_v54  ;;  %v15754_v37 = vpack.c.bf16 %v9712_v35, %v9711_v16 }
 0x6dd   :  { %9659 = vst.msk [vmem:[#allocation4 + $0x28] sm:$0x3] %vm9626_vm5, %v20560_v55  ;;  %9660 = vst.msk [vmem:[#allocation4 + $0x40] sm:$0x3] %vm9626_vm5, %v20560_v55 }
 0x6de   :  { %9661 = vst.msk [vmem:[#allocation4 + $0x58] sm:$0x3] %vm9626_vm5, %v20560_v55  ;;  %9662 = vst.msk [vmem:[#allocation4 + $0x70] sm:$0x3] %vm9626_vm5, %v20560_v55  ;;  %15755 = vmatprep.subr.bf16.mxu0 %v15754_v37 }
 0x6df   :  { %15223 = vmatmul.mubr.msk.f32.gmra.mrb[136].mxu0 %vm779_vm2, %v19433_v13  ;;  %9663 = vst.msk [vmem:[#allocation4 + $0x88] sm:$0x3] %vm9626_vm5, %v20560_v55  ;;  %9664 = vst.msk [vmem:[#allocation4 + $0xa0] sm:$0x3] %vm9626_vm5, %v20560_v55  ;;  %v19756_v13 = vld [vmem:[%s20201_s6] ss:$0 sm:$0xff] }
 0x6e0   :  { %15225 = vmatprep.mubr.msk.f32.mxu0 %vm779_vm2, %v19437_v31  ;;  %9665 = vst.msk [vmem:[#allocation4 + $0xb8] sm:$0x3] %vm9626_vm5, %v20560_v55  ;;  %9666 = vst.msk [vmem:[#allocation4 + $0xd0] sm:$0x3] %vm9626_vm5, %v20560_v55 }
 0x6e1   :  { %9669 = vst.msk [vmem:[#allocation4 + $0x118] sm:$0x3] %vm9626_vm5, %v20560_v55  ;;  %9670 = vst.msk [vmem:[#allocation4 + $0x130] sm:$0x3] %vm9626_vm5, %v20560_v55 }
 0x6e2   :  { %9671 = vst.msk [vmem:[#allocation4 + $0x148] sm:$0x3] %vm9626_vm5, %v20560_v55  ;;  %9672 = vst.msk [vmem:[#allocation4 + $0x160] sm:$0x3] %vm9626_vm5, %v20560_v55 }
 0x6e3   :  { %15226 = vmatmul.mubr.msk.f32.gmra.mrb[138].mxu0 %vm779_vm2, %v19441_v36  ;;  %9673 = vst.msk [vmem:[#allocation4 + $0x178] sm:$0x3] %vm9626_vm5, %v20560_v55  ;;  %9674 = vst.msk [vmem:[#allocation4 + $0x190] sm:$0x3] %vm9626_vm5, %v20560_v55 }
 0x6e4   :  { %15228 = vmatprep.mubr.msk.f32.mxu0 %vm779_vm2, %v19445_v40  ;;  %9675 = vst.msk [vmem:[#allocation4 + $0x1a8] sm:$0x3] %vm9626_vm5, %v20560_v55  ;;  %9676 = vst.msk [vmem:[#allocation4 + $0x1c0] sm:$0x3] %vm9626_vm5, %v20560_v55 }
 0x6e5   :  { %9658 = vst.msk [vmem:[#allocation4 + $0x10] sm:$0x3] %vm9626_vm5, %v20560_v55  ;;  %9667 = vst.msk [vmem:[#allocation4 + $0xe8] sm:$0x3] %vm9626_vm5, %v20560_v55 }
 0x6e6   :  { %9668 = vst.msk [vmem:[#allocation4 + $0x100] sm:$0x3] %vm9626_vm5, %v20560_v55  ;;  %9677 = vst.msk [vmem:[#allocation4 + $0x1d8] sm:$0x3] %vm9626_vm5, %v20560_v55  ;;  %v15770_v55 = vpack.c.bf16 %v10148_v21, %v10147_v2 }
 0x6e7   :  { %15229 = vmatmul.mubr.msk.f32.gmra.mrb[140].mxu0 %vm779_vm2, %v19449_v42 }
 0x6e8   :  { %15231 = vmatprep.mubr.msk.f32.mxu0 %vm779_vm2, %v19557_v20 }
 0x6eb   :  { %15232 = vmatmul.mubr.msk.f32.gmra.mrb[142].mxu0 %vm779_vm2, %v9369_v11  ;;  %v9727_v11 = vld [vmem:[#allocation4 + $0xf8] sm:$0xff] }
 0x6ec   :  { %15250 = vmatprep.mubr.msk.f32.mxu0 %vm9623_vm4, %v9719_v15 }
 0x7a2   :  { %v15212_v31 = vpop.f32.mrb[128].mxu0 }
 0x7a3   :  { %v9592_v36 = vadd.f32 %v15212_v31, %v19756_v13  ;;  %v9489_v40 = vpop.f32.mrb[129].mxu0 }
 0x7a4   :  { %v9591_v42 = vadd.f32 %v19756_v13, %v9489_v40 }
 0x7a5   :  { %v9608_v38 = vmax.f32 %v9592_v36, 0.0 }
 0x7a6   :  { %v9607_v43 = vmax.f32 %v9591_v42, 0.0  ;;  %v15215_v44 = vpop.f32.mrb[130].mxu0 }
 0x7a7   :  { %9680 = vst.msk [vmem:[#allocation4 + $0x38] sm:$0xff] %vm9623_vm4, %v9608_v38  ;;  %v9594_v29 = vadd.f32 %v15215_v44, %v19756_v13  ;;  %v9499_v3 = vpop.f32.mrb[131].mxu0 }
 0x7a8   :  { %9679 = vst.msk [vmem:[#allocation4 + $0x20] sm:$0xff] %vm9623_vm4, %v9607_v43  ;;  %v9593_v7 = vadd.f32 %v19756_v13, %v9499_v3 }
 0x7a9   :  { %v9610_v62 = vmax.f32 %v9594_v29, 0.0 }
 0x7aa   :  { %v9609_v32 = vmax.f32 %v9593_v7, 0.0  ;;  %v15218_v25 = vpop.f32.mrb[132].mxu0 }
 0x7ab   :  { %9682 = vst.msk [vmem:[#allocation4 + $0x68] sm:$0xff] %vm9623_vm4, %v9610_v62  ;;  %v9596_v61 = vadd.f32 %v15218_v25, %v19756_v13  ;;  %v9509_v45 = vpop.f32.mrb[133].mxu0  ;;  %v9695_v62 = vld [vmem:[#allocation4 + $0x7] sm:$0xff]  ;;  %v10149_v25 = vld [vmem:[#allocation8 + $0x90] sm:$0xff] }
 0x7ac   :  { %9681 = vst.msk [vmem:[#allocation4 + $0x50] sm:$0xff] %vm9623_vm4, %v9609_v32  ;;  %v9595_v0 = vadd.f32 %v19756_v13, %v9509_v45 }
 0x7ad   :  { %v9612_v23 = vmax.f32 %v9596_v61, 0.0  ;;  %v10150_v61 = vld [vmem:[#allocation8 + $0x98] sm:$0xff] }
 0x7ae   :  { %v9611_v6 = vmax.f32 %v9595_v0, 0.0  ;;  %v15221_v49 = vpop.f32.mrb[134].mxu0  ;;  %v19776_v22 = vld [vmem:[#allocation4 + $0x38] sm:$0xff]  ;;  %v15774_v45 = vpack.c.bf16 %v10150_v61, %v10149_v25  ;;  %v10152_v0 = vld [vmem:[#allocation8 + $0xa8] sm:$0xff] }
 0x7af   :  { %9684 = vst.msk [vmem:[#allocation4 + $0x98] sm:$0xff] %vm9623_vm4, %v9612_v23  ;;  %v9598_v57 = vadd.f32 %v15221_v49, %v19756_v13  ;;  %v9519_v17 = vpop.f32.mrb[135].mxu0  ;;  %v19770_v52 = vld [vmem:[#allocation4 + $0x20] sm:$0xff]  ;;  %v19852_v23 = vld [vmem:[#allocation4 + $0x37] sm:$0xff] }
 0x7b0   :  { %9683 = vst.msk [vmem:[#allocation4 + $0x80] sm:$0xff] %vm9623_vm4, %v9611_v6  ;;  %v9597_v20 = vadd.f32 %v19756_v13, %v9519_v17  ;;  %15251 = vmatmul.mubr.msk.f32.vlgmr.msra.gmra.mrb[144].mxu0 %vm9623_vm4, %v19770_v52  ;;  %v19848_v47 = vld [vmem:[#allocation4 + $0x1f] sm:$0xff]  ;;  %v15778_v6 = vpack.c.bf16 %v10152_v0, %v10151_v53 }
 0x7b1   :  { %v9614_v26 = vmax.f32 %v9598_v57, 0.0  ;;  %15757 = vmatpush3.bf16.msra.mxu0 %v15754_v37  ;;  %15253 = vmatprep.mubr.msk.f32.mxu0 %vm9623_vm4, %v19776_v22  ;;  %v10154_v57 = vld [vmem:[#allocation8 + $0xb8] sm:$0xff]  ;;  %v19906_v21 = vld [vmem:[#allocation4 + $0x21] sm:$0xff] }
 0x7b2   :  { %v9613_v30 = vmax.f32 %v9597_v20, 0.0  ;;  %v15224_v33 = vpop.f32.mrb[136].mxu0  ;;  %15759 = vmatprep.subr.bf16.mxu0 %v15758_v24  ;;  %v19788_v28 = vld [vmem:[#allocation4 + $0x68] sm:$0xff]  ;;  %v10381_v20 = vld [vmem:[#allocation8 + $0xc0] sm:$0xff] }
 0x7b3   :  { %9686 = vst.msk [vmem:[#allocation4 + $0xc8] sm:$0xff] %vm9623_vm4, %v9614_v26  ;;  %v9600_v50 = vadd.f32 %v15224_v33, %v19756_v13  ;;  %v9529_v9 = vpop.f32.mrb[137].mxu0  ;;  %v19782_v39 = vld [vmem:[#allocation4 + $0x50] sm:$0xff]  ;;  %v19860_v17 = vld [vmem:[#allocation4 + $0x67] sm:$0xff] }
 0x7b4   :  { %9685 = vst.msk [vmem:[#allocation4 + $0xb0] sm:$0xff] %vm9623_vm4, %v9613_v30  ;;  %v9599_v8 = vadd.f32 %v19756_v13, %v9529_v9  ;;  %15254 = vmatmul.mubr.msk.f32.gmra.mrb[146].mxu0 %vm9623_vm4, %v19782_v39  ;;  %v19856_v49 = vld [vmem:[#allocation4 + $0x4f] sm:$0xff]  ;;  %v9703_v33 = vld [vmem:[#allocation4 + $0xf7] sm:$0xff] }
 0x7b5   :  { %v9616_v56 = vmax.f32 %v9600_v50, 0.0  ;;  %15256 = vmatprep.mubr.msk.f32.mxu0 %vm9623_vm4, %v19788_v28  ;;  %15761 = vmatpush3.bf16.msra.mxu0 %v15758_v24  ;;  %v10153_v24 = vld [vmem:[#allocation8 + $0xb0] sm:$0xff]  ;;  %v10382_v26 = vld [vmem:[#allocation8 + $0xc8] sm:$0xff] }
 0x7b6   :  { %v9615_v58 = vmax.f32 %v9599_v8, 0.0  ;;  %v15227_v59 = vpop.f32.mrb[138].mxu0  ;;  %15763 = vmatprep.subr.bf16.mxu0 %v15762_v46  ;;  %v19800_v34 = vld [vmem:[#allocation4 + $0x98] sm:$0xff]  ;;  %v15782_v10 = vpack.c.bf16 %v10154_v57, %v10153_v24 }
 0x7b7   :  { %9688 = vst.msk [vmem:[#allocation4 + $0x128] sm:$0xff] %vm9623_vm4, %v9616_v56  ;;  %v9602_v4 = vadd.f32 %v15227_v59, %v19756_v13  ;;  %v9539_v12 = vpop.f32.mrb[139].mxu0  ;;  %v19794_v63 = vld [vmem:[#allocation4 + $0x80] sm:$0xff]  ;;  %v19868_v30 = vld [vmem:[#allocation4 + $0x97] sm:$0xff]  ;;  %v10130_v59 = vld [vmem:[#allocation4 + $0x9] sm:$0xff] }
 0x7b8   :  { %9687 = vst.msk [vmem:[#allocation4 + $0x110] sm:$0xff] %vm9623_vm4, %v9615_v58  ;;  %v9601_v48 = vadd.f32 %v19756_v13, %v9539_v12  ;;  %15257 = vmatmul.mubr.msk.f32.gmra.mrb[148].mxu0 %vm9623_vm4, %v19794_v63  ;;  %v19864_v14 = vld [vmem:[#allocation4 + $0x7f] sm:$0xff] }
 0x7b9   :  { %v9618_v1 = vmax.f32 %v9602_v4, 0.0  ;;  %15259 = vmatprep.mubr.msk.f32.mxu0 %vm9623_vm4, %v19800_v34  ;;  %15765 = vmatpush3.bf16.msra.mxu0 %v15762_v46  ;;  %v15786_v46 = vpack.c.bf16 %v10382_v26, %v10381_v20  ;;  %v10383_v4 = vld [vmem:[#allocation8 + $0xd0] sm:$0xff]  ;;  %v10384_v12 = vld [vmem:[#allocation8 + $0xd8] sm:$0xff]  ;;  %v10620_v20 = vld [vmem:[#allocation8 + $0x128] sm:$0xff] }
 0x7ba   :  { %v9617_v27 = vmax.f32 %v9601_v48, 0.0  ;;  %v15230_v60 = vpop.f32.mrb[140].mxu0  ;;  %15767 = vmatprep.subr.bf16.mxu0 %v15766_v18  ;;  %v15790_v2 = vpack.c.bf16 %v10384_v12, %v10383_v4  ;;  %v10385_v48 = vld [vmem:[#allocation8 + $0xe0] sm:$0xff]  ;;  %v10618_v24 = vld [vmem:[#allocation8 + $0x118] sm:$0xff]  ;;  %v10850_v4 = vld [vmem:[#allocation8 + $0x148] sm:$0xff] }
 0x7bb   :  { %9690 = vst.msk [vmem:[#allocation4 + $0x158] sm:$0xff] %vm9623_vm4, %v9618_v1  ;;  %v9604_v51 = vadd.f32 %v15230_v60, %v19756_v13  ;;  %v9549_v5 = vpop.f32.mrb[141].mxu0  ;;  %v19806_v54 = vld [vmem:[#allocation4 + $0xb0] sm:$0xff]  ;;  %v10386_v1 = vld [vmem:[#allocation8 + $0xe8] sm:$0xff] }
 0x7bc   :  { %9689 = vst.msk [vmem:[#allocation4 + $0x140] sm:$0xff] %vm9623_vm4, %v9617_v27  ;;  %v9603_v15 = vadd.f32 %v19756_v13, %v9549_v5  ;;  %15260 = vmatmul.mubr.msk.f32.gmra.mrb[150].mxu0 %vm9623_vm4, %v19806_v54  ;;  %v19872_v50 = vld [vmem:[#allocation4 + $0xaf] sm:$0xff]  ;;  %v19910_v27 = vld [vmem:[#allocation4 + $0x39] sm:$0xff]  ;;  %v15794_v60 = vpack.c.bf16 %v10386_v1, %v10385_v48 }
 0x7bd   :  { %v9620_v16 = vmax.f32 %v9604_v51, 0.0  ;;  %15262 = vmatprep.mubr.msk.f32.mxu0 %vm9623_vm4, %v9727_v11  ;;  %15769 = vmatpush3.bf16.msra.mxu0 %v15766_v18  ;;  %v19914_v11 = vld [vmem:[#allocation4 + $0x51] sm:$0xff]  ;;  %v19918_v5 = vld [vmem:[#allocation4 + $0x69] sm:$0xff] }
 0x7be   :  { %v9619_v35 = vmax.f32 %v9603_v15, 0.0  ;;  %v15233_v37 = vpop.f32.mrb[142].mxu0  ;;  %15771 = vmatprep.subr.bf16.mxu0 %v15770_v55  ;;  %v19821_v38 = vld [vmem:[#allocation4 + $0x128] sm:$0xff]  ;;  %v10388_v51 = vld [vmem:[#allocation8 + $0xf8] sm:$0xff]  ;;  %v10851_v48 = vld [vmem:[#allocation8 + $0x150] sm:$0xff] }
 0x7bf   :  { %9692 = vst.msk [vmem:[#allocation4 + $0x188] sm:$0xff] %vm9623_vm4, %v9620_v16  ;;  %v9606_v31 = vadd.f32 %v15233_v37, %v19756_v13  ;;  %v9559_v36 = vpop.f32.mrb[143].mxu0  ;;  %v19815_v40 = vld [vmem:[#allocation4 + $0x110] sm:$0xff]  ;;  %v19881_v41 = vld [vmem:[#allocation4 + $0x127] sm:$0xff]  ;;  %v10852_v1 = vld [vmem:[#allocation8 + $0x158] sm:$0xff] }
 0x7c0   :  { %9691 = vst.msk [vmem:[#allocation4 + $0x170] sm:$0xff] %vm9623_vm4, %v9619_v35  ;;  %v9605_v42 = vadd.f32 %v19756_v13, %v9559_v36  ;;  %15263 = vmatmul.mubr.msk.f32.gmra.mrb[152].mxu0 %vm9623_vm4, %v19815_v40  ;;  %v19877_v9 = vld [vmem:[#allocation4 + $0x10f] sm:$0xff]  ;;  %v19922_v16 = vld [vmem:[#allocation4 + $0x81] sm:$0xff]  ;;  %v10138_v36 = vld [vmem:[#allocation4 + $0xf9] sm:$0xff] }
 0x7c1   :  { %v9622_v43 = vmax.f32 %v9606_v31, 0.0  ;;  %15265 = vmatprep.mubr.msk.f32.mxu0 %vm9623_vm4, %v19821_v38  ;;  %v10615_v35 = vld [vmem:[#allocation8 + $0x100] sm:$0xff]  ;;  %v10616_v37 = vld [vmem:[#allocation8 + $0x108] sm:$0xff] }
 0x7c2   :  { %v9621_v44 = vmax.f32 %v9605_v42, 0.0  ;;  %v19831_v13 = vld [vmem:[#allocation4 + $0x158] sm:$0xff]  ;;  %v15802_v42 = vpack.c.bf16 %v10616_v37, %v10615_v35  ;;  %v10855_v35 = vld [vmem:[#allocation8 + $0x170] sm:$0xff] }
 0x7c3   :  { %9694 = vst.msk [vmem:[#allocation4 + $0x1b8] sm:$0xff] %vm9623_vm4, %v9622_v43  ;;  %v19826_v29 = vld [vmem:[#allocation4 + $0x140] sm:$0xff]  ;;  %v19889_v8 = vld [vmem:[#allocation4 + $0x157] sm:$0xff] }
 0x7c4   :  { %9693 = vst.msk [vmem:[#allocation4 + $0x1a0] sm:$0xff] %vm9623_vm4, %v9621_v44  ;;  %15266 = vmatmul.mubr.msk.f32.gmra.mrb[154].mxu0 %vm9623_vm4, %v19826_v29  ;;  %v19885_v19 = vld [vmem:[#allocation4 + $0x13f] sm:$0xff]  ;;  %v19930_v43 = vld [vmem:[#allocation4 + $0xb1] sm:$0xff] }
 0x7c5   :  { %15268 = vmatprep.mubr.msk.f32.mxu0 %vm9623_vm4, %v19831_v13  ;;  %v19926_v31 = vld [vmem:[#allocation4 + $0x99] sm:$0xff]  ;;  %v19935_v44 = vld [vmem:[#allocation4 + $0x111] sm:$0xff]  ;;  %v19943_v25 = vld [vmem:[#allocation4 + $0x141] sm:$0xff] }
 0x7c6   :  { %v19839_v7 = vld [vmem:[#allocation4 + $0x188] sm:$0xff]  ;;  %v19947_v61 = vld [vmem:[#allocation4 + $0x159] sm:$0xff] }
 0x7c7   :  { %v19835_v3 = vld [vmem:[#allocation4 + $0x170] sm:$0xff]  ;;  %v19897_v58 = vld [vmem:[#allocation4 + $0x187] sm:$0xff]  ;;  %v10856_v37 = vld [vmem:[#allocation8 + $0x178] sm:$0xff] }
 0x7c8   :  { %15269 = vmatmul.mubr.msk.f32.gmra.mrb[156].mxu0 %vm9623_vm4, %v19835_v3  ;;  %v19893_v56 = vld [vmem:[#allocation4 + $0x16f] sm:$0xff] }
 0x7c9   :  { %15271 = vmatprep.mubr.msk.f32.mxu0 %vm9623_vm4, %v19839_v7  ;;  %v19955_v53 = vld [vmem:[#allocation4 + $0x189] sm:$0xff] }
 0x7cb   :  { %v19843_v32 = vld [vmem:[#allocation4 + $0x1a0] sm:$0xff] }
 0x7cc   :  { %15272 = vmatmul.mubr.msk.f32.gmra.mrb[158].mxu0 %vm9623_vm4, %v19843_v32  ;;  %v19901_v18 = vld [vmem:[#allocation4 + $0x19f] sm:$0xff] }
 0x7cd   :  { %15290 = vmatprep.mubr.msk.f32.mxu0 %vm9623_vm4, %v9695_v62  ;;  %v19939_v62 = vld [vmem:[#allocation4 + $0x129] sm:$0xff]  ;;  %v19959_v0 = vld [vmem:[#allocation4 + $0x1a1] sm:$0xff] }
 0x7d0   :  { %15291 = vmatmul.mubr.msk.f32.vlgmr.msra.gmra.mrb[144].mxu0 %vm9623_vm4, %v19848_v47 }
 0x7d1   :  { %15773 = vmatpush3.bf16.msra.mxu0 %v15770_v55  ;;  %15293 = vmatprep.mubr.msk.f32.mxu0 %vm9623_vm4, %v19852_v23  ;;  %v10387_v55 = vld [vmem:[#allocation8 + $0xf0] sm:$0xff] }
 0x7d2   :  { %15775 = vmatprep.subr.bf16.mxu0 %v15774_v45  ;;  %v15798_v15 = vpack.c.bf16 %v10388_v51, %v10387_v55  ;;  %v10853_v55 = vld [vmem:[#allocation8 + $0x160] sm:$0xff]  ;;  %v10854_v51 = vld [vmem:[#allocation8 + $0x168] sm:$0xff] }
 0x7d4   :  { %15294 = vmatmul.mubr.msk.f32.gmra.mrb[146].mxu0 %vm9623_vm4, %v19856_v49 }
 0x7d5   :  { %15296 = vmatprep.mubr.msk.f32.mxu0 %vm9623_vm4, %v19860_v17  ;;  %15777 = vmatpush3.bf16.msra.mxu0 %v15774_v45  ;;  %v19951_v45 = vld [vmem:[#allocation4 + $0x171] sm:$0xff] }
 0x7d6   :  { %15779 = vmatprep.subr.bf16.mxu0 %v15778_v6 }
 0x7d8   :  { %15297 = vmatmul.mubr.msk.f32.gmra.mrb[148].mxu0 %vm9623_vm4, %v19864_v14 }
 0x7d9   :  { %15299 = vmatprep.mubr.msk.f32.mxu0 %vm9623_vm4, %v19868_v30  ;;  %15781 = vmatpush3.bf16.msra.mxu0 %v15778_v6  ;;  %v10617_v6 = vld [vmem:[#allocation8 + $0x110] sm:$0xff] }
 0x7da   :  { %15783 = vmatprep.subr.bf16.mxu0 %v15782_v10  ;;  %v15806_v57 = vpack.c.bf16 %v10618_v24, %v10617_v6  ;;  %v20013_v24 = vld [vmem:[#allocation4 + $0xc8] sm:$0xff] }
 0x7dc   :  { %15300 = vmatmul.mubr.msk.f32.gmra.mrb[150].mxu0 %vm9623_vm4, %v19872_v50 }
 0x7dd   :  { %15302 = vmatprep.mubr.msk.f32.mxu0 %vm9623_vm4, %v9703_v33  ;;  %15785 = vmatpush3.bf16.msra.mxu0 %v15782_v10  ;;  %v10619_v10 = vld [vmem:[#allocation8 + $0x120] sm:$0xff]  ;;  %v10621_v33 = vld [vmem:[#allocation8 + $0x130] sm:$0xff] }
 0x7de   :  { %15787 = vmatprep.subr.bf16.mxu0 %v15786_v46  ;;  %v15810_v26 = vpack.c.bf16 %v10620_v20, %v10619_v10  ;;  %v11087_v10 = vld [vmem:[#allocation8 + $0x198] sm:$0xff] }
 0x7e0   :  { %15303 = vmatmul.mubr.msk.f32.gmra.mrb[152].mxu0 %vm9623_vm4, %v19877_v9 }
 0x7e1   :  { %15305 = vmatprep.mubr.msk.f32.mxu0 %vm9623_vm4, %v19881_v41 }
 0x7e4   :  { %15306 = vmatmul.mubr.msk.f32.gmra.mrb[154].mxu0 %vm9623_vm4, %v19885_v19 }
 0x7e5   :  { %15308 = vmatprep.mubr.msk.f32.mxu0 %vm9623_vm4, %v19889_v8 }
 0x7e8   :  { %15309 = vmatmul.mubr.msk.f32.gmra.mrb[156].mxu0 %vm9623_vm4, %v19893_v56 }
 0x7e9   :  { %15311 = vmatprep.mubr.msk.f32.mxu0 %vm9623_vm4, %v19897_v58 }
 0x7ec   :  { %15312 = vmatmul.mubr.msk.f32.gmra.mrb[158].mxu0 %vm9623_vm4, %v19901_v18 }
 0x7ed   :  { %15330 = vmatprep.mubr.msk.f32.mxu0 %vm9623_vm4, %v10130_v59  ;;  %v10849_v59 = vld [vmem:[#allocation8 + $0x140] sm:$0xff] }
 0x7ee   :  { %v15818_v12 = vpack.c.bf16 %v10850_v4, %v10849_v59  ;;  %v11091_v59 = vld [vmem:[#allocation8 + $0x1b8] sm:$0xff]  ;;  %v11318_v4 = vld [vmem:[#allocation8 + $0x1c0] sm:$0xff] }
 0x7f0   :  { %15331 = vmatmul.mubr.msk.f32.vlgmr.msra.gmra.mrb[144].mxu0 %vm9623_vm4, %v19906_v21 }
 0x7f1   :  { %15789 = vmatpush3.bf16.msra.mxu0 %v15786_v46  ;;  %15333 = vmatprep.mubr.msk.f32.mxu0 %vm9623_vm4, %v19910_v27  ;;  %v10622_v46 = vld [vmem:[#allocation8 + $0x138] sm:$0xff] }
 0x7f2   :  { %15791 = vmatprep.subr.bf16.mxu0 %v15790_v2 }
 0x7f4   :  { %15334 = vmatmul.mubr.msk.f32.gmra.mrb[146].mxu0 %vm9623_vm4, %v19914_v11 }
 0x7f5   :  { %15336 = vmatprep.mubr.msk.f32.mxu0 %vm9623_vm4, %v19918_v5  ;;  %15793 = vmatpush3.bf16.msra.mxu0 %v15790_v2  ;;  %v19977_v2 = vld [vmem:[#allocation4 + $0xc7] sm:$0xff] }
 0x7f6   :  { %15795 = vmatprep.subr.bf16.mxu0 %v15794_v60 }
 0x7f8   :  { %15337 = vmatmul.mubr.msk.f32.gmra.mrb[148].mxu0 %vm9623_vm4, %v19922_v16 }
 0x7f9   :  { %15339 = vmatprep.mubr.msk.f32.mxu0 %vm9623_vm4, %v19926_v31  ;;  %15797 = vmatpush3.bf16.msra.mxu0 %v15794_v60  ;;  %v15822_v60 = vpack.c.bf16 %v10852_v1, %v10851_v48  ;;  %v20049_v1 = vld [vmem:[#allocation4 + $0xc9] sm:$0xff] }
 0x7fa   :  { %15799 = vmatprep.subr.bf16.mxu0 %v15798_v15 }
 0x7fc   :  { %15340 = vmatmul.mubr.msk.f32.gmra.mrb[150].mxu0 %vm9623_vm4, %v19930_v43 }
 0x7fd   :  { %15342 = vmatprep.mubr.msk.f32.mxu0 %vm9623_vm4, %v10138_v36  ;;  %15801 = vmatpush3.bf16.msra.mxu0 %v15798_v15  ;;  %v15826_v15 = vpack.c.bf16 %v10854_v51, %v10853_v55  ;;  %v11084_v36 = vld [vmem:[#allocation8 + $0x180] sm:$0xff]  ;;  %v11321_v55 = vld [vmem:[#allocation8 + $0x1d8] sm:$0xff] }
 0x7fe   :  { %15803 = vmatprep.subr.bf16.mxu0 %v15802_v42 }
 0x800   :  { %15343 = vmatmul.mubr.msk.f32.gmra.mrb[152].mxu0 %vm9623_vm4, %v19935_v44 }
 0x801   :  { %15345 = vmatprep.mubr.msk.f32.mxu0 %vm9623_vm4, %v19939_v62 }
 0x804   :  { %15346 = vmatmul.mubr.msk.f32.gmra.mrb[154].mxu0 %vm9623_vm4, %v19943_v25 }
 0x805   :  { %15348 = vmatprep.mubr.msk.f32.mxu0 %vm9623_vm4, %v19947_v61 }
 0x808   :  { %15349 = vmatmul.mubr.msk.f32.gmra.mrb[156].mxu0 %vm9623_vm4, %v19951_v45 }
 0x809   :  { %15351 = vmatprep.mubr.msk.f32.mxu0 %vm9623_vm4, %v19955_v53 }
 0x80c   :  { %15352 = vmatmul.mubr.msk.f32.gmra.mrb[158].mxu0 %vm9623_vm4, %v19959_v0 }
 0x80d   :  { %15370 = vmatprep.mubr.msk.f32.mxu0 %vm9623_vm4, %v19848_v47  ;;  %v15814_v47 = vpack.c.bf16 %v10622_v46, %v10621_v33  ;;  %v11089_v33 = vld [vmem:[#allocation8 + $0x1a8] sm:$0xff] }
 0x810   :  { %15371 = vmatmul.mubr.msk.f32.vlgmr.msra.gmra.mrb[144].mxu0 %vm9623_vm4, %v19852_v23 }
 0x811   :  { %15805 = vmatpush3.bf16.msra.mxu0 %v15802_v42  ;;  %15373 = vmatprep.mubr.msk.f32.mxu0 %vm9623_vm4, %v19856_v49  ;;  %v11085_v42 = vld [vmem:[#allocation8 + $0x188] sm:$0xff] }
 0x812   :  { %15807 = vmatprep.subr.bf16.mxu0 %v15806_v57  ;;  %v15834_v6 = vpack.c.bf16 %v11085_v42, %v11084_v36  ;;  %v11325_v36 = vld [vmem:[#allocation8 + $0x1f8] sm:$0xff]  ;;  %v11552_v42 = vld [vmem:[#allocation8 + $0x200] sm:$0xff] }
 0x814   :  { %15374 = vmatmul.mubr.msk.f32.gmra.mrb[146].mxu0 %vm9623_vm4, %v19860_v17 }
 0x815   :  { %15376 = vmatprep.mubr.msk.f32.mxu0 %vm9623_vm4, %v19864_v14  ;;  %15809 = vmatpush3.bf16.msra.mxu0 %v15806_v57  ;;  %v11086_v57 = vld [vmem:[#allocation8 + $0x190] sm:$0xff] }
 0x816   :  { %15811 = vmatprep.subr.bf16.mxu0 %v15810_v26  ;;  %v15838_v20 = vpack.c.bf16 %v11087_v10, %v11086_v57 }
 0x818   :  { %15377 = vmatmul.mubr.msk.f32.gmra.mrb[148].mxu0 %vm9623_vm4, %v19868_v30 }
 0x819   :  { %15379 = vmatprep.mubr.msk.f32.mxu0 %vm9623_vm4, %v19872_v50  ;;  %15813 = vmatpush3.bf16.msra.mxu0 %v15810_v26  ;;  %v11088_v26 = vld [vmem:[#allocation8 + $0x1a0] sm:$0xff] }
 0x81a   :  { %15815 = vmatprep.subr.bf16.mxu0 %v15814_v47  ;;  %v15842_v46 = vpack.c.bf16 %v11089_v33, %v11088_v26 }
 0x81c   :  { %15380 = vmatmul.mubr.msk.f32.gmra.mrb[150].mxu0 %vm9623_vm4, %v19977_v2 }
 0x81d   :  { %15382 = vmatprep.mubr.msk.f32.mxu0 %vm9623_vm4, %v19877_v9  ;;  %15817 = vmatpush3.bf16.msra.mxu0 %v15814_v47  ;;  %v19995_v9 = vld [vmem:[#allocation4 + $0x1b7] sm:$0xff] }
 0x81e   :  { %15819 = vmatprep.subr.bf16.mxu0 %v15818_v12  ;;  %v11090_v47 = vld [vmem:[#allocation8 + $0x1b0] sm:$0xff] }
 0x820   :  { %15383 = vmatmul.mubr.msk.f32.gmra.mrb[152].mxu0 %vm9623_vm4, %v19881_v41 }
 0x821   :  { %15385 = vmatprep.mubr.msk.f32.mxu0 %vm9623_vm4, %v19885_v19 }
 0x824   :  { %15386 = vmatmul.mubr.msk.f32.gmra.mrb[154].mxu0 %vm9623_vm4, %v19889_v8 }
 0x825   :  { %15388 = vmatprep.mubr.msk.f32.mxu0 %vm9623_vm4, %v19893_v56 }
 0x828   :  { %15389 = vmatmul.mubr.msk.f32.gmra.mrb[156].mxu0 %vm9623_vm4, %v19897_v58 }
 0x829   :  { %15391 = vmatprep.mubr.msk.f32.mxu0 %vm9623_vm4, %v19901_v18 }
 0x82c   :  { %15392 = vmatmul.mubr.msk.f32.gmra.mrb[158].mxu0 %vm9623_vm4, %v19995_v9 }
 0x82d   :  { %15410 = vmatprep.mubr.msk.f32.mxu0 %vm9623_vm4, %v19770_v52  ;;  %v15830_v52 = vpack.c.bf16 %v10856_v37, %v10855_v35  ;;  %v11323_v35 = vld [vmem:[#allocation8 + $0x1e8] sm:$0xff] }
 0x830   :  { %15411 = vmatmul.mubr.msk.f32.vlgmr.msra.gmra.mrb[144].mxu0 %vm9623_vm4, %v19776_v22 }
 0x831   :  { %15821 = vmatpush3.bf16.msra.mxu0 %v15818_v12  ;;  %15413 = vmatprep.mubr.msk.f32.mxu0 %vm9623_vm4, %v19782_v39  ;;  %v11319_v12 = vld [vmem:[#allocation8 + $0x1c8] sm:$0xff] }
 0x832   :  { %15823 = vmatprep.subr.bf16.mxu0 %v15822_v60  ;;  %v15850_v48 = vpack.c.bf16 %v11319_v12, %v11318_v4 }
 0x834   :  { %15414 = vmatmul.mubr.msk.f32.gmra.mrb[146].mxu0 %vm9623_vm4, %v19788_v28 }
 0x835   :  { %15416 = vmatprep.mubr.msk.f32.mxu0 %vm9623_vm4, %v19794_v63  ;;  %15825 = vmatpush3.bf16.msra.mxu0 %v15822_v60  ;;  %v11320_v60 = vld [vmem:[#allocation8 + $0x1d0] sm:$0xff] }
 0x836   :  { %15827 = vmatprep.subr.bf16.mxu0 %v15826_v15  ;;  %v15854_v51 = vpack.c.bf16 %v11321_v55, %v11320_v60 }
 0x838   :  { %15417 = vmatmul.mubr.msk.f32.gmra.mrb[148].mxu0 %vm9623_vm4, %v19800_v34 }
 0x839   :  { %15419 = vmatprep.mubr.msk.f32.mxu0 %vm9623_vm4, %v19806_v54  ;;  %15829 = vmatpush3.bf16.msra.mxu0 %v15826_v15  ;;  %v11322_v15 = vld [vmem:[#allocation8 + $0x1e0] sm:$0xff] }
 0x83a   :  { %15831 = vmatprep.subr.bf16.mxu0 %v15830_v52  ;;  %v15858_v37 = vpack.c.bf16 %v11323_v35, %v11322_v15 }
 0x83c   :  { %15420 = vmatmul.mubr.msk.f32.gmra.mrb[150].mxu0 %vm9623_vm4, %v20013_v24 }
 0x83d   :  { %15422 = vmatprep.mubr.msk.f32.mxu0 %vm9623_vm4, %v19815_v40  ;;  %15833 = vmatpush3.bf16.msra.mxu0 %v15830_v52  ;;  %v20031_v40 = vld [vmem:[#allocation4 + $0x1b8] sm:$0xff]  ;;  %v11324_v52 = vld [vmem:[#allocation8 + $0x1f0] sm:$0xff] }
 0x83e   :  { %15835 = vmatprep.subr.bf16.mxu0 %v15834_v6 }
 0x840   :  { %15423 = vmatmul.mubr.msk.f32.gmra.mrb[152].mxu0 %vm9623_vm4, %v19821_v38 }
 0x841   :  { %15425 = vmatprep.mubr.msk.f32.mxu0 %vm9623_vm4, %v19826_v29 }
 0x844   :  { %15426 = vmatmul.mubr.msk.f32.gmra.mrb[154].mxu0 %vm9623_vm4, %v19831_v13 }
 0x845   :  { %15428 = vmatprep.mubr.msk.f32.mxu0 %vm9623_vm4, %v19835_v3 }
 0x848   :  { %15429 = vmatmul.mubr.msk.f32.gmra.mrb[156].mxu0 %vm9623_vm4, %v19839_v7 }
 0x849   :  { %15431 = vmatprep.mubr.msk.f32.mxu0 %vm9623_vm4, %v19843_v32 }
 0x84c   :  { %15432 = vmatmul.mubr.msk.f32.gmra.mrb[158].mxu0 %vm9623_vm4, %v20031_v40 }
 0x84d   :  { %15450 = vmatprep.mubr.msk.f32.mxu0 %vm9623_vm4, %v19906_v21  ;;  %v15846_v21 = vpack.c.bf16 %v11091_v59, %v11090_v47 }
 0x850   :  { %15451 = vmatmul.mubr.msk.f32.vlgmr.msra.gmra.mrb[144].mxu0 %vm9623_vm4, %v19910_v27 }
 0x851   :  { %15837 = vmatpush3.bf16.msra.mxu0 %v15834_v6  ;;  %15453 = vmatprep.mubr.msk.f32.mxu0 %vm9623_vm4, %v19914_v11  ;;  %v11553_v6 = vld [vmem:[#allocation8 + $0x208] sm:$0xff] }
 0x852   :  { %15839 = vmatprep.subr.bf16.mxu0 %v15838_v20 }
 0x854   :  { %15454 = vmatmul.mubr.msk.f32.gmra.mrb[146].mxu0 %vm9623_vm4, %v19918_v5 }
 0x855   :  { %15456 = vmatprep.mubr.msk.f32.mxu0 %vm9623_vm4, %v19922_v16  ;;  %15841 = vmatpush3.bf16.msra.mxu0 %v15838_v20 }
 0x856   :  { %15843 = vmatprep.subr.bf16.mxu0 %v15842_v46 }
 0x858   :  { %15457 = vmatmul.mubr.msk.f32.gmra.mrb[148].mxu0 %vm9623_vm4, %v19926_v31 }
 0x859   :  { %15459 = vmatprep.mubr.msk.f32.mxu0 %vm9623_vm4, %v19930_v43  ;;  %15845 = vmatpush3.bf16.msra.mxu0 %v15842_v46 }
 0x85a   :  { %15847 = vmatprep.subr.bf16.mxu0 %v15846_v21 }
 0x85c   :  { %15460 = vmatmul.mubr.msk.f32.gmra.mrb[150].mxu0 %vm9623_vm4, %v20049_v1 }
 0x85d   :  { %15462 = vmatprep.mubr.msk.f32.mxu0 %vm9623_vm4, %v19935_v44  ;;  %15849 = vmatpush3.bf16.msra.mxu0 %v15846_v21  ;;  %v20067_v44 = vld [vmem:[#allocation4 + $0x1b9] sm:$0xff] }
 0x85e   :  { %15851 = vmatprep.subr.bf16.mxu0 %v15850_v48 }
 0x860   :  { %15463 = vmatmul.mubr.msk.f32.gmra.mrb[152].mxu0 %vm9623_vm4, %v19939_v62 }
 0x861   :  { %15465 = vmatprep.mubr.msk.f32.mxu0 %vm9623_vm4, %v19943_v25 }
 0x864   :  { %15466 = vmatmul.mubr.msk.f32.gmra.mrb[154].mxu0 %vm9623_vm4, %v19947_v61 }
 0x865   :  { %15468 = vmatprep.mubr.msk.f32.mxu0 %vm9623_vm4, %v19951_v45 }
 0x868   :  { %15469 = vmatmul.mubr.msk.f32.gmra.mrb[156].mxu0 %vm9623_vm4, %v19955_v53 }
 0x869   :  { %15471 = vmatprep.mubr.msk.f32.mxu0 %vm9623_vm4, %v19959_v0 }
 0x86c   :  { %15472 = vmatmul.mubr.msk.f32.gmra.mrb[158].mxu0 %vm9623_vm4, %v20067_v44 }
 0x86d   :  { %15490 = vmatprep.mubr.msk.f32.mxu0 %vm9623_vm4, %v19852_v23  ;;  %v15862_v23 = vpack.c.bf16 %v11325_v36, %v11324_v52 }
 0x870   :  { %15491 = vmatmul.mubr.msk.f32.vlgmr.msra.gmra.mrb[144].mxu0 %vm9623_vm4, %v19856_v49  ;;  %v11074_v49 = vld [vmem:[#allocation4 + $0xdf] sm:$0xff] }
 0x871   :  { %15853 = vmatpush3.bf16.msra.mxu0 %v15850_v48  ;;  %15493 = vmatprep.mubr.msk.f32.mxu0 %vm9623_vm4, %v19860_v17  ;;  %v15866_v17 = vpack.c.bf16 %v11553_v6, %v11552_v42 }
 0x872   :  { %15855 = vmatprep.subr.bf16.mxu0 %v15854_v51 }
 0x874   :  { %15494 = vmatmul.mubr.msk.f32.gmra.mrb[146].mxu0 %vm9623_vm4, %v19864_v14  ;;  %v11082_v14 = vld [vmem:[#allocation4 + $0x1cf] sm:$0xff] }
 0x875   :  { %15496 = vmatprep.mubr.msk.f32.mxu0 %vm9623_vm4, %v19868_v30  ;;  %15857 = vmatpush3.bf16.msra.mxu0 %v15854_v51  ;;  %v11554_v30 = vld [vmem:[#allocation8 + $0x210] sm:$0xff] }
 0x876   :  { %15859 = vmatprep.subr.bf16.mxu0 %v15858_v37 }
 0x878   :  { %15497 = vmatmul.mubr.msk.f32.gmra.mrb[148].mxu0 %vm9623_vm4, %v19872_v50  ;;  %v11555_v50 = vld [vmem:[#allocation8 + $0x218] sm:$0xff] }
 0x879   :  { %15499 = vmatprep.mubr.msk.f32.mxu0 %vm9623_vm4, %v19977_v2  ;;  %15861 = vmatpush3.bf16.msra.mxu0 %v15858_v37 }
 0x87a   :  { %15863 = vmatprep.subr.bf16.mxu0 %v15862_v23 }
 0x87c   :  { %15500 = vmatmul.mubr.msk.f32.gmra.mrb[150].mxu0 %vm9623_vm4, %v11074_v49 }
 0x87d   :  { %15502 = vmatprep.mubr.msk.f32.mxu0 %vm9623_vm4, %v19881_v41  ;;  %15865 = vmatpush3.bf16.msra.mxu0 %v15862_v23  ;;  %v15870_v41 = vpack.c.bf16 %v11555_v50, %v11554_v30 }
 0x87e   :  { %15867 = vmatprep.subr.bf16.mxu0 %v15866_v17 }
 0x880   :  { %15503 = vmatmul.mubr.msk.f32.gmra.mrb[152].mxu0 %vm9623_vm4, %v19885_v19  ;;  %v11556_v19 = vld [vmem:[#allocation8 + $0x220] sm:$0xff] }
 0x881   :  { %15505 = vmatprep.mubr.msk.f32.mxu0 %vm9623_vm4, %v19889_v8  ;;  %v11557_v8 = vld [vmem:[#allocation8 + $0x228] sm:$0xff] }
 0x884   :  { %15506 = vmatmul.mubr.msk.f32.gmra.mrb[154].mxu0 %vm9623_vm4, %v19893_v56  ;;  %v15874_v56 = vpack.c.bf16 %v11557_v8, %v11556_v19 }
 0x885   :  { %15508 = vmatprep.mubr.msk.f32.mxu0 %vm9623_vm4, %v19897_v58  ;;  %v11558_v58 = vld [vmem:[#allocation8 + $0x230] sm:$0xff] }
 0x888   :  { %15509 = vmatmul.mubr.msk.f32.gmra.mrb[156].mxu0 %vm9623_vm4, %v19901_v18  ;;  %v11559_v18 = vld [vmem:[#allocation8 + $0x238] sm:$0xff] }
 0x889   :  { %15511 = vmatprep.mubr.msk.f32.mxu0 %vm9623_vm4, %v19995_v9 }
 0x88c   :  { %15512 = vmatmul.mubr.msk.f32.gmra.mrb[158].mxu0 %vm9623_vm4, %v11082_v14 }
 0x88d   :  { %15530 = vmatprep.mubr.msk.f32.mxu0 %vm9623_vm4, %v19776_v22  ;;  %v15878_v22 = vpack.c.bf16 %v11559_v18, %v11558_v58 }
 0x890   :  { %15531 = vmatmul.mubr.msk.f32.vlgmr.msra.gmra.mrb[144].mxu0 %vm9623_vm4, %v19782_v39  ;;  %v11308_v39 = vld [vmem:[#allocation4 + $0xe0] sm:$0xff] }
 0x891   :  { %15869 = vmatpush3.bf16.msra.mxu0 %v15866_v17  ;;  %15533 = vmatprep.mubr.msk.f32.mxu0 %vm9623_vm4, %v19788_v28  ;;  %v11316_v28 = vld [vmem:[#allocation4 + $0x1d0] sm:$0xff] }
 0x892   :  { %15871 = vmatprep.subr.bf16.mxu0 %v15870_v41 }
 0x894   :  { %15534 = vmatmul.mubr.msk.f32.gmra.mrb[146].mxu0 %vm9623_vm4, %v19794_v63  ;;  %v11542_v63 = vld [vmem:[#allocation4 + $0xe1] sm:$0xff] }
 0x895   :  { %15536 = vmatprep.mubr.msk.f32.mxu0 %vm9623_vm4, %v19800_v34  ;;  %15873 = vmatpush3.bf16.msra.mxu0 %v15870_v41  ;;  %v11550_v34 = vld [vmem:[#allocation4 + $0x1d1] sm:$0xff] }
 0x896   :  { %15875 = vmatprep.subr.bf16.mxu0 %v15874_v56 }
 0x898   :  { %15537 = vmatmul.mubr.msk.f32.gmra.mrb[148].mxu0 %vm9623_vm4, %v19806_v54  ;;  %v12838_v54 = vld [vmem:[%s20203_s8] ss:$0 sm:$0xff]  ;;  %s16738_s8 = smov [#allocation10]  }
 0x899   :  { %15539 = vmatprep.mubr.msk.f32.mxu0 %vm9623_vm4, %v20013_v24  ;;  %15877 = vmatpush3.bf16.msra.mxu0 %v15874_v56  ;;  %s11829_s7 = sshll.u32 %s16738_s8, 4  ;;  %s11830_s7 = int_to_ptr.vmem [resolvable:$true] %s11829_s7 }
 0x89a   :  { %15879 = vmatprep.subr.bf16.mxu0 %v15878_v22  ;;  %s16705_s21 = scalar_lea.vmem %s11830_s7, 2048  ;;  %p16710_p3 = scmp.lt.s32.totalorder %s11830_s7, %s11830_s7 }
 0x89b   :  { %p16706_p2 = scmp.ne.s32.totalorder %s11830_s7, %s16705_s21  ;;  %p16711_p4 = scmp.lt.s32.totalorder %s16705_s21, %s16705_s21 }
 0x89c   :  { %15540 = vmatmul.mubr.msk.f32.gmra.mrb[150].mxu0 %vm9623_vm4, %v11308_v39 }
 0x89d   :  { %15542 = vmatprep.mubr.msk.f32.mxu0 %vm9623_vm4, %v19821_v38  ;;  %15881 = vmatpush3.bf16.msra.mxu0 %v15878_v22  ;;  %p16712_p5 = por %p16711_p4, %p16710_p3 }
 0x89f   :  { %p16713_p6 = pnand %p16712_p5, %p16706_p2 }
 0x8a0   :  { %15543 = vmatmul.mubr.msk.f32.gmra.mrb[152].mxu0 %vm9623_vm4, %v19826_v29 }
 0x8a1   :  { %15545 = vmatprep.mubr.msk.f32.mxu0 %vm9623_vm4, %v19831_v13 }
 0x8a4   :  { %15546 = vmatmul.mubr.msk.f32.gmra.mrb[154].mxu0 %vm9623_vm4, %v19835_v3 }
 0x8a5   :  { %15548 = vmatprep.mubr.msk.f32.mxu0 %vm9623_vm4, %v19839_v7 }
 0x8a8   :  { %15549 = vmatmul.mubr.msk.f32.gmra.mrb[156].mxu0 %vm9623_vm4, %v19843_v32 }
 0x8a9   :  { %15551 = vmatprep.mubr.msk.f32.mxu0 %vm9623_vm4, %v20031_v40 }
 0x8ac   :  { %15552 = vmatmul.mubr.msk.f32.gmra.mrb[158].mxu0 %vm9623_vm4, %v11316_v28 }
 0x8ad   :  { %15570 = vmatprep.mubr.msk.f32.mxu0 %vm9623_vm4, %v19910_v27 }
 0x8b0   :  { %15571 = vmatmul.mubr.msk.f32.vlgmr.msra.gmra.mrb[144].mxu0 %vm9623_vm4, %v19914_v11 }
 0x8b1   :  { %15573 = vmatprep.mubr.msk.f32.mxu0 %vm9623_vm4, %v19918_v5 }
 0x8b4   :  { %15574 = vmatmul.mubr.msk.f32.gmra.mrb[146].mxu0 %vm9623_vm4, %v19922_v16 }
 0x8b5   :  { %15576 = vmatprep.mubr.msk.f32.mxu0 %vm9623_vm4, %v19926_v31 }
 0x8b8   :  { %15577 = vmatmul.mubr.msk.f32.gmra.mrb[148].mxu0 %vm9623_vm4, %v19930_v43 }
 0x8b9   :  { %15579 = vmatprep.mubr.msk.f32.mxu0 %vm9623_vm4, %v20049_v1 }
 0x8bc   :  { %15580 = vmatmul.mubr.msk.f32.gmra.mrb[150].mxu0 %vm9623_vm4, %v11542_v63 }
 0x8bd   :  { %15582 = vmatprep.mubr.msk.f32.mxu0 %vm9623_vm4, %v19939_v62 }
 0x8c0   :  { %15583 = vmatmul.mubr.msk.f32.gmra.mrb[152].mxu0 %vm9623_vm4, %v19943_v25 }
 0x8c1   :  { %15585 = vmatprep.mubr.msk.f32.mxu0 %vm9623_vm4, %v19947_v61 }
 0x8c4   :  { %15586 = vmatmul.mubr.msk.f32.gmra.mrb[154].mxu0 %vm9623_vm4, %v19951_v45 }
 0x8c5   :  { %15588 = vmatprep.mubr.msk.f32.mxu0 %vm9623_vm4, %v19955_v53 }
 0x8c8   :  { %15589 = vmatmul.mubr.msk.f32.gmra.mrb[156].mxu0 %vm9623_vm4, %v19959_v0 }
 0x8c9   :  { %15591 = vmatprep.mubr.msk.f32.mxu0 %vm9623_vm4, %v20067_v44 }
 0x8cc   :  { %15592 = vmatmul.mubr.msk.f32.gmra.mrb[158].mxu0 %vm9623_vm4, %v11550_v34 }
 0x983   :  { %v15572_v38 = vpop.f32.mrb[144].mxu0 }
 0x984   :  { %v11777_v29 = vadd.f32 %v15572_v38, %v12838_v54  ;;  %v11674_v13 = vpop.f32.mrb[145].mxu0 }
 0x985   :  { %v11776_v3 = vadd.f32 %v12838_v54, %v11674_v13 }
 0x986   :  { %v11793_v7 = vmax.f32 %v11777_v29, 0.0 }
 0x987   :  { %v11792_v32 = vmax.f32 %v11776_v3, 0.0  ;;  %v15575_v27 = vpop.f32.mrb[146].mxu0 }
 0x988   :  { %11809 = vst.msk [vmem:[#allocation10 + $0x8] sm:$0xff] %vm9623_vm4, %v11793_v7  ;;  %v11779_v11 = vadd.f32 %v15575_v27, %v12838_v54  ;;  %v11684_v5 = vpop.f32.mrb[147].mxu0 }
 0x989   :  { %11808 = vst.msk [vmem:[#allocation10] sm:$0xff] %vm9623_vm4, %v11792_v32  ;;  %v11778_v16 = vadd.f32 %v12838_v54, %v11684_v5 }
 0x98a   :  { %v11795_v31 = vmax.f32 %v11779_v11, 0.0 }
 0x98b   :  { %v11794_v43 = vmax.f32 %v11778_v16, 0.0  ;;  %v15578_v62 = vpop.f32.mrb[148].mxu0 }
 0x98c   :  { %11811 = vst.msk [vmem:[#allocation10 + $0x18] sm:$0xff] %vm9623_vm4, %v11795_v31  ;;  %v11781_v25 = vadd.f32 %v15578_v62, %v12838_v54  ;;  %v11694_v61 = vpop.f32.mrb[149].mxu0 }
 0x98d   :  { %11810 = vst.msk [vmem:[#allocation10 + $0x10] sm:$0xff] %vm9623_vm4, %v11794_v43  ;;  %v11780_v45 = vadd.f32 %v12838_v54, %v11694_v61 }
 0x98e   :  { %v11797_v53 = vmax.f32 %v11781_v25, 0.0 }
 0x98f   :  { %v11796_v0 = vmax.f32 %v11780_v45, 0.0  ;;  %v15581_v2 = vpop.f32.mrb[150].mxu0 }
 0x990   :  { %11813 = vst.msk [vmem:[#allocation10 + $0x28] sm:$0xff] %vm9623_vm4, %v11797_v53  ;;  %v11783_v9 = vadd.f32 %v15581_v2, %v12838_v54  ;;  %v11704_v24 = vpop.f32.mrb[151].mxu0 }
 0x991   :  { %11812 = vst.msk [vmem:[#allocation10 + $0x20] sm:$0xff] %vm9623_vm4, %v11796_v0  ;;  %v11782_v40 = vadd.f32 %v12838_v54, %v11704_v24 }
 0x992   :  { %v11799_v57 = vmax.f32 %v11783_v9, 0.0 }
 0x993   :  { %v11798_v10 = vmax.f32 %v11782_v40, 0.0  ;;  %v15584_v20 = vpop.f32.mrb[152].mxu0 }
 0x994   :  { %11815 = vst.msk [vmem:[#allocation10 + $0x38] sm:$0xff] %vm9623_vm4, %v11799_v57  ;;  %v11785_v26 = vadd.f32 %v15584_v20, %v12838_v54  ;;  %v11714_v33 = vpop.f32.mrb[153].mxu0 }
 0x995   :  { %11814 = vst.msk [vmem:[#allocation10 + $0x30] sm:$0xff] %vm9623_vm4, %v11798_v10  ;;  %v11784_v46 = vadd.f32 %v12838_v54, %v11714_v33 }
 0x996   :  { %v11801_v47 = vmax.f32 %v11785_v26, 0.0 }
 0x997   :  { %v11800_v59 = vmax.f32 %v11784_v46, 0.0  ;;  %v15587_v21 = vpop.f32.mrb[154].mxu0 }
 0x998   :  { %11817 = vst.msk [vmem:[#allocation10 + $0x48] sm:$0xff] %vm9623_vm4, %v11801_v47  ;;  %v11787_v4 = vadd.f32 %v15587_v21, %v12838_v54  ;;  %v11724_v12 = vpop.f32.mrb[155].mxu0 }
 0x999   :  { %11816 = vst.msk [vmem:[#allocation10 + $0x40] sm:$0xff] %vm9623_vm4, %v11800_v59  ;;  %v11786_v48 = vadd.f32 %v12838_v54, %v11724_v12 }
 0x99a   :  { %v11803_v1 = vmax.f32 %v11787_v4, 0.0 }
 0x99b   :  { %v11802_v44 = vmax.f32 %v11786_v48, 0.0  ;;  %v15590_v60 = vpop.f32.mrb[156].mxu0 }
 0x99c   :  { %11819 = vst.msk [vmem:[#allocation10 + $0x58] sm:$0xff] %vm9623_vm4, %v11803_v1  ;;  %v11789_v55 = vadd.f32 %v15590_v60, %v12838_v54  ;;  %v11734_v51 = vpop.f32.mrb[157].mxu0 }
 0x99d   :  { %11818 = vst.msk [vmem:[#allocation10 + $0x50] sm:$0xff] %vm9623_vm4, %v11802_v44  ;;  %v11788_v15 = vadd.f32 %v12838_v54, %v11734_v51 }
 0x99e   :  { %v11805_v35 = vmax.f32 %v11789_v55, 0.0 }
 0x99f   :  { %v11804_v37 = vmax.f32 %v11788_v15, 0.0  ;;  %v15593_v52 = vpop.f32.mrb[158].mxu0 }
 0x9a0   :  { %11821 = vst.msk [vmem:[#allocation10 + $0x68] sm:$0xff] %vm9623_vm4, %v11805_v35  ;;  %v11791_v36 = vadd.f32 %v15593_v52, %v12838_v54  ;;  %v11744_v23 = vpop.f32.mrb[159].mxu0 }
 0x9a1   :  { %11820 = vst.msk [vmem:[#allocation10 + $0x60] sm:$0xff] %vm9623_vm4, %v11804_v37  ;;  %v11790_v42 = vadd.f32 %v12838_v54, %v11744_v23 }
 0x9a2   :  { %v11807_v6 = vmax.f32 %v11791_v36, 0.0 }
 0x9a3   :  { %v11806_v49 = vmax.f32 %v11790_v42, 0.0 }
 0x9a4   :  { %11823 = vst.msk [vmem:[#allocation10 + $0x78] sm:$0xff] %vm9623_vm4, %v11807_v6 }
 0x9a5   :  { %11822 = vst.msk [vmem:[#allocation10 + $0x70] sm:$0xff] %vm9623_vm4, %v11806_v49 }
 0x9a6   :  { %16716 = shalt.err (!%p16713_p6)
}
 0x9a7   :  { %s16717_s0 = scalar_lea.hbm %s20204_s9, 2048 }
 0x9a8   :  { %p16718_p7 = scmp.ne.s32.totalorder %s20204_s9, %s16717_s0  ;;  %p16721_p8 = scmp.lt.u32.totalorder %s16717_s0, %s20204_s9 }
 0x9aa   :  { %p16723_p9 = pnand %p16721_p8, %p16718_p7 }
 0x9ac   :  { %16726 = shalt.err (!%p16723_p9)
}
 0x9ad   :  { %11835 = dma.vmem_to_hbm [thread:$0]  %s11830_s7, 2048, %s20204_s9, [#allocation7], %s16734_s19, %s16734_s19, %s16735_s20  }
 0x9ae   :  { %16731 = dma.done.wait [#allocation7], 2048  }
 0x9af   :  { %16732 = vsyncadd [#allocation7], 4294965248 }
 0x9b0   :  { %11839 = vsyncpa [#allocation6], 1 }
 0x9b1   :  { %11840 = vsyncpa [#allocation9], 1 }
 0x9b2   :  { %11841 = vsyncpa [#allocation7], 1 }

</bundles_post_ra>
